<compile_context>
chip_gen: v7x
topology: tpu7x:2x2x1
jax: 0.10.0
libtpu: 0.0.40
codegen_flags: <defaults>
</compile_context>

<pallas_src>
import functools

import jax
import jax.numpy as jnp
from jax.experimental import pallas as pl
from jax.experimental.pallas import tpu as pltpu

EPS = 1e-5
LANE = 128  # channel block size on the lane axis


def _dwconv_bn_relu_kernel(w_ref, gamma_ref, beta_ref, x_ref, o_ref, *,
                           Ho, Wo, stride):
    """One grid step == one block of LANE channels (channels on lanes).

    w_ref:     VMEM (9, CB)           tap k = 3*di + dj, per-channel weights
    gamma_ref: VMEM (1, CB)           BN weight
    beta_ref:  VMEM (1, CB)           BN bias
    x_ref:     VMEM (N, Hp, Wp, CB)   halo-padded NHWC input slab
    o_ref:     VMEM (N, Ho, Wo, CB)   output slab (lane-dense last dim)
    """
    x = x_ref[...].astype(jnp.float32)
    n = x.shape[0]
    cb = x.shape[3]

    # 3x3 depthwise conv as 9 shifted, per-lane VPU multiply-adds.
    # Spatial shifts land on sublane / higher axes (cheap); lanes stay dense.
    acc = jnp.zeros((n, Ho, Wo, cb), jnp.float32)
    for di in range(3):
        for dj in range(3):
            tap = x[:,
                    di:di + (Ho - 1) * stride + 1:stride,
                    dj:dj + (Wo - 1) * stride + 1:stride,
                    :]
            acc = acc + tap * w_ref[3 * di + dj]
    # NOTE: conv bias is mathematically cancelled by training-mode BN (it
    # shifts the batch mean by the same constant), so it is not added here.

    # BatchNorm2d(1) with batch statistics: per-channel (= per-lane) mean/var
    # over (N, Ho, Wo), affine folded to one scale + one shift, then ReLU.
    mean = jnp.mean(acc, axis=(0, 1, 2), keepdims=True)          # (1,1,1,CB)
    diff = acc - mean
    var = jnp.mean(diff * diff, axis=(0, 1, 2), keepdims=True)   # (1,1,1,CB)
    scale = jax.lax.rsqrt(var + EPS) * gamma_ref[...]             # (1,1,1,CB)
    shift = beta_ref[...] - mean * scale                          # (1,1,1,CB)
    y = acc * scale + shift
    o_ref[...] = jnp.maximum(y, 0.0).astype(o_ref.dtype)


def depthwise_conv1_forward(x, w, b, gamma, beta, *, stride=1):
    """x: (N, C, H, W) float32 NCHW (as in PyTorch). Returns (N, C, Ho, Wo).

    `b` (conv bias) is accepted for API parity but is a mathematical no-op
    under training-mode BatchNorm, so the kernel never touches it.
    """
    del b
    N, C, H, W = x.shape
    Hp, Wp = H + 2, W + 2
    Ho = (H + 2 - 3) // stride + 1
    Wo = (W + 2 - 3) // stride + 1

    cb = LANE
    Cp = ((C + cb - 1) // cb) * cb

    # Layout glue: NCHW -> NHWC (channels on lanes), halo pad (padding=1),
    # zero-pad channels to a multiple of 128 so stores are full-lane.
    # Zero-padded channels stay exactly zero through conv/BN/ReLU.
    x_nhwc = jnp.transpose(x, (0, 2, 3, 1))
    x_nhwc = jnp.pad(x_nhwc, ((0, 0), (1, 1), (1, 1), (0, Cp - C)))

    w_taps = jnp.pad(jnp.transpose(w.reshape(C, 9).astype(jnp.float32)),
                     ((0, 0), (0, Cp - C)))                        # (9, Cp)
    gamma_p = jnp.pad(gamma.astype(jnp.float32), (0, Cp - C)).reshape(1, Cp)
    beta_p = jnp.pad(beta.astype(jnp.float32), (0, Cp - C)).reshape(1, Cp)

    kernel = functools.partial(_dwconv_bn_relu_kernel,
                               Ho=Ho, Wo=Wo, stride=stride)

    # Per-step VMEM: (N*Hp*Wp + N*Ho*Wo) * 128 * 4 B, double-buffered -> ~1 MB
    # at these shapes, far under the 32 MiB scoped limit on any generation.
    # TODO(synk): for large N*H*W, additionally tile the batch/height axes.
    out_nhwc = pl.pallas_call(
        kernel,
        out_shape=jax.ShapeDtypeStruct((N, Ho, Wo, Cp), x.dtype),
        grid=(Cp // cb,),
        in_specs=[
            pl.BlockSpec((9, cb), lambda c: (0, c)),               # tap weights
            pl.BlockSpec((1, cb), lambda c: (0, c)),               # gamma
            pl.BlockSpec((1, cb), lambda c: (0, c)),               # beta
            pl.BlockSpec((N, Hp, Wp, cb), lambda c: (0, 0, 0, c)),  # input slab
        ],
        out_specs=pl.BlockSpec((N, Ho, Wo, cb), lambda c: (0, 0, 0, c)),
        compiler_params=pltpu.CompilerParams(
            dimension_semantics=("parallel",)),   # channel blocks independent
    )(w_taps, gamma_p, beta_p, x_nhwc)

    # Drop channel padding, back to NCHW.
    return jnp.transpose(out_nhwc[..., :C], (0, 3, 1, 2))


def reference_forward(x, w, b, gamma, beta, *, stride=1):
    """Pure-JAX reference mirroring the PyTorch forward (training-mode BN)."""
    N, C, H, W = x.shape
    outs = []
    for f in range(C):
        xf = x[:, f:f + 1]                                         # (N,1,H,W)
        y = jax.lax.conv_general_dilated(
            xf, w[f].reshape(1, 1, 3, 3),
            window_strides=(stride, stride), padding=((1, 1), (1, 1)),
            dimension_numbers=("NCHW", "OIHW", "NCHW")) + b[f]
        mean = jnp.mean(y)
        var = jnp.mean((y - mean) ** 2)
        y = (y - mean) * jax.lax.rsqrt(var + EPS) * gamma[f] + beta[f]
        outs.append(jnp.maximum(y, 0.0))
    return jnp.concatenate(outs, axis=1)


if __name__ == "__main__":
    layers = 4      # number of channels == number of per-channel convs
    stride = 1
    N, H, W = 2, 16, 16

    key = jax.random.PRNGKey(0)
    kx, kw, kb = jax.random.split(key, 3)

    x = jax.random.normal(kx, (N, layers, H, W), dtype=jnp.float32)
    # Conv2d(1,1,3) weights/bias, one per channel; deterministic init.
    bound = 1.0 / 3.0                                              # 1/sqrt(9)
    w = jax.random.uniform(kw, (layers, 3, 3), jnp.float32, -bound, bound)
    b = jax.random.uniform(kb, (layers,), jnp.float32, -bound, bound)
    # BatchNorm2d(1) default affine init: weight=1, bias=0.
    gamma = jnp.ones((layers,), jnp.float32)
    beta = jnp.zeros((layers,), jnp.float32)

    out = depthwise_conv1_forward(x, w, b, gamma, beta, stride=stride)
    out = jax.block_until_ready(out)

    ref = reference_forward(x, w, b, gamma, beta, stride=stride)
    assert out.shape == ref.shape == (N, layers, H, W)
    assert jnp.allclose(out, ref, rtol=1e-4, atol=1e-4), \
        f"max abs err {jnp.max(jnp.abs(out - ref))}"

    print("KERNEL_OK")
</pallas_src>

<mosaic_0001>
module attributes {stable_mosaic.version = 11 : i64} {
  func.func @_dwconv_bn_relu_kernel(%arg0: i32, %arg1: memref<9x128xf32, #tpu.memory_space<vmem>>, %arg2: memref<1x128xf32, #tpu.memory_space<vmem>>, %arg3: memref<1x128xf32, #tpu.memory_space<vmem>>, %arg4: memref<2x18x18x128xf32, #tpu.memory_space<vmem>>, %arg5: memref<2x16x16x128xf32, #tpu.memory_space<vmem>>) attributes {dimension_semantics = [#tpu.dimension_semantics<parallel>], iteration_bounds = array<i64: 1>, scalar_prefetch = 0 : i64, scratch_operands = 0 : i64, tpu.core_type = #tpu.core_type<tc>, window_params = [{transform_indices = @transform_0, window_bounds = array<i64: 9, 128>}, {transform_indices = @transform_1, window_bounds = array<i64: 1, 128>}, {transform_indices = @transform_2, window_bounds = array<i64: 1, 128>}, {transform_indices = @transform_3, window_bounds = array<i64: 2, 18, 18, 128>}, {transform_indices = @transform_4, window_bounds = array<i64: 2, 16, 16, 128>}]} {
    %c0 = arith.constant 0 : index
    %c0_0 = arith.constant 0 : index
    %c0_1 = arith.constant 0 : index
    %c0_2 = arith.constant 0 : index
    %0 = vector.load %arg4[%c0, %c0_0, %c0_1, %c0_2] : memref<2x18x18x128xf32, #tpu.memory_space<vmem>>, vector<2x18x18x128xf32>
    %cst = arith.constant 0.000000e+00 : f32
    %1 = vector.broadcast %cst : f32 to vector<2x16x16x128xf32>
    %2 = vector.extract_strided_slice %0 {offsets = [0, 0, 0, 0], sizes = [2, 16, 16, 128], strides = [1, 1, 1, 1]} : vector<2x18x18x128xf32> to vector<2x16x16x128xf32>
    %c0_3 = arith.constant 0 : index
    %c0_4 = arith.constant 0 : index
    %3 = vector.load %arg1[%c0_3, %c0_4] : memref<9x128xf32, #tpu.memory_space<vmem>>, vector<1x128xf32>
    %4 = vector.shape_cast %3 : vector<1x128xf32> to vector<128xf32>
    %5 = vector.shape_cast %4 : vector<128xf32> to vector<1x1x1x128xf32>
    %6 = vector.broadcast %5 : vector<1x1x1x128xf32> to vector<2x16x16x128xf32>
    %7 = arith.mulf %2, %6 : vector<2x16x16x128xf32>
    %8 = arith.addf %1, %7 : vector<2x16x16x128xf32>
    %9 = vector.extract_strided_slice %0 {offsets = [0, 0, 1, 0], sizes = [2, 16, 16, 128], strides = [1, 1, 1, 1]} : vector<2x18x18x128xf32> to vector<2x16x16x128xf32>
    %c1 = arith.constant 1 : index
    %c0_5 = arith.constant 0 : index
    %10 = vector.load %arg1[%c1, %c0_5] : memref<9x128xf32, #tpu.memory_space<vmem>>, vector<1x128xf32>
    %11 = vector.shape_cast %10 : vector<1x128xf32> to vector<128xf32>
    %12 = vector.shape_cast %11 : vector<128xf32> to vector<1x1x1x128xf32>
    %13 = vector.broadcast %12 : vector<1x1x1x128xf32> to vector<2x16x16x128xf32>
    %14 = arith.mulf %9, %13 : vector<2x16x16x128xf32>
    %15 = arith.addf %8, %14 : vector<2x16x16x128xf32>
    %16 = vector.extract_strided_slice %0 {offsets = [0, 0, 2, 0], sizes = [2, 16, 16, 128], strides = [1, 1, 1, 1]} : vector<2x18x18x128xf32> to vector<2x16x16x128xf32>
    %c2 = arith.constant 2 : index
    %c0_6 = arith.constant 0 : index
    %17 = vector.load %arg1[%c2, %c0_6] : memref<9x128xf32, #tpu.memory_space<vmem>>, vector<1x128xf32>
    %18 = vector.shape_cast %17 : vector<1x128xf32> to vector<128xf32>
    %19 = vector.shape_cast %18 : vector<128xf32> to vector<1x1x1x128xf32>
    %20 = vector.broadcast %19 : vector<1x1x1x128xf32> to vector<2x16x16x128xf32>
    %21 = arith.mulf %16, %20 : vector<2x16x16x128xf32>
    %22 = arith.addf %15, %21 : vector<2x16x16x128xf32>
    %23 = vector.extract_strided_slice %0 {offsets = [0, 1, 0, 0], sizes = [2, 16, 16, 128], strides = [1, 1, 1, 1]} : vector<2x18x18x128xf32> to vector<2x16x16x128xf32>
    %c3 = arith.constant 3 : index
    %c0_7 = arith.constant 0 : index
    %24 = vector.load %arg1[%c3, %c0_7] : memref<9x128xf32, #tpu.memory_space<vmem>>, vector<1x128xf32>
    %25 = vector.shape_cast %24 : vector<1x128xf32> to vector<128xf32>
    %26 = vector.shape_cast %25 : vector<128xf32> to vector<1x1x1x128xf32>
    %27 = vector.broadcast %26 : vector<1x1x1x128xf32> to vector<2x16x16x128xf32>
    %28 = arith.mulf %23, %27 : vector<2x16x16x128xf32>
    %29 = arith.addf %22, %28 : vector<2x16x16x128xf32>
    %30 = vector.extract_strided_slice %0 {offsets = [0, 1, 1, 0], sizes = [2, 16, 16, 128], strides = [1, 1, 1, 1]} : vector<2x18x18x128xf32> to vector<2x16x16x128xf32>
    %c4 = arith.constant 4 : index
    %c0_8 = arith.constant 0 : index
    %31 = vector.load %arg1[%c4, %c0_8] : memref<9x128xf32, #tpu.memory_space<vmem>>, vector<1x128xf32>
    %32 = vector.shape_cast %31 : vector<1x128xf32> to vector<128xf32>
    %33 = vector.shape_cast %32 : vector<128xf32> to vector<1x1x1x128xf32>
    %34 = vector.broadcast %33 : vector<1x1x1x128xf32> to vector<2x16x16x128xf32>
    %35 = arith.mulf %30, %34 : vector<2x16x16x128xf32>
    %36 = arith.addf %29, %35 : vector<2x16x16x128xf32>
    %37 = vector.extract_strided_slice %0 {offsets = [0, 1, 2, 0], sizes = [2, 16, 16, 128], strides = [1, 1, 1, 1]} : vector<2x18x18x128xf32> to vector<2x16x16x128xf32>
    %c5 = arith.constant 5 : index
    %c0_9 = arith.constant 0 : index
    %38 = vector.load %arg1[%c5, %c0_9] : memref<9x128xf32, #tpu.memory_space<vmem>>, vector<1x128xf32>
    %39 = vector.shape_cast %38 : vector<1x128xf32> to vector<128xf32>
    %40 = vector.shape_cast %39 : vector<128xf32> to vector<1x1x1x128xf32>
    %41 = vector.broadcast %40 : vector<1x1x1x128xf32> to vector<2x16x16x128xf32>
    %42 = arith.mulf %37, %41 : vector<2x16x16x128xf32>
    %43 = arith.addf %36, %42 : vector<2x16x16x128xf32>
    %44 = vector.extract_strided_slice %0 {offsets = [0, 2, 0, 0], sizes = [2, 16, 16, 128], strides = [1, 1, 1, 1]} : vector<2x18x18x128xf32> to vector<2x16x16x128xf32>
    %c6 = arith.constant 6 : index
    %c0_10 = arith.constant 0 : index
    %45 = vector.load %arg1[%c6, %c0_10] : memref<9x128xf32, #tpu.memory_space<vmem>>, vector<1x128xf32>
    %46 = vector.shape_cast %45 : vector<1x128xf32> to vector<128xf32>
    %47 = vector.shape_cast %46 : vector<128xf32> to vector<1x1x1x128xf32>
    %48 = vector.broadcast %47 : vector<1x1x1x128xf32> to vector<2x16x16x128xf32>
    %49 = arith.mulf %44, %48 : vector<2x16x16x128xf32>
    %50 = arith.addf %43, %49 : vector<2x16x16x128xf32>
    %51 = vector.extract_strided_slice %0 {offsets = [0, 2, 1, 0], sizes = [2, 16, 16, 128], strides = [1, 1, 1, 1]} : vector<2x18x18x128xf32> to vector<2x16x16x128xf32>
    %c7 = arith.constant 7 : index
    %c0_11 = arith.constant 0 : index
    %52 = vector.load %arg1[%c7, %c0_11] : memref<9x128xf32, #tpu.memory_space<vmem>>, vector<1x128xf32>
    %53 = vector.shape_cast %52 : vector<1x128xf32> to vector<128xf32>
    %54 = vector.shape_cast %53 : vector<128xf32> to vector<1x1x1x128xf32>
    %55 = vector.broadcast %54 : vector<1x1x1x128xf32> to vector<2x16x16x128xf32>
    %56 = arith.mulf %51, %55 : vector<2x16x16x128xf32>
    %57 = arith.addf %50, %56 : vector<2x16x16x128xf32>
    %58 = vector.extract_strided_slice %0 {offsets = [0, 2, 2, 0], sizes = [2, 16, 16, 128], strides = [1, 1, 1, 1]} : vector<2x18x18x128xf32> to vector<2x16x16x128xf32>
    %c8 = arith.constant 8 : index
    %c0_12 = arith.constant 0 : index
    %59 = vector.load %arg1[%c8, %c0_12] : memref<9x128xf32, #tpu.memory_space<vmem>>, vector<1x128xf32>
    %60 = vector.shape_cast %59 : vector<1x128xf32> to vector<128xf32>
    %61 = vector.shape_cast %60 : vector<128xf32> to vector<1x1x1x128xf32>
    %62 = vector.broadcast %61 : vector<1x1x1x128xf32> to vector<2x16x16x128xf32>
    %63 = arith.mulf %58, %62 : vector<2x16x16x128xf32>
    %64 = arith.addf %57, %63 : vector<2x16x16x128xf32>
    %cst_13 = arith.constant dense<0.000000e+00> : vector<128xf32>
    %65 = vector.multi_reduction <add>, %64, %cst_13 [0, 1, 2] : vector<2x16x16x128xf32> to vector<128xf32>
    %66 = vector.shape_cast %65 : vector<128xf32> to vector<1x1x1x128xf32>
    %cst_14 = arith.constant 5.120000e+02 : f32
    %67 = vector.broadcast %cst_14 : f32 to vector<1x1x1x128xf32>
    %68 = arith.divf %66, %67 : vector<1x1x1x128xf32>
    %69 = vector.broadcast %68 : vector<1x1x1x128xf32> to vector<2x16x16x128xf32>
    %70 = arith.subf %64, %69 : vector<2x16x16x128xf32>
    %71 = arith.mulf %70, %70 : vector<2x16x16x128xf32>
    %cst_15 = arith.constant dense<0.000000e+00> : vector<128xf32>
    %72 = vector.multi_reduction <add>, %71, %cst_15 [0, 1, 2] : vector<2x16x16x128xf32> to vector<128xf32>
    %73 = vector.shape_cast %72 : vector<128xf32> to vector<1x1x1x128xf32>
    %cst_16 = arith.constant 5.120000e+02 : f32
    %74 = vector.broadcast %cst_16 : f32 to vector<1x1x1x128xf32>
    %75 = arith.divf %73, %74 : vector<1x1x1x128xf32>
    %cst_17 = arith.constant 9.99999974E-6 : f32
    %76 = vector.broadcast %cst_17 : f32 to vector<1x1x1x128xf32>
    %77 = arith.addf %75, %76 : vector<1x1x1x128xf32>
    %78 = math.rsqrt %77 : vector<1x1x1x128xf32>
    %c0_18 = arith.constant 0 : index
    %c0_19 = arith.constant 0 : index
    %79 = vector.load %arg2[%c0_18, %c0_19] : memref<1x128xf32, #tpu.memory_space<vmem>>, vector<1x128xf32>
    %80 = vector.shape_cast %79 : vector<1x128xf32> to vector<1x1x1x128xf32>
    %81 = arith.mulf %78, %80 : vector<1x1x1x128xf32>
    %c0_20 = arith.constant 0 : index
    %c0_21 = arith.constant 0 : index
    %82 = vector.load %arg3[%c0_20, %c0_21] : memref<1x128xf32, #tpu.memory_space<vmem>>, vector<1x128xf32>
    %83 = arith.mulf %68, %81 : vector<1x1x1x128xf32>
    %84 = vector.shape_cast %82 : vector<1x128xf32> to vector<1x1x1x128xf32>
    %85 = arith.subf %84, %83 : vector<1x1x1x128xf32>
    %86 = vector.broadcast %81 : vector<1x1x1x128xf32> to vector<2x16x16x128xf32>
    %87 = arith.mulf %64, %86 : vector<2x16x16x128xf32>
    %88 = vector.broadcast %85 : vector<1x1x1x128xf32> to vector<2x16x16x128xf32>
    %89 = arith.addf %87, %88 : vector<2x16x16x128xf32>
    %cst_22 = arith.constant 0.000000e+00 : f32
    %90 = vector.broadcast %cst_22 : f32 to vector<2x16x16x128xf32>
    %91 = arith.maximumf %89, %90 : vector<2x16x16x128xf32>
    %c0_23 = arith.constant 0 : index
    %c0_24 = arith.constant 0 : index
    %c0_25 = arith.constant 0 : index
    %c0_26 = arith.constant 0 : index
    %92 = vector.load %arg5[%c0_23, %c0_24, %c0_25, %c0_26] : memref<2x16x16x128xf32, #tpu.memory_space<vmem>>, vector<2x16x16x128xf32>
    tpu.vector_store %arg5[%c0_23, %c0_24, %c0_25, %c0_26], %91 {strides = array<i32>} : memref<2x16x16x128xf32, #tpu.memory_space<vmem>>, vector<2x16x16x128xf32>,
    return
  }
  func.func @transform_0(%arg0: i32) -> (i32, i32) {
    %c0_i32 = arith.constant 0 : i32
    %c0_i32_0 = arith.constant 0 : i32
    return %c0_i32, %arg0 : i32, i32
  }
  func.func @transform_1(%arg0: i32) -> (i32, i32) {
    %c0_i32 = arith.constant 0 : i32
    %c0_i32_0 = arith.constant 0 : i32
    return %c0_i32, %arg0 : i32, i32
  }
  func.func @transform_2(%arg0: i32) -> (i32, i32) {
    %c0_i32 = arith.constant 0 : i32
    %c0_i32_0 = arith.constant 0 : i32
    return %c0_i32, %arg0 : i32, i32
  }
  func.func @transform_3(%arg0: i32) -> (i32, i32, i32, i32) {
    %c0_i32 = arith.constant 0 : i32
    %c0_i32_0 = arith.constant 0 : i32
    %c0_i32_1 = arith.constant 0 : i32
    %c0_i32_2 = arith.constant 0 : i32
    return %c0_i32, %c0_i32_0, %c0_i32_1, %arg0 : i32, i32, i32, i32
  }
  func.func @transform_4(%arg0: i32) -> (i32, i32, i32, i32) {
    %c0_i32 = arith.constant 0 : i32
    %c0_i32_0 = arith.constant 0 : i32
    %c0_i32_1 = arith.constant 0 : i32
    %c0_i32_2 = arith.constant 0 : i32
    return %c0_i32, %c0_i32_0, %c0_i32_1, %arg0 : i32, i32, i32, i32
  }
}

</mosaic_0001>

<bundles_post_ra>
// kernel: tpu_custom_call.1
= control target key start
LH: loop header
LB: loop body
LE: loop exit
PB: predicated region body
PF: predicated region fallthrough
CT: control target
= control target key end

     0   :  { %9 = vsyncpa [#allocation3], 0  ;;  %vm456_vm0 = vcmask 1046528   ;;  %vm942_vm1 = vcmask 1045504   ;;  %s11960_s0 = inlined_call_operand.vmem [shape: f32[9,128], index: 0, kind: input, shape index: {}]   ;;  %s11961_s1 = inlined_call_operand.vmem [shape: f32[1,128], index: 1, kind: input, shape index: {}]   ;;  %s11962_s2 = inlined_call_operand.vmem [shape: f32[1,128], index: 2, kind: input, shape index: {}]   ;;  %s11963_s3 = inlined_call_operand.vmem [shape: f32[2,18,18,128], index: 3, kind: input, shape index: {}]   ;;  %s11964_s4 = inlined_call_operand.hbm [shape: f32[2,16,16,128], index: 4, kind: output, shape index: {}]  }
   0x1   :  { %v4314_v0 = vld [vmem:[%s11963_s3] sm:$0xff]  ;;  %v4319_v1 = vld [vmem:[%s11963_s3 + $0x8] sm:$0xff]  ;;  %v4324_v2 = vld [vmem:[%s11963_s3 + $0x18] sm:$0xff] }
   0x2   :  { %12415 = vst [vmem:[#allocation5_spill] sm:$0xff] %v4314_v0  ;;  %12416 = vst [vmem:[#allocation6_spill] sm:$0xff] %v4319_v1  ;;  %v4329_v3 = vld [vmem:[%s11963_s3 + $0x20] sm:$0xff]  ;;  %v4339_v5 = vld [vmem:[%s11963_s3 + $0x30] sm:$0xff] }
   0x3   :  { %12417 = vst [vmem:[#allocation7_spill] sm:$0xff] %v4324_v2  ;;  %12418 = vst [vmem:[#allocation8_spill] sm:$0xff] %v4329_v3  ;;  %v4334_v4 = vld [vmem:[%s11960_s0] ss:$0 sm:$0xff]  ;;  %v4344_v6 = vld [vmem:[%s11963_s3 + $0x38] sm:$0xff] }
   0x4   :  { %12419 = vst [vmem:[#allocation9_spill] sm:$0xff] %v4334_v4  ;;  %12420 = vst [vmem:[#allocation10_spill] sm:$0xff] %v4339_v5  ;;  %v4349_v7 = vld [vmem:[%s11963_s3 + $0x48] sm:$0xff]  ;;  %v4354_v8 = vld [vmem:[%s11963_s3 + $0x50] sm:$0xff]  ;;  %v4398_v17 = vmul.f32 %v4334_v4, %v4314_v0  ;;  %v4402_v18 = vmul.f32 %v4334_v4, %v4319_v1  ;;  %v4406_v19 = vmul.f32 %v4334_v4, %v4324_v2 }
   0x5   :  { %12421 = vst [vmem:[#allocation11_spill] sm:$0xff] %v4344_v6  ;;  %12422 = vst [vmem:[#allocation12_spill] sm:$0xff] %v4349_v7  ;;  %v4359_v9 = vld [vmem:[%s11963_s3 + $0x60] sm:$0xff]  ;;  %v4364_v10 = vld [vmem:[%s11963_s3 + $0x1b8] sm:$0xff]  ;;  %v4410_v20 = vmul.f32 %v4334_v4, %v4329_v3  ;;  %v4429_v24 = vmul.f32 %v4334_v4, %v4339_v5  ;;  %v4433_v25 = vmul.f32 %v4334_v4, %v4344_v6 }
   0x6   :  { %12423 = vst [vmem:[#allocation13_spill] sm:$0xff] %v4354_v8  ;;  %12424 = vst [vmem:[#allocation14_spill] sm:$0xff] %v4359_v9  ;;  %v4369_v11 = vld [vmem:[%s11963_s3 + $0x1c8] sm:$0xff]  ;;  %v4374_v12 = vld [vmem:[%s11963_s3 + $0x1d0] sm:$0xff]  ;;  %v4437_v26 = vmul.f32 %v4334_v4, %v4349_v7  ;;  %v4441_v27 = vmul.f32 %v4334_v4, %v4354_v8  ;;  %v4460_v31 = vmul.f32 %v4334_v4, %v4359_v9 }
   0x7   :  { %12425 = vst [vmem:[#allocation15_spill] sm:$0xff] %v4364_v10  ;;  %12426 = vst [vmem:[#allocation16_spill] sm:$0xff] %v4369_v11  ;;  %v4379_v13 = vld [vmem:[%s11963_s3 + $0x1e0] sm:$0xff]  ;;  %v4384_v14 = vld [vmem:[%s11963_s3 + $0x1e8] sm:$0xff]  ;;  %v4464_v32 = vmul.f32 %v4334_v4, %v4364_v10  ;;  %v4468_v33 = vmul.f32 %v4334_v4, %v4369_v11  ;;  %v4472_v34 = vmul.f32 %v4334_v4, %v4374_v12 }
   0x8   :  { %12427 = vst [vmem:[#allocation17_spill] sm:$0xff] %v4374_v12  ;;  %12428 = vst [vmem:[#allocation18_spill] sm:$0xff] %v4379_v13  ;;  %v4389_v15 = vld [vmem:[%s11963_s3 + $0x1f8] sm:$0xff]  ;;  %v4394_v16 = vld [vmem:[%s11963_s3 + $0x200] sm:$0xff]  ;;  %v4491_v38 = vmul.f32 %v4334_v4, %v4379_v13  ;;  %v4495_v39 = vmul.f32 %v4334_v4, %v4384_v14 }
   0x9   :  { %12429 = vst [vmem:[#allocation19_spill] sm:$0xff] %v4384_v14  ;;  %12430 = vst [vmem:[#allocation20_spill] sm:$0xff] %v4389_v15  ;;  %v4415_v21 = vld [vmem:[%s11963_s3 + $0x210] sm:$0xff]  ;;  %v4420_v22 = vld [vmem:[%s11963_s3 + $0x218] sm:$0xff]  ;;  %v4499_v40 = vmul.f32 %v4334_v4, %v4389_v15  ;;  %v4503_v41 = vmul.f32 %v4334_v4, %v4394_v16 }
   0xa   :  { %12431 = vst [vmem:[#allocation21_spill] sm:$0xff] %v4394_v16  ;;  %12432 = vst [vmem:[#allocation22_spill] sm:$0xff] %v4398_v17  ;;  %v4425_v23 = vld [vmem:[%s11963_s3 + $0x228] sm:$0xff]  ;;  %v4446_v28 = vld [vmem:[%s11963_s3 + $0x230] sm:$0xff]  ;;  %v4522_v45 = vmul.f32 %v4334_v4, %v4415_v21  ;;  %v4526_v46 = vmul.f32 %v4334_v4, %v4420_v22 }
   0xb   :  { %12433 = vst [vmem:[#allocation23_spill] sm:$0xff] %v4402_v18  ;;  %12434 = vst [vmem:[#allocation24_spill] sm:$0xff] %v4406_v19  ;;  %v4451_v29 = vld [vmem:[%s11963_s3 + $0x240] sm:$0xff]  ;;  %v4456_v30 = vld [vmem:[%s11963_s3 + $0x248] sm:$0xff]  ;;  %v4530_v47 = vmul.f32 %v4334_v4, %v4425_v23  ;;  %v4534_v48 = vmul.f32 %v4334_v4, %v4446_v28 }
   0xc   :  { %12435 = vst [vmem:[#allocation25_spill] sm:$0xff] %v4410_v20  ;;  %12436 = vst [vmem:[#allocation26_spill] sm:$0xff] %v4415_v21  ;;  %v4477_v35 = vld [vmem:[%s11963_s3 + $0x258] sm:$0xff]  ;;  %v4482_v36 = vld [vmem:[%s11963_s3 + $0x260] sm:$0xff]  ;;  %v4558_v53 = vmul.f32 %v4334_v4, %v4451_v29  ;;  %v4562_v54 = vmul.f32 %v4334_v4, %v4456_v30 }
   0xd   :  { %12437 = vst [vmem:[#allocation27_spill] sm:$0xff] %v4420_v22  ;;  %12438 = vst [vmem:[#allocation28_spill] sm:$0xff] %v4425_v23  ;;  %v4487_v37 = vld [vmem:[%s11963_s3 + $0x270] sm:$0xff]  ;;  %v4508_v42 = vld [vmem:[%s11963_s3 + $0x278] sm:$0xff]  ;;  %v4566_v55 = vmul.f32 %v4334_v4, %v4477_v35  ;;  %v4570_v56 = vmul.f32 %v4334_v4, %v4482_v36 }
   0xe   :  { %12439 = vst [vmem:[#allocation29_spill] sm:$0xff] %v4429_v24  ;;  %12440 = vst [vmem:[#allocation30_spill] sm:$0xff] %v4433_v25  ;;  %v4513_v43 = vld [vmem:[%s11963_s3 + $0x288] sm:$0xff]  ;;  %v4518_v44 = vld [vmem:[%s11963_s3 + $0x290] sm:$0xff]  ;;  %v4599_v62 = vmul.f32 %v4334_v4, %v4487_v37  ;;  %v4603_v63 = vmul.f32 %v4334_v4, %v4508_v42 }
   0xf   :  { %12441 = vst [vmem:[#allocation31_spill] sm:$0xff] %v4437_v26  ;;  %12442 = vst [vmem:[#allocation32_spill] sm:$0xff] %v4441_v27  ;;  %v4539_v49 = vld [vmem:[%s11963_s3 + $0x1c0] sm:$0x3]  ;;  %v4549_v51 = vld [vmem:[%s11963_s3 + $0x2a8] sm:$0xff]  ;;  %v4611_v27 = vmul.f32 %v4334_v4, %v4518_v44 }
  0x10   :  { %12443 = vst [vmem:[#allocation33_spill] sm:$0xff] %v4446_v28  ;;  %12444 = vst [vmem:[#allocation34_spill] sm:$0xff] %v4451_v29  ;;  %v4544_v50 = vld [vmem:[%s11963_s3 + $0x2a0] sm:$0xff]  ;;  %v4554_v52 = vld [vmem:[%s11963_s3 + $0x2b8] sm:$0xff]  ;;  %v4634_v19 = vmul.f32 %v4334_v4, %v4549_v51 }
  0x11   :  { %12445 = vst [vmem:[#allocation35_spill] sm:$0xff] %v4456_v30  ;;  %12446 = vst [vmem:[#allocation36_spill] sm:$0xff] %v4460_v31  ;;  %v4575_v57 = vld [vmem:[%s11963_s3 + $0x1d8] sm:$0x3]  ;;  %v4580_v58 = vld [vmem:[%s11963_s3 + $0x1f0] sm:$0x3]  ;;  %v4607_v31 = vmul.f32 %v4334_v4, %v4513_v43  ;;  %v4630_v20 = vmul.f32 %v4334_v4, %v4544_v50  ;;  %v4638_v18 = vmul.f32 %v4334_v4, %v4554_v52 }
  0x12   :  { %12447 = vst [vmem:[#allocation37_spill] sm:$0xff] %v4477_v35  ;;  %12448 = vst [vmem:[#allocation38_spill] sm:$0xff] %v4482_v36  ;;  %v4585_v59 = vld [vmem:[%s11963_s3 + $0x2c0] sm:$0xff]  ;;  %v4590_v60 = vld [vmem:[%s11963_s3 + $0x2d0] sm:$0xff] }
  0x13   :  { %12449 = vst [vmem:[#allocation39_spill] sm:$0xff] %v4487_v37  ;;  %12450 = vst [vmem:[#allocation40_spill] sm:$0xff] %v4508_v42  ;;  %v4595_v61 = vld [vmem:[%s11963_s3 + $0x2d8] sm:$0xff]  ;;  %v4616_v26 = vld [vmem:[%s11963_s3 + $0x2e8] sm:$0xff]  ;;  %v4642_v17 = vmul.f32 %v4334_v4, %v4585_v59  ;;  %v4661_v6 = vmul.f32 %v4334_v4, %v4590_v60 }
  0x14   :  { %12451 = vst [vmem:[#allocation41_spill] sm:$0xff] %v4513_v43  ;;  %12452 = vst [vmem:[#allocation42_spill] sm:$0xff] %v4518_v44  ;;  %v4621_v25 = vld [vmem:[%s11963_s3 + $0x2f0] sm:$0xff]  ;;  %v4626_v24 = vld [vmem:[%s11963_s3 + $0x300] sm:$0xff]  ;;  %v4665_v5 = vmul.f32 %v4334_v4, %v4595_v61  ;;  %v4669_v3 = vmul.f32 %v4334_v4, %v4616_v26 }
  0x15   :  { %12453 = vst [vmem:[#allocation43_spill] sm:$0xff] %v4522_v45  ;;  %12454 = vst [vmem:[#allocation44_spill] sm:$0xff] %v4526_v46  ;;  %v4647_v9 = vld [vmem:[%s11963_s3 + $0x308] sm:$0xff]  ;;  %v4652_v8 = vld [vmem:[%s11963_s3 + $0x318] sm:$0xff]  ;;  %v4673_v2 = vmul.f32 %v4334_v4, %v4621_v25  ;;  %v4682_v0 = vmul.f32 %v4334_v4, %v4626_v24 }
  0x16   :  { %12455 = vst [vmem:[#allocation45_spill] sm:$0xff] %v4530_v47  ;;  %12456 = vst [vmem:[#allocation46_spill] sm:$0xff] %v4534_v48  ;;  %v4657_v7 = vld [vmem:[%s11963_s3 + $0x320] sm:$0xff]  ;;  %v4678_v1 = vld [vmem:[%s11963_s3 + $0x208] sm:$0x3] }
  0x17   :  { %12457 = vst [vmem:[#allocation47_spill] sm:$0xff] %v4539_v49  ;;  %12458 = vst [vmem:[#allocation48_spill] sm:$0xff] %v4544_v50 }
  0x18   :  { %12459 = vst [vmem:[#allocation49_spill] sm:$0xff] %v4549_v51  ;;  %12460 = vst [vmem:[#allocation50_spill] sm:$0xff] %v4554_v52 }
  0x19   :  { %12461 = vst [vmem:[#allocation51_spill] sm:$0xff] %v4558_v53  ;;  %12462 = vst [vmem:[#allocation52_spill] sm:$0xff] %v4562_v54  ;;  %v4903_v54 = vld [vmem:[%s11963_s3 + $0x328] sm:$0x3] }
  0x1a   :  { %12463 = vst [vmem:[#allocation53_spill] sm:$0xff] %v4566_v55  ;;  %12464 = vst [vmem:[#allocation54_spill] sm:$0xff] %v4570_v56  ;;  %v4861_v56 = vld [vmem:[%s11963_s3 + $0x2f8] sm:$0x3]  ;;  %v4882_v55 = vld [vmem:[%s11963_s3 + $0x310] sm:$0x3] }
  0x1b   :  { %12465 = vst [vmem:[#allocation55_spill] sm:$0xff] %v4575_v57  ;;  %12466 = vst [vmem:[#allocation56_spill] sm:$0xff] %v4580_v58 }
  0x1c   :  { %12467 = vst [vmem:[#allocation57_spill] sm:$0xff] %v4585_v59  ;;  %12468 = vst [vmem:[#allocation58_spill] sm:$0xff] %v4590_v60 }
  0x1d   :  { %12469 = vst [vmem:[#allocation59_spill] sm:$0xff] %v4595_v61  ;;  %12470 = vst [vmem:[#allocation60_spill] sm:$0xff] %v4599_v62  ;;  %v4840_v62 = vld [vmem:[%s11963_s3 + $0x2e0] sm:$0x3] }
  0x1e   :  { %12471 = vst [vmem:[#allocation61_spill] sm:$0xff] %v4603_v63  ;;  %12472 = vst [vmem:[#allocation62_spill] sm:$0xff] %v4607_v31  ;;  %v4819_v63 = vld [vmem:[%s11963_s3 + $0x2c8] sm:$0x3] }
  0x1f   :  { %12473 = vst [vmem:[#allocation63_spill] sm:$0xff] %v4611_v27  ;;  %12474 = vst [vmem:[#allocation64_spill] sm:$0xff] %v4616_v26  ;;  %v4793_v27 = vld [vmem:[%s11963_s3 + $0x298] sm:$0x3] }
  0x20   :  { %12475 = vst [vmem:[#allocation65_spill] sm:$0xff] %v4621_v25  ;;  %12476 = vst [vmem:[#allocation66_spill] sm:$0xff] %v4626_v24 }
  0x21   :  { %12477 = vst [vmem:[#allocation67_spill] sm:$0xff] %v4630_v20  ;;  %12478 = vst [vmem:[#allocation68_spill] sm:$0xff] %v4634_v19  ;;  %v4751_v19 = vld [vmem:[%s11963_s3 + $0x268] sm:$0x3]  ;;  %v4772_v20 = vld [vmem:[%s11963_s3 + $0x280] sm:$0x3] }
  0x22   :  { %12479 = vst [vmem:[#allocation69_spill] sm:$0xff] %v4638_v18  ;;  %12480 = vst [vmem:[#allocation70_spill] sm:$0xff] %v4642_v17  ;;  %v4725_v17 = vld [vmem:[%s11963_s3 + $0x238] sm:$0x3] }
  0x23   :  { %12481 = vst [vmem:[#allocation71_spill] sm:$0xff] %v4647_v9  ;;  %12482 = vst [vmem:[#allocation72_spill] sm:$0xff] %v4652_v8 }
  0x24   :  { %12483 = vst [vmem:[#allocation73_spill] sm:$0xff] %v4657_v7  ;;  %12484 = vst [vmem:[#allocation74_spill] sm:$0xff] %v4661_v6  ;;  %v4699_v6 = vld [vmem:[%s11960_s0 + $0x1] ss:$0 sm:$0xff] }
  0x25   :  { %12485 = vst [vmem:[#allocation75_spill] sm:$0xff] %v4665_v5  ;;  %12486 = vst [vmem:[#allocation76_spill] sm:$0xff] %v4669_v3  ;;  %v4686_v5 = vmul.f32 %v4334_v4, %v4647_v9  ;;  %v4690_v3 = vmul.f32 %v4334_v4, %v4652_v8  ;;  %v4746_v18 = vmul.f32 %v4699_v6, %v4580_v58 }
  0x26   :  { %12487 = vst [vmem:[#allocation77_spill] sm:$0xff] %v4673_v2  ;;  %12488 = vst [vmem:[#allocation78_spill] sm:$0xff] %v4678_v1  ;;  %v4694_v2 = vmul.f32 %v4334_v4, %v4657_v7  ;;  %v4716_v4 = vmul.f32 %v4699_v6, %v4369_v11  ;;  %v4738_v11 = vmul.f32 %v4699_v6, %v4379_v13 }
  0x27   :  { %12489 = vst [vmem:[#allocation79_spill] sm:$0xff] %v4682_v0  ;;  %12490 = vst [vmem:[#allocation80_spill] sm:$0xff] %v4686_v5  ;;  %v4704_v0 = vld [vmem:[%s11963_s3 + $0x220] sm:$0x3]  ;;  %v4708_v5 = vmul.f32 %v4699_v6, %v4364_v10  ;;  %v4730_v10 = vld [vmem:[%s11963_s3 + $0x250] sm:$0x3]  ;;  %v4759_v13 = vmul.f32 %v4699_v6, %v4394_v16  ;;  %v4767_v58 = vmul.f32 %v4699_v6, %v4415_v21 }
  0x28   :  { %12491 = vst [vmem:[#allocation81_spill] sm:$0xff] %v4690_v3  ;;  %12492 = vst [vmem:[#allocation82_spill] sm:$0xff] %v4694_v2  ;;  %v4712_v3 = vmul.f32 %v4699_v6, %v4539_v49  ;;  %v4720_v2 = vmul.f32 %v4699_v6, %v4374_v12  ;;  %v4734_v49 = vmul.f32 %v4699_v6, %v4575_v57  ;;  %v550_v45 = vrot.slane %v4746_v18, 1 }
  0x29   :  { %12493 = vst [vmem:[#allocation83_spill] sm:$0xff] %v4699_v6  ;;  %12494 = vst [vmem:[#allocation84_spill] sm:$0xff] %v4704_v0  ;;  %v4742_v12 = vmul.f32 %v4699_v6, %v4384_v14  ;;  %v4755_v57 = vmul.f32 %v4699_v6, %v4389_v15  ;;  %v4763_v14 = vmul.f32 %v4699_v6, %v4678_v1 }
  0x2a   :  { %12495 = vst [vmem:[#allocation85_spill] sm:$0xff] %v4708_v5  ;;  %12496 = vst [vmem:[#allocation86_spill] sm:$0xff] %v4725_v17  ;;  %v4776_v15 = vmul.f32 %v4699_v6, %v4420_v22  ;;  %v4780_v16 = vmul.f32 %v4699_v6, %v4704_v0  ;;  %v4784_v1 = vmul.f32 %v4699_v6, %v4425_v23  ;;  %v4798_v22 = vld [vmem:[%s11963_s3 + $0x2b0] sm:$0x3]  ;;  %v543_v47 = vrot.slane %v4720_v2, 1 }
  0x2b   :  { %12497 = vst [vmem:[#allocation87_spill] sm:$0xff] %v4730_v10  ;;  %12498 = vst [vmem:[#allocation88_spill] sm:$0xff] %v4751_v19  ;;  %v4788_v21 = vmul.f32 %v4699_v6, %v4446_v28  ;;  %v4802_v0 = vmul.f32 %v4699_v6, %v4725_v17  ;;  %v4806_v23 = vmul.f32 %v4699_v6, %v4451_v29  ;;  %v548_v46 = vrot.slane %v4742_v12, 1 }
  0x2c   :  { %12499 = vst [vmem:[#allocation89_spill] sm:$0xff] %v4772_v20  ;;  %12500 = vst [vmem:[#allocation90_spill] sm:$0xff] %v4793_v27  ;;  %v4810_v28 = vmul.f32 %v4699_v6, %v4456_v30  ;;  %v4814_v31 = vmul.f32 %v4699_v6, %v4730_v10  ;;  %v4823_v17 = vmul.f32 %v4699_v6, %v4477_v35  ;;  %v557_v2 = vrot.slane %v4767_v58, 1 }
  0x2d   :  { %12501 = vst [vmem:[#allocation91_spill] sm:$0xff] %v4798_v22  ;;  %12502 = vst [vmem:[#allocation92_spill] sm:$0xff] %v4819_v63  ;;  %v4827_v29 = vmul.f32 %v4699_v6, %v4482_v36  ;;  %v4831_v30 = vmul.f32 %v4699_v6, %v4751_v19  ;;  %v4835_v10 = vmul.f32 %v4699_v6, %v4487_v37  ;;  %v565_v12 = vrot.slane %v4802_v0, 1 }
  0x2e   :  { %12503 = vst [vmem:[#allocation93_spill] sm:$0xff] %v4840_v62  ;;  %v4844_v35 = vmul.f32 %v4699_v6, %v4508_v42  ;;  %v4848_v36 = vmul.f32 %v4699_v6, %v4772_v20  ;;  %v4852_v19 = vmul.f32 %v4699_v6, %v4513_v43  ;;  %v4856_v37 = vmul.f32 %v4699_v6, %v4518_v44 }
  0x2f   :  { %12504 = vst [vmem:[#allocation94_spill] sm:$0xff] %v4861_v56  ;;  %v4865_v42 = vmul.f32 %v4699_v6, %v4793_v27  ;;  %v4869_v20 = vmul.f32 %v4699_v6, %v4544_v50  ;;  %v4873_v43 = vmul.f32 %v4699_v6, %v4549_v51  ;;  %v4877_v44 = vmul.f32 %v4699_v6, %v4798_v22 }
  0x30   :  { %12505 = vst [vmem:[#allocation95_spill] sm:$0xff] %v4882_v55  ;;  %v4886_v27 = vmul.f32 %v4699_v6, %v4554_v52  ;;  %v4890_v50 = vmul.f32 %v4699_v6, %v4585_v59  ;;  %v4894_v51 = vmul.f32 %v4699_v6, %v4819_v63  ;;  %v4898_v22 = vmul.f32 %v4699_v6, %v4590_v60 }
  0x31   :  { %12506 = vst [vmem:[#allocation96_spill] sm:$0xff] %v4903_v54  ;;  %v4907_v52 = vmul.f32 %v4699_v6, %v4595_v61  ;;  %v4911_v59 = vmul.f32 %v4699_v6, %v4840_v62  ;;  %v4915_v63 = vmul.f32 %v4699_v6, %v4616_v26  ;;  %v540_v60 = vrot.slane %v4712_v3, 1 }
  0x32   :  { %v4920_v53 = vmul.f32 %v4699_v6, %v4621_v25  ;;  %v4924_v48 = vmul.f32 %v4699_v6, %v4861_v56  ;;  %v4928_v61 = vmul.f32 %v4699_v6, %v4626_v24  ;;  %v4932_v62 = vmul.f32 %v4699_v6, %v4647_v9 }
  0x33   :  { %v4936_v26 = vmul.f32 %v4699_v6, %v4882_v55  ;;  %v4940_v3 = vmul.f32 %v4699_v6, %v4652_v8  ;;  %v4944_v56 = vmul.f32 %v4699_v6, %v4657_v7  ;;  %v12026_v25 = vrot.slane %v4708_v5, 1 }
  0x34   :  { %v4949_v24 = vmul.f32 %v4699_v6, %v4903_v54  ;;  %v542_v9 = vrot.slane %v4716_v4, 1  ;;  %v545_v55 = vrot.slane %v4734_v49, 1  ;;  %v547_v7 = vrot.slane %v4738_v11, 1 }
  0x35   :  { %v4957_v8 = vsel %vm456_vm0, %v12026_v25, %v540_v60  ;;  %v552_v54 = vrot.slane %v4755_v57, 1  ;;  %v553_v6 = vrot.slane %v4759_v13, 1  ;;  %v555_v4 = vrot.slane %v4763_v14, 1 }
  0x36   :  { %v558_v49 = vrot.slane %v4776_v15, 1  ;;  %v560_v5 = vrot.slane %v4780_v16, 1  ;;  %v562_v60 = vrot.slane %v4784_v1, 1  ;;  %v563_v11 = vrot.slane %v4788_v21, 1 }
  0x37   :  { %v567_v18 = vrot.slane %v4806_v23, 1  ;;  %v568_v57 = vrot.slane %v4810_v28, 1  ;;  %v570_v13 = vrot.slane %v4814_v31, 1  ;;  %v544_v14 = vsel %vm456_vm0, %v542_v9, %v543_v47 }
  0x38   :  { %v572_v58 = vrot.slane %v4823_v17, 1  ;;  %v573_v15 = vrot.slane %v4827_v29, 1  ;;  %v575_v16 = vrot.slane %v4831_v30, 1  ;;  %v546_v1 = vsel %vm456_vm0, %v543_v47, %v545_v55 }
  0x39   :  { %v549_v21 = vsel %vm456_vm0, %v547_v7, %v548_v46  ;;  %v551_v0 = vsel %vm456_vm0, %v548_v46, %v550_v45  ;;  %v554_v23 = vsel %vm456_vm0, %v552_v54, %v553_v6  ;;  %v556_v28 = vsel %vm456_vm0, %v553_v6, %v555_v4 }
  0x3a   :  { %v559_v31 = vsel %vm456_vm0, %v557_v2, %v558_v49  ;;  %v561_v9 = vsel %vm456_vm0, %v558_v49, %v560_v5  ;;  %v564_v17 = vsel %vm456_vm0, %v562_v60, %v563_v11  ;;  %v566_v29 = vsel %vm456_vm0, %v563_v11, %v565_v12 }
  0x3b   :  { %v569_v30 = vsel %vm456_vm0, %v567_v18, %v568_v57  ;;  %v571_v47 = vsel %vm456_vm0, %v568_v57, %v570_v13  ;;  %v577_v7 = vrot.slane %v4835_v10, 1  ;;  %v574_v45 = vsel %vm456_vm0, %v572_v58, %v573_v15 }
  0x3c   :  { %v576_v46 = vsel %vm456_vm0, %v573_v15, %v575_v16  ;;  %v578_v6 = vrot.slane %v4844_v35, 1  ;;  %v580_v54 = vrot.slane %v4848_v36, 1  ;;  %v582_v5 = vrot.slane %v4852_v19, 1 }
  0x3d   :  { %v583_v55 = vrot.slane %v4856_v37, 1  ;;  %v585_v4 = vrot.slane %v4865_v42, 1  ;;  %v587_v2 = vrot.slane %v4869_v20, 1  ;;  %v588_v49 = vrot.slane %v4873_v43, 1 }
  0x3e   :  { %v590_v10 = vrot.slane %v4877_v44, 1  ;;  %v592_v60 = vrot.slane %v4886_v27, 1  ;;  %v593_v11 = vrot.slane %v4890_v50, 1  ;;  %v595_v35 = vrot.slane %v4894_v51, 1 }
  0x3f   :  { %v597_v36 = vrot.slane %v4898_v22, 1  ;;  %v598_v19 = vrot.slane %v4907_v52, 1  ;;  %v600_v37 = vrot.slane %v4911_v59, 1  ;;  %v602_v42 = vrot.slane %v4915_v63, 1 }
  0x40   :  { %v603_v20 = vrot.slane %v4920_v53, 1  ;;  %v605_v43 = vrot.slane %v4924_v48, 1  ;;  %v607_v44 = vrot.slane %v4928_v61, 1  ;;  %v608_v27 = vrot.slane %v4932_v62, 1 }
  0x41   :  { %v610_v50 = vrot.slane %v4936_v26, 1  ;;  %v612_v51 = vrot.slane %v4940_v3, 1  ;;  %v613_v22 = vrot.slane %v4944_v56, 1  ;;  %v579_v52 = vsel %vm456_vm0, %v577_v7, %v578_v6 }
  0x42   :  { %v581_v59 = vsel %vm456_vm0, %v578_v6, %v580_v54  ;;  %v584_v63 = vsel %vm456_vm0, %v582_v5, %v583_v55  ;;  %v615_v53 = vrot.slane %v4949_v24, 1  ;;  %v586_v48 = vsel %vm456_vm0, %v583_v55, %v585_v4 }
  0x43   :  { %v589_v61 = vsel %vm456_vm0, %v587_v2, %v588_v49  ;;  %v591_v62 = vsel %vm456_vm0, %v588_v49, %v590_v10  ;;  %v594_v26 = vsel %vm456_vm0, %v592_v60, %v593_v11  ;;  %v596_v3 = vsel %vm456_vm0, %v593_v11, %v595_v35  ;;  %v12535_v35 = vld [vmem:[#allocation67_spill] sm:$0xff] }
  0x44   :  { %v599_v56 = vsel %vm456_vm0, %v597_v36, %v598_v19  ;;  %v601_v12 = vsel %vm456_vm0, %v598_v19, %v600_v37  ;;  %v604_v18 = vsel %vm456_vm0, %v602_v42, %v603_v20  ;;  %v606_v57 = vsel %vm456_vm0, %v603_v20, %v605_v43  ;;  %v12537_v19 = vld [vmem:[#allocation68_spill] sm:$0xff]  ;;  %v12539_v42 = vld [vmem:[#allocation69_spill] sm:$0xff]  ;;  %v12541_v43 = vld [vmem:[#allocation70_spill] sm:$0xff] }
  0x45   :  { %v609_v24 = vsel %vm456_vm0, %v607_v44, %v608_v27  ;;  %v611_v13 = vsel %vm456_vm0, %v608_v27, %v610_v50  ;;  %v614_v58 = vsel %vm456_vm0, %v612_v51, %v613_v22  ;;  %v616_v15 = vsel %vm456_vm0, %v613_v22, %v615_v53  ;;  %v5119_v27 = vld [vmem:[%s11963_s3 + $0x90] sm:$0xff]  ;;  %v5124_v50 = vld [vmem:[%s11963_s3 + $0x98] sm:$0xff]  ;;  %v5129_v51 = vld [vmem:[%s11963_s3 + $0xa8] sm:$0xff] }
  0x46   :  { %v5033_v16 = vadd.f32 %v4957_v8, %v4464_v32  ;;  %v5036_v7 = vadd.f32 %v544_v14, %v4468_v33  ;;  %v5039_v6 = vadd.f32 %v546_v1, %v4472_v34  ;;  %v5042_v54 = vadd.f32 %v549_v21, %v4491_v38  ;;  %v12508_v8 = vld [vmem:[#allocation43_spill] sm:$0xff]  ;;  %v12510_v33 = vld [vmem:[#allocation44_spill] sm:$0xff]  ;;  %v12512_v34 = vld [vmem:[#allocation45_spill] sm:$0xff]  ;;  %12543 = vst [vmem:[#allocation101_spill] sm:$0xff] %v5119_v27 }
  0x47   :  { %v5045_v5 = vadd.f32 %v551_v0, %v4495_v39  ;;  %v5048_v55 = vadd.f32 %v554_v23, %v4499_v40  ;;  %v5051_v4 = vadd.f32 %v556_v28, %v4503_v41  ;;  %v5054_v32 = vadd.f32 %v559_v31, %v12508_v8  ;;  %v12514_v38 = vld [vmem:[#allocation46_spill] sm:$0xff]  ;;  %v12516_v39 = vld [vmem:[#allocation51_spill] sm:$0xff]  ;;  %v12518_v40 = vld [vmem:[#allocation52_spill] sm:$0xff]  ;;  %12544 = vst [vmem:[#allocation102_spill] sm:$0xff] %v5124_v50 }
  0x48   :  { %v5057_v14 = vadd.f32 %v561_v9, %v12510_v33  ;;  %v5060_v1 = vadd.f32 %v564_v17, %v12512_v34  ;;  %v5063_v21 = vadd.f32 %v566_v29, %v12514_v38  ;;  %v5066_v0 = vadd.f32 %v569_v30, %v12516_v39  ;;  %v12520_v41 = vld [vmem:[#allocation53_spill] sm:$0xff]  ;;  %v12522_v31 = vld [vmem:[#allocation54_spill] sm:$0xff]  ;;  %v12524_v9 = vld [vmem:[#allocation60_spill] sm:$0xff]  ;;  %12545 = vst [vmem:[#allocation103_spill] sm:$0xff] %v5129_v51 }
  0x49   :  { %12507 = vst [vmem:[#allocation97_spill] sm:$0xff] %v5051_v4  ;;  %12509 = vst [vmem:[#allocation43_spill] sm:$0xff] %v5054_v32  ;;  %v5069_v23 = vadd.f32 %v571_v47, %v12518_v40  ;;  %v5072_v28 = vadd.f32 %v574_v45, %v12520_v41  ;;  %v5075_v2 = vadd.f32 %v576_v46, %v12522_v31  ;;  %v12526_v17 = vld [vmem:[#allocation61_spill] sm:$0xff]  ;;  %v12528_v29 = vld [vmem:[#allocation62_spill] sm:$0xff] }
  0x4a   :  { %12511 = vst [vmem:[#allocation44_spill] sm:$0xff] %v5057_v14  ;;  %12513 = vst [vmem:[#allocation45_spill] sm:$0xff] %v5060_v1  ;;  %v5078_v49 = vadd.f32 %v579_v52, %v12524_v9  ;;  %v5081_v10 = vadd.f32 %v581_v59, %v12526_v17  ;;  %v5084_v60 = vadd.f32 %v584_v63, %v12528_v29  ;;  %v12530_v30 = vld [vmem:[#allocation63_spill] sm:$0xff]  ;;  %v5092_v47 = vld [vmem:[%s11963_s3 + $0x68] sm:$0xff] }
  0x4b   :  { %12515 = vst [vmem:[#allocation46_spill] sm:$0xff] %v5063_v21  ;;  %12517 = vst [vmem:[#allocation51_spill] sm:$0xff] %v5066_v0  ;;  %v5087_v11 = vadd.f32 %v586_v48, %v12530_v30  ;;  %v5097_v45 = vld [vmem:[%s11963_s3 + $0x78] sm:$0xff]  ;;  %v5102_v46 = vld [vmem:[%s11963_s3 + $0x80] sm:$0xff]  ;;  %v5105_v36 = vadd.f32 %v589_v61, %v12535_v35  ;;  %v5108_v37 = vadd.f32 %v591_v62, %v12537_v19 }
  0x4c   :  { %12519 = vst [vmem:[#allocation52_spill] sm:$0xff] %v5069_v23  ;;  %12521 = vst [vmem:[#allocation53_spill] sm:$0xff] %v5072_v28  ;;  %v5111_v20 = vadd.f32 %v594_v26, %v12539_v42  ;;  %v5114_v44 = vadd.f32 %v596_v3, %v12541_v43  ;;  %v12546_v22 = vld [vmem:[#allocation74_spill] sm:$0xff]  ;;  %v12548_v59 = vld [vmem:[#allocation75_spill] sm:$0xff] }
  0x4d   :  { %12523 = vst [vmem:[#allocation54_spill] sm:$0xff] %v5075_v2  ;;  %12525 = vst [vmem:[#allocation60_spill] sm:$0xff] %v5078_v49  ;;  %v5132_v52 = vadd.f32 %v599_v56, %v12546_v22  ;;  %v5135_v63 = vadd.f32 %v601_v12, %v12548_v59  ;;  %v12550_v53 = vld [vmem:[#allocation76_spill] sm:$0xff]  ;;  %v12552_v61 = vld [vmem:[#allocation77_spill] sm:$0xff] }
  0x4e   :  { %12527 = vst [vmem:[#allocation61_spill] sm:$0xff] %v5081_v10  ;;  %12529 = vst [vmem:[#allocation62_spill] sm:$0xff] %v5084_v60  ;;  %v5138_v48 = vadd.f32 %v604_v18, %v12550_v53  ;;  %v5141_v62 = vadd.f32 %v606_v57, %v12552_v61  ;;  %v5146_v26 = vld [vmem:[%s11963_s3 + $0xb0] sm:$0xff]  ;;  %v5151_v3 = vld [vmem:[%s11963_s3 + $0xc0] sm:$0xff] }
  0x4f   :  { %12531 = vst [vmem:[#allocation63_spill] sm:$0xff] %v5087_v11  ;;  %12532 = vst [vmem:[#allocation98_spill] sm:$0xff] %v5092_v47  ;;  %v5156_v56 = vld [vmem:[%s11963_s3 + $0xc8] sm:$0xff]  ;;  %v12557_v12 = vld [vmem:[#allocation79_spill] sm:$0xff] }
  0x50   :  { %12533 = vst [vmem:[#allocation99_spill] sm:$0xff] %v5097_v45  ;;  %12534 = vst [vmem:[#allocation100_spill] sm:$0xff] %v5102_v46  ;;  %v5159_v18 = vadd.f32 %v609_v24, %v12557_v12  ;;  %v12559_v57 = vld [vmem:[#allocation80_spill] sm:$0xff]  ;;  %v12561_v33 = vld [vmem:[#allocation81_spill] sm:$0xff] }
  0x51   :  { %12536 = vst [vmem:[#allocation67_spill] sm:$0xff] %v5105_v36  ;;  %12538 = vst [vmem:[#allocation68_spill] sm:$0xff] %v5108_v37  ;;  %v5162_v8 = vadd.f32 %v611_v13, %v12559_v57  ;;  %v5165_v34 = vadd.f32 %v614_v58, %v12561_v33  ;;  %v12563_v38 = vld [vmem:[#allocation82_spill] sm:$0xff]  ;;  %v5173_v40 = vld [vmem:[%s11963_s3 + $0xd8] sm:$0xff] }
  0x52   :  { %12540 = vst [vmem:[#allocation69_spill] sm:$0xff] %v5111_v20  ;;  %12542 = vst [vmem:[#allocation70_spill] sm:$0xff] %v5114_v44  ;;  %v5168_v39 = vadd.f32 %v616_v15, %v12563_v38  ;;  %v5178_v41 = vld [vmem:[%s11963_s3 + $0xe0] sm:$0xff]  ;;  %v5183_v24 = vld [vmem:[%s11963_s3 + $0xf0] sm:$0xff] }
  0x53   :  { %12547 = vst [vmem:[#allocation74_spill] sm:$0xff] %v5132_v52  ;;  %12549 = vst [vmem:[#allocation75_spill] sm:$0xff] %v5135_v63  ;;  %v12568_v13 = vld [vmem:[#allocation9_spill] sm:$0xff]  ;;  %v5204_v17 = vld [vmem:[%s11963_s3 + $0x10] sm:$0x3] }
  0x54   :  { %12551 = vst [vmem:[#allocation76_spill] sm:$0xff] %v5138_v48  ;;  %12553 = vst [vmem:[#allocation77_spill] sm:$0xff] %v5141_v62  ;;  %v5187_v58 = vmul.f32 %v12568_v13, %v5092_v47  ;;  %v5191_v15 = vmul.f32 %v12568_v13, %v5097_v45  ;;  %v5195_v31 = vmul.f32 %v12568_v13, %v5102_v46  ;;  %v5209_v29 = vld [vmem:[%s11963_s3 + $0xf8] sm:$0xff]  ;;  %v5214_v30 = vld [vmem:[%s11963_s3 + $0x108] sm:$0xff] }
  0x55   :  { %12554 = vst [vmem:[#allocation104_spill] sm:$0xff] %v5146_v26  ;;  %12555 = vst [vmem:[#allocation105_spill] sm:$0xff] %v5151_v3  ;;  %v5199_v9 = vmul.f32 %v12568_v13, %v5119_v27  ;;  %v5219_v35 = vld [vmem:[%s11963_s3 + $0x110] sm:$0xff]  ;;  %v5223_v19 = vmul.f32 %v12568_v13, %v5124_v50  ;;  %v5227_v42 = vmul.f32 %v12568_v13, %v5129_v51  ;;  %v5240_v59 = vld [vmem:[%s11963_s3 + $0x28] sm:$0x3] }
  0x56   :  { %12556 = vst [vmem:[#allocation106_spill] sm:$0xff] %v5156_v56  ;;  %12558 = vst [vmem:[#allocation79_spill] sm:$0xff] %v5159_v18  ;;  %v5231_v43 = vmul.f32 %v12568_v13, %v5146_v26  ;;  %v5235_v22 = vmul.f32 %v12568_v13, %v5151_v3  ;;  %v5245_v53 = vld [vmem:[%s11963_s3 + $0x120] sm:$0xff]  ;;  %v5250_v61 = vld [vmem:[%s11963_s3 + $0x128] sm:$0xff]  ;;  %v5259_v57 = vmul.f32 %v12568_v13, %v5156_v56 }
  0x57   :  { %12560 = vst [vmem:[#allocation80_spill] sm:$0xff] %v5162_v8  ;;  %12562 = vst [vmem:[#allocation81_spill] sm:$0xff] %v5165_v34  ;;  %v5255_v12 = vld [vmem:[%s11963_s3 + $0x138] sm:$0xff]  ;;  %v5263_v33 = vmul.f32 %v12568_v13, %v5173_v40  ;;  %v5267_v38 = vmul.f32 %v12568_v13, %v5178_v41  ;;  %v5271_v25 = vmul.f32 %v12568_v13, %v5183_v24  ;;  %v12610_v34 = vld [vmem:[#allocation5_spill] sm:$0xff] }
  0x58   :  { %12564 = vst [vmem:[#allocation82_spill] sm:$0xff] %v5168_v39  ;;  %12565 = vst [vmem:[#allocation107_spill] sm:$0xff] %v5173_v40  ;;  %v5364_v39 = vld [vmem:[%s11963_s3 + $0x70] sm:$0x3]  ;;  %v12612_v18 = vld [vmem:[#allocation6_spill] sm:$0xff] }
  0x59   :  { %12566 = vst [vmem:[#allocation108_spill] sm:$0xff] %v5178_v41  ;;  %12567 = vst [vmem:[#allocation109_spill] sm:$0xff] %v5183_v24  ;;  %v12611_v8 = vld [vmem:[#allocation83_spill] sm:$0xff]  ;;  %v12615_v48 = vld [vmem:[#allocation8_spill] sm:$0xff] }
  0x5a   :  { %12569 = vst [vmem:[#allocation9_spill] sm:$0xff] %v5187_v58  ;;  %12570 = vst [vmem:[#allocation110_spill] sm:$0xff] %v5191_v15  ;;  %v5338_v15 = vld [vmem:[%s11963_s3 + $0x40] sm:$0x3]  ;;  %v12613_v62 = vld [vmem:[#allocation7_spill] sm:$0xff]  ;;  %v5520_v23 = vmul.f32 %v12611_v8, %v5178_v41 }
  0x5b   :  { %12571 = vst [vmem:[#allocation111_spill] sm:$0xff] %v5195_v31  ;;  %12572 = vst [vmem:[#allocation112_spill] sm:$0xff] %v5199_v9  ;;  %v12616_v63 = vld [vmem:[#allocation10_spill] sm:$0xff]  ;;  %v12617_v52 = vld [vmem:[#allocation11_spill] sm:$0xff] }
  0x5c   :  { %12573 = vst [vmem:[#allocation113_spill] sm:$0xff] %v5204_v17  ;;  %12574 = vst [vmem:[#allocation114_spill] sm:$0xff] %v5209_v29  ;;  %v5406_v44 = vld [vmem:[%s11963_s3 + $0xa0] sm:$0x3]  ;;  %v5432_v11 = vld [vmem:[%s11963_s3 + $0xd0] sm:$0x3] }
  0x5d   :  { %12575 = vst [vmem:[#allocation115_spill] sm:$0xff] %v5214_v30  ;;  %12576 = vst [vmem:[#allocation116_spill] sm:$0xff] %v5219_v35  ;;  %v12623_v60 = vld [vmem:[#allocation14_spill] sm:$0xff]  ;;  %v5474_v49 = vld [vmem:[%s11963_s3 + $0x100] sm:$0x3] }
  0x5e   :  { %12577 = vst [vmem:[#allocation117_spill] sm:$0xff] %v5223_v19  ;;  %12578 = vst [vmem:[#allocation118_spill] sm:$0xff] %v5227_v42  ;;  %v5302_v42 = vmul.f32 %v12568_v13, %v5245_v53  ;;  %v5307_v19 = vld [vmem:[%s11963_s3 + $0x168] sm:$0xff]  ;;  %v5500_v28 = vld [vmem:[%s11963_s3 + $0x130] sm:$0x3]  ;;  %v5541_v41 = vmul.f32 %v12611_v8, %v5474_v49 }
  0x5f   :  { %12579 = vst [vmem:[#allocation119_spill] sm:$0xff] %v5231_v43  ;;  %12580 = vst [vmem:[#allocation120_spill] sm:$0xff] %v5235_v22  ;;  %v5276_v22 = vld [vmem:[%s11963_s3 + $0x140] sm:$0xff]  ;;  %v5298_v43 = vmul.f32 %v12568_v13, %v5219_v35  ;;  %v5453_v10 = vld [vmem:[%s11963_s3 + $0xe8] sm:$0x3] }
  0x60   :  { %12581 = vst [vmem:[#allocation121_spill] sm:$0xff] %v5240_v59  ;;  %12582 = vst [vmem:[#allocation122_spill] sm:$0xff] %v5245_v53  ;;  %v5329_v9 = vmul.f32 %v12568_v13, %v5276_v22  ;;  %v5558_v0 = vld [vmem:[%s11963_s3 + $0x160] sm:$0x3]  ;;  %v5579_v21 = vld [vmem:[%s11963_s3 + $0x178] sm:$0x3] }
  0x61   :  { %12583 = vst [vmem:[#allocation123_spill] sm:$0xff] %v5250_v61  ;;  %12584 = vst [vmem:[#allocation124_spill] sm:$0xff] %v5255_v12 }
  0x62   :  { %12585 = vst [vmem:[#allocation125_spill] sm:$0xff] %v5259_v57  ;;  %12586 = vst [vmem:[#allocation126_spill] sm:$0xff] %v5263_v33  ;;  %v5281_v57 = vld [vmem:[%s11963_s3 + $0x150] sm:$0xff]  ;;  %v5286_v33 = vld [vmem:[%s11963_s3 + $0x158] sm:$0xff] }
  0x63   :  { %12587 = vst [vmem:[#allocation127_spill] sm:$0xff] %v5267_v38  ;;  %12588 = vst [vmem:[#allocation128_spill] sm:$0xff] %v5271_v25  ;;  %v5290_v38 = vmul.f32 %v12568_v13, %v5209_v29  ;;  %v5294_v25 = vmul.f32 %v12568_v13, %v5214_v30  ;;  %v5333_v31 = vmul.f32 %v12568_v13, %v5281_v57 }
  0x64   :  { %12589 = vst [vmem:[#allocation129_spill] sm:$0xff] %v5276_v22  ;;  %12590 = vst [vmem:[#allocation130_spill] sm:$0xff] %v5281_v57 }
  0x65   :  { %12591 = vst [vmem:[#allocation131_spill] sm:$0xff] %v5286_v33  ;;  %12592 = vst [vmem:[#allocation132_spill] sm:$0xff] %v5290_v38  ;;  %v5312_v38 = vld [vmem:[%s11963_s3 + $0x170] sm:$0xff] }
  0x66   :  { %12593 = vst [vmem:[#allocation133_spill] sm:$0xff] %v5294_v25  ;;  %12594 = vst [vmem:[#allocation134_spill] sm:$0xff] %v5298_v43  ;;  %v5317_v25 = vld [vmem:[%s11963_s3 + $0x1b0] sm:$0xff]  ;;  %v5321_v43 = vmul.f32 %v12568_v13, %v5250_v61 }
  0x67   :  { %12595 = vst [vmem:[#allocation135_spill] sm:$0xff] %v5302_v42  ;;  %12596 = vst [vmem:[#allocation136_spill] sm:$0xff] %v5307_v19  ;;  %v5325_v42 = vmul.f32 %v12568_v13, %v5255_v12  ;;  %v5359_v58 = vmul.f32 %v12568_v13, %v5317_v25 }
  0x68   :  { %12597 = vst [vmem:[#allocation137_spill] sm:$0xff] %v5312_v38  ;;  %12598 = vst [vmem:[#allocation138_spill] sm:$0xff] %v5317_v25 }
  0x69   :  { %12599 = vst [vmem:[#allocation139_spill] sm:$0xff] %v5321_v43  ;;  %12600 = vst [vmem:[#allocation140_spill] sm:$0xff] %v5325_v42  ;;  %v5343_v43 = vld [vmem:[%s11963_s3 + $0x58] sm:$0x3]  ;;  %v5347_v42 = vmul.f32 %v12568_v13, %v5286_v33 }
  0x6a   :  { %12601 = vst [vmem:[#allocation141_spill] sm:$0xff] %v5329_v9  ;;  %12602 = vst [vmem:[#allocation142_spill] sm:$0xff] %v5333_v31  ;;  %v5351_v9 = vmul.f32 %v12568_v13, %v5307_v19  ;;  %v5355_v31 = vmul.f32 %v12568_v13, %v5312_v38  ;;  %v5380_v13 = vmul.f32 %v12611_v8, %v12613_v62 }
  0x6b   :  { %12603 = vst [vmem:[#allocation143_spill] sm:$0xff] %v5338_v15  ;;  %12604 = vst [vmem:[#allocation144_spill] sm:$0xff] %v5343_v43  ;;  %v5401_v62 = vmul.f32 %v12611_v8, %v12617_v52  ;;  %v12621_v52 = vld [vmem:[#allocation13_spill] sm:$0xff]  ;;  %v5427_v36 = vmul.f32 %v12611_v8, %v5343_v43  ;;  %v5448_v43 = vmul.f32 %v12611_v8, %v5097_v45 }
  0x6c   :  { %12605 = vst [vmem:[#allocation145_spill] sm:$0xff] %v5347_v42  ;;  %12606 = vst [vmem:[#allocation146_spill] sm:$0xff] %v5351_v9  ;;  %v5368_v42 = vmul.f32 %v12611_v8, %v12610_v34  ;;  %v5372_v9 = vmul.f32 %v12611_v8, %v12612_v18  ;;  %v5389_v34 = vmul.f32 %v12611_v8, %v12615_v48  ;;  %v5411_v48 = vld [vmem:[%s11963_s3 + $0xb8] sm:$0x3]  ;;  %v462_v32 = vrot.slane %v5380_v13, 1 }
  0x6d   :  { %12607 = vst [vmem:[#allocation147_spill] sm:$0xff] %v5355_v31  ;;  %12608 = vst [vmem:[#allocation148_spill] sm:$0xff] %v5359_v58  ;;  %v5376_v31 = vmul.f32 %v12611_v8, %v5204_v17  ;;  %v5385_v58 = vld [vmem:[%s11963_s3 + $0x88] sm:$0x3]  ;;  %v5393_v18 = vmul.f32 %v12611_v8, %v5240_v59  ;;  %v5397_v17 = vmul.f32 %v12611_v8, %v12616_v63  ;;  %v12620_v63 = vld [vmem:[#allocation12_spill] sm:$0xff] }
  0x6e   :  { %12609 = vst [vmem:[#allocation149_spill] sm:$0xff] %v5364_v39  ;;  %12614 = vst [vmem:[#allocation5_spill] sm:$0xff] %v5385_v58  ;;  %v5415_v59 = vmul.f32 %v12611_v8, %v5338_v15  ;;  %v5419_v20 = vmul.f32 %v12611_v8, %v12620_v63  ;;  %v5423_v37 = vmul.f32 %v12611_v8, %v12621_v52  ;;  %v458_v1 = vrot.slane %v5372_v9, 1 }
  0x6f   :  { %12618 = vst [vmem:[#allocation83_spill] sm:$0xff] %v5406_v44  ;;  %12619 = vst [vmem:[#allocation6_spill] sm:$0xff] %v5411_v48  ;;  %v5436_v15 = vmul.f32 %v12611_v8, %v12623_v60  ;;  %v5440_v63 = vmul.f32 %v12611_v8, %v5092_v47  ;;  %v5444_v52 = vmul.f32 %v12611_v8, %v5364_v39  ;;  %v463_v4 = vrot.slane %v5389_v34, 1 }
  0x70   :  { %12622 = vst [vmem:[#allocation7_spill] sm:$0xff] %v5432_v11  ;;  %12624 = vst [vmem:[#allocation8_spill] sm:$0xff] %v5453_v10  ;;  %v5457_v60 = vmul.f32 %v12611_v8, %v5102_v46  ;;  %v5461_v47 = vmul.f32 %v12611_v8, %v5385_v58  ;;  %v5465_v39 = vmul.f32 %v12611_v8, %v5119_v27  ;;  %v5479_v46 = vld [vmem:[%s11963_s3 + $0x118] sm:$0x3] }
  0x71   :  { %v5469_v45 = vmul.f32 %v12611_v8, %v5124_v50  ;;  %12625 = vst [vmem:[#allocation10_spill] sm:$0xff] %v5474_v49  ;;  %12626 = vst [vmem:[#allocation11_spill] sm:$0xff] %v5479_v46  ;;  %v5483_v58 = vmul.f32 %v12611_v8, %v5406_v44  ;;  %v5487_v27 = vmul.f32 %v12611_v8, %v5129_v51 }
  0x72   :  { %v5491_v50 = vmul.f32 %v12611_v8, %v5146_v26  ;;  %v5495_v2 = vmul.f32 %v12611_v8, %v5411_v48  ;;  %12627 = vst [vmem:[#allocation12_spill] sm:$0xff] %v5500_v28  ;;  %v5504_v44 = vmul.f32 %v12611_v8, %v5151_v3  ;;  %v5508_v51 = vmul.f32 %v12611_v8, %v5156_v56 }
  0x73   :  { %v5512_v26 = vmul.f32 %v12611_v8, %v5432_v11  ;;  %v5516_v48 = vmul.f32 %v12611_v8, %v5173_v40  ;;  %v5524_v3 = vmul.f32 %v12611_v8, %v5453_v10  ;;  %v5528_v56 = vmul.f32 %v12611_v8, %v5183_v24  ;;  %v5537_v40 = vld [vmem:[%s11963_s3 + $0x148] sm:$0x3]  ;;  %12629 = vst [vmem:[#allocation14_spill] sm:$0xff] %v5558_v0 }
  0x74   :  { %v5532_v11 = vmul.f32 %v12611_v8, %v5209_v29  ;;  %12628 = vst [vmem:[#allocation13_spill] sm:$0xff] %v5537_v40  ;;  %v5545_v10 = vmul.f32 %v12611_v8, %v5214_v30  ;;  %v5549_v24 = vmul.f32 %v12611_v8, %v5219_v35  ;;  %v5553_v29 = vmul.f32 %v12611_v8, %v5479_v46 }
  0x75   :  { %v5562_v49 = vmul.f32 %v12611_v8, %v5245_v53  ;;  %v5566_v30 = vmul.f32 %v12611_v8, %v5250_v61  ;;  %v5570_v35 = vmul.f32 %v12611_v8, %v5500_v28  ;;  %v5574_v46 = vmul.f32 %v12611_v8, %v5255_v12  ;;  %12630 = vst [vmem:[#allocation150_spill] sm:$0xff] %v5579_v21 }
  0x76   :  { %v5583_v53 = vmul.f32 %v12611_v8, %v5276_v22  ;;  %v457_v61 = vrot.slane %v5368_v42, 1  ;;  %v460_v28 = vrot.slane %v5376_v31, 1  ;;  %v5590_v14 = vmul.f32 %v12611_v8, %v5537_v40 }
  0x77   :  { %v5594_v12 = vmul.f32 %v12611_v8, %v5281_v57  ;;  %v5600_v22 = vmul.f32 %v12611_v8, %v5286_v33  ;;  %v5604_v9 = vmul.f32 %v12611_v8, %v5558_v0  ;;  %v5608_v31 = vmul.f32 %v12611_v8, %v5307_v19 }
  0x78   :  { %v5612_v42 = vmul.f32 %v12611_v8, %v5312_v38  ;;  %v5616_v13 = vmul.f32 %v12611_v8, %v5579_v21  ;;  %v5620_v34 = vmul.f32 %v12611_v8, %v5317_v25  ;;  %v465_v33 = vrot.slane %v5393_v18, 1 }
  0x79   :  { %v467_v0 = vrot.slane %v5397_v17, 1  ;;  %v5625_v57 = vsel %vm456_vm0, %v457_v61, %v458_v1  ;;  %v5628_v19 = vsel %vm456_vm0, %v458_v1, %v460_v28  ;;  %v468_v38 = vrot.slane %v5401_v62, 1 }
  0x7a   :  { %v470_v40 = vrot.slane %v5415_v59, 1  ;;  %v5633_v21 = vsel %vm456_vm0, %v462_v32, %v463_v4  ;;  %v472_v8 = vrot.slane %v5419_v20, 1  ;;  %v473_v25 = vrot.slane %v5423_v37, 1 }
  0x7b   :  { %v475_v18 = vrot.slane %v5427_v36, 1  ;;  %v477_v17 = vrot.slane %v5436_v15, 1  ;;  %v478_v61 = vrot.slane %v5440_v63, 1  ;;  %v480_v1 = vrot.slane %v5444_v52, 1 }
  0x7c   :  { %v482_v28 = vrot.slane %v5448_v43, 1  ;;  %v483_v62 = vrot.slane %v5457_v60, 1  ;;  %v485_v59 = vrot.slane %v5461_v47, 1  ;;  %v487_v32 = vrot.slane %v5465_v39, 1 }
  0x7d   :  { %v488_v20 = vrot.slane %v5469_v45, 1  ;;  %v490_v37 = vrot.slane %v5483_v58, 1  ;;  %v492_v36 = vrot.slane %v5487_v27, 1  ;;  %v493_v15 = vrot.slane %v5491_v50, 1 }
  0x7e   :  { %v495_v63 = vrot.slane %v5495_v2, 1  ;;  %v466_v52 = vsel %vm456_vm0, %v463_v4, %v465_v33  ;;  %v469_v43 = vsel %vm456_vm0, %v467_v0, %v468_v38  ;;  %v497_v60 = vrot.slane %v5504_v44, 1 }
  0x7f   :  { %v498_v47 = vrot.slane %v5508_v51, 1  ;;  %v471_v39 = vsel %vm456_vm0, %v468_v38, %v470_v40  ;;  %v474_v45 = vsel %vm456_vm0, %v472_v8, %v473_v25  ;;  %v476_v58 = vsel %vm456_vm0, %v473_v25, %v475_v18 }
  0x80   :  { %v500_v27 = vrot.slane %v5512_v26, 1  ;;  %v479_v50 = vsel %vm456_vm0, %v477_v17, %v478_v61  ;;  %v5660_v2 = vsel %vm456_vm0, %v478_v61, %v480_v1  ;;  %v5663_v4 = vsel %vm456_vm0, %v482_v28, %v483_v62 }
  0x81   :  { %12631 = vst [vmem:[#allocation151_spill] sm:$0xff] %v5663_v4  ;;  %v5666_v0 = vsel %vm456_vm0, %v483_v62, %v485_v59  ;;  %v5669_v44 = vsel %vm456_vm0, %v487_v32, %v488_v20  ;;  %v5672_v51 = vsel %vm456_vm0, %v488_v20, %v490_v37  ;;  %v5675_v25 = vsel %vm456_vm0, %v492_v36, %v493_v15 }
  0x82   :  { %12632 = vst [vmem:[#allocation152_spill] sm:$0xff] %v5666_v0  ;;  %12633 = vst [vmem:[#allocation153_spill] sm:$0xff] %v5669_v44  ;;  %v5678_v26 = vsel %vm456_vm0, %v493_v15, %v495_v63  ;;  %v5681_v40 = vsel %vm456_vm0, %v497_v60, %v498_v47  ;;  %v502_v33 = vrot.slane %v5516_v48, 1  ;;  %v503_v38 = vrot.slane %v5520_v23, 1  ;;  %v12653_v63 = vld [vmem:[#allocation85_spill] sm:$0xff] }
  0x83   :  { %12634 = vst [vmem:[#allocation154_spill] sm:$0xff] %v5672_v51  ;;  %12635 = vst [vmem:[#allocation155_spill] sm:$0xff] %v5675_v25  ;;  %v505_v8 = vrot.slane %v5524_v3, 1  ;;  %v5687_v18 = vsel %vm456_vm0, %v498_v47, %v500_v27  ;;  %v507_v17 = vrot.slane %v5528_v56, 1  ;;  %v508_v61 = vrot.slane %v5532_v11, 1  ;;  %v12656_v27 = vld [vmem:[#allocation22_spill] sm:$0xff] }
  0x84   :  { %12636 = vst [vmem:[#allocation156_spill] sm:$0xff] %v5678_v26  ;;  %12637 = vst [vmem:[#allocation157_spill] sm:$0xff] %v5681_v40  ;;  %v510_v1 = vrot.slane %v5541_v41, 1  ;;  %v512_v28 = vrot.slane %v5545_v10, 1  ;;  %v513_v62 = vrot.slane %v5549_v24, 1  ;;  %v515_v59 = vrot.slane %v5553_v29, 1 }
  0x85   :  { %12638 = vst [vmem:[#allocation158_spill] sm:$0xff] %v5687_v18  ;;  %v517_v48 = vrot.slane %v5562_v49, 1  ;;  %v518_v23 = vrot.slane %v5566_v30, 1  ;;  %v520_v3 = vrot.slane %v5570_v35, 1  ;;  %v522_v32 = vrot.slane %v5574_v46, 1  ;;  %v12718_v18 = vld [vmem:[#allocation71_spill] sm:$0xff] }
  0x86   :  { %v523_v56 = vrot.slane %v5583_v53, 1  ;;  %v525_v11 = vrot.slane %v5590_v14, 1  ;;  %v527_v41 = vrot.slane %v5594_v12, 1  ;;  %v528_v10 = vrot.slane %v5600_v22, 1  ;;  %v12719_v40 = vld [vmem:[#allocation95_spill] sm:$0xff]  ;;  %v12721_v26 = vld [vmem:[#allocation73_spill] sm:$0xff] }
  0x87   :  { %v530_v24 = vrot.slane %v5604_v9, 1  ;;  %v532_v29 = vrot.slane %v5608_v31, 1  ;;  %v533_v49 = vrot.slane %v5612_v42, 1  ;;  %v535_v30 = vrot.slane %v5616_v13, 1 }
  0x88   :  { %v537_v35 = vrot.slane %v5620_v34, 1  ;;  %v5709_v46 = vsel %vm456_vm0, %v502_v33, %v503_v38  ;;  %v5712_v53 = vsel %vm456_vm0, %v503_v38, %v505_v8  ;;  %v5715_v14 = vsel %vm456_vm0, %v507_v17, %v508_v61  ;;  %v12658_v38 = vld [vmem:[#allocation23_spill] sm:$0xff]  ;;  %v12660_v17 = vld [vmem:[#allocation24_spill] sm:$0xff] }
  0x89   :  { %12639 = vst [vmem:[#allocation159_spill] sm:$0xff] %v5709_v46  ;;  %12640 = vst [vmem:[#allocation160_spill] sm:$0xff] %v5712_v53  ;;  %v5718_v22 = vsel %vm456_vm0, %v508_v61, %v510_v1  ;;  %v5721_v12 = vsel %vm456_vm0, %v512_v28, %v513_v62  ;;  %v5724_v9 = vsel %vm456_vm0, %v513_v62, %v515_v59  ;;  %v12654_v60 = vrot.slane %v12653_v63, 1  ;;  %v12662_v1 = vld [vmem:[#allocation25_spill] sm:$0xff]  ;;  %v12716_v53 = vld [vmem:[#allocation94_spill] sm:$0xff] }
  0x8a   :  { %12641 = vst [vmem:[#allocation161_spill] sm:$0xff] %v5715_v14  ;;  %12642 = vst [vmem:[#allocation162_spill] sm:$0xff] %v5718_v22  ;;  %v5727_v31 = vsel %vm456_vm0, %v517_v48, %v518_v23  ;;  %v5730_v42 = vsel %vm456_vm0, %v518_v23, %v520_v3  ;;  %v5733_v13 = vsel %vm456_vm0, %v522_v32, %v523_v56  ;;  %v12664_v62 = vld [vmem:[#allocation29_spill] sm:$0xff]  ;;  %v12666_v48 = vld [vmem:[#allocation30_spill] sm:$0xff] }
  0x8b   :  { %12643 = vst [vmem:[#allocation163_spill] sm:$0xff] %v5721_v12  ;;  %12644 = vst [vmem:[#allocation164_spill] sm:$0xff] %v5724_v9  ;;  %v5736_v34 = vsel %vm456_vm0, %v523_v56, %v525_v11  ;;  %v5739_v20 = vsel %vm456_vm0, %v527_v41, %v528_v10  ;;  %v5742_v37 = vsel %vm456_vm0, %v528_v10, %v530_v24  ;;  %v12668_v3 = vld [vmem:[#allocation31_spill] sm:$0xff]  ;;  %v12670_v32 = vld [vmem:[#allocation32_spill] sm:$0xff] }
  0x8c   :  { %12645 = vst [vmem:[#allocation165_spill] sm:$0xff] %v5727_v31  ;;  %12646 = vst [vmem:[#allocation166_spill] sm:$0xff] %v5730_v42  ;;  %v5745_v36 = vsel %vm456_vm0, %v532_v29, %v533_v49  ;;  %v5748_v15 = vsel %vm456_vm0, %v533_v49, %v535_v30  ;;  %v5753_v47 = vsel %vm456_vm0, %v537_v35, %v12654_v60  ;;  %v12680_v24 = vld [vmem:[#allocation55_spill] sm:$0xff]  ;;  %v12681_v49 = vld [vmem:[#allocation18_spill] sm:$0xff] }
  0x8d   :  { %12647 = vst [vmem:[#allocation167_spill] sm:$0xff] %v5733_v13  ;;  %12648 = vst [vmem:[#allocation168_spill] sm:$0xff] %v5736_v34  ;;  %v5757_v33 = vadd.f32 %v5625_v57, %v12656_v27  ;;  %v5761_v8 = vadd.f32 %v5628_v19, %v12658_v38  ;;  %v5765_v61 = vadd.f32 %v5633_v21, %v12660_v17  ;;  %v12672_v19 = vld [vmem:[#allocation36_spill] sm:$0xff]  ;;  %v5788_v21 = vld [vmem:[%s11960_s0 + $0x2] ss:$0 sm:$0xff] }
  0x8e   :  { %12649 = vst [vmem:[#allocation169_spill] sm:$0xff] %v5739_v20  ;;  %12650 = vst [vmem:[#allocation170_spill] sm:$0xff] %v5742_v37  ;;  %v5768_v28 = vadd.f32 %v466_v52, %v12662_v1  ;;  %v5771_v59 = vadd.f32 %v469_v43, %v12664_v62  ;;  %v5774_v23 = vadd.f32 %v471_v39, %v12666_v48  ;;  %v12675_v52 = vld [vmem:[#allocation15_spill] sm:$0xff]  ;;  %v12683_v60 = vld [vmem:[#allocation56_spill] sm:$0xff] }
  0x8f   :  { %12651 = vst [vmem:[#allocation171_spill] sm:$0xff] %v5745_v36  ;;  %12652 = vst [vmem:[#allocation172_spill] sm:$0xff] %v5748_v15  ;;  %v5777_v57 = vadd.f32 %v474_v45, %v12668_v3  ;;  %v5780_v56 = vadd.f32 %v476_v58, %v12670_v32  ;;  %v5783_v11 = vadd.f32 %v479_v50, %v12672_v19  ;;  %v12677_v39 = vld [vmem:[#allocation47_spill] sm:$0xff]  ;;  %v12678_v45 = vld [vmem:[#allocation16_spill] sm:$0xff] }
  0x90   :  { %12655 = vst [vmem:[#allocation85_spill] sm:$0xff] %v5753_v47  ;;  %12657 = vst [vmem:[#allocation22_spill] sm:$0xff] %v5757_v33  ;;  %v5792_v43 = vmul.f32 %v5788_v21, %v12675_v52  ;;  %v800_v41 = vmul.f32 %v5788_v21, %v12677_v39  ;;  %v5798_v10 = vmul.f32 %v5788_v21, %v12678_v45  ;;  %v12679_v58 = vld [vmem:[#allocation17_spill] sm:$0xff]  ;;  %v12682_v35 = vld [vmem:[#allocation19_spill] sm:$0xff] }
  0x91   :  { %12659 = vst [vmem:[#allocation23_spill] sm:$0xff] %v5761_v8  ;;  %12661 = vst [vmem:[#allocation24_spill] sm:$0xff] %v5765_v61  ;;  %v5802_v50 = vmul.f32 %v5788_v21, %v12679_v58  ;;  %v5806_v29 = vmul.f32 %v5788_v21, %v12680_v24  ;;  %v5810_v30 = vmul.f32 %v5788_v21, %v12681_v49  ;;  %v12684_v38 = vld [vmem:[#allocation20_spill] sm:$0xff]  ;;  %v12685_v1 = vld [vmem:[#allocation21_spill] sm:$0xff] }
  0x92   :  { %12663 = vst [vmem:[#allocation25_spill] sm:$0xff] %v5768_v28  ;;  %12665 = vst [vmem:[#allocation29_spill] sm:$0xff] %v5771_v59  ;;  %v5814_v63 = vmul.f32 %v5788_v21, %v12682_v35  ;;  %v5818_v27 = vmul.f32 %v5788_v21, %v12683_v60  ;;  %v5822_v17 = vmul.f32 %v5788_v21, %v12684_v38  ;;  %v12686_v48 = vld [vmem:[#allocation78_spill] sm:$0xff]  ;;  %v12688_v52 = vld [vmem:[#allocation27_spill] sm:$0xff]  ;;  %v1026_v22 = vrot.slane %v800_v41, 2 }
  0x93   :  { %12667 = vst [vmem:[#allocation30_spill] sm:$0xff] %v5774_v23  ;;  %12669 = vst [vmem:[#allocation31_spill] sm:$0xff] %v5777_v57  ;;  %v5826_v62 = vmul.f32 %v5788_v21, %v12685_v1  ;;  %v5830_v3 = vmul.f32 %v5788_v21, %v12686_v48  ;;  %v12687_v32 = vld [vmem:[#allocation26_spill] sm:$0xff]  ;;  %v5838_v39 = vmul.f32 %v5788_v21, %v12688_v52  ;;  %v12689_v45 = vld [vmem:[#allocation84_spill] sm:$0xff]  ;;  %v12070_v25 = vrot.slane %v5792_v43, 2 }
  0x94   :  { %12671 = vst [vmem:[#allocation32_spill] sm:$0xff] %v5780_v56  ;;  %12673 = vst [vmem:[#allocation36_spill] sm:$0xff] %v5783_v11  ;;  %v5834_v19 = vmul.f32 %v5788_v21, %v12687_v32  ;;  %v5842_v58 = vmul.f32 %v5788_v21, %v12689_v45  ;;  %v12690_v24 = vld [vmem:[#allocation28_spill] sm:$0xff]  ;;  %v12691_v35 = vld [vmem:[#allocation33_spill] sm:$0xff]  ;;  %v1029_v44 = vrot.slane %v5802_v50, 2  ;;  %v1034_v0 = vrot.slane %v5814_v63, 2 }
  0x95   :  { %12674 = vst [vmem:[#allocation173_spill] sm:$0xff] %v5788_v21  ;;  %12676 = vst [vmem:[#allocation15_spill] sm:$0xff] %v5792_v43  ;;  %v5846_v49 = vmul.f32 %v5788_v21, %v12690_v24  ;;  %v5850_v60 = vmul.f32 %v5788_v21, %v12691_v35  ;;  %v12692_v38 = vld [vmem:[#allocation86_spill] sm:$0xff]  ;;  %v12694_v52 = vld [vmem:[#allocation35_spill] sm:$0xff]  ;;  %v1036_v4 = vrot.slane %v5818_v27, 2 }
  0x96   :  { %v5854_v1 = vmul.f32 %v5788_v21, %v12692_v38  ;;  %v12693_v48 = vld [vmem:[#allocation34_spill] sm:$0xff]  ;;  %v5862_v45 = vmul.f32 %v5788_v21, %v12694_v52  ;;  %v12695_v11 = vld [vmem:[#allocation87_spill] sm:$0xff]  ;;  %v12696_v56 = vld [vmem:[#allocation37_spill] sm:$0xff]  ;;  %v1043_v50 = vrot.slane %v5834_v19, 2  ;;  %v1046_v43 = vrot.slane %v5842_v58, 2 }
  0x97   :  { %v5858_v32 = vmul.f32 %v5788_v21, %v12693_v48  ;;  %v5866_v24 = vmul.f32 %v5788_v21, %v12695_v11  ;;  %v5870_v35 = vmul.f32 %v5788_v21, %v12696_v56  ;;  %v12697_v57 = vld [vmem:[#allocation38_spill] sm:$0xff]  ;;  %v12698_v23 = vld [vmem:[#allocation88_spill] sm:$0xff]  ;;  %v12699_v59 = vld [vmem:[#allocation39_spill] sm:$0xff] }
  0x98   :  { %v5874_v38 = vmul.f32 %v5788_v21, %v12697_v57  ;;  %v5878_v48 = vmul.f32 %v5788_v21, %v12698_v23  ;;  %v5882_v52 = vmul.f32 %v5788_v21, %v12699_v59  ;;  %v12700_v28 = vld [vmem:[#allocation40_spill] sm:$0xff]  ;;  %v12701_v61 = vld [vmem:[#allocation89_spill] sm:$0xff]  ;;  %v12703_v33 = vld [vmem:[#allocation42_spill] sm:$0xff]  ;;  %v1051_v63 = vrot.slane %v5854_v1, 2 }
  0x99   :  { %v5886_v11 = vmul.f32 %v5788_v21, %v12700_v28  ;;  %v5890_v56 = vmul.f32 %v5788_v21, %v12701_v61  ;;  %v12702_v8 = vld [vmem:[#allocation41_spill] sm:$0xff]  ;;  %v5898_v23 = vmul.f32 %v5788_v21, %v12703_v33  ;;  %v12704_v47 = vld [vmem:[#allocation90_spill] sm:$0xff]  ;;  %v12705_v15 = vld [vmem:[#allocation48_spill] sm:$0xff]  ;;  %v1053_v27 = vrot.slane %v5858_v32, 2 }
  0x9a   :  { %v5894_v57 = vmul.f32 %v5788_v21, %v12702_v8  ;;  %v5902_v59 = vmul.f32 %v5788_v21, %v12704_v47  ;;  %v5906_v28 = vmul.f32 %v5788_v21, %v12705_v15  ;;  %v12706_v36 = vld [vmem:[#allocation49_spill] sm:$0xff]  ;;  %v12707_v37 = vld [vmem:[#allocation91_spill] sm:$0xff]  ;;  %v12708_v20 = vld [vmem:[#allocation50_spill] sm:$0xff]  ;;  %v1058_v19 = vrot.slane %v5870_v35, 2 }
  0x9b   :  { %v5910_v61 = vmul.f32 %v5788_v21, %v12706_v36  ;;  %v5914_v8 = vmul.f32 %v5788_v21, %v12707_v37  ;;  %v5918_v33 = vmul.f32 %v5788_v21, %v12708_v20  ;;  %v12709_v34 = vld [vmem:[#allocation57_spill] sm:$0xff]  ;;  %v12710_v13 = vld [vmem:[#allocation92_spill] sm:$0xff]  ;;  %v12711_v42 = vld [vmem:[#allocation58_spill] sm:$0xff]  ;;  %v1061_v58 = vrot.slane %v5878_v48, 2 }
  0x9c   :  { %v5922_v47 = vmul.f32 %v5788_v21, %v12709_v34  ;;  %v5926_v15 = vmul.f32 %v5788_v21, %v12710_v13  ;;  %v5930_v36 = vmul.f32 %v5788_v21, %v12711_v42  ;;  %v12712_v31 = vld [vmem:[#allocation59_spill] sm:$0xff]  ;;  %v12713_v9 = vld [vmem:[#allocation93_spill] sm:$0xff]  ;;  %v12714_v12 = vld [vmem:[#allocation64_spill] sm:$0xff]  ;;  %v5950_v42 = vmul.f32 %v5788_v21, %v12716_v53 }
  0x9d   :  { %v5934_v37 = vmul.f32 %v5788_v21, %v12712_v31  ;;  %v5938_v20 = vmul.f32 %v5788_v21, %v12713_v9  ;;  %v5942_v34 = vmul.f32 %v5788_v21, %v12714_v12  ;;  %v12715_v14 = vld [vmem:[#allocation65_spill] sm:$0xff]  ;;  %v12717_v46 = vld [vmem:[#allocation66_spill] sm:$0xff]  ;;  %v5958_v9 = vmul.f32 %v5788_v21, %v12718_v18  ;;  %v12720_v41 = vld [vmem:[#allocation72_spill] sm:$0xff] }
  0x9e   :  { %v5946_v13 = vmul.f32 %v5788_v21, %v12715_v14  ;;  %v5954_v31 = vmul.f32 %v5788_v21, %v12717_v46  ;;  %v5962_v12 = vmul.f32 %v5788_v21, %v12719_v40  ;;  %v5966_v14 = vmul.f32 %v5788_v21, %v12720_v41  ;;  %v12722_v46 = vld [vmem:[#allocation96_spill] sm:$0xff] }
  0x9f   :  { %v5970_v53 = vmul.f32 %v5788_v21, %v12721_v26  ;;  %v5975_v51 = vmul.f32 %v5788_v21, %v12722_v46  ;;  %v1028_v18 = vrot.slane %v5798_v10, 2  ;;  %v1031_v40 = vrot.slane %v5806_v29, 2 }
  0xa0   :  { %v5983_v41 = vsel %vm942_vm1, %v12070_v25, %v1026_v22  ;;  %v1033_v26 = vrot.slane %v5810_v30, 2  ;;  %v1038_v46 = vrot.slane %v5822_v17, 2  ;;  %v1039_v21 = vrot.slane %v5826_v62, 2  ;;  %v12817_v25 = vld [vmem:[#allocation171_spill] sm:$0xff] }
  0xa1   :  { %v1041_v10 = vrot.slane %v5830_v3, 2  ;;  %v1044_v29 = vrot.slane %v5838_v39, 2  ;;  %v1048_v22 = vrot.slane %v5846_v49, 2  ;;  %v1049_v30 = vrot.slane %v5850_v60, 2 }
  0xa2   :  { %v1054_v17 = vrot.slane %v5862_v45, 2  ;;  %v1056_v62 = vrot.slane %v5866_v24, 2  ;;  %v1030_v3 = vsel %vm942_vm1, %v1028_v18, %v1029_v44  ;;  %v1059_v39 = vrot.slane %v5874_v38, 2 }
  0xa3   :  { %v1032_v49 = vsel %vm942_vm1, %v1029_v44, %v1031_v40  ;;  %v1035_v60 = vsel %vm942_vm1, %v1033_v26, %v1034_v0  ;;  %v1037_v1 = vsel %vm942_vm1, %v1034_v0, %v1036_v4  ;;  %v1040_v32 = vsel %vm942_vm1, %v1038_v46, %v1039_v21 }
  0xa4   :  { %v1042_v45 = vsel %vm942_vm1, %v1039_v21, %v1041_v10  ;;  %v1045_v24 = vsel %vm942_vm1, %v1043_v50, %v1044_v29  ;;  %v1047_v18 = vsel %vm942_vm1, %v1044_v29, %v1046_v43  ;;  %v1050_v35 = vsel %vm942_vm1, %v1048_v22, %v1049_v30 }
  0xa5   :  { %v1052_v38 = vsel %vm942_vm1, %v1049_v30, %v1051_v63  ;;  %v1055_v48 = vsel %vm942_vm1, %v1053_v27, %v1054_v17  ;;  %v1057_v44 = vsel %vm942_vm1, %v1054_v17, %v1056_v62  ;;  %v1063_v40 = vrot.slane %v5882_v52, 2 }
  0xa6   :  { %v1060_v4 = vsel %vm942_vm1, %v1058_v19, %v1059_v39  ;;  %v1062_v0 = vsel %vm942_vm1, %v1059_v39, %v1061_v58  ;;  %v1064_v21 = vrot.slane %v5886_v11, 2  ;;  %v1066_v26 = vrot.slane %v5890_v56, 2 }
  0xa7   :  { %v1068_v43 = vrot.slane %v5894_v57, 2  ;;  %v1069_v46 = vrot.slane %v5898_v23, 2  ;;  %v1071_v10 = vrot.slane %v5902_v59, 2  ;;  %v1073_v50 = vrot.slane %v5906_v28, 2 }
  0xa8   :  { %v1074_v29 = vrot.slane %v5910_v61, 2  ;;  %v1076_v52 = vrot.slane %v5914_v8, 2  ;;  %v1078_v22 = vrot.slane %v5918_v33, 2  ;;  %v1079_v30 = vrot.slane %v5922_v47, 2 }
  0xa9   :  { %v1081_v11 = vrot.slane %v5926_v15, 2  ;;  %v1083_v56 = vrot.slane %v5930_v36, 2  ;;  %v1084_v57 = vrot.slane %v5934_v37, 2  ;;  %v1086_v23 = vrot.slane %v5938_v20, 2 }
  0xaa   :  { %v1088_v59 = vrot.slane %v5942_v34, 2  ;;  %v1089_v28 = vrot.slane %v5946_v13, 2  ;;  %v1091_v61 = vrot.slane %v5950_v42, 2  ;;  %v1093_v8 = vrot.slane %v5954_v31, 2 }
  0xab   :  { %v1094_v33 = vrot.slane %v5958_v9, 2  ;;  %v1096_v47 = vrot.slane %v5962_v12, 2  ;;  %v1098_v15 = vrot.slane %v5966_v14, 2  ;;  %v1099_v36 = vrot.slane %v5970_v53, 2 }
  0xac   :  { %v1065_v37 = vsel %vm942_vm1, %v1063_v40, %v1064_v21  ;;  %v1067_v20 = vsel %vm942_vm1, %v1064_v21, %v1066_v26  ;;  %v1070_v34 = vsel %vm942_vm1, %v1068_v43, %v1069_v46  ;;  %v1101_v13 = vrot.slane %v5975_v51, 2 }
  0xad   :  { %v1072_v42 = vsel %vm942_vm1, %v1069_v46, %v1071_v10  ;;  %v1075_v31 = vsel %vm942_vm1, %v1073_v50, %v1074_v29  ;;  %v1077_v9 = vsel %vm942_vm1, %v1074_v29, %v1076_v52  ;;  %v1080_v12 = vsel %vm942_vm1, %v1078_v22, %v1079_v30  ;;  %v12723_v10 = vld [vmem:[#allocation97_spill] sm:$0xff] }
  0xae   :  { %v1082_v14 = vsel %vm942_vm1, %v1079_v30, %v1081_v11  ;;  %v1085_v53 = vsel %vm942_vm1, %v1083_v56, %v1084_v57  ;;  %v1087_v63 = vsel %vm942_vm1, %v1084_v57, %v1086_v23  ;;  %v1090_v27 = vsel %vm942_vm1, %v1088_v59, %v1089_v28 }
  0xaf   :  { %v1092_v17 = vsel %vm942_vm1, %v1089_v28, %v1091_v61  ;;  %v1095_v51 = vsel %vm942_vm1, %v1093_v8, %v1094_v33  ;;  %v1097_v62 = vsel %vm942_vm1, %v1094_v33, %v1096_v47  ;;  %v1100_v19 = vsel %vm942_vm1, %v1098_v15, %v1099_v36  ;;  %v12739_v28 = vld [vmem:[#allocation70_spill] sm:$0xff]  ;;  %v12741_v47 = vld [vmem:[#allocation75_spill] sm:$0xff] }
  0xb0   :  { %v1102_v39 = vsel %vm942_vm1, %v1099_v36, %v1101_v13  ;;  %v6059_v58 = vadd.f32 %v5983_v41, %v5033_v16  ;;  %v6062_v40 = vadd.f32 %v1030_v3, %v5036_v7  ;;  %v6065_v21 = vadd.f32 %v1032_v49, %v5039_v6  ;;  %v12724_v16 = vld [vmem:[#allocation43_spill] sm:$0xff]  ;;  %v12725_v7 = vld [vmem:[#allocation44_spill] sm:$0xff]  ;;  %v12726_v6 = vld [vmem:[#allocation45_spill] sm:$0xff] }
  0xb1   :  { %v6068_v26 = vadd.f32 %v1035_v60, %v5042_v54  ;;  %v6071_v43 = vadd.f32 %v1037_v1, %v5045_v5  ;;  %v6074_v46 = vadd.f32 %v1040_v32, %v5048_v55  ;;  %v6077_v50 = vadd.f32 %v1042_v45, %v12723_v10  ;;  %v12727_v54 = vld [vmem:[#allocation46_spill] sm:$0xff]  ;;  %v12728_v5 = vld [vmem:[#allocation51_spill] sm:$0xff]  ;;  %v12729_v55 = vld [vmem:[#allocation52_spill] sm:$0xff] }
  0xb2   :  { %v6080_v41 = vadd.f32 %v1045_v24, %v12724_v16  ;;  %v6083_v3 = vadd.f32 %v1047_v18, %v12725_v7  ;;  %v6086_v49 = vadd.f32 %v1050_v35, %v12726_v6  ;;  %v6089_v60 = vadd.f32 %v1052_v38, %v12727_v54  ;;  %v12730_v45 = vld [vmem:[#allocation53_spill] sm:$0xff]  ;;  %v12731_v24 = vld [vmem:[#allocation54_spill] sm:$0xff]  ;;  %v12732_v18 = vld [vmem:[#allocation60_spill] sm:$0xff] }
  0xb3   :  { %v6092_v1 = vadd.f32 %v1055_v48, %v12728_v5  ;;  %v6095_v32 = vadd.f32 %v1057_v44, %v12729_v55  ;;  %v6098_v29 = vadd.f32 %v1060_v4, %v12730_v45  ;;  %v6101_v52 = vadd.f32 %v1062_v0, %v12731_v24  ;;  %v12733_v35 = vld [vmem:[#allocation61_spill] sm:$0xff]  ;;  %v12734_v38 = vld [vmem:[#allocation62_spill] sm:$0xff]  ;;  %v12735_v48 = vld [vmem:[#allocation63_spill] sm:$0xff] }
  0xb4   :  { %v6104_v22 = vadd.f32 %v1065_v37, %v12732_v18  ;;  %v6107_v30 = vadd.f32 %v1067_v20, %v12733_v35  ;;  %v6110_v11 = vadd.f32 %v1070_v34, %v12734_v38  ;;  %v6113_v56 = vadd.f32 %v1072_v42, %v12735_v48  ;;  %v12736_v44 = vld [vmem:[#allocation67_spill] sm:$0xff]  ;;  %v12737_v4 = vld [vmem:[#allocation68_spill] sm:$0xff]  ;;  %v12738_v0 = vld [vmem:[#allocation69_spill] sm:$0xff] }
  0xb5   :  { %v6116_v57 = vadd.f32 %v1075_v31, %v12736_v44  ;;  %v6119_v23 = vadd.f32 %v1077_v9, %v12737_v4  ;;  %v6122_v59 = vadd.f32 %v1080_v12, %v12738_v0  ;;  %v6125_v61 = vadd.f32 %v1082_v14, %v12739_v28  ;;  %v12740_v8 = vld [vmem:[#allocation74_spill] sm:$0xff]  ;;  %v12742_v36 = vld [vmem:[#allocation76_spill] sm:$0xff]  ;;  %v12744_v20 = vld [vmem:[#allocation77_spill] sm:$0xff] }
  0xb6   :  { %v6128_v33 = vadd.f32 %v1085_v53, %v12740_v8  ;;  %v6131_v15 = vadd.f32 %v1087_v63, %v12741_v47  ;;  %v6134_v37 = vadd.f32 %v1090_v27, %v12742_v36  ;;  %v6137_v34 = vadd.f32 %v1092_v17, %v12744_v20  ;;  %v12746_v13 = vld [vmem:[#allocation79_spill] sm:$0xff]  ;;  %v12748_v31 = vld [vmem:[#allocation80_spill] sm:$0xff]  ;;  %v12750_v12 = vld [vmem:[#allocation81_spill] sm:$0xff] }
  0xb7   :  { %v6140_v42 = vadd.f32 %v1095_v51, %v12746_v13  ;;  %v6143_v9 = vadd.f32 %v1097_v62, %v12748_v31  ;;  %v6146_v14 = vadd.f32 %v1100_v19, %v12750_v12  ;;  %v12752_v53 = vld [vmem:[#allocation82_spill] sm:$0xff]  ;;  %v12754_v63 = vld [vmem:[#allocation9_spill] sm:$0xff]  ;;  %v12757_v7 = vld [vmem:[#allocation151_spill] sm:$0xff] }
  0xb8   :  { %12743 = vst [vmem:[#allocation47_spill] sm:$0xff] %v6134_v37  ;;  %12745 = vst [vmem:[#allocation16_spill] sm:$0xff] %v6137_v34  ;;  %v6149_v10 = vadd.f32 %v1102_v39, %v12752_v53  ;;  %v6153_v16 = vadd.f32 %v5660_v2, %v12754_v63  ;;  %v12756_v27 = vld [vmem:[#allocation110_spill] sm:$0xff]  ;;  %v12759_v6 = vld [vmem:[#allocation111_spill] sm:$0xff] }
  0xb9   :  { %12747 = vst [vmem:[#allocation17_spill] sm:$0xff] %v6140_v42  ;;  %12749 = vst [vmem:[#allocation55_spill] sm:$0xff] %v6143_v9  ;;  %v6157_v17 = vadd.f32 %v12757_v7, %v12756_v27  ;;  %v12760_v51 = vld [vmem:[#allocation152_spill] sm:$0xff]  ;;  %v12763_v5 = vld [vmem:[#allocation153_spill] sm:$0xff] }
  0xba   :  { %12751 = vst [vmem:[#allocation18_spill] sm:$0xff] %v6146_v14  ;;  %12753 = vst [vmem:[#allocation19_spill] sm:$0xff] %v6149_v10  ;;  %v6161_v54 = vadd.f32 %v12760_v51, %v12759_v6  ;;  %v12762_v62 = vld [vmem:[#allocation112_spill] sm:$0xff]  ;;  %v12765_v19 = vld [vmem:[#allocation117_spill] sm:$0xff] }
  0xbb   :  { %12755 = vst [vmem:[#allocation56_spill] sm:$0xff] %v6153_v16  ;;  %12758 = vst [vmem:[#allocation20_spill] sm:$0xff] %v6157_v17  ;;  %v6165_v55 = vadd.f32 %v12763_v5, %v12762_v62  ;;  %v12766_v45 = vld [vmem:[#allocation154_spill] sm:$0xff]  ;;  %v12769_v18 = vld [vmem:[#allocation155_spill] sm:$0xff] }
  0xbc   :  { %12761 = vst [vmem:[#allocation21_spill] sm:$0xff] %v6161_v54  ;;  %v6169_v39 = vadd.f32 %v12766_v45, %v12765_v19  ;;  %v12768_v24 = vld [vmem:[#allocation118_spill] sm:$0xff]  ;;  %v12771_v35 = vld [vmem:[#allocation119_spill] sm:$0xff]  ;;  %v12772_v38 = vld [vmem:[#allocation156_spill] sm:$0xff] }
  0xbd   :  { %12764 = vst [vmem:[#allocation78_spill] sm:$0xff] %v6165_v55  ;;  %v6173_v2 = vadd.f32 %v12769_v18, %v12768_v24  ;;  %v6177_v48 = vadd.f32 %v12772_v38, %v12771_v35  ;;  %v12774_v44 = vld [vmem:[#allocation120_spill] sm:$0xff]  ;;  %v12775_v4 = vld [vmem:[#allocation157_spill] sm:$0xff]  ;;  %v12778_v8 = vld [vmem:[#allocation158_spill] sm:$0xff] }
  0xbe   :  { %12767 = vst [vmem:[#allocation26_spill] sm:$0xff] %v6169_v39  ;;  %v6181_v0 = vadd.f32 %v12775_v4, %v12774_v44  ;;  %v12777_v28 = vld [vmem:[#allocation125_spill] sm:$0xff]  ;;  %v12780_v36 = vld [vmem:[#allocation126_spill] sm:$0xff]  ;;  %v12781_v20 = vld [vmem:[#allocation159_spill] sm:$0xff] }
  0xbf   :  { %12770 = vst [vmem:[#allocation27_spill] sm:$0xff] %v6173_v2  ;;  %12773 = vst [vmem:[#allocation84_spill] sm:$0xff] %v6177_v48  ;;  %v6185_v47 = vadd.f32 %v12778_v8, %v12777_v28  ;;  %v6189_v13 = vadd.f32 %v12781_v20, %v12780_v36  ;;  %v12783_v31 = vld [vmem:[#allocation127_spill] sm:$0xff]  ;;  %v12784_v12 = vld [vmem:[#allocation160_spill] sm:$0xff] }
  0xc0   :  { %12776 = vst [vmem:[#allocation28_spill] sm:$0xff] %v6181_v0  ;;  %v6193_v53 = vadd.f32 %v12784_v12, %v12783_v31  ;;  %v12786_v63 = vld [vmem:[#allocation128_spill] sm:$0xff]  ;;  %v12787_v27 = vld [vmem:[#allocation161_spill] sm:$0xff]  ;;  %v12790_v51 = vld [vmem:[#allocation162_spill] sm:$0xff] }
  0xc1   :  { %12779 = vst [vmem:[#allocation33_spill] sm:$0xff] %v6185_v47  ;;  %12782 = vst [vmem:[#allocation86_spill] sm:$0xff] %v6189_v13  ;;  %v6197_v7 = vadd.f32 %v12787_v27, %v12786_v63  ;;  %v12789_v6 = vld [vmem:[#allocation132_spill] sm:$0xff]  ;;  %v12792_v5 = vld [vmem:[#allocation133_spill] sm:$0xff] }
  0xc2   :  { %12785 = vst [vmem:[#allocation34_spill] sm:$0xff] %v6193_v53  ;;  %v6201_v62 = vadd.f32 %v12790_v51, %v12789_v6  ;;  %v12793_v19 = vld [vmem:[#allocation163_spill] sm:$0xff]  ;;  %v12795_v24 = vld [vmem:[#allocation134_spill] sm:$0xff]  ;;  %v12796_v18 = vld [vmem:[#allocation164_spill] sm:$0xff] }
  0xc3   :  { %12788 = vst [vmem:[#allocation35_spill] sm:$0xff] %v6197_v7  ;;  %v6205_v45 = vadd.f32 %v12793_v19, %v12792_v5  ;;  %v6209_v35 = vadd.f32 %v12796_v18, %v12795_v24  ;;  %v12798_v38 = vld [vmem:[#allocation135_spill] sm:$0xff]  ;;  %v12799_v44 = vld [vmem:[#allocation165_spill] sm:$0xff]  ;;  %v12802_v8 = vld [vmem:[#allocation166_spill] sm:$0xff] }
  0xc4   :  { %12791 = vst [vmem:[#allocation87_spill] sm:$0xff] %v6201_v62  ;;  %v6213_v4 = vadd.f32 %v12799_v44, %v12798_v38  ;;  %v12801_v28 = vld [vmem:[#allocation139_spill] sm:$0xff]  ;;  %v12804_v20 = vld [vmem:[#allocation140_spill] sm:$0xff]  ;;  %v12807_v63 = vld [vmem:[#allocation141_spill] sm:$0xff] }
  0xc5   :  { %12794 = vst [vmem:[#allocation37_spill] sm:$0xff] %v6205_v45  ;;  %12797 = vst [vmem:[#allocation38_spill] sm:$0xff] %v6209_v35  ;;  %v6217_v36 = vadd.f32 %v12802_v8, %v12801_v28  ;;  %v12805_v31 = vld [vmem:[#allocation167_spill] sm:$0xff]  ;;  %v12808_v27 = vld [vmem:[#allocation168_spill] sm:$0xff] }
  0xc6   :  { %12800 = vst [vmem:[#allocation88_spill] sm:$0xff] %v6213_v4  ;;  %v6221_v12 = vadd.f32 %v12805_v31, %v12804_v20  ;;  %v6225_v6 = vadd.f32 %v12808_v27, %v12807_v63  ;;  %v12810_v51 = vld [vmem:[#allocation142_spill] sm:$0xff]  ;;  %v12811_v5 = vld [vmem:[#allocation169_spill] sm:$0xff]  ;;  %v12819_v8 = vld [vmem:[#allocation147_spill] sm:$0xff] }
  0xc7   :  { %12803 = vst [vmem:[#allocation39_spill] sm:$0xff] %v6217_v36  ;;  %v6229_v19 = vadd.f32 %v12811_v5, %v12810_v51  ;;  %v12813_v24 = vld [vmem:[#allocation145_spill] sm:$0xff]  ;;  %v12814_v18 = vld [vmem:[#allocation170_spill] sm:$0xff]  ;;  %v12820_v36 = vld [vmem:[#allocation172_spill] sm:$0xff] }
  0xc8   :  { %12806 = vst [vmem:[#allocation40_spill] sm:$0xff] %v6221_v12  ;;  %12809 = vst [vmem:[#allocation89_spill] sm:$0xff] %v6225_v6  ;;  %v6233_v38 = vadd.f32 %v12814_v18, %v12813_v24  ;;  %v12816_v44 = vld [vmem:[#allocation146_spill] sm:$0xff]  ;;  %v6241_v20 = vadd.f32 %v12820_v36, %v12819_v8  ;;  %v12822_v31 = vld [vmem:[#allocation148_spill] sm:$0xff] }
  0xc9   :  { %12812 = vst [vmem:[#allocation41_spill] sm:$0xff] %v6229_v19  ;;  %v6237_v28 = vadd.f32 %v12817_v25, %v12816_v44  ;;  %v12823_v12 = vld [vmem:[#allocation85_spill] sm:$0xff]  ;;  %v4010_v25 = vld [vmem:[%s11963_s3 + $0x8] sm:$0xff]  ;;  %v12854_v62 = vld [vmem:[#allocation99_spill] sm:$0xff] }
  0xca   :  { %12815 = vst [vmem:[#allocation42_spill] sm:$0xff] %v6233_v38  ;;  %12821 = vst [vmem:[#allocation48_spill] sm:$0xff] %v6241_v20  ;;  %v6245_v63 = vadd.f32 %v12823_v12, %v12822_v31  ;;  %v4009_v27 = vld [vmem:[%s11963_s3] sm:$0xff]  ;;  %v6266_v12 = vld [vmem:[%s11963_s3 + $0x18] sm:$0xff] }
  0xcb   :  { %12818 = vst [vmem:[#allocation90_spill] sm:$0xff] %v6237_v28  ;;  %v12825_v51 = vld [vmem:[#allocation173_spill] sm:$0xff]  ;;  %12830 = vst [vmem:[#allocation92_spill] sm:$0xff] %v6266_v12  ;;  %v6310_v28 = vld [vmem:[%s11963_s3 + $0x48] sm:$0xff] }
  0xcc   :  { %12824 = vst [vmem:[#allocation49_spill] sm:$0xff] %v6245_v63  ;;  %v6251_v5 = vmul.f32 %v4009_v27, %v12825_v51  ;;  %v6257_v24 = vmul.f32 %v4010_v25, %v12825_v51  ;;  %v12828_v36 = vld [vmem:[#allocation113_spill] sm:$0xff]  ;;  %v6270_v44 = vmul.f32 %v6266_v12, %v12825_v51  ;;  %v6297_v63 = vld [vmem:[%s11963_s3 + $0x38] sm:$0xff]  ;;  %12842 = vst [vmem:[#allocation72_spill] sm:$0xff] %v6310_v28 }
  0xcd   :  { %v6261_v18 = vmul.f32 %v12825_v51, %v12828_v36  ;;  %v6275_v8 = vld [vmem:[%s11963_s3 + $0x20] sm:$0xff]  ;;  %v6288_v36 = vld [vmem:[%s11963_s3 + $0x30] sm:$0xff]  ;;  %12838 = vst [vmem:[#allocation66_spill] sm:$0xff] %v6297_v63  ;;  %v12850_v4 = vld [vmem:[#allocation98_spill] sm:$0xff] }
  0xce   :  { %12826 = vst [vmem:[#allocation91_spill] sm:$0xff] %v6251_v5  ;;  %12827 = vst [vmem:[#allocation50_spill] sm:$0xff] %v6257_v24  ;;  %v6279_v31 = vmul.f32 %v6275_v8, %v12825_v51  ;;  %v12834_v27 = vld [vmem:[#allocation121_spill] sm:$0xff]  ;;  %v6292_v12 = vmul.f32 %v6288_v36, %v12825_v51  ;;  %v6319_v38 = vld [vmem:[%s11963_s3 + $0x50] sm:$0xff]  ;;  %v6340_v35 = vmul.f32 %v12825_v51, %v12850_v4 }
  0xcf   :  { %12829 = vst [vmem:[#allocation57_spill] sm:$0xff] %v6261_v18  ;;  %12831 = vst [vmem:[#allocation58_spill] sm:$0xff] %v6270_v44  ;;  %v6283_v25 = vmul.f32 %v12825_v51, %v12834_v27  ;;  %v12840_v27 = vld [vmem:[#allocation143_spill] sm:$0xff]  ;;  %v6332_v6 = vld [vmem:[%s11963_s3 + $0x60] sm:$0xff] }
  0xd0   :  { %12832 = vst [vmem:[#allocation59_spill] sm:$0xff] %v6275_v8  ;;  %12833 = vst [vmem:[#allocation93_spill] sm:$0xff] %v6279_v31  ;;  %v6301_v8 = vmul.f32 %v6297_v63, %v12825_v51  ;;  %v6305_v20 = vmul.f32 %v12825_v51, %v12840_v27  ;;  %v6323_v63 = vmul.f32 %v6319_v38, %v12825_v51  ;;  %v12846_v27 = vld [vmem:[#allocation144_spill] sm:$0xff]  ;;  %v12852_v45 = vld [vmem:[#allocation149_spill] sm:$0xff] }
  0xd1   :  { %12835 = vst [vmem:[#allocation64_spill] sm:$0xff] %v6283_v25  ;;  %12836 = vst [vmem:[#allocation65_spill] sm:$0xff] %v6288_v36  ;;  %v6314_v36 = vmul.f32 %v6310_v28, %v12825_v51  ;;  %v6327_v19 = vmul.f32 %v12825_v51, %v12846_v27  ;;  %v6336_v28 = vmul.f32 %v6332_v6, %v12825_v51  ;;  %v12856_v7 = vld [vmem:[#allocation100_spill] sm:$0xff]  ;;  %v12858_v13 = vld [vmem:[#allocation5_spill] sm:$0xff] }
  0xd2   :  { %12837 = vst [vmem:[#allocation94_spill] sm:$0xff] %v6292_v12  ;;  %12839 = vst [vmem:[#allocation71_spill] sm:$0xff] %v6301_v8  ;;  %v6348_v27 = vmul.f32 %v12825_v51, %v12854_v62  ;;  %v6352_v53 = vmul.f32 %v12825_v51, %v12856_v7  ;;  %v12860_v47 = vld [vmem:[#allocation101_spill] sm:$0xff]  ;;  %v12862_v0 = vld [vmem:[#allocation102_spill] sm:$0xff] }
  0xd3   :  { %12841 = vst [vmem:[#allocation95_spill] sm:$0xff] %v6305_v20  ;;  %12843 = vst [vmem:[#allocation73_spill] sm:$0xff] %v6314_v36  ;;  %v6360_v4 = vmul.f32 %v12825_v51, %v12860_v47  ;;  %v12864_v48 = vld [vmem:[#allocation83_spill] sm:$0xff]  ;;  %v12868_v39 = vld [vmem:[#allocation104_spill] sm:$0xff] }
  0xd4   :  { %12844 = vst [vmem:[#allocation96_spill] sm:$0xff] %v6319_v38  ;;  %12845 = vst [vmem:[#allocation97_spill] sm:$0xff] %v6323_v63  ;;  %v6344_v38 = vmul.f32 %v12825_v51, %v12852_v45  ;;  %v6364_v45 = vmul.f32 %v12825_v51, %v12862_v0  ;;  %v6368_v62 = vmul.f32 %v12825_v51, %v12864_v48  ;;  %v12866_v2 = vld [vmem:[#allocation103_spill] sm:$0xff]  ;;  %v12870_v55 = vld [vmem:[#allocation6_spill] sm:$0xff] }
  0xd5   :  { %12847 = vst [vmem:[#allocation43_spill] sm:$0xff] %v6327_v19  ;;  %12848 = vst [vmem:[#allocation44_spill] sm:$0xff] %v6332_v6  ;;  %v6356_v6 = vmul.f32 %v12825_v51, %v12858_v13  ;;  %v6372_v7 = vmul.f32 %v12825_v51, %v12866_v2  ;;  %v6376_v13 = vmul.f32 %v12825_v51, %v12868_v39  ;;  %v12872_v54 = vld [vmem:[#allocation105_spill] sm:$0xff]  ;;  %v12874_v17 = vld [vmem:[#allocation106_spill] sm:$0xff] }
  0xd6   :  { %12849 = vst [vmem:[#allocation45_spill] sm:$0xff] %v6336_v28  ;;  %12851 = vst [vmem:[#allocation46_spill] sm:$0xff] %v6340_v35  ;;  %v6380_v47 = vmul.f32 %v12825_v51, %v12870_v55  ;;  %v6384_v0 = vmul.f32 %v12825_v51, %v12872_v54  ;;  %v6388_v48 = vmul.f32 %v12825_v51, %v12874_v17  ;;  %v12876_v16 = vld [vmem:[#allocation7_spill] sm:$0xff]  ;;  %v6559_v35 = vld [vmem:[%s11963_s3 + $0x278] sm:$0xff] }
  0xd7   :  { %12853 = vst [vmem:[#allocation51_spill] sm:$0xff] %v6344_v38  ;;  %12855 = vst [vmem:[#allocation52_spill] sm:$0xff] %v6348_v27  ;;  %v6392_v2 = vmul.f32 %v12825_v51, %v12876_v16  ;;  %v6566_v28 = vld [vmem:[%s11963_s3 + $0x288] sm:$0xff]  ;;  %v6573_v19 = vld [vmem:[%s11963_s3 + $0x290] sm:$0xff] }
  0xd8   :  { %12857 = vst [vmem:[#allocation53_spill] sm:$0xff] %v6352_v53  ;;  %12859 = vst [vmem:[#allocation54_spill] sm:$0xff] %v6356_v6  ;;  %v6648_v18 = vld [vmem:[%s11963_s3 + $0x308] sm:$0xff]  ;;  %v6662_v10 = vld [vmem:[%s11963_s3 + $0x320] sm:$0xff] }
  0xd9   :  { %12861 = vst [vmem:[#allocation60_spill] sm:$0xff] %v6360_v4  ;;  %12863 = vst [vmem:[#allocation61_spill] sm:$0xff] %v6364_v45 }
  0xda   :  { %12865 = vst [vmem:[#allocation62_spill] sm:$0xff] %v6368_v62  ;;  %12867 = vst [vmem:[#allocation63_spill] sm:$0xff] %v6372_v7  ;;  %v12878_v7 = vld [vmem:[#allocation107_spill] sm:$0xff] }
  0xdb   :  { %12869 = vst [vmem:[#allocation67_spill] sm:$0xff] %v6376_v13  ;;  %12871 = vst [vmem:[#allocation68_spill] sm:$0xff] %v6380_v47  ;;  %v6396_v39 = vmul.f32 %v12825_v51, %v12878_v7  ;;  %v12880_v13 = vld [vmem:[#allocation108_spill] sm:$0xff] }
  0xdc   :  { %12873 = vst [vmem:[#allocation69_spill] sm:$0xff] %v6384_v0  ;;  %12875 = vst [vmem:[#allocation70_spill] sm:$0xff] %v6388_v48  ;;  %v6400_v55 = vmul.f32 %v12825_v51, %v12880_v13  ;;  %v12882_v47 = vld [vmem:[#allocation8_spill] sm:$0xff]  ;;  %v12884_v0 = vld [vmem:[#allocation109_spill] sm:$0xff] }
  0xdd   :  { %12877 = vst [vmem:[#allocation74_spill] sm:$0xff] %v6392_v2  ;;  %12879 = vst [vmem:[#allocation75_spill] sm:$0xff] %v6396_v39  ;;  %v6404_v54 = vmul.f32 %v12825_v51, %v12882_v47  ;;  %v6408_v17 = vmul.f32 %v12825_v51, %v12884_v0  ;;  %v12886_v48 = vld [vmem:[#allocation114_spill] sm:$0xff]  ;;  %v12890_v39 = vld [vmem:[#allocation115_spill] sm:$0xff] }
  0xde   :  { %12881 = vst [vmem:[#allocation76_spill] sm:$0xff] %v6400_v55  ;;  %v6412_v16 = vmul.f32 %v12825_v51, %v12886_v48  ;;  %v12888_v2 = vld [vmem:[#allocation10_spill] sm:$0xff]  ;;  %v6420_v13 = vmul.f32 %v12825_v51, %v12890_v39  ;;  %v12892_v55 = vld [vmem:[#allocation116_spill] sm:$0xff]  ;;  %12919 = vst [vmem:[#allocation128_spill] sm:$0xff] %v6559_v35 }
  0xdf   :  { %12883 = vst [vmem:[#allocation77_spill] sm:$0xff] %v6404_v54  ;;  %12885 = vst [vmem:[#allocation79_spill] sm:$0xff] %v6408_v17  ;;  %v6416_v7 = vmul.f32 %v12825_v51, %v12888_v2  ;;  %v6424_v47 = vmul.f32 %v12825_v51, %v12892_v55  ;;  %v12894_v54 = vld [vmem:[#allocation11_spill] sm:$0xff]  ;;  %v12896_v17 = vld [vmem:[#allocation122_spill] sm:$0xff] }
  0xe0   :  { %12887 = vst [vmem:[#allocation80_spill] sm:$0xff] %v6412_v16  ;;  %12891 = vst [vmem:[#allocation82_spill] sm:$0xff] %v6420_v13  ;;  %v6428_v0 = vmul.f32 %v12825_v51, %v12894_v54  ;;  %v6432_v48 = vmul.f32 %v12825_v51, %v12896_v17  ;;  %v12898_v16 = vld [vmem:[#allocation123_spill] sm:$0xff]  ;;  %v12902_v13 = vld [vmem:[#allocation124_spill] sm:$0xff] }
  0xe1   :  { %12889 = vst [vmem:[#allocation81_spill] sm:$0xff] %v6416_v7  ;;  %12893 = vst [vmem:[#allocation9_spill] sm:$0xff] %v6424_v47  ;;  %v6436_v2 = vmul.f32 %v12825_v51, %v12898_v16  ;;  %v12900_v7 = vld [vmem:[#allocation12_spill] sm:$0xff]  ;;  %v6444_v55 = vmul.f32 %v12825_v51, %v12902_v13  ;;  %v6449_v54 = vld [vmem:[%s11960_s0 + $0x3] ss:$0 sm:$0xff] }
  0xe2   :  { %12895 = vst [vmem:[#allocation110_spill] sm:$0xff] %v6428_v0  ;;  %12897 = vst [vmem:[#allocation151_spill] sm:$0xff] %v6432_v48  ;;  %v6440_v39 = vmul.f32 %v12825_v51, %v12900_v7  ;;  %v6456_v16 = vld [vmem:[%s11963_s3 + $0x1d0] sm:$0xff]  ;;  %v6463_v13 = vld [vmem:[%s11963_s3 + $0x1e0] sm:$0xff]  ;;  %v1285_v63 = vmul.f32 %v6573_v19, %v6449_v54  ;;  %v1297_v14 = vmul.f32 %v6662_v10, %v6449_v54 }
  0xe3   :  { %12899 = vst [vmem:[#allocation111_spill] sm:$0xff] %v6436_v2  ;;  %12903 = vst [vmem:[#allocation112_spill] sm:$0xff] %v6444_v55  ;;  %v1269_v7 = vmul.f32 %v6456_v16, %v6449_v54  ;;  %v1270_v55 = vmul.f32 %v6463_v13, %v6449_v54  ;;  %v6470_v17 = vld [vmem:[%s11963_s3 + $0x1e8] sm:$0xff]  ;;  %v6655_v51 = vld [vmem:[%s11963_s3 + $0x318] sm:$0xff] }
  0xe4   :  { %12901 = vst [vmem:[#allocation152_spill] sm:$0xff] %v6440_v39  ;;  %12904 = vst [vmem:[#allocation153_spill] sm:$0xff] %v6456_v16  ;;  %v1271_v48 = vmul.f32 %v6470_v17, %v6449_v54  ;;  %v6477_v16 = vld [vmem:[%s11963_s3 + $0x1f8] sm:$0xff] }
  0xe5   :  { %12905 = vst [vmem:[#allocation117_spill] sm:$0xff] %v6463_v13  ;;  %12906 = vst [vmem:[#allocation154_spill] sm:$0xff] %v6470_v17  ;;  %v1272_v39 = vmul.f32 %v6477_v16, %v6449_v54  ;;  %v6484_v13 = vld [vmem:[%s11963_s3 + $0x200] sm:$0xff]  ;;  %v6491_v17 = vld [vmem:[%s11963_s3 + $0x210] sm:$0xff]  ;;  %v6671_v42 = vadd.f32 %v1269_v7, %v6059_v58  ;;  %v6674_v34 = vadd.f32 %v1270_v55, %v6062_v40 }
  0xe6   :  { %12907 = vst [vmem:[#allocation118_spill] sm:$0xff] %v6477_v16  ;;  %12908 = vst [vmem:[#allocation155_spill] sm:$0xff] %v6484_v13  ;;  %v1273_v2 = vmul.f32 %v6484_v13, %v6449_v54  ;;  %v1274_v0 = vmul.f32 %v6491_v17, %v6449_v54  ;;  %v6498_v16 = vld [vmem:[%s11963_s3 + $0x218] sm:$0xff]  ;;  %v6505_v13 = vld [vmem:[%s11963_s3 + $0x228] sm:$0xff] }
  0xe7   :  { %12909 = vst [vmem:[#allocation119_spill] sm:$0xff] %v6491_v17  ;;  %12910 = vst [vmem:[#allocation156_spill] sm:$0xff] %v6498_v16  ;;  %v1275_v47 = vmul.f32 %v6498_v16, %v6449_v54  ;;  %v1276_v62 = vmul.f32 %v6505_v13, %v6449_v54  ;;  %v6512_v17 = vld [vmem:[%s11963_s3 + $0x230] sm:$0xff]  ;;  %v6519_v16 = vld [vmem:[%s11963_s3 + $0x240] sm:$0xff]  ;;  %v6680_v37 = vadd.f32 %v1272_v39, %v6068_v26 }
  0xe8   :  { %12911 = vst [vmem:[#allocation120_spill] sm:$0xff] %v6505_v13  ;;  %12912 = vst [vmem:[#allocation157_spill] sm:$0xff] %v6512_v17  ;;  %v1277_v45 = vmul.f32 %v6512_v17, %v6449_v54  ;;  %v1278_v4 = vmul.f32 %v6519_v16, %v6449_v54  ;;  %v6526_v13 = vld [vmem:[%s11963_s3 + $0x248] sm:$0xff]  ;;  %v6533_v17 = vld [vmem:[%s11963_s3 + $0x258] sm:$0xff] }
  0xe9   :  { %12913 = vst [vmem:[#allocation125_spill] sm:$0xff] %v6519_v16  ;;  %12914 = vst [vmem:[#allocation158_spill] sm:$0xff] %v6526_v13  ;;  %v1279_v6 = vmul.f32 %v6526_v13, %v6449_v54  ;;  %v1280_v53 = vmul.f32 %v6533_v17, %v6449_v54  ;;  %v6540_v16 = vld [vmem:[%s11963_s3 + $0x260] sm:$0xff]  ;;  %v6547_v13 = vld [vmem:[%s11963_s3 + $0x270] sm:$0xff]  ;;  %v6692_v58 = vadd.f32 %v1276_v62, %v6080_v41 }
  0xea   :  { %12915 = vst [vmem:[#allocation126_spill] sm:$0xff] %v6533_v17  ;;  %12916 = vst [vmem:[#allocation159_spill] sm:$0xff] %v6540_v16  ;;  %v1281_v27 = vmul.f32 %v6540_v16, %v6449_v54  ;;  %v1282_v38 = vmul.f32 %v6547_v13, %v6449_v54  ;;  %v6554_v17 = vld [vmem:[%s11963_s3 + $0x330] sm:$0xff]  ;;  %v1283_v16 = vmul.f32 %v6559_v35, %v6449_v54  ;;  %v6580_v35 = vld [vmem:[%s11963_s3 + $0x2a0] sm:$0xff] }
  0xeb   :  { %12917 = vst [vmem:[#allocation127_spill] sm:$0xff] %v6547_v13  ;;  %12918 = vst [vmem:[#allocation160_spill] sm:$0xff] %v6554_v17  ;;  %v1284_v13 = vmul.f32 %v6566_v28, %v6449_v54  ;;  %v1286_v36 = vmul.f32 %v6580_v35, %v6449_v54  ;;  %v1298_v9 = vmul.f32 %v6449_v54, %v6554_v17  ;;  %v12976_v39 = vld [vmem:[#allocation58_spill] sm:$0xff] }
  0xec   :  { %12920 = vst [vmem:[#allocation161_spill] sm:$0xff] %v6566_v28  ;;  %12921 = vst [vmem:[#allocation132_spill] sm:$0xff] %v6573_v19  ;;  %v6587_v28 = vld [vmem:[%s11963_s3 + $0x2a8] sm:$0xff]  ;;  %v6594_v19 = vld [vmem:[%s11963_s3 + $0x2b8] sm:$0xff]  ;;  %v6686_v17 = vadd.f32 %v1274_v0, %v6074_v46  ;;  %v6695_v40 = vadd.f32 %v1277_v45, %v6083_v3  ;;  %v6701_v26 = vadd.f32 %v1279_v6, %v6089_v60  ;;  %v948_v55 = vrot.slane %v12976_v39, 2 }
  0xed   :  { %12922 = vst [vmem:[#allocation162_spill] sm:$0xff] %v6580_v35  ;;  %12923 = vst [vmem:[#allocation133_spill] sm:$0xff] %v6587_v28  ;;  %v1287_v20 = vmul.f32 %v6587_v28, %v6449_v54  ;;  %v1288_v8 = vmul.f32 %v6594_v19, %v6449_v54  ;;  %v6601_v35 = vld [vmem:[%s11963_s3 + $0x2c0] sm:$0xff]  ;;  %v6608_v28 = vld [vmem:[%s11963_s3 + $0x2d0] sm:$0xff]  ;;  %v6707_v46 = vadd.f32 %v1281_v27, %v6095_v32 }
  0xee   :  { %12924 = vst [vmem:[#allocation163_spill] sm:$0xff] %v6594_v19  ;;  %12925 = vst [vmem:[#allocation134_spill] sm:$0xff] %v6601_v35  ;;  %v1289_v12 = vmul.f32 %v6601_v35, %v6449_v54  ;;  %v1290_v25 = vmul.f32 %v6608_v28, %v6449_v54  ;;  %v6615_v19 = vld [vmem:[%s11963_s3 + $0x2d8] sm:$0xff]  ;;  %v6622_v35 = vld [vmem:[%s11963_s3 + $0x2e8] sm:$0xff]  ;;  %v6713_v41 = vadd.f32 %v1283_v16, %v6101_v52 }
  0xef   :  { %12926 = vst [vmem:[#allocation164_spill] sm:$0xff] %v6608_v28  ;;  %12927 = vst [vmem:[#allocation135_spill] sm:$0xff] %v6615_v19  ;;  %v1291_v5 = vmul.f32 %v6615_v19, %v6449_v54  ;;  %v1292_v24 = vmul.f32 %v6622_v35, %v6449_v54  ;;  %v6629_v28 = vld [vmem:[%s11963_s3 + $0x2f0] sm:$0xff]  ;;  %v6636_v19 = vld [vmem:[%s11963_s3 + $0x300] sm:$0xff]  ;;  %v6716_v3 = vadd.f32 %v1284_v13, %v6104_v22 }
  0xf0   :  { %12928 = vst [vmem:[#allocation165_spill] sm:$0xff] %v6622_v35  ;;  %12929 = vst [vmem:[#allocation139_spill] sm:$0xff] %v6629_v28  ;;  %v1293_v31 = vmul.f32 %v6629_v28, %v6449_v54  ;;  %v1294_v44 = vmul.f32 %v6636_v19, %v6449_v54  ;;  %v6643_v35 = vld [vmem:[%s11963_s3 + $0x338] sm:$0xff]  ;;  %v1295_v28 = vmul.f32 %v6648_v18, %v6449_v54  ;;  %v12973_v45 = vld [vmem:[#allocation137_spill] sm:$0xff] }
  0xf1   :  { %12930 = vst [vmem:[#allocation166_spill] sm:$0xff] %v6636_v19  ;;  %12931 = vst [vmem:[#allocation140_spill] sm:$0xff] %v6643_v35  ;;  %v1296_v19 = vmul.f32 %v6655_v51, %v6449_v54  ;;  %v6722_v60 = vadd.f32 %v1286_v36, %v6110_v11  ;;  %v6728_v32 = vadd.f32 %v1288_v8, %v6116_v57  ;;  %v12955_v57 = vld [vmem:[#allocation16_spill] sm:$0xff]  ;;  %v12968_v8 = vld [vmem:[#allocation130_spill] sm:$0xff] }
  0xf2   :  { %12932 = vst [vmem:[#allocation167_spill] sm:$0xff] %v6648_v18  ;;  %12933 = vst [vmem:[#allocation141_spill] sm:$0xff] %v6655_v51  ;;  %v1299_v18 = vmul.f32 %v6449_v54, %v6643_v35  ;;  %v6677_v51 = vadd.f32 %v1271_v48, %v6065_v21  ;;  %v6689_v35 = vadd.f32 %v1275_v47, %v6077_v50  ;;  %v12972_v27 = vld [vmem:[#allocation136_spill] sm:$0xff]  ;;  %v12974_v47 = vld [vmem:[#allocation150_spill] sm:$0xff] }
  0xf3   :  { %12934 = vst [vmem:[#allocation168_spill] sm:$0xff] %v6662_v10  ;;  %v6683_v10 = vadd.f32 %v1273_v2, %v6071_v43  ;;  %12935 = vst [vmem:[#allocation142_spill] sm:$0xff] %v6692_v58  ;;  %v6698_v21 = vadd.f32 %v1278_v4, %v6086_v49  ;;  %v6704_v43 = vadd.f32 %v1280_v53, %v6092_v1  ;;  %v12975_v48 = vld [vmem:[#allocation138_spill] sm:$0xff]  ;;  %v12977_v16 = vld [vmem:[#allocation93_spill] sm:$0xff] }
  0xf4   :  { %12936 = vst [vmem:[#allocation169_spill] sm:$0xff] %v6695_v40  ;;  %12938 = vst [vmem:[#allocation170_spill] sm:$0xff] %v6701_v26  ;;  %v6710_v50 = vadd.f32 %v1282_v38, %v6098_v29  ;;  %v6719_v49 = vadd.f32 %v1285_v63, %v6107_v30  ;;  %v6725_v1 = vadd.f32 %v1287_v20, %v6113_v56  ;;  %v12953_v56 = vld [vmem:[#allocation47_spill] sm:$0xff]  ;;  %v949_v7 = vrot.slane %v12977_v16, 2  ;;  %v12978_v13 = vld [vmem:[#allocation50_spill] sm:$0xff] }
  0xf5   :  { %12937 = vst [vmem:[#allocation145_spill] sm:$0xff] %v6698_v21  ;;  %12939 = vst [vmem:[#allocation146_spill] sm:$0xff] %v6704_v43  ;;  %v6731_v29 = vadd.f32 %v1289_v12, %v6119_v23  ;;  %v6734_v52 = vadd.f32 %v1290_v25, %v6122_v59  ;;  %v6737_v22 = vadd.f32 %v1291_v5, %v6125_v61  ;;  %v12957_v23 = vld [vmem:[#allocation17_spill] sm:$0xff]  ;;  %v12959_v59 = vld [vmem:[#allocation55_spill] sm:$0xff] }
  0xf6   :  { %12940 = vst [vmem:[#allocation171_spill] sm:$0xff] %v6707_v46  ;;  %12941 = vst [vmem:[#allocation147_spill] sm:$0xff] %v6710_v50  ;;  %v6740_v30 = vadd.f32 %v1292_v24, %v6128_v33  ;;  %v6743_v11 = vadd.f32 %v1293_v31, %v6131_v15  ;;  %v6746_v53 = vadd.f32 %v1294_v44, %v12953_v56  ;;  %v12961_v61 = vld [vmem:[#allocation18_spill] sm:$0xff]  ;;  %v12963_v33 = vld [vmem:[#allocation19_spill] sm:$0xff]  ;;  %v12979_v56 = vrot.slane %v12978_v13, 2 }
  0xf7   :  { %12942 = vst [vmem:[#allocation172_spill] sm:$0xff] %v6713_v41  ;;  %12943 = vst [vmem:[#allocation148_spill] sm:$0xff] %v6716_v3  ;;  %v6749_v6 = vadd.f32 %v1295_v28, %v12955_v57  ;;  %v6752_v38 = vadd.f32 %v1296_v19, %v12957_v23  ;;  %v6755_v20 = vadd.f32 %v1297_v14, %v12959_v59  ;;  %v12965_v15 = vld [vmem:[#allocation129_spill] sm:$0xff]  ;;  %v12970_v25 = vld [vmem:[#allocation131_spill] sm:$0xff] }
  0xf8   :  { %12944 = vst [vmem:[#allocation85_spill] sm:$0xff] %v6719_v49  ;;  %12945 = vst [vmem:[#allocation113_spill] sm:$0xff] %v6722_v60  ;;  %v6758_v63 = vadd.f32 %v1298_v9, %v12961_v61  ;;  %v6761_v5 = vadd.f32 %v1299_v18, %v12963_v33  ;;  %v12966_v24 = vld [vmem:[#allocation173_spill] sm:$0xff]  ;;  %v12971_v18 = vld [vmem:[#allocation14_spill] sm:$0xff] }
  0xf9   :  { %12946 = vst [vmem:[#allocation121_spill] sm:$0xff] %v6725_v1  ;;  %12947 = vst [vmem:[#allocation143_spill] sm:$0xff] %v6728_v32  ;;  %v6765_v12 = vmul.f32 %v12966_v24, %v12965_v15  ;;  %v12967_v44 = vld [vmem:[#allocation13_spill] sm:$0xff]  ;;  %v6773_v19 = vmul.f32 %v12966_v24, %v12968_v8  ;;  %v6778_v9 = vmul.f32 %v12966_v24, %v12970_v25  ;;  %v12980_v57 = vld [vmem:[#allocation91_spill] sm:$0xff] }
  0xfa   :  { %12948 = vst [vmem:[#allocation144_spill] sm:$0xff] %v6731_v29  ;;  %12949 = vst [vmem:[#allocation98_spill] sm:$0xff] %v6734_v52  ;;  %v6769_v28 = vmul.f32 %v12966_v24, %v12967_v44  ;;  %v12969_v14 = vld [vmem:[#allocation57_spill] sm:$0xff]  ;;  %v6782_v36 = vmul.f32 %v12966_v24, %v12971_v18  ;;  %v6786_v4 = vmul.f32 %v12966_v24, %v12972_v27  ;;  %v12981_v23 = vrot.slane %v12980_v57, 2  ;;  %v12982_v61 = vld [vmem:[#allocation64_spill] sm:$0xff] }
  0xfb   :  { %12950 = vst [vmem:[#allocation149_spill] sm:$0xff] %v6737_v22  ;;  %12951 = vst [vmem:[#allocation99_spill] sm:$0xff] %v6740_v30  ;;  %v946_v31 = vrot.slane %v12969_v14, 2  ;;  %v6790_v62 = vmul.f32 %v12966_v24, %v12973_v45  ;;  %v6794_v0 = vmul.f32 %v12966_v24, %v12974_v47  ;;  %v6798_v2 = vmul.f32 %v12966_v24, %v12975_v48  ;;  %v12983_v15 = vld [vmem:[#allocation94_spill] sm:$0xff]  ;;  %v12984_v8 = vld [vmem:[#allocation71_spill] sm:$0xff] }
  0xfc   :  { %12952 = vst [vmem:[#allocation100_spill] sm:$0xff] %v6743_v11  ;;  %12954 = vst [vmem:[#allocation5_spill] sm:$0xff] %v6746_v53  ;;  %v6807_v59 = vsel %vm942_vm1, %v12981_v23, %v12979_v56  ;;  %v951_v33 = vrot.slane %v12982_v61, 2  ;;  %v953_v44 = vrot.slane %v12983_v15, 2  ;;  %v954_v14 = vrot.slane %v12984_v8, 2  ;;  %v12986_v18 = vld [vmem:[#allocation95_spill] sm:$0xff] }
  0xfd   :  { %12956 = vst [vmem:[#allocation101_spill] sm:$0xff] %v6749_v6  ;;  %12958 = vst [vmem:[#allocation102_spill] sm:$0xff] %v6752_v38  ;;  %v12985_v24 = vmov %v12979_v56  ;;  %v956_v27 = vrot.slane %v12986_v18, 2  ;;  %v12987_v45 = vld [vmem:[#allocation73_spill] sm:$0xff]  ;;  %v12989_v16 = vld [vmem:[#allocation43_spill] sm:$0xff] }
  0xfe   :  { %12960 = vst [vmem:[#allocation83_spill] sm:$0xff] %v6755_v20  ;;  %12962 = vst [vmem:[#allocation103_spill] sm:$0xff] %v6758_v63  ;;  %v6815_v25 = vsel %vm942_vm1, %v12985_v24, %v946_v31  ;;  %v958_v47 = vrot.slane %v12987_v45, 2  ;;  %v12988_v48 = vld [vmem:[#allocation97_spill] sm:$0xff]  ;;  %v961_v56 = vrot.slane %v12989_v16, 2  ;;  %v12991_v61 = vld [vmem:[#allocation46_spill] sm:$0xff] }
  0xff   :  { %12964 = vst [vmem:[#allocation104_spill] sm:$0xff] %v6761_v5  ;;  %v959_v39 = vrot.slane %v12988_v48, 2  ;;  %v12990_v57 = vld [vmem:[#allocation45_spill] sm:$0xff]  ;;  %v964_v5 = vrot.slane %v12991_v61, 2  ;;  %v12992_v15 = vld [vmem:[#allocation51_spill] sm:$0xff]  ;;  %v12993_v8 = vld [vmem:[#allocation52_spill] sm:$0xff]  ;;  %v950_v61 = vsel %vm942_vm1, %v948_v55, %v949_v7 }
 0x100   :  { %v963_v23 = vrot.slane %v12990_v57, 2  ;;  %v966_v63 = vrot.slane %v12992_v15, 2  ;;  %v968_v20 = vrot.slane %v12993_v8, 2  ;;  %v12994_v13 = vld [vmem:[#allocation53_spill] sm:$0xff]  ;;  %v12995_v31 = vld [vmem:[#allocation54_spill] sm:$0xff]  ;;  %v12996_v6 = vld [vmem:[#allocation60_spill] sm:$0xff] }
 0x101   :  { %v969_v38 = vrot.slane %v12994_v13, 2  ;;  %v971_v24 = vrot.slane %v12995_v31, 2  ;;  %v973_v18 = vrot.slane %v12996_v6, 2  ;;  %v12997_v53 = vld [vmem:[#allocation61_spill] sm:$0xff]  ;;  %v12998_v11 = vld [vmem:[#allocation62_spill] sm:$0xff]  ;;  %v12999_v30 = vld [vmem:[#allocation63_spill] sm:$0xff]  ;;  %v952_v31 = vsel %vm942_vm1, %v949_v7, %v951_v33 }
 0x102   :  { %v974_v45 = vrot.slane %v12997_v53, 2  ;;  %v976_v48 = vrot.slane %v12998_v11, 2  ;;  %v978_v16 = vrot.slane %v12999_v30, 2  ;;  %v13000_v22 = vld [vmem:[#allocation67_spill] sm:$0xff]  ;;  %v13001_v52 = vld [vmem:[#allocation68_spill] sm:$0xff]  ;;  %v13002_v29 = vld [vmem:[#allocation69_spill] sm:$0xff]  ;;  %v955_v6 = vsel %vm942_vm1, %v953_v44, %v954_v14 }
 0x103   :  { %v979_v57 = vrot.slane %v13000_v22, 2  ;;  %v981_v15 = vrot.slane %v13001_v52, 2  ;;  %v983_v8 = vrot.slane %v13002_v29, 2  ;;  %v13003_v32 = vld [vmem:[#allocation70_spill] sm:$0xff]  ;;  %v957_v53 = vsel %vm942_vm1, %v954_v14, %v956_v27  ;;  %v13008_v1 = vld [vmem:[#allocation79_spill] sm:$0xff]  ;;  %v13010_v60 = vld [vmem:[#allocation81_spill] sm:$0xff] }
 0x104   :  { %v984_v13 = vrot.slane %v13003_v32, 2  ;;  %v960_v11 = vsel %vm942_vm1, %v958_v47, %v959_v39  ;;  %v962_v30 = vsel %vm942_vm1, %v959_v39, %v961_v56  ;;  %v965_v22 = vsel %vm942_vm1, %v963_v23, %v964_v5  ;;  %v13004_v27 = vld [vmem:[#allocation74_spill] sm:$0xff]  ;;  %v13005_v39 = vld [vmem:[#allocation75_spill] sm:$0xff]  ;;  %v13006_v23 = vld [vmem:[#allocation76_spill] sm:$0xff] }
 0x105   :  { %v967_v55 = vsel %vm942_vm1, %v964_v5, %v966_v63  ;;  %v970_v52 = vsel %vm942_vm1, %v968_v20, %v969_v38  ;;  %v972_v29 = vsel %vm942_vm1, %v969_v38, %v971_v24  ;;  %v975_v32 = vsel %vm942_vm1, %v973_v18, %v974_v45  ;;  %v13007_v5 = vld [vmem:[#allocation77_spill] sm:$0xff]  ;;  %v13009_v24 = vld [vmem:[#allocation80_spill] sm:$0xff]  ;;  %v13014_v3 = vld [vmem:[#allocation151_spill] sm:$0xff] }
 0x106   :  { %v977_v7 = vsel %vm942_vm1, %v974_v45, %v976_v48  ;;  %v980_v33 = vsel %vm942_vm1, %v978_v16, %v979_v57  ;;  %v982_v44 = vsel %vm942_vm1, %v979_v57, %v981_v15  ;;  %v985_v14 = vsel %vm942_vm1, %v983_v8, %v984_v13  ;;  %v13011_v48 = vld [vmem:[#allocation82_spill] sm:$0xff]  ;;  %v13012_v49 = vld [vmem:[#allocation9_spill] sm:$0xff]  ;;  %v13015_v41 = vld [vmem:[#allocation111_spill] sm:$0xff] }
 0x107   :  { %v986_v47 = vrot.slane %v13004_v27, 2  ;;  %v988_v56 = vrot.slane %v13005_v39, 2  ;;  %v989_v63 = vrot.slane %v13006_v23, 2  ;;  %v991_v20 = vrot.slane %v13007_v5, 2  ;;  %v13013_v15 = vld [vmem:[#allocation110_spill] sm:$0xff]  ;;  %v13016_v50 = vld [vmem:[#allocation152_spill] sm:$0xff] }
 0x108   :  { %v993_v38 = vrot.slane %v13008_v1, 2  ;;  %v994_v18 = vrot.slane %v13009_v24, 2  ;;  %v996_v45 = vrot.slane %v13010_v60, 2  ;;  %v998_v16 = vrot.slane %v13011_v48, 2  ;;  %v13017_v46 = vld [vmem:[#allocation112_spill] sm:$0xff] }
 0x109   :  { %v999_v57 = vrot.slane %v13012_v49, 2  ;;  %v1001_v8 = vrot.slane %v13013_v15, 2  ;;  %v1003_v27 = vrot.slane %v13014_v3, 2  ;;  %v1004_v39 = vrot.slane %v13015_v41, 2 }
 0x10a   :  { %v1006_v23 = vrot.slane %v13016_v50, 2  ;;  %v1008_v5 = vrot.slane %v13017_v46, 2  ;;  %v1009_v1 = vrot.slane %v6765_v12, 2  ;;  %v1011_v24 = vrot.slane %v6769_v28, 2 }
 0x10b   :  { %v1013_v60 = vrot.slane %v6773_v19, 2  ;;  %v1014_v48 = vrot.slane %v6778_v9, 2  ;;  %v1016_v49 = vrot.slane %v6782_v36, 2  ;;  %v1018_v15 = vrot.slane %v6786_v4, 2 }
 0x10c   :  { %v1019_v3 = vrot.slane %v6790_v62, 2  ;;  %v1021_v41 = vrot.slane %v6794_v0, 2  ;;  %v987_v50 = vsel %vm942_vm1, %v984_v13, %v986_v47  ;;  %v990_v46 = vsel %vm942_vm1, %v988_v56, %v989_v63 }
 0x10d   :  { %v992_v12 = vsel %vm942_vm1, %v989_v63, %v991_v20  ;;  %v1023_v28 = vrot.slane %v6798_v2, 2  ;;  %v995_v19 = vsel %vm942_vm1, %v993_v38, %v994_v18  ;;  %v997_v9 = vsel %vm942_vm1, %v994_v18, %v996_v45  ;;  %v13018_v38 = vld [vmem:[#allocation15_spill] sm:$0xff] }
 0x10e   :  { %v1000_v36 = vsel %vm942_vm1, %v998_v16, %v999_v57  ;;  %v1002_v4 = vsel %vm942_vm1, %v999_v57, %v1001_v8  ;;  %v1005_v62 = vsel %vm942_vm1, %v1003_v27, %v1004_v39  ;;  %v1007_v0 = vsel %vm942_vm1, %v1004_v39, %v1006_v23  ;;  %v13020_v16 = vld [vmem:[#allocation22_spill] sm:$0xff]  ;;  %v13021_v8 = vld [vmem:[#allocation23_spill] sm:$0xff]  ;;  %v13022_v39 = vld [vmem:[#allocation24_spill] sm:$0xff] }
 0x10f   :  { %v1010_v13 = vsel %vm942_vm1, %v1008_v5, %v1009_v1  ;;  %v1012_v47 = vsel %vm942_vm1, %v1009_v1, %v1011_v24  ;;  %v1015_v56 = vsel %vm942_vm1, %v1013_v60, %v1014_v48  ;;  %v1017_v2 = vsel %vm942_vm1, %v1014_v48, %v1016_v49  ;;  %v13023_v5 = vld [vmem:[#allocation25_spill] sm:$0xff]  ;;  %v13025_v48 = vld [vmem:[#allocation30_spill] sm:$0xff] }
 0x110   :  { %v1020_v63 = vsel %vm942_vm1, %v1018_v15, %v1019_v3  ;;  %v1022_v20 = vsel %vm942_vm1, %v1019_v3, %v1021_v41  ;;  %v13019_v18 = vrot.slane %v13018_v38, 2  ;;  %v6893_v57 = vadd.f32 %v6807_v59, %v13020_v16  ;;  %v13024_v24 = vld [vmem:[#allocation29_spill] sm:$0xff]  ;;  %v13026_v15 = vld [vmem:[#allocation31_spill] sm:$0xff]  ;;  %v13027_v59 = vld [vmem:[#allocation32_spill] sm:$0xff] }
 0x111   :  { %v6897_v27 = vadd.f32 %v6815_v25, %v13021_v8  ;;  %v6900_v23 = vadd.f32 %v950_v61, %v13022_v39  ;;  %v6903_v1 = vadd.f32 %v952_v31, %v13023_v5  ;;  %v6906_v60 = vadd.f32 %v955_v6, %v13024_v24  ;;  %v13028_v25 = vld [vmem:[#allocation36_spill] sm:$0xff]  ;;  %v13033_v6 = vld [vmem:[#allocation21_spill] sm:$0xff] }
 0x112   :  { %v1025_v45 = vsel %vm942_vm1, %v1023_v28, %v13019_v18  ;;  %v6909_v49 = vadd.f32 %v957_v53, %v13025_v48  ;;  %v6912_v3 = vadd.f32 %v960_v11, %v13026_v15  ;;  %v6915_v41 = vadd.f32 %v962_v30, %v13027_v59  ;;  %v13029_v61 = vld [vmem:[#allocation56_spill] sm:$0xff]  ;;  %v13035_v53 = vld [vmem:[#allocation78_spill] sm:$0xff]  ;;  %v13039_v30 = vld [vmem:[#allocation27_spill] sm:$0xff] }
 0x113   :  { %v6918_v28 = vadd.f32 %v965_v22, %v13028_v25  ;;  %v6921_v38 = vadd.f32 %v967_v55, %v13029_v61  ;;  %v13031_v31 = vld [vmem:[#allocation20_spill] sm:$0xff]  ;;  %v6927_v16 = vadd.f32 %v972_v29, %v13033_v6  ;;  %v6930_v8 = vadd.f32 %v975_v32, %v13035_v53  ;;  %v13037_v11 = vld [vmem:[#allocation26_spill] sm:$0xff] }
 0x114   :  { %v6924_v18 = vadd.f32 %v970_v52, %v13031_v31  ;;  %v6933_v39 = vadd.f32 %v977_v7, %v13037_v11  ;;  %v6936_v5 = vadd.f32 %v980_v33, %v13039_v30  ;;  %v13041_v22 = vld [vmem:[#allocation84_spill] sm:$0xff]  ;;  %v13045_v52 = vld [vmem:[#allocation33_spill] sm:$0xff]  ;;  %v13047_v29 = vld [vmem:[#allocation86_spill] sm:$0xff] }
 0x115   :  { %13030 = vst [vmem:[#allocation6_spill] sm:$0xff] %v6921_v38  ;;  %13034 = vst [vmem:[#allocation106_spill] sm:$0xff] %v6927_v16  ;;  %v6939_v24 = vadd.f32 %v982_v44, %v13041_v22  ;;  %v13043_v55 = vld [vmem:[#allocation28_spill] sm:$0xff]  ;;  %v6945_v15 = vadd.f32 %v987_v50, %v13045_v52  ;;  %v6948_v59 = vadd.f32 %v990_v46, %v13047_v29  ;;  %v13049_v32 = vld [vmem:[#allocation34_spill] sm:$0xff] }
 0x116   :  { %13032 = vst [vmem:[#allocation105_spill] sm:$0xff] %v6924_v18  ;;  %13036 = vst [vmem:[#allocation7_spill] sm:$0xff] %v6930_v8  ;;  %v6942_v48 = vadd.f32 %v985_v14, %v13043_v55  ;;  %v6951_v25 = vadd.f32 %v992_v12, %v13049_v32  ;;  %v13051_v7 = vld [vmem:[#allocation35_spill] sm:$0xff]  ;;  %v13055_v44 = vld [vmem:[#allocation37_spill] sm:$0xff] }
 0x117   :  { %13038 = vst [vmem:[#allocation107_spill] sm:$0xff] %v6933_v39  ;;  %13040 = vst [vmem:[#allocation108_spill] sm:$0xff] %v6936_v5  ;;  %v6954_v61 = vadd.f32 %v995_v19, %v13051_v7  ;;  %v13053_v33 = vld [vmem:[#allocation87_spill] sm:$0xff]  ;;  %v6960_v6 = vadd.f32 %v1000_v36, %v13055_v44  ;;  %v13057_v14 = vld [vmem:[#allocation38_spill] sm:$0xff] }
 0x118   :  { %13042 = vst [vmem:[#allocation8_spill] sm:$0xff] %v6939_v24  ;;  %13044 = vst [vmem:[#allocation109_spill] sm:$0xff] %v6942_v48  ;;  %v6957_v31 = vadd.f32 %v997_v9, %v13053_v33  ;;  %v6963_v53 = vadd.f32 %v1002_v4, %v13057_v14  ;;  %v13059_v50 = vld [vmem:[#allocation88_spill] sm:$0xff]  ;;  %v13061_v46 = vld [vmem:[#allocation39_spill] sm:$0xff] }
 0x119   :  { %13046 = vst [vmem:[#allocation114_spill] sm:$0xff] %v6945_v15  ;;  %13048 = vst [vmem:[#allocation10_spill] sm:$0xff] %v6948_v59  ;;  %v6966_v11 = vadd.f32 %v1005_v62, %v13059_v50  ;;  %v6969_v30 = vadd.f32 %v1007_v0, %v13061_v46  ;;  %v13063_v12 = vld [vmem:[#allocation40_spill] sm:$0xff]  ;;  %v13065_v19 = vld [vmem:[#allocation89_spill] sm:$0xff] }
 0x11a   :  { %13050 = vst [vmem:[#allocation115_spill] sm:$0xff] %v6951_v25  ;;  %13052 = vst [vmem:[#allocation116_spill] sm:$0xff] %v6954_v61  ;;  %v6972_v22 = vadd.f32 %v1010_v13, %v13063_v12  ;;  %v6975_v55 = vadd.f32 %v1012_v47, %v13065_v19  ;;  %v13067_v9 = vld [vmem:[#allocation41_spill] sm:$0xff]  ;;  %v13069_v36 = vld [vmem:[#allocation42_spill] sm:$0xff] }
 0x11b   :  { %13054 = vst [vmem:[#allocation11_spill] sm:$0xff] %v6957_v31  ;;  %13056 = vst [vmem:[#allocation122_spill] sm:$0xff] %v6960_v6  ;;  %v6978_v52 = vadd.f32 %v1015_v56, %v13067_v9  ;;  %v6981_v29 = vadd.f32 %v1017_v2, %v13069_v36  ;;  %v13071_v4 = vld [vmem:[#allocation90_spill] sm:$0xff]  ;;  %v13073_v62 = vld [vmem:[#allocation48_spill] sm:$0xff] }
 0x11c   :  { %13058 = vst [vmem:[#allocation123_spill] sm:$0xff] %v6963_v53  ;;  %13060 = vst [vmem:[#allocation12_spill] sm:$0xff] %v6966_v11  ;;  %v6984_v32 = vadd.f32 %v1020_v63, %v13071_v4  ;;  %v6987_v7 = vadd.f32 %v1022_v20, %v13073_v62  ;;  %v13075_v0 = vld [vmem:[#allocation49_spill] sm:$0xff]  ;;  %v13077_v13 = vld [vmem:[#allocation92_spill] sm:$0xff] }
 0x11d   :  { %13062 = vst [vmem:[#allocation124_spill] sm:$0xff] %v6969_v30  ;;  %13064 = vst [vmem:[#allocation47_spill] sm:$0xff] %v6972_v22  ;;  %v6990_v33 = vadd.f32 %v1025_v45, %v13075_v0  ;;  %v1236_v44 = vmul.f32 %v13077_v13, %v6449_v54  ;;  %v13078_v47 = vld [vmem:[#allocation59_spill] sm:$0xff]  ;;  %v13079_v56 = vld [vmem:[#allocation65_spill] sm:$0xff] }
 0x11e   :  { %13066 = vst [vmem:[#allocation16_spill] sm:$0xff] %v6975_v55  ;;  %13068 = vst [vmem:[#allocation17_spill] sm:$0xff] %v6978_v52  ;;  %v1237_v14 = vmul.f32 %v13078_v47, %v6449_v54  ;;  %v1238_v50 = vmul.f32 %v13079_v56, %v6449_v54  ;;  %v13080_v2 = vld [vmem:[#allocation66_spill] sm:$0xff]  ;;  %v13081_v63 = vld [vmem:[#allocation72_spill] sm:$0xff] }
 0x11f   :  { %13070 = vst [vmem:[#allocation55_spill] sm:$0xff] %v6981_v29  ;;  %13072 = vst [vmem:[#allocation18_spill] sm:$0xff] %v6984_v32  ;;  %v1239_v46 = vmul.f32 %v13080_v2, %v6449_v54  ;;  %v1240_v12 = vmul.f32 %v13081_v63, %v6449_v54  ;;  %v13082_v20 = vld [vmem:[#allocation96_spill] sm:$0xff]  ;;  %v7009_v36 = vld [vmem:[%s11963_s3 + $0x68] sm:$0xff] }
 0x120   :  { %13074 = vst [vmem:[#allocation19_spill] sm:$0xff] %v6987_v7  ;;  %13076 = vst [vmem:[#allocation129_spill] sm:$0xff] %v6990_v33  ;;  %v1241_v19 = vmul.f32 %v13082_v20, %v6449_v54  ;;  %v13083_v45 = vld [vmem:[#allocation44_spill] sm:$0xff]  ;;  %v1243_v4 = vmul.f32 %v7009_v36, %v6449_v54  ;;  %v7109_v29 = vld [vmem:[%s11963_s3 + $0xf0] sm:$0xff] }
 0x121   :  { %v1242_v9 = vmul.f32 %v13083_v45, %v6449_v54  ;;  %13084 = vst [vmem:[#allocation173_spill] sm:$0xff] %v7009_v36  ;;  %v7016_v62 = vld [vmem:[%s11963_s3 + $0x78] sm:$0xff]  ;;  %v7023_v45 = vld [vmem:[%s11963_s3 + $0x80] sm:$0xff]  ;;  %v7032_v36 = vld [vmem:[%s11963_s3 + $0x90] sm:$0xff] }
 0x122   :  { %13085 = vst [vmem:[#allocation13_spill] sm:$0xff] %v7016_v62  ;;  %v1244_v0 = vmul.f32 %v7016_v62, %v6449_v54  ;;  %13086 = vst [vmem:[#allocation130_spill] sm:$0xff] %v7023_v45  ;;  %v7027_v20 = vmul.f32 %v7023_v45, %v6449_v54  ;;  %v7036_v63 = vmul.f32 %v7032_v36, %v6449_v54  ;;  %v7041_v62 = vld [vmem:[%s11963_s3 + $0x98] sm:$0xff]  ;;  %v7050_v45 = vld [vmem:[%s11963_s3 + $0xa8] sm:$0xff] }
 0x123   :  { %13088 = vst [vmem:[#allocation131_spill] sm:$0xff] %v7032_v36  ;;  %13090 = vst [vmem:[#allocation136_spill] sm:$0xff] %v7041_v62  ;;  %v7045_v2 = vmul.f32 %v7041_v62, %v6449_v54  ;;  %v7054_v56 = vmul.f32 %v7050_v45, %v6449_v54  ;;  %v7059_v36 = vld [vmem:[%s11963_s3 + $0xb0] sm:$0xff]  ;;  %v7068_v62 = vld [vmem:[%s11963_s3 + $0xc0] sm:$0xff] }
 0x124   :  { %13087 = vst [vmem:[#allocation57_spill] sm:$0xff] %v7027_v20  ;;  %13089 = vst [vmem:[#allocation14_spill] sm:$0xff] %v7036_v63  ;;  %v7063_v47 = vmul.f32 %v7059_v36, %v6449_v54  ;;  %v7072_v13 = vmul.f32 %v7068_v62, %v6449_v54  ;;  %v7118_v52 = vld [vmem:[%s11963_s3 + $0xf8] sm:$0xff]  ;;  %v7127_v55 = vld [vmem:[%s11963_s3 + $0x108] sm:$0xff] }
 0x125   :  { %13091 = vst [vmem:[#allocation137_spill] sm:$0xff] %v7045_v2  ;;  %13092 = vst [vmem:[#allocation150_spill] sm:$0xff] %v7050_v45  ;;  %v7077_v45 = vld [vmem:[%s11963_s3 + $0xc8] sm:$0xff]  ;;  %v7131_v22 = vmul.f32 %v7127_v55, %v6449_v54  ;;  %v13185_v8 = vld [vmem:[#allocation167_spill] sm:$0xff] }
 0x126   :  { %13093 = vst [vmem:[#allocation138_spill] sm:$0xff] %v7054_v56  ;;  %13094 = vst [vmem:[#allocation58_spill] sm:$0xff] %v7059_v36  ;;  %v7081_v33 = vmul.f32 %v7077_v45, %v6449_v54  ;;  %v7086_v36 = vld [vmem:[%s11963_s3 + $0xd8] sm:$0xff] }
 0x127   :  { %13095 = vst [vmem:[#allocation93_spill] sm:$0xff] %v7063_v47  ;;  %13096 = vst [vmem:[#allocation50_spill] sm:$0xff] %v7068_v62  ;;  %v7090_v7 = vmul.f32 %v7086_v36, %v6449_v54  ;;  %v7095_v62 = vld [vmem:[%s11963_s3 + $0xe0] sm:$0xff]  ;;  %v7484_v47 = vld [vmem:[%s11963_s3 + $0x2f8] sm:$0x3] }
 0x128   :  { %13097 = vst [vmem:[#allocation91_spill] sm:$0xff] %v7072_v13  ;;  %13098 = vst [vmem:[#allocation64_spill] sm:$0xff] %v7077_v45  ;;  %v7099_v32 = vmul.f32 %v7095_v62, %v6449_v54  ;;  %v7104_v45 = vld [vmem:[%s11963_s3 + $0x180] sm:$0xff]  ;;  %v13190_v20 = vld [vmem:[#allocation160_spill] sm:$0xff] }
 0x129   :  { %13099 = vst [vmem:[#allocation94_spill] sm:$0xff] %v7081_v33  ;;  %13100 = vst [vmem:[#allocation71_spill] sm:$0xff] %v7086_v36  ;;  %v7113_v36 = vmul.f32 %v7109_v29, %v6449_v54  ;;  %v13191_v38 = vld [vmem:[#allocation140_spill] sm:$0xff] }
 0x12a   :  { %13101 = vst [vmem:[#allocation95_spill] sm:$0xff] %v7090_v7  ;;  %13102 = vst [vmem:[#allocation73_spill] sm:$0xff] %v7095_v62  ;;  %v7122_v62 = vmul.f32 %v7118_v52, %v6449_v54 }
 0x12b   :  { %13103 = vst [vmem:[#allocation97_spill] sm:$0xff] %v7099_v32  ;;  %13104 = vst [vmem:[#allocation43_spill] sm:$0xff] %v7104_v45 }
 0x12c   :  { %13105 = vst [vmem:[#allocation45_spill] sm:$0xff] %v7109_v29  ;;  %13106 = vst [vmem:[#allocation46_spill] sm:$0xff] %v7113_v36  ;;  %v7136_v29 = vld [vmem:[%s11963_s3 + $0x110] sm:$0xff] }
 0x12d   :  { %13107 = vst [vmem:[#allocation51_spill] sm:$0xff] %v7118_v52  ;;  %13108 = vst [vmem:[#allocation52_spill] sm:$0xff] %v7122_v62  ;;  %v7140_v30 = vmul.f32 %v7136_v29, %v6449_v54  ;;  %v7145_v52 = vld [vmem:[%s11963_s3 + $0x120] sm:$0xff] }
 0x12e   :  { %13109 = vst [vmem:[#allocation53_spill] sm:$0xff] %v7127_v55  ;;  %13110 = vst [vmem:[#allocation54_spill] sm:$0xff] %v7131_v22  ;;  %v7149_v11 = vmul.f32 %v7145_v52, %v6449_v54  ;;  %v7154_v55 = vld [vmem:[%s11963_s3 + $0x128] sm:$0xff] }
 0x12f   :  { %13111 = vst [vmem:[#allocation60_spill] sm:$0xff] %v7136_v29  ;;  %13112 = vst [vmem:[#allocation61_spill] sm:$0xff] %v7140_v30  ;;  %v7158_v53 = vmul.f32 %v7154_v55, %v6449_v54  ;;  %v7163_v29 = vld [vmem:[%s11963_s3 + $0x138] sm:$0xff] }
 0x130   :  { %13113 = vst [vmem:[#allocation62_spill] sm:$0xff] %v7145_v52  ;;  %13114 = vst [vmem:[#allocation63_spill] sm:$0xff] %v7149_v11  ;;  %v7167_v6 = vmul.f32 %v7163_v29, %v6449_v54  ;;  %v7172_v52 = vld [vmem:[%s11963_s3 + $0x140] sm:$0xff] }
 0x131   :  { %13115 = vst [vmem:[#allocation67_spill] sm:$0xff] %v7154_v55  ;;  %13116 = vst [vmem:[#allocation68_spill] sm:$0xff] %v7158_v53  ;;  %v7176_v11 = vmul.f32 %v7172_v52, %v6449_v54  ;;  %v7181_v55 = vld [vmem:[%s11963_s3 + $0x188] sm:$0xff]  ;;  %v7186_v53 = vld [vmem:[%s11963_s3 + $0x150] sm:$0xff] }
 0x132   :  { %13117 = vst [vmem:[#allocation69_spill] sm:$0xff] %v7163_v29  ;;  %13118 = vst [vmem:[#allocation70_spill] sm:$0xff] %v7167_v6  ;;  %v7190_v29 = vmul.f32 %v7186_v53, %v6449_v54  ;;  %v7195_v6 = vld [vmem:[%s11963_s3 + $0x158] sm:$0xff] }
 0x133   :  { %13119 = vst [vmem:[#allocation74_spill] sm:$0xff] %v7172_v52  ;;  %13120 = vst [vmem:[#allocation75_spill] sm:$0xff] %v7176_v11  ;;  %v7199_v52 = vmul.f32 %v7195_v6, %v6449_v54  ;;  %v7204_v11 = vld [vmem:[%s11963_s3 + $0x168] sm:$0xff] }
 0x134   :  { %13121 = vst [vmem:[#allocation76_spill] sm:$0xff] %v7181_v55  ;;  %13122 = vst [vmem:[#allocation77_spill] sm:$0xff] %v7186_v53  ;;  %v7208_v30 = vmul.f32 %v7204_v11, %v6449_v54  ;;  %v7213_v53 = vld [vmem:[%s11963_s3 + $0x170] sm:$0xff] }
 0x135   :  { %13123 = vst [vmem:[#allocation79_spill] sm:$0xff] %v7190_v29  ;;  %13124 = vst [vmem:[#allocation80_spill] sm:$0xff] %v7195_v6  ;;  %v7217_v29 = vmul.f32 %v7213_v53, %v6449_v54  ;;  %v7221_v6 = vmul.f32 %v6449_v54, %v7104_v45  ;;  %v7243_v45 = vadd.f32 %v1238_v50, %v6900_v23  ;;  %v7266_v23 = vld [vmem:[%s11960_s0 + $0x4] ss:$0 sm:$0xff]  ;;  %v7292_v50 = vld [vmem:[%s11963_s3 + $0x1f0] sm:$0x3] }
 0x136   :  { %13125 = vst [vmem:[#allocation81_spill] sm:$0xff] %v7199_v52  ;;  %13126 = vst [vmem:[#allocation82_spill] sm:$0xff] %v7204_v11  ;;  %v7225_v52 = vmul.f32 %v6449_v54, %v7181_v55  ;;  %v7230_v11 = vld [vmem:[%s11963_s3 + $0x1c8] sm:$0xff]  ;;  %v7246_v55 = vadd.f32 %v1239_v46, %v6903_v1  ;;  %v13144_v1 = vld [vmem:[#allocation153_spill] sm:$0xff]  ;;  %v7296_v46 = vmul.f32 %v7292_v50, %v7266_v23 }
 0x137   :  { %13127 = vst [vmem:[#allocation9_spill] sm:$0xff] %v7208_v30  ;;  %13128 = vst [vmem:[#allocation110_spill] sm:$0xff] %v7213_v53  ;;  %v7234_v30 = vmul.f32 %v7230_v11, %v6449_v54  ;;  %v7237_v53 = vadd.f32 %v1236_v44, %v6893_v57  ;;  %v7255_v54 = vadd.f32 %v1242_v9, %v6912_v3  ;;  %v13148_v44 = vld [vmem:[#allocation154_spill] sm:$0xff]  ;;  %v13151_v9 = vld [vmem:[#allocation155_spill] sm:$0xff] }
 0x138   :  { %13129 = vst [vmem:[#allocation151_spill] sm:$0xff] %v7217_v29  ;;  %13130 = vst [vmem:[#allocation111_spill] sm:$0xff] %v7221_v6  ;;  %v7240_v29 = vadd.f32 %v1237_v14, %v6897_v27  ;;  %v7252_v6 = vadd.f32 %v1241_v19, %v6909_v49  ;;  %v7258_v57 = vadd.f32 %v1243_v4, %v6915_v41  ;;  %v7275_v49 = vld [vmem:[%s11963_s3 + $0x1d8] sm:$0x3]  ;;  %v13147_v41 = vld [vmem:[#allocation117_spill] sm:$0xff] }
 0x139   :  { %13131 = vst [vmem:[#allocation152_spill] sm:$0xff] %v7225_v52  ;;  %13132 = vst [vmem:[#allocation112_spill] sm:$0xff] %v7230_v11  ;;  %v7249_v52 = vadd.f32 %v1240_v12, %v6906_v60  ;;  %v7261_v27 = vadd.f32 %v1244_v0, %v6918_v28  ;;  %v7270_v60 = vmul.f32 %v13144_v1, %v7266_v23  ;;  %v13150_v12 = vld [vmem:[#allocation118_spill] sm:$0xff] }
 0x13a   :  { %13133 = vst [vmem:[#allocation15_spill] sm:$0xff] %v7234_v30  ;;  %13134 = vst [vmem:[#allocation22_spill] sm:$0xff] %v7237_v53  ;;  %v7279_v3 = vmul.f32 %v7275_v49, %v7266_v23  ;;  %v7283_v28 = vmul.f32 %v13147_v41, %v7266_v23  ;;  %v7287_v14 = vmul.f32 %v13148_v44, %v7266_v23  ;;  %v7309_v0 = vld [vmem:[%s11963_s3 + $0x208] sm:$0x3]  ;;  %v13153_v41 = vld [vmem:[#allocation119_spill] sm:$0xff] }
 0x13b   :  { %13135 = vst [vmem:[#allocation23_spill] sm:$0xff] %v7240_v29  ;;  %13136 = vst [vmem:[#allocation24_spill] sm:$0xff] %v7243_v45  ;;  %v7300_v19 = vmul.f32 %v13150_v12, %v7266_v23  ;;  %v7304_v4 = vmul.f32 %v13151_v9, %v7266_v23  ;;  %v7313_v1 = vmul.f32 %v7309_v0, %v7266_v23  ;;  %v13154_v12 = vld [vmem:[#allocation156_spill] sm:$0xff]  ;;  %v7326_v9 = vld [vmem:[%s11963_s3 + $0x220] sm:$0x3] }
 0x13c   :  { %13137 = vst [vmem:[#allocation25_spill] sm:$0xff] %v7246_v55  ;;  %13138 = vst [vmem:[#allocation29_spill] sm:$0xff] %v7249_v52  ;;  %v7317_v44 = vmul.f32 %v13153_v41, %v7266_v23  ;;  %v13157_v41 = vld [vmem:[#allocation157_spill] sm:$0xff]  ;;  %v1644_v56 = vrot.slane %v7279_v3, 1  ;;  %v7497_v2 = vmul.f32 %v13185_v8, %v7266_v23  ;;  %v7519_v8 = vld [vmem:[%s11963_s3 + $0x328] sm:$0x3] }
 0x13d   :  { %13139 = vst [vmem:[#allocation30_spill] sm:$0xff] %v7252_v6  ;;  %13140 = vst [vmem:[#allocation31_spill] sm:$0xff] %v7255_v54  ;;  %v7523_v18 = vmul.f32 %v7519_v8, %v7266_v23  ;;  %v1646_v26 = vrot.slane %v7283_v28, 1  ;;  %v1647_v21 = vrot.slane %v7287_v14, 1  ;;  %v1652_v40 = vrot.slane %v7304_v4, 1 }
 0x13e   :  { %13141 = vst [vmem:[#allocation32_spill] sm:$0xff] %v7258_v57  ;;  %13142 = vst [vmem:[#allocation36_spill] sm:$0xff] %v7261_v27  ;;  %v7338_v57 = vmul.f32 %v13157_v41, %v7266_v23  ;;  %v7360_v41 = vld [vmem:[%s11963_s3 + $0x250] sm:$0x3]  ;;  %v1654_v58 = vrot.slane %v7313_v1, 1 }
 0x13f   :  { %13143 = vst [vmem:[#allocation56_spill] sm:$0xff] %v7266_v23  ;;  %13145 = vst [vmem:[#allocation20_spill] sm:$0xff] %v7270_v60  ;;  %v7364_v55 = vmul.f32 %v7360_v41, %v7266_v23 }
 0x140   :  { %13146 = vst [vmem:[#allocation21_spill] sm:$0xff] %v7275_v49  ;;  %13149 = vst [vmem:[#allocation78_spill] sm:$0xff] %v7292_v50  ;;  %v7321_v50 = vmul.f32 %v13154_v12, %v7266_v23  ;;  %v7330_v49 = vmul.f32 %v7326_v9, %v7266_v23  ;;  %v7343_v12 = vld [vmem:[%s11963_s3 + $0x238] sm:$0x3] }
 0x141   :  { %13152 = vst [vmem:[#allocation26_spill] sm:$0xff] %v7309_v0  ;;  %13155 = vst [vmem:[#allocation27_spill] sm:$0xff] %v7326_v9  ;;  %v13156_v0 = vld [vmem:[#allocation120_spill] sm:$0xff]  ;;  %v7347_v54 = vmul.f32 %v7343_v12, %v7266_v23  ;;  %v13159_v9 = vld [vmem:[#allocation125_spill] sm:$0xff]  ;;  %v1669_v4 = vrot.slane %v7364_v55, 1  ;;  %v1655_v55 = vsel %vm456_vm0, %v1652_v40, %v1654_v58 }
 0x142   :  { %v7334_v27 = vmul.f32 %v13156_v0, %v7266_v23  ;;  %13158 = vst [vmem:[#allocation84_spill] sm:$0xff] %v7343_v12  ;;  %v7351_v6 = vmul.f32 %v13159_v9, %v7266_v23  ;;  %v13160_v0 = vld [vmem:[#allocation158_spill] sm:$0xff]  ;;  %13161 = vst [vmem:[#allocation28_spill] sm:$0xff] %v7360_v41  ;;  %v13163_v9 = vld [vmem:[#allocation159_spill] sm:$0xff]  ;;  %v1659_v28 = vrot.slane %v7330_v49, 1  ;;  %v1648_v49 = vsel %vm456_vm0, %v1646_v26, %v1647_v21 }
 0x143   :  { %v7355_v52 = vmul.f32 %v13160_v0, %v7266_v23  ;;  %v13162_v12 = vld [vmem:[#allocation126_spill] sm:$0xff]  ;;  %v7372_v29 = vmul.f32 %v13163_v9, %v7266_v23  ;;  %v13165_v41 = vld [vmem:[#allocation127_spill] sm:$0xff]  ;;  %v7394_v9 = vld [vmem:[%s11963_s3 + $0x280] sm:$0x3]  ;;  %13183 = vst [vmem:[#allocation88_spill] sm:$0xff] %v7484_v47 }
 0x144   :  { %v7368_v45 = vmul.f32 %v13162_v12, %v7266_v23  ;;  %v7377_v0 = vld [vmem:[%s11963_s3 + $0x268] sm:$0x3]  ;;  %v7385_v11 = vmul.f32 %v13165_v41, %v7266_v23  ;;  %v13166_v12 = vld [vmem:[#allocation128_spill] sm:$0xff]  ;;  %13167 = vst [vmem:[#allocation86_spill] sm:$0xff] %v7394_v9  ;;  %v7398_v31 = vmul.f32 %v7394_v9, %v7266_v23  ;;  %13189 = vst [vmem:[#allocation40_spill] sm:$0xff] %v7519_v8  ;;  %v1649_v8 = vrot.slane %v7296_v46, 1 }
 0x145   :  { %13164 = vst [vmem:[#allocation33_spill] sm:$0xff] %v7377_v0  ;;  %v7381_v53 = vmul.f32 %v7377_v0, %v7266_v23  ;;  %v7389_v30 = vmul.f32 %v13166_v12, %v7266_v23  ;;  %v13168_v0 = vld [vmem:[#allocation161_spill] sm:$0xff]  ;;  %v13169_v41 = vld [vmem:[#allocation132_spill] sm:$0xff]  ;;  %v13171_v9 = vld [vmem:[#allocation162_spill] sm:$0xff]  ;;  %v1661_v14 = vrot.slane %v7334_v27, 1  ;;  %v1662_v46 = vrot.slane %v7338_v57, 1 }
 0x146   :  { %v7402_v22 = vmul.f32 %v13168_v0, %v7266_v23  ;;  %v7406_v61 = vmul.f32 %v13169_v41, %v7266_v23  ;;  %v7411_v12 = vld [vmem:[%s11963_s3 + $0x298] sm:$0x3]  ;;  %v7419_v25 = vmul.f32 %v13171_v9, %v7266_v23  ;;  %v13172_v0 = vld [vmem:[#allocation133_spill] sm:$0xff]  ;;  %v7428_v41 = vld [vmem:[%s11963_s3 + $0x2b0] sm:$0x3]  ;;  %v1671_v1 = vrot.slane %v7368_v45, 1 }
 0x147   :  { %13170 = vst [vmem:[#allocation34_spill] sm:$0xff] %v7411_v12  ;;  %v7415_v62 = vmul.f32 %v7411_v12, %v7266_v23  ;;  %v7423_v36 = vmul.f32 %v13172_v0, %v7266_v23  ;;  %13173 = vst [vmem:[#allocation35_spill] sm:$0xff] %v7428_v41  ;;  %v7432_v59 = vmul.f32 %v7428_v41, %v7266_v23  ;;  %v13174_v12 = vld [vmem:[#allocation163_spill] sm:$0xff]  ;;  %v13175_v9 = vld [vmem:[#allocation134_spill] sm:$0xff]  ;;  %v1676_v27 = vrot.slane %v7385_v11, 1 }
 0x148   :  { %v7436_v32 = vmul.f32 %v13174_v12, %v7266_v23  ;;  %v7440_v15 = vmul.f32 %v13175_v9, %v7266_v23  ;;  %v7445_v0 = vld [vmem:[%s11963_s3 + $0x2c8] sm:$0x3]  ;;  %v13177_v41 = vld [vmem:[#allocation164_spill] sm:$0xff]  ;;  %v13178_v12 = vld [vmem:[#allocation135_spill] sm:$0xff]  ;;  %v1677_v57 = vrot.slane %v7389_v30, 1 }
 0x149   :  { %13176 = vst [vmem:[#allocation87_spill] sm:$0xff] %v7445_v0  ;;  %v7449_v7 = vmul.f32 %v7445_v0, %v7266_v23  ;;  %v7453_v48 = vmul.f32 %v13177_v41, %v7266_v23  ;;  %v7457_v33 = vmul.f32 %v13178_v12, %v7266_v23  ;;  %v7462_v9 = vld [vmem:[%s11963_s3 + $0x2e0] sm:$0x3]  ;;  %v13182_v12 = vld [vmem:[#allocation139_spill] sm:$0xff] }
 0x14a   :  { %13179 = vst [vmem:[#allocation37_spill] sm:$0xff] %v7462_v9  ;;  %v7466_v24 = vmul.f32 %v7462_v9, %v7266_v23  ;;  %v13180_v0 = vld [vmem:[#allocation165_spill] sm:$0xff]  ;;  %v7479_v5 = vmul.f32 %v13182_v12, %v7266_v23  ;;  %v7488_v9 = vmul.f32 %v7484_v47, %v7266_v23  ;;  %v7502_v12 = vld [vmem:[%s11963_s3 + $0x310] sm:$0x3]  ;;  %v1678_v58 = vsel %vm456_vm0, %v1676_v27, %v1677_v57 }
 0x14b   :  { %v7470_v13 = vmul.f32 %v13180_v0, %v7266_v23  ;;  %v7475_v41 = vld [vmem:[%s11963_s3 + $0x340] sm:$0x3]  ;;  %v13184_v0 = vld [vmem:[#allocation166_spill] sm:$0xff]  ;;  %13186 = vst [vmem:[#allocation39_spill] sm:$0xff] %v7502_v12  ;;  %v7506_v16 = vmul.f32 %v7502_v12, %v7266_v23  ;;  %v7527_v12 = vmul.f32 %v7266_v23, %v13190_v20 }
 0x14c   :  { %13181 = vst [vmem:[#allocation38_spill] sm:$0xff] %v7475_v41  ;;  %v7492_v39 = vmul.f32 %v13184_v0, %v7266_v23  ;;  %v13187_v47 = vld [vmem:[#allocation141_spill] sm:$0xff]  ;;  %v13188_v0 = vld [vmem:[#allocation168_spill] sm:$0xff]  ;;  %v7536_v43 = vmul.f32 %v7266_v23, %v7475_v41  ;;  %v1656_v41 = vrot.slane %v7317_v44, 1  ;;  %v1672_v44 = vrot.slane %v7372_v29, 1 }
 0x14d   :  { %v7510_v63 = vmul.f32 %v13187_v47, %v7266_v23  ;;  %v7514_v3 = vmul.f32 %v13188_v0, %v7266_v23  ;;  %v7531_v47 = vmul.f32 %v7266_v23, %v13191_v38  ;;  %v12165_v0 = vrot.slane %v7270_v60, 1 }
 0x14e   :  { %v1651_v38 = vrot.slane %v7300_v19, 1  ;;  %v1657_v23 = vrot.slane %v7321_v50, 1  ;;  %v1664_v60 = vrot.slane %v7347_v54, 1  ;;  %v1667_v19 = vrot.slane %v7355_v52, 1 }
 0x14f   :  { %v7544_v20 = vsel %vm456_vm0, %v12165_v0, %v1644_v56  ;;  %v1666_v56 = vrot.slane %v7351_v6, 1  ;;  %v1674_v50 = vrot.slane %v7381_v53, 1  ;;  %v1679_v54 = vrot.slane %v7398_v31, 1  ;;  %v13305_v0 = vld [vmem:[#allocation111_spill] sm:$0xff] }
 0x150   :  { %v1650_v6 = vsel %vm456_vm0, %v1647_v21, %v1649_v8  ;;  %v1653_v52 = vsel %vm456_vm0, %v1651_v38, %v1652_v40  ;;  %v1658_v45 = vsel %vm456_vm0, %v1656_v41, %v1657_v23  ;;  %v1660_v29 = vsel %vm456_vm0, %v1657_v23, %v1659_v28 }
 0x151   :  { %v1663_v53 = vsel %vm456_vm0, %v1661_v14, %v1662_v46  ;;  %v1665_v26 = vsel %vm456_vm0, %v1662_v46, %v1664_v60  ;;  %v1668_v11 = vsel %vm456_vm0, %v1666_v56, %v1667_v19  ;;  %v1670_v30 = vsel %vm456_vm0, %v1667_v19, %v1669_v4 }
 0x152   :  { %v1673_v31 = vsel %vm456_vm0, %v1671_v1, %v1672_v44  ;;  %v1675_v21 = vsel %vm456_vm0, %v1672_v44, %v1674_v50  ;;  %v1681_v8 = vrot.slane %v7402_v22, 1  ;;  %v1680_v40 = vsel %vm456_vm0, %v1677_v57, %v1679_v54 }
 0x153   :  { %v1682_v23 = vrot.slane %v7406_v61, 1  ;;  %v1684_v41 = vrot.slane %v7415_v62, 1  ;;  %v1686_v60 = vrot.slane %v7419_v25, 1  ;;  %v1687_v38 = vrot.slane %v7423_v36, 1 }
 0x154   :  { %v1689_v28 = vrot.slane %v7432_v59, 1  ;;  %v1691_v14 = vrot.slane %v7436_v32, 1  ;;  %v1692_v46 = vrot.slane %v7440_v15, 1  ;;  %v1694_v22 = vrot.slane %v7449_v7, 1 }
 0x155   :  { %v1696_v56 = vrot.slane %v7453_v48, 1  ;;  %v1697_v19 = vrot.slane %v7457_v33, 1  ;;  %v1699_v61 = vrot.slane %v7466_v24, 1  ;;  %v1701_v62 = vrot.slane %v7470_v13, 1 }
 0x156   :  { %v1702_v25 = vrot.slane %v7479_v5, 1  ;;  %v1704_v36 = vrot.slane %v7488_v9, 1  ;;  %v1706_v59 = vrot.slane %v7492_v39, 1  ;;  %v1707_v32 = vrot.slane %v7497_v2, 1 }
 0x157   :  { %v1709_v15 = vrot.slane %v7506_v16, 1  ;;  %v1711_v7 = vrot.slane %v7510_v63, 1  ;;  %v1712_v48 = vrot.slane %v7514_v3, 1  ;;  %v1714_v33 = vrot.slane %v7523_v18, 1 }
 0x158   :  { %v1716_v24 = vrot.slane %v7527_v12, 1  ;;  %v1717_v13 = vrot.slane %v7531_v47, 1  ;;  %v1683_v5 = vsel %vm456_vm0, %v1681_v8, %v1682_v23  ;;  %v1685_v9 = vsel %vm456_vm0, %v1682_v23, %v1684_v41 }
 0x159   :  { %v1688_v39 = vsel %vm456_vm0, %v1686_v60, %v1687_v38  ;;  %v1719_v2 = vrot.slane %v7536_v43, 1  ;;  %v1690_v16 = vsel %vm456_vm0, %v1687_v38, %v1689_v28  ;;  %v1693_v63 = vsel %vm456_vm0, %v1691_v14, %v1692_v46 }
 0x15a   :  { %v1695_v3 = vsel %vm456_vm0, %v1692_v46, %v1694_v22  ;;  %v1698_v18 = vsel %vm456_vm0, %v1696_v56, %v1697_v19  ;;  %v1700_v12 = vsel %vm456_vm0, %v1697_v19, %v1699_v61  ;;  %v1703_v47 = vsel %vm456_vm0, %v1701_v62, %v1702_v25 }
 0x15b   :  { %v1705_v4 = vsel %vm456_vm0, %v1702_v25, %v1704_v36  ;;  %v1708_v1 = vsel %vm456_vm0, %v1706_v59, %v1707_v32  ;;  %v1710_v44 = vsel %vm456_vm0, %v1707_v32, %v1709_v15  ;;  %v1713_v43 = vsel %vm456_vm0, %v1711_v7, %v1712_v48  ;;  %v13223_v36 = vld [vmem:[#allocation149_spill] sm:$0xff]  ;;  %v13225_v32 = vld [vmem:[#allocation99_spill] sm:$0xff]  ;;  %v13227_v7 = vld [vmem:[#allocation100_spill] sm:$0xff] }
 0x15c   :  { %v1715_v50 = vsel %vm456_vm0, %v1712_v48, %v1714_v33  ;;  %v1718_v27 = vsel %vm456_vm0, %v1716_v24, %v1717_v13  ;;  %v1720_v57 = vsel %vm456_vm0, %v1717_v13, %v1719_v2  ;;  %v7620_v54 = vadd.f32 %v7544_v20, %v6671_v42  ;;  %v13193_v42 = vld [vmem:[#allocation142_spill] sm:$0xff]  ;;  %v13229_v33 = vld [vmem:[#allocation5_spill] sm:$0xff]  ;;  %v13235_v2 = vld [vmem:[#allocation83_spill] sm:$0xff] }
 0x15d   :  { %v7623_v8 = vadd.f32 %v1648_v49, %v6674_v34  ;;  %v7626_v23 = vadd.f32 %v1650_v6, %v6677_v51  ;;  %v7629_v41 = vadd.f32 %v1653_v52, %v6680_v37  ;;  %v7632_v60 = vadd.f32 %v1655_v55, %v6683_v10  ;;  %v13195_v34 = vld [vmem:[#allocation169_spill] sm:$0xff]  ;;  %v13199_v37 = vld [vmem:[#allocation170_spill] sm:$0xff] }
 0x15e   :  { %v7635_v38 = vadd.f32 %v1658_v45, %v6686_v17  ;;  %v7638_v28 = vadd.f32 %v1660_v29, %v6689_v35  ;;  %v7641_v20 = vadd.f32 %v1663_v53, %v13193_v42  ;;  %v7644_v49 = vadd.f32 %v1665_v26, %v13195_v34  ;;  %v13197_v51 = vld [vmem:[#allocation145_spill] sm:$0xff]  ;;  %v13201_v10 = vld [vmem:[#allocation146_spill] sm:$0xff]  ;;  %v13203_v17 = vld [vmem:[#allocation171_spill] sm:$0xff] }
 0x15f   :  { %v7647_v6 = vadd.f32 %v1668_v11, %v13197_v51  ;;  %v7650_v52 = vadd.f32 %v1670_v30, %v13199_v37  ;;  %v7653_v55 = vadd.f32 %v1673_v31, %v13201_v10  ;;  %v7656_v45 = vadd.f32 %v1675_v21, %v13203_v17  ;;  %v13205_v35 = vld [vmem:[#allocation147_spill] sm:$0xff]  ;;  %v13207_v53 = vld [vmem:[#allocation172_spill] sm:$0xff]  ;;  %v13211_v11 = vld [vmem:[#allocation85_spill] sm:$0xff] }
 0x160   :  { %13192 = vst [vmem:[#allocation89_spill] sm:$0xff] %v7638_v28  ;;  %13194 = vst [vmem:[#allocation41_spill] sm:$0xff] %v7641_v20  ;;  %v7659_v29 = vadd.f32 %v1678_v58, %v13205_v35  ;;  %v7662_v14 = vadd.f32 %v1680_v40, %v13207_v53  ;;  %v13209_v26 = vld [vmem:[#allocation148_spill] sm:$0xff]  ;;  %v7668_v22 = vadd.f32 %v1685_v9, %v13211_v11  ;;  %v13213_v30 = vld [vmem:[#allocation113_spill] sm:$0xff] }
 0x161   :  { %13196 = vst [vmem:[#allocation42_spill] sm:$0xff] %v7644_v49  ;;  %13198 = vst [vmem:[#allocation90_spill] sm:$0xff] %v7647_v6  ;;  %v7665_v46 = vadd.f32 %v1683_v5, %v13209_v26  ;;  %v7671_v56 = vadd.f32 %v1688_v39, %v13213_v30  ;;  %v13215_v31 = vld [vmem:[#allocation121_spill] sm:$0xff]  ;;  %v13217_v21 = vld [vmem:[#allocation143_spill] sm:$0xff]  ;;  %v7686_v59 = vadd.f32 %v1700_v12, %v13223_v36 }
 0x162   :  { %13200 = vst [vmem:[#allocation48_spill] sm:$0xff] %v7650_v52  ;;  %13202 = vst [vmem:[#allocation49_spill] sm:$0xff] %v7653_v55  ;;  %v7674_v19 = vadd.f32 %v1690_v16, %v13215_v31  ;;  %v7677_v61 = vadd.f32 %v1693_v63, %v13217_v21  ;;  %v13219_v58 = vld [vmem:[#allocation144_spill] sm:$0xff]  ;;  %v13221_v40 = vld [vmem:[#allocation98_spill] sm:$0xff]  ;;  %v7689_v15 = vadd.f32 %v1703_v47, %v13225_v32 }
 0x163   :  { %13204 = vst [vmem:[#allocation153_spill] sm:$0xff] %v7656_v45  ;;  %13206 = vst [vmem:[#allocation117_spill] sm:$0xff] %v7659_v29  ;;  %v7680_v62 = vadd.f32 %v1695_v3, %v13219_v58  ;;  %v7683_v25 = vadd.f32 %v1698_v18, %v13221_v40  ;;  %v7692_v48 = vadd.f32 %v1705_v4, %v13227_v7  ;;  %v13231_v13 = vld [vmem:[#allocation101_spill] sm:$0xff]  ;;  %v13233_v9 = vld [vmem:[#allocation102_spill] sm:$0xff] }
 0x164   :  { %13208 = vst [vmem:[#allocation154_spill] sm:$0xff] %v7662_v14  ;;  %13210 = vst [vmem:[#allocation118_spill] sm:$0xff] %v7665_v46  ;;  %v7695_v24 = vadd.f32 %v1708_v1, %v13229_v33  ;;  %v7698_v5 = vadd.f32 %v1710_v44, %v13231_v13  ;;  %v7701_v39 = vadd.f32 %v1713_v43, %v13233_v9  ;;  %v13237_v63 = vld [vmem:[#allocation103_spill] sm:$0xff]  ;;  %v13239_v18 = vld [vmem:[#allocation104_spill] sm:$0xff] }
 0x165   :  { %13212 = vst [vmem:[#allocation155_spill] sm:$0xff] %v7668_v22  ;;  %13214 = vst [vmem:[#allocation119_spill] sm:$0xff] %v7671_v56  ;;  %v7704_v16 = vadd.f32 %v1715_v50, %v13235_v2  ;;  %v7707_v3 = vadd.f32 %v1718_v27, %v13237_v63  ;;  %v7710_v12 = vadd.f32 %v1720_v57, %v13239_v18  ;;  %v13241_v47 = vld [vmem:[#allocation6_spill] sm:$0xff]  ;;  %v13242_v4 = vld [vmem:[#allocation57_spill] sm:$0xff] }
 0x166   :  { %13216 = vst [vmem:[#allocation156_spill] sm:$0xff] %v7674_v19  ;;  %13218 = vst [vmem:[#allocation120_spill] sm:$0xff] %v7677_v61  ;;  %v7714_v42 = vadd.f32 %v13242_v4, %v13241_v47  ;;  %v13244_v1 = vld [vmem:[#allocation105_spill] sm:$0xff]  ;;  %v13245_v34 = vld [vmem:[#allocation14_spill] sm:$0xff] }
 0x167   :  { %13220 = vst [vmem:[#allocation157_spill] sm:$0xff] %v7680_v62  ;;  %13222 = vst [vmem:[#allocation125_spill] sm:$0xff] %v7683_v25  ;;  %v7718_v44 = vadd.f32 %v13245_v34, %v13244_v1  ;;  %v13247_v51 = vld [vmem:[#allocation106_spill] sm:$0xff]  ;;  %v13248_v43 = vld [vmem:[#allocation137_spill] sm:$0xff] }
 0x168   :  { %13224 = vst [vmem:[#allocation158_spill] sm:$0xff] %v7686_v59  ;;  %13226 = vst [vmem:[#allocation126_spill] sm:$0xff] %v7689_v15  ;;  %v7722_v37 = vadd.f32 %v13248_v43, %v13247_v51  ;;  %v13250_v50 = vld [vmem:[#allocation7_spill] sm:$0xff]  ;;  %v13251_v10 = vld [vmem:[#allocation138_spill] sm:$0xff] }
 0x169   :  { %13228 = vst [vmem:[#allocation159_spill] sm:$0xff] %v7692_v48  ;;  %13230 = vst [vmem:[#allocation127_spill] sm:$0xff] %v7695_v24  ;;  %v7726_v17 = vadd.f32 %v13251_v10, %v13250_v50  ;;  %v13253_v27 = vld [vmem:[#allocation107_spill] sm:$0xff]  ;;  %v13254_v35 = vld [vmem:[#allocation93_spill] sm:$0xff] }
 0x16a   :  { %13232 = vst [vmem:[#allocation128_spill] sm:$0xff] %v7698_v5  ;;  %13234 = vst [vmem:[#allocation161_spill] sm:$0xff] %v7701_v39  ;;  %v7730_v57 = vadd.f32 %v13254_v35, %v13253_v27  ;;  %v13256_v53 = vld [vmem:[#allocation108_spill] sm:$0xff]  ;;  %v13257_v26 = vld [vmem:[#allocation91_spill] sm:$0xff] }
 0x16b   :  { %13236 = vst [vmem:[#allocation132_spill] sm:$0xff] %v7704_v16  ;;  %13238 = vst [vmem:[#allocation162_spill] sm:$0xff] %v7707_v3  ;;  %v7734_v11 = vadd.f32 %v13257_v26, %v13256_v53  ;;  %v13259_v30 = vld [vmem:[#allocation8_spill] sm:$0xff]  ;;  %v13260_v31 = vld [vmem:[#allocation94_spill] sm:$0xff] }
 0x16c   :  { %13240 = vst [vmem:[#allocation133_spill] sm:$0xff] %v7710_v12  ;;  %13243 = vst [vmem:[#allocation163_spill] sm:$0xff] %v7714_v42  ;;  %v7738_v21 = vadd.f32 %v13260_v31, %v13259_v30  ;;  %v13262_v58 = vld [vmem:[#allocation109_spill] sm:$0xff]  ;;  %v13263_v40 = vld [vmem:[#allocation95_spill] sm:$0xff] }
 0x16d   :  { %13246 = vst [vmem:[#allocation134_spill] sm:$0xff] %v7718_v44  ;;  %13249 = vst [vmem:[#allocation164_spill] sm:$0xff] %v7722_v37  ;;  %v7742_v36 = vadd.f32 %v13263_v40, %v13262_v58  ;;  %v13265_v32 = vld [vmem:[#allocation114_spill] sm:$0xff]  ;;  %v13266_v7 = vld [vmem:[#allocation97_spill] sm:$0xff] }
 0x16e   :  { %13252 = vst [vmem:[#allocation135_spill] sm:$0xff] %v7726_v17  ;;  %13255 = vst [vmem:[#allocation165_spill] sm:$0xff] %v7730_v57  ;;  %v7746_v33 = vadd.f32 %v13266_v7, %v13265_v32  ;;  %v13268_v13 = vld [vmem:[#allocation10_spill] sm:$0xff]  ;;  %v13271_v63 = vld [vmem:[#allocation115_spill] sm:$0xff] }
 0x16f   :  { %13258 = vst [vmem:[#allocation139_spill] sm:$0xff] %v7734_v11  ;;  %13261 = vst [vmem:[#allocation166_spill] sm:$0xff] %v7738_v21  ;;  %v13269_v9 = vld [vmem:[#allocation46_spill] sm:$0xff]  ;;  %v13272_v18 = vld [vmem:[#allocation52_spill] sm:$0xff] }
 0x170   :  { %13264 = vst [vmem:[#allocation167_spill] sm:$0xff] %v7742_v36  ;;  %13267 = vst [vmem:[#allocation141_spill] sm:$0xff] %v7746_v33  ;;  %v7750_v2 = vadd.f32 %v13269_v9, %v13268_v13  ;;  %v7754_v47 = vadd.f32 %v13272_v18, %v13271_v63  ;;  %v13274_v4 = vld [vmem:[#allocation116_spill] sm:$0xff]  ;;  %v13275_v1 = vld [vmem:[#allocation54_spill] sm:$0xff] }
 0x171   :  { %v7758_v34 = vadd.f32 %v13275_v1, %v13274_v4  ;;  %v13277_v51 = vld [vmem:[#allocation11_spill] sm:$0xff]  ;;  %v13278_v43 = vld [vmem:[#allocation61_spill] sm:$0xff]  ;;  %v13280_v10 = vld [vmem:[#allocation122_spill] sm:$0xff] }
 0x172   :  { %13270 = vst [vmem:[#allocation168_spill] sm:$0xff] %v7750_v2  ;;  %13273 = vst [vmem:[#allocation160_spill] sm:$0xff] %v7754_v47  ;;  %v7762_v50 = vadd.f32 %v13278_v43, %v13277_v51  ;;  %v13281_v27 = vld [vmem:[#allocation63_spill] sm:$0xff]  ;;  %v13284_v26 = vld [vmem:[#allocation68_spill] sm:$0xff] }
 0x173   :  { %13276 = vst [vmem:[#allocation140_spill] sm:$0xff] %v7758_v34  ;;  %v7766_v35 = vadd.f32 %v13281_v27, %v13280_v10  ;;  %v13283_v53 = vld [vmem:[#allocation123_spill] sm:$0xff]  ;;  %v13286_v31 = vld [vmem:[#allocation12_spill] sm:$0xff]  ;;  %v13287_v58 = vld [vmem:[#allocation70_spill] sm:$0xff] }
 0x174   :  { %13279 = vst [vmem:[#allocation142_spill] sm:$0xff] %v7762_v50  ;;  %v7770_v30 = vadd.f32 %v13284_v26, %v13283_v53  ;;  %v7774_v40 = vadd.f32 %v13287_v58, %v13286_v31  ;;  %v13289_v32 = vld [vmem:[#allocation124_spill] sm:$0xff]  ;;  %v13290_v7 = vld [vmem:[#allocation75_spill] sm:$0xff]  ;;  %v13296_v1 = vld [vmem:[#allocation81_spill] sm:$0xff] }
 0x175   :  { %13282 = vst [vmem:[#allocation169_spill] sm:$0xff] %v7766_v35  ;;  %v7778_v13 = vadd.f32 %v13290_v7, %v13289_v32  ;;  %v13292_v9 = vld [vmem:[#allocation47_spill] sm:$0xff]  ;;  %v13295_v4 = vld [vmem:[#allocation16_spill] sm:$0xff]  ;;  %v13298_v43 = vld [vmem:[#allocation17_spill] sm:$0xff] }
 0x176   :  { %13285 = vst [vmem:[#allocation145_spill] sm:$0xff] %v7770_v30  ;;  %13288 = vst [vmem:[#allocation170_spill] sm:$0xff] %v7774_v40  ;;  %v13293_v63 = vld [vmem:[#allocation79_spill] sm:$0xff]  ;;  %v7786_v51 = vadd.f32 %v13296_v1, %v13295_v4  ;;  %v13299_v10 = vld [vmem:[#allocation9_spill] sm:$0xff] }
 0x177   :  { %13291 = vst [vmem:[#allocation146_spill] sm:$0xff] %v7778_v13  ;;  %v7782_v18 = vadd.f32 %v13293_v63, %v13292_v9  ;;  %v7790_v27 = vadd.f32 %v13299_v10, %v13298_v43  ;;  %v13301_v53 = vld [vmem:[#allocation55_spill] sm:$0xff]  ;;  %v13304_v58 = vld [vmem:[#allocation18_spill] sm:$0xff]  ;;  %v13308_v13 = vld [vmem:[#allocation152_spill] sm:$0xff] }
 0x178   :  { %13297 = vst [vmem:[#allocation147_spill] sm:$0xff] %v7786_v51  ;;  %v13302_v26 = vld [vmem:[#allocation151_spill] sm:$0xff]  ;;  %v7798_v32 = vadd.f32 %v13305_v0, %v13304_v58  ;;  %v13310_v63 = vld [vmem:[#allocation129_spill] sm:$0xff]  ;;  %v13313_v1 = vld [vmem:[#allocation56_spill] sm:$0xff] }
 0x179   :  { %13294 = vst [vmem:[#allocation171_spill] sm:$0xff] %v7782_v18  ;;  %13300 = vst [vmem:[#allocation172_spill] sm:$0xff] %v7790_v27  ;;  %v7794_v31 = vadd.f32 %v13302_v26, %v13301_v53  ;;  %v13307_v7 = vld [vmem:[#allocation19_spill] sm:$0xff]  ;;  %v13314_v51 = vld [vmem:[#allocation92_spill] sm:$0xff] }
 0x17a   :  { %13306 = vst [vmem:[#allocation85_spill] sm:$0xff] %v7798_v32  ;;  %v7802_v9 = vadd.f32 %v13308_v13, %v13307_v7  ;;  %v13311_v18 = vld [vmem:[#allocation15_spill] sm:$0xff]  ;;  %v7810_v43 = vmul.f32 %v13314_v51, %v13313_v1  ;;  %v7819_v0 = vld [vmem:[%s11963_s3 + $0x28] sm:$0x3]  ;;  %v7836_v7 = vld [vmem:[%s11963_s3 + $0x40] sm:$0x3] }
 0x17b   :  { %13303 = vst [vmem:[#allocation148_spill] sm:$0xff] %v7794_v31  ;;  %v7806_v4 = vadd.f32 %v13311_v18, %v13310_v63  ;;  %v13315_v10 = vld [vmem:[#allocation59_spill] sm:$0xff]  ;;  %13316 = vst [vmem:[#allocation143_spill] sm:$0xff] %v7819_v0  ;;  %v7823_v13 = vmul.f32 %v7819_v0, %v13313_v1  ;;  %v13317_v18 = vld [vmem:[#allocation65_spill] sm:$0xff]  ;;  %v7840_v63 = vmul.f32 %v7836_v7, %v13313_v1 }
 0x17c   :  { %13309 = vst [vmem:[#allocation113_spill] sm:$0xff] %v7802_v9  ;;  %v7814_v53 = vmul.f32 %v13315_v10, %v13313_v1  ;;  %v7827_v26 = vmul.f32 %v13317_v18, %v13313_v1  ;;  %v13318_v51 = vld [vmem:[#allocation66_spill] sm:$0xff]  ;;  %13319 = vst [vmem:[#allocation144_spill] sm:$0xff] %v7836_v7  ;;  %v13320_v10 = vld [vmem:[#allocation72_spill] sm:$0xff]  ;;  %v1561_v56 = vrot.slane %v7810_v43, 1 }
 0x17d   :  { %13312 = vst [vmem:[#allocation121_spill] sm:$0xff] %v7806_v4  ;;  %v7831_v58 = vmul.f32 %v13318_v51, %v13313_v1  ;;  %v7844_v0 = vmul.f32 %v13320_v10, %v13313_v1  ;;  %v13321_v18 = vld [vmem:[#allocation96_spill] sm:$0xff]  ;;  %v13324_v10 = vld [vmem:[#allocation173_spill] sm:$0xff]  ;;  %v13357_v14 = vld [vmem:[#allocation82_spill] sm:$0xff]  ;;  %v1569_v49 = vrot.slane %v7840_v63, 1 }
 0x17e   :  { %v7848_v4 = vmul.f32 %v13321_v18, %v13313_v1  ;;  %v7853_v51 = vld [vmem:[%s11963_s3 + $0x58] sm:$0x3]  ;;  %v7865_v31 = vmul.f32 %v13324_v10, %v13313_v1  ;;  %v7870_v18 = vld [vmem:[%s11963_s3 + $0x70] sm:$0x3]  ;;  %v7887_v10 = vld [vmem:[%s11963_s3 + $0x88] sm:$0x3]  ;;  %v8056_v29 = vmul.f32 %v13357_v14, %v13313_v1 }
 0x17f   :  { %13322 = vst [vmem:[#allocation98_spill] sm:$0xff] %v7853_v51  ;;  %v7857_v9 = vmul.f32 %v7853_v51, %v13313_v1  ;;  %v13323_v7 = vld [vmem:[#allocation44_spill] sm:$0xff]  ;;  %13325 = vst [vmem:[#allocation149_spill] sm:$0xff] %v7870_v18  ;;  %v7874_v27 = vmul.f32 %v7870_v18, %v13313_v1  ;;  %v13326_v51 = vld [vmem:[#allocation13_spill] sm:$0xff]  ;;  %v7891_v35 = vmul.f32 %v7887_v10, %v13313_v1  ;;  %v1562_v22 = vrot.slane %v7814_v53, 1 }
 0x180   :  { %v7861_v32 = vmul.f32 %v13323_v7, %v13313_v1  ;;  %v7878_v40 = vmul.f32 %v13326_v51, %v13313_v1  ;;  %v13327_v7 = vld [vmem:[#allocation130_spill] sm:$0xff]  ;;  %13328 = vst [vmem:[#allocation99_spill] sm:$0xff] %v7887_v10  ;;  %v13329_v18 = vld [vmem:[#allocation131_spill] sm:$0xff]  ;;  %v13330_v51 = vld [vmem:[#allocation136_spill] sm:$0xff]  ;;  %v1567_v43 = vrot.slane %v7831_v58, 1 }
 0x181   :  { %v7882_v30 = vmul.f32 %v13327_v7, %v13313_v1  ;;  %v7895_v50 = vmul.f32 %v13329_v18, %v13313_v1  ;;  %v7899_v34 = vmul.f32 %v13330_v51, %v13313_v1  ;;  %v7904_v7 = vld [vmem:[%s11963_s3 + $0xa0] sm:$0x3]  ;;  %v13332_v10 = vld [vmem:[#allocation150_spill] sm:$0xff]  ;;  %v7921_v51 = vld [vmem:[%s11963_s3 + $0xb8] sm:$0x3]  ;;  %v8092_v20 = vsel %vm456_vm0, %v1561_v56, %v1562_v22 }
 0x182   :  { %13331 = vst [vmem:[#allocation100_spill] sm:$0xff] %v7904_v7  ;;  %v7908_v47 = vmul.f32 %v7904_v7, %v13313_v1  ;;  %v7912_v2 = vmul.f32 %v13332_v10, %v13313_v1  ;;  %v13333_v18 = vld [vmem:[#allocation58_spill] sm:$0xff]  ;;  %13334 = vst [vmem:[#allocation5_spill] sm:$0xff] %v7921_v51  ;;  %v7925_v36 = vmul.f32 %v7921_v51, %v13313_v1  ;;  %v13336_v10 = vld [vmem:[#allocation64_spill] sm:$0xff]  ;;  %v1574_v28 = vrot.slane %v7857_v9, 1 }
 0x183   :  { %v7916_v33 = vmul.f32 %v13333_v18, %v13313_v1  ;;  %v13335_v7 = vld [vmem:[#allocation50_spill] sm:$0xff]  ;;  %v7933_v11 = vmul.f32 %v13336_v10, %v13313_v1  ;;  %v7938_v18 = vld [vmem:[%s11963_s3 + $0xd0] sm:$0x3]  ;;  %v8067_v45 = vld [vmem:[%s11963_s3 + $0x178] sm:$0x3]  ;;  %v1579_v63 = vrot.slane %v7874_v27, 1 }
 0x184   :  { %v7929_v21 = vmul.f32 %v13335_v7, %v13313_v1  ;;  %13337 = vst [vmem:[#allocation101_spill] sm:$0xff] %v7938_v18  ;;  %v7942_v57 = vmul.f32 %v7938_v18, %v13313_v1  ;;  %v13338_v51 = vld [vmem:[#allocation71_spill] sm:$0xff]  ;;  %v13339_v7 = vld [vmem:[#allocation73_spill] sm:$0xff]  ;;  %v7955_v10 = vld [vmem:[%s11963_s3 + $0xe8] sm:$0x3]  ;;  %v1582_v56 = vrot.slane %v7882_v30, 1 }
 0x185   :  { %v7946_v17 = vmul.f32 %v13338_v51, %v13313_v1  ;;  %v7950_v37 = vmul.f32 %v13339_v7, %v13313_v1  ;;  %13340 = vst [vmem:[#allocation102_spill] sm:$0xff] %v7955_v10  ;;  %v7959_v44 = vmul.f32 %v7955_v10, %v13313_v1  ;;  %v13341_v18 = vld [vmem:[#allocation45_spill] sm:$0xff]  ;;  %v13342_v51 = vld [vmem:[#allocation51_spill] sm:$0xff]  ;;  %v13358_v53 = vld [vmem:[#allocation110_spill] sm:$0xff]  ;;  %v1589_v9 = vrot.slane %v7908_v47, 1 }
 0x186   :  { %v7963_v42 = vmul.f32 %v13341_v18, %v13313_v1  ;;  %v7967_v12 = vmul.f32 %v13342_v51, %v13313_v1  ;;  %v7972_v7 = vld [vmem:[%s11963_s3 + $0x100] sm:$0x3]  ;;  %v13345_v18 = vld [vmem:[#allocation60_spill] sm:$0xff]  ;;  %13359 = vst [vmem:[#allocation14_spill] sm:$0xff] %v8067_v45  ;;  %v13360_v55 = vld [vmem:[#allocation43_spill] sm:$0xff]  ;;  %v1596_v27 = vrot.slane %v7929_v21, 1 }
 0x187   :  { %13343 = vst [vmem:[#allocation83_spill] sm:$0xff] %v7972_v7  ;;  %v7976_v3 = vmul.f32 %v7972_v7, %v13313_v1  ;;  %v13344_v10 = vld [vmem:[#allocation53_spill] sm:$0xff]  ;;  %v7984_v39 = vmul.f32 %v13345_v18, %v13313_v1  ;;  %v7989_v51 = vld [vmem:[%s11963_s3 + $0x118] sm:$0x3]  ;;  %v13347_v7 = vld [vmem:[#allocation62_spill] sm:$0xff]  ;;  %v8075_v14 = vmul.f32 %v13313_v1, %v13360_v55  ;;  %v1599_v30 = vrot.slane %v7942_v57, 1 }
 0x188   :  { %v7980_v16 = vmul.f32 %v13344_v10, %v13313_v1  ;;  %13346 = vst [vmem:[#allocation103_spill] sm:$0xff] %v7989_v51  ;;  %v7993_v5 = vmul.f32 %v7989_v51, %v13313_v1  ;;  %v7997_v24 = vmul.f32 %v13347_v7, %v13313_v1  ;;  %v13348_v10 = vld [vmem:[#allocation67_spill] sm:$0xff]  ;;  %v13350_v51 = vld [vmem:[#allocation69_spill] sm:$0xff]  ;;  %v13351_v7 = vld [vmem:[#allocation74_spill] sm:$0xff]  ;;  %v1602_v47 = vrot.slane %v7950_v37, 1 }
 0x189   :  { %v8001_v48 = vmul.f32 %v13348_v10, %v13313_v1  ;;  %v8006_v18 = vld [vmem:[%s11963_s3 + $0x130] sm:$0x3]  ;;  %v8014_v59 = vmul.f32 %v13350_v51, %v13313_v1  ;;  %v8018_v25 = vmul.f32 %v13351_v7, %v13313_v1  ;;  %v8023_v10 = vld [vmem:[%s11963_s3 + $0x148] sm:$0x3]  ;;  %v13355_v7 = vld [vmem:[#allocation80_spill] sm:$0xff]  ;;  %v1604_v21 = vrot.slane %v7959_v44, 1 }
 0x18a   :  { %13349 = vst [vmem:[#allocation104_spill] sm:$0xff] %v8006_v18  ;;  %v8010_v15 = vmul.f32 %v8006_v18, %v13313_v1  ;;  %13352 = vst [vmem:[#allocation6_spill] sm:$0xff] %v8023_v10  ;;  %v8027_v62 = vmul.f32 %v8023_v10, %v13313_v1  ;;  %v13353_v18 = vld [vmem:[#allocation77_spill] sm:$0xff]  ;;  %v8036_v51 = vld [vmem:[%s11963_s3 + $0x190] sm:$0x3]  ;;  %v8040_v19 = vmul.f32 %v13355_v7, %v13313_v1  ;;  %v1564_v10 = vrot.slane %v7823_v13, 1 }
 0x18b   :  { %v8031_v61 = vmul.f32 %v13353_v18, %v13313_v1  ;;  %13354 = vst [vmem:[#allocation57_spill] sm:$0xff] %v8036_v51  ;;  %v8048_v18 = vld [vmem:[%s11963_s3 + $0x160] sm:$0x3]  ;;  %v1566_v7 = vrot.slane %v7827_v26, 1  ;;  %v8062_v13 = vmul.f32 %v13358_v53, %v13313_v1  ;;  %v13361_v26 = vld [vmem:[#allocation76_spill] sm:$0xff]  ;;  %v8083_v53 = vmul.f32 %v13313_v1, %v8036_v51 }
 0x18c   :  { %13356 = vst [vmem:[#allocation105_spill] sm:$0xff] %v8048_v18  ;;  %v8052_v46 = vmul.f32 %v8048_v18, %v13313_v1  ;;  %v8071_v18 = vmul.f32 %v8067_v45, %v13313_v1  ;;  %v8079_v58 = vmul.f32 %v13313_v1, %v13361_v26  ;;  %v13362_v52 = vld [vmem:[#allocation112_spill] sm:$0xff]  ;;  %v1571_v45 = vrot.slane %v7844_v0, 1 }
 0x18d   :  { %v8087_v6 = vmul.f32 %v13362_v52, %v13313_v1  ;;  %v8095_v55 = vsel %vm456_vm0, %v1562_v22, %v1564_v10  ;;  %v1572_v26 = vrot.slane %v7848_v4, 1  ;;  %v8100_v51 = vsel %vm456_vm0, %v1566_v7, %v1567_v43 }
 0x18e   :  { %v1576_v52 = vrot.slane %v7861_v32, 1  ;;  %v1577_v1 = vrot.slane %v7865_v31, 1  ;;  %v1581_v0 = vrot.slane %v7878_v40, 1  ;;  %v1584_v22 = vrot.slane %v7891_v35, 1 }
 0x18f   :  { %v1586_v10 = vrot.slane %v7895_v50, 1  ;;  %v1587_v4 = vrot.slane %v7899_v34, 1  ;;  %v1591_v7 = vrot.slane %v7912_v2, 1  ;;  %v1592_v32 = vrot.slane %v7916_v33, 1 }
 0x190   :  { %v1594_v31 = vrot.slane %v7925_v36, 1  ;;  %v1597_v40 = vrot.slane %v7933_v11, 1  ;;  %v1570_v35 = vsel %vm456_vm0, %v1567_v43, %v1569_v49  ;;  %v1573_v50 = vsel %vm456_vm0, %v1571_v45, %v1572_v26 }
 0x191   :  { %v1601_v34 = vrot.slane %v7946_v17, 1  ;;  %v1575_v2 = vsel %vm456_vm0, %v1572_v26, %v1574_v28  ;;  %v1578_v33 = vsel %vm456_vm0, %v1576_v52, %v1577_v1  ;;  %v1580_v36 = vsel %vm456_vm0, %v1577_v1, %v1579_v63 }
 0x192   :  { %v1583_v11 = vsel %vm456_vm0, %v1581_v0, %v1582_v56  ;;  %v8127_v57 = vsel %vm456_vm0, %v1582_v56, %v1584_v22  ;;  %v8130_v49 = vsel %vm456_vm0, %v1586_v10, %v1587_v4  ;;  %v8133_v45 = vsel %vm456_vm0, %v1587_v4, %v1589_v9 }
 0x193   :  { %13363 = vst [vmem:[#allocation106_spill] sm:$0xff] %v8130_v49  ;;  %13364 = vst [vmem:[#allocation137_spill] sm:$0xff] %v8133_v45  ;;  %v8136_v37 = vsel %vm456_vm0, %v1591_v7, %v1592_v32  ;;  %v8139_v28 = vsel %vm456_vm0, %v1592_v32, %v1594_v31  ;;  %v8142_v17 = vsel %vm456_vm0, %v1596_v27, %v1597_v40  ;;  %v1606_v26 = vrot.slane %v7963_v42, 1 }
 0x194   :  { %13365 = vst [vmem:[#allocation7_spill] sm:$0xff] %v8136_v37  ;;  %13366 = vst [vmem:[#allocation138_spill] sm:$0xff] %v8139_v28  ;;  %v8145_v44 = vsel %vm456_vm0, %v1597_v40, %v1599_v30  ;;  %v8148_v43 = vsel %vm456_vm0, %v1601_v34, %v1602_v47  ;;  %v1607_v52 = vrot.slane %v7967_v12, 1  ;;  %v1609_v1 = vrot.slane %v7976_v3, 1  ;;  %v13385_v30 = vld [vmem:[#allocation20_spill] sm:$0xff] }
 0x195   :  { %13367 = vst [vmem:[#allocation107_spill] sm:$0xff] %v8142_v17  ;;  %13368 = vst [vmem:[#allocation93_spill] sm:$0xff] %v8145_v44  ;;  %v8154_v63 = vsel %vm456_vm0, %v1602_v47, %v1604_v21  ;;  %v1611_v0 = vrot.slane %v7980_v16, 1  ;;  %v1612_v56 = vrot.slane %v7984_v39, 1  ;;  %v1614_v22 = vrot.slane %v7993_v5, 1  ;;  %v13388_v21 = vld [vmem:[#allocation22_spill] sm:$0xff] }
 0x196   :  { %13369 = vst [vmem:[#allocation108_spill] sm:$0xff] %v8148_v43  ;;  %13370 = vst [vmem:[#allocation91_spill] sm:$0xff] %v8154_v63  ;;  %v1616_v10 = vrot.slane %v7997_v24, 1  ;;  %v1617_v4 = vrot.slane %v8001_v48, 1  ;;  %v1619_v9 = vrot.slane %v8010_v15, 1  ;;  %v1621_v42 = vrot.slane %v8014_v59, 1 }
 0x197   :  { %v1622_v12 = vrot.slane %v8018_v25, 1  ;;  %v1624_v3 = vrot.slane %v8027_v62, 1  ;;  %v1626_v7 = vrot.slane %v8031_v61, 1  ;;  %v1627_v16 = vrot.slane %v8040_v19, 1  ;;  %v8588_v63 = vld [vmem:[%s11963_s3 + $0x338] sm:$0xff]  ;;  %v13453_v43 = vld [vmem:[#allocation38_spill] sm:$0xff] }
 0x198   :  { %v1629_v39 = vrot.slane %v8052_v46, 1  ;;  %v1631_v5 = vrot.slane %v8056_v29, 1  ;;  %v1632_v24 = vrot.slane %v8062_v13, 1  ;;  %v1634_v48 = vrot.slane %v8071_v18, 1  ;;  %13452 = vst [vmem:[#allocation45_spill] sm:$0xff] %v8588_v63 }
 0x199   :  { %v1636_v15 = vrot.slane %v8075_v14, 1  ;;  %v1637_v59 = vrot.slane %v8079_v58, 1  ;;  %v1639_v25 = vrot.slane %v8083_v53, 1  ;;  %v1641_v62 = vrot.slane %v8087_v6, 1 }
 0x19a   :  { %v8176_v61 = vsel %vm456_vm0, %v1606_v26, %v1607_v52  ;;  %v8179_v19 = vsel %vm456_vm0, %v1607_v52, %v1609_v1  ;;  %v8182_v29 = vsel %vm456_vm0, %v1611_v0, %v1612_v56  ;;  %v8185_v46 = vsel %vm456_vm0, %v1612_v56, %v1614_v22  ;;  %v13390_v52 = vld [vmem:[#allocation23_spill] sm:$0xff]  ;;  %v13392_v0 = vld [vmem:[#allocation24_spill] sm:$0xff]  ;;  %v13394_v22 = vld [vmem:[#allocation25_spill] sm:$0xff] }
 0x19b   :  { %13371 = vst [vmem:[#allocation8_spill] sm:$0xff] %v8176_v61  ;;  %13372 = vst [vmem:[#allocation94_spill] sm:$0xff] %v8179_v19  ;;  %v8188_v18 = vsel %vm456_vm0, %v1616_v10, %v1617_v4  ;;  %v8191_v13 = vsel %vm456_vm0, %v1617_v4, %v1619_v9  ;;  %v8194_v6 = vsel %vm456_vm0, %v1621_v42, %v1622_v12  ;;  %v13386_v34 = vrot.slane %v13385_v30, 1  ;;  %v13396_v4 = vld [vmem:[#allocation29_spill] sm:$0xff]  ;;  %v13398_v42 = vld [vmem:[#allocation30_spill] sm:$0xff] }
 0x19c   :  { %13373 = vst [vmem:[#allocation109_spill] sm:$0xff] %v8182_v29  ;;  %13374 = vst [vmem:[#allocation95_spill] sm:$0xff] %v8185_v46  ;;  %v8197_v14 = vsel %vm456_vm0, %v1622_v12, %v1624_v3  ;;  %v8200_v58 = vsel %vm456_vm0, %v1626_v7, %v1627_v16  ;;  %v8203_v53 = vsel %vm456_vm0, %v1627_v16, %v1629_v39  ;;  %v13400_v3 = vld [vmem:[#allocation31_spill] sm:$0xff]  ;;  %v13402_v7 = vld [vmem:[#allocation32_spill] sm:$0xff] }
 0x19d   :  { %13375 = vst [vmem:[#allocation114_spill] sm:$0xff] %v8188_v18  ;;  %13376 = vst [vmem:[#allocation97_spill] sm:$0xff] %v8191_v13  ;;  %v8206_v32 = vsel %vm456_vm0, %v1631_v5, %v1632_v24  ;;  %v8209_v31 = vsel %vm456_vm0, %v1632_v24, %v1634_v48  ;;  %v8212_v27 = vsel %vm456_vm0, %v1636_v15, %v1637_v59  ;;  %v8279_v5 = vld [vmem:[%s11963_s3 + $0x1e8] sm:$0xff]  ;;  %v13447_v18 = vld [vmem:[#allocation39_spill] sm:$0xff] }
 0x19e   :  { %13377 = vst [vmem:[#allocation10_spill] sm:$0xff] %v8194_v6  ;;  %13378 = vst [vmem:[#allocation46_spill] sm:$0xff] %v8197_v14  ;;  %v8215_v40 = vsel %vm456_vm0, %v1637_v59, %v1639_v25  ;;  %v8220_v47 = vsel %vm456_vm0, %v1641_v62, %v13386_v34  ;;  %v8224_v26 = vadd.f32 %v8092_v20, %v13388_v21  ;;  %v13411_v48 = vld [vmem:[#allocation78_spill] sm:$0xff]  ;;  %v8292_v59 = vld [vmem:[%s11963_s3 + $0x1f8] sm:$0xff] }
 0x19f   :  { %13379 = vst [vmem:[#allocation115_spill] sm:$0xff] %v8200_v58  ;;  %13380 = vst [vmem:[#allocation52_spill] sm:$0xff] %v8203_v53  ;;  %v8228_v1 = vadd.f32 %v8095_v55, %v13390_v52  ;;  %v8232_v56 = vadd.f32 %v8100_v51, %v13392_v0  ;;  %v8235_v10 = vadd.f32 %v1570_v35, %v13394_v22  ;;  %v13404_v55 = vld [vmem:[#allocation36_spill] sm:$0xff]  ;;  %v8255_v51 = vld [vmem:[%s11960_s0 + $0x5] ss:$0 sm:$0xff] }
 0x1a0   :  { %13381 = vst [vmem:[#allocation116_spill] sm:$0xff] %v8206_v32  ;;  %13382 = vst [vmem:[#allocation54_spill] sm:$0xff] %v8209_v31  ;;  %v8238_v9 = vadd.f32 %v1573_v50, %v13396_v4  ;;  %v8241_v12 = vadd.f32 %v1575_v2, %v13398_v42  ;;  %v8244_v20 = vadd.f32 %v1578_v33, %v13400_v3  ;;  %v4101_v35 = vld [vmem:[%s11963_s3 + $0x1d0] sm:$0xff]  ;;  %v13408_v2 = vld [vmem:[#allocation21_spill] sm:$0xff] }
 0x1a1   :  { %13383 = vst [vmem:[#allocation11_spill] sm:$0xff] %v8212_v27  ;;  %13384 = vst [vmem:[#allocation61_spill] sm:$0xff] %v8215_v40  ;;  %v8247_v16 = vadd.f32 %v1580_v36, %v13402_v7  ;;  %v8250_v39 = vadd.f32 %v1583_v11, %v13404_v55  ;;  %v8261_v50 = vmul.f32 %v4101_v35, %v8255_v51  ;;  %v8270_v36 = vld [vmem:[%s11963_s3 + $0x1e0] sm:$0xff]  ;;  %v13414_v34 = vld [vmem:[#allocation26_spill] sm:$0xff] }
 0x1a2   :  { %13387 = vst [vmem:[#allocation122_spill] sm:$0xff] %v8220_v47  ;;  %13389 = vst [vmem:[#allocation63_spill] sm:$0xff] %v8224_v26  ;;  %v8265_v33 = vmul.f32 %v13408_v2, %v8255_v51  ;;  %v8274_v11 = vmul.f32 %v8270_v36, %v8255_v51  ;;  %v8283_v24 = vmul.f32 %v8279_v5, %v8255_v51  ;;  %v8301_v62 = vld [vmem:[%s11963_s3 + $0x200] sm:$0xff]  ;;  %v8314_v52 = vld [vmem:[%s11963_s3 + $0x210] sm:$0xff] }
 0x1a3   :  { %13391 = vst [vmem:[#allocation123_spill] sm:$0xff] %v8228_v1  ;;  %13393 = vst [vmem:[#allocation68_spill] sm:$0xff] %v8232_v56  ;;  %v8287_v15 = vmul.f32 %v13411_v48, %v8255_v51  ;;  %v8296_v25 = vmul.f32 %v8292_v59, %v8255_v51  ;;  %v8305_v30 = vmul.f32 %v8301_v62, %v8255_v51  ;;  %v8323_v22 = vld [vmem:[%s11963_s3 + $0x218] sm:$0xff]  ;;  %v13417_v42 = vld [vmem:[#allocation27_spill] sm:$0xff] }
 0x1a4   :  { %13395 = vst [vmem:[#allocation12_spill] sm:$0xff] %v8235_v10  ;;  %13397 = vst [vmem:[#allocation70_spill] sm:$0xff] %v8238_v9  ;;  %v8309_v21 = vmul.f32 %v13414_v34, %v8255_v51  ;;  %v8318_v0 = vmul.f32 %v8314_v52, %v8255_v51  ;;  %v8327_v4 = vmul.f32 %v8323_v22, %v8255_v51  ;;  %v8336_v7 = vld [vmem:[%s11963_s3 + $0x228] sm:$0xff]  ;;  %v8345_v35 = vld [vmem:[%s11963_s3 + $0x230] sm:$0xff]  ;;  %v2129_v13 = vrot.slane %v8265_v33, 2 }
 0x1a5   :  { %13399 = vst [vmem:[#allocation124_spill] sm:$0xff] %v8241_v12  ;;  %13401 = vst [vmem:[#allocation75_spill] sm:$0xff] %v8244_v20  ;;  %v8331_v3 = vmul.f32 %v13417_v42, %v8255_v51  ;;  %v8340_v55 = vmul.f32 %v8336_v7, %v8255_v51  ;;  %v8349_v2 = vmul.f32 %v8345_v35, %v8255_v51  ;;  %v13420_v48 = vld [vmem:[#allocation84_spill] sm:$0xff]  ;;  %v8358_v42 = vld [vmem:[%s11963_s3 + $0x240] sm:$0xff]  ;;  %v2131_v17 = vrot.slane %v8274_v11, 2 }
 0x1a6   :  { %13403 = vst [vmem:[#allocation47_spill] sm:$0xff] %v8247_v16  ;;  %13405 = vst [vmem:[#allocation79_spill] sm:$0xff] %v8250_v39  ;;  %v8353_v34 = vmul.f32 %v13420_v48, %v8255_v51  ;;  %v8367_v39 = vld [vmem:[%s11963_s3 + $0x248] sm:$0xff]  ;;  %v13423_v48 = vld [vmem:[#allocation28_spill] sm:$0xff]  ;;  %v8552_v46 = vmul.f32 %v13447_v18, %v8255_v51  ;;  %v8597_v44 = vmul.f32 %v8255_v51, %v13453_v43  ;;  %v2134_v28 = vrot.slane %v8287_v15, 2 }
 0x1a7   :  { %13406 = vst [vmem:[#allocation16_spill] sm:$0xff] %v8255_v51  ;;  %13407 = vst [vmem:[#allocation81_spill] sm:$0xff] %v8261_v50  ;;  %v8371_v16 = vmul.f32 %v8367_v39, %v8255_v51  ;;  %v8375_v20 = vmul.f32 %v13423_v48, %v8255_v51  ;;  %v8380_v12 = vld [vmem:[%s11963_s3 + $0x258] sm:$0xff]  ;;  %v8389_v10 = vld [vmem:[%s11963_s3 + $0x260] sm:$0xff]  ;;  %v2137_v45 = vrot.slane %v8305_v30, 2  ;;  %v2139_v49 = vrot.slane %v8309_v21, 2 }
 0x1a8   :  { %13409 = vst [vmem:[#allocation17_spill] sm:$0xff] %v8270_v36  ;;  %13410 = vst [vmem:[#allocation9_spill] sm:$0xff] %v8279_v5  ;;  %v8362_v36 = vmul.f32 %v8358_v42, %v8255_v51  ;;  %v8384_v9 = vmul.f32 %v8380_v12, %v8255_v51  ;;  %v8393_v56 = vmul.f32 %v8389_v10, %v8255_v51  ;;  %v13426_v48 = vld [vmem:[#allocation33_spill] sm:$0xff]  ;;  %v8402_v26 = vld [vmem:[%s11963_s3 + $0x270] sm:$0xff]  ;;  %v2141_v43 = vrot.slane %v8318_v0, 2 }
 0x1a9   :  { %13412 = vst [vmem:[#allocation55_spill] sm:$0xff] %v8292_v59  ;;  %13413 = vst [vmem:[#allocation151_spill] sm:$0xff] %v8301_v62  ;;  %v8397_v1 = vmul.f32 %v13426_v48, %v8255_v51  ;;  %v13429_v48 = vld [vmem:[#allocation86_spill] sm:$0xff]  ;;  %v8468_v5 = vld [vmem:[%s11963_s3 + $0x2b8] sm:$0xff]  ;;  %v2144_v11 = vrot.slane %v8331_v3, 2  ;;  %v2147_v15 = vrot.slane %v8349_v2, 2 }
 0x1aa   :  { %13415 = vst [vmem:[#allocation18_spill] sm:$0xff] %v8314_v52  ;;  %13416 = vst [vmem:[#allocation111_spill] sm:$0xff] %v8323_v22  ;;  %v8446_v52 = vld [vmem:[%s11963_s3 + $0x2a0] sm:$0xff]  ;;  %v8455_v62 = vld [vmem:[%s11963_s3 + $0x2a8] sm:$0xff]  ;;  %v2154_v30 = vrot.slane %v8375_v20, 2  ;;  %v2156_v21 = vrot.slane %v8384_v9, 2  ;;  %v2140_v20 = vsel %vm942_vm1, %v2137_v45, %v2139_v49 }
 0x1ab   :  { %13418 = vst [vmem:[#allocation19_spill] sm:$0xff] %v8336_v7  ;;  %13419 = vst [vmem:[#allocation152_spill] sm:$0xff] %v8345_v35  ;;  %v8424_v35 = vld [vmem:[%s11963_s3 + $0x288] sm:$0xff]  ;;  %v8433_v7 = vld [vmem:[%s11963_s3 + $0x290] sm:$0xff]  ;;  %v2157_v0 = vrot.slane %v8393_v56, 2 }
 0x1ac   :  { %13421 = vst [vmem:[#allocation129_spill] sm:$0xff] %v8358_v42  ;;  %13422 = vst [vmem:[#allocation15_spill] sm:$0xff] %v8367_v39  ;;  %v8411_v39 = vld [vmem:[%s11963_s3 + $0x278] sm:$0xff]  ;;  %v8419_v42 = vmul.f32 %v13429_v48, %v8255_v51  ;;  %v13432_v48 = vld [vmem:[#allocation34_spill] sm:$0xff] }
 0x1ad   :  { %13424 = vst [vmem:[#allocation56_spill] sm:$0xff] %v8380_v12  ;;  %13425 = vst [vmem:[#allocation92_spill] sm:$0xff] %v8389_v10  ;;  %v8406_v12 = vmul.f32 %v8402_v26, %v8255_v51  ;;  %v8415_v10 = vmul.f32 %v8411_v39, %v8255_v51  ;;  %v8441_v22 = vmul.f32 %v13432_v48, %v8255_v51  ;;  %v13435_v48 = vld [vmem:[#allocation35_spill] sm:$0xff]  ;;  %v8477_v47 = vld [vmem:[%s11963_s3 + $0x2c0] sm:$0xff] }
 0x1ae   :  { %13427 = vst [vmem:[#allocation59_spill] sm:$0xff] %v8402_v26  ;;  %13428 = vst [vmem:[#allocation65_spill] sm:$0xff] %v8411_v39  ;;  %v8428_v26 = vmul.f32 %v8424_v35, %v8255_v51  ;;  %v8437_v39 = vmul.f32 %v8433_v7, %v8255_v51  ;;  %v8463_v59 = vmul.f32 %v13435_v48, %v8255_v51  ;;  %v13438_v48 = vld [vmem:[#allocation87_spill] sm:$0xff]  ;;  %v8499_v31 = vld [vmem:[%s11963_s3 + $0x2d8] sm:$0xff] }
 0x1af   :  { %13430 = vst [vmem:[#allocation66_spill] sm:$0xff] %v8424_v35  ;;  %13431 = vst [vmem:[#allocation72_spill] sm:$0xff] %v8433_v7  ;;  %v8450_v35 = vmul.f32 %v8446_v52, %v8255_v51  ;;  %v8459_v7 = vmul.f32 %v8455_v62, %v8255_v51  ;;  %v8485_v40 = vmul.f32 %v13438_v48, %v8255_v51  ;;  %v8490_v27 = vld [vmem:[%s11963_s3 + $0x2d0] sm:$0xff]  ;;  %v13441_v48 = vld [vmem:[#allocation37_spill] sm:$0xff]  ;;  %v2162_v2 = vrot.slane %v8415_v10, 2 }
 0x1b0   :  { %13433 = vst [vmem:[#allocation96_spill] sm:$0xff] %v8446_v52  ;;  %13434 = vst [vmem:[#allocation44_spill] sm:$0xff] %v8455_v62  ;;  %v8472_v52 = vmul.f32 %v8468_v5, %v8255_v51  ;;  %v8481_v62 = vmul.f32 %v8477_v47, %v8255_v51  ;;  %v8507_v32 = vmul.f32 %v13441_v48, %v8255_v51  ;;  %v8512_v53 = vld [vmem:[%s11963_s3 + $0x2e8] sm:$0xff]  ;;  %v8521_v58 = vld [vmem:[%s11963_s3 + $0x2f0] sm:$0xff] }
 0x1b1   :  { %13436 = vst [vmem:[#allocation173_spill] sm:$0xff] %v8468_v5  ;;  %13437 = vst [vmem:[#allocation13_spill] sm:$0xff] %v8477_v47  ;;  %v8494_v5 = vmul.f32 %v8490_v27, %v8255_v51  ;;  %v8503_v47 = vmul.f32 %v8499_v31, %v8255_v51  ;;  %v13444_v48 = vld [vmem:[#allocation88_spill] sm:$0xff]  ;;  %v8534_v6 = vld [vmem:[%s11963_s3 + $0x300] sm:$0xff] }
 0x1b2   :  { %13439 = vst [vmem:[#allocation130_spill] sm:$0xff] %v8490_v27  ;;  %13440 = vst [vmem:[#allocation131_spill] sm:$0xff] %v8499_v31  ;;  %v8516_v27 = vmul.f32 %v8512_v53, %v8255_v51  ;;  %v8525_v31 = vmul.f32 %v8521_v58, %v8255_v51  ;;  %v8529_v14 = vmul.f32 %v13444_v48, %v8255_v51  ;;  %v8566_v29 = vld [vmem:[%s11963_s3 + $0x320] sm:$0xff]  ;;  %v13450_v18 = vld [vmem:[#allocation40_spill] sm:$0xff] }
 0x1b3   :  { %13442 = vst [vmem:[#allocation136_spill] sm:$0xff] %v8512_v53  ;;  %13443 = vst [vmem:[#allocation150_spill] sm:$0xff] %v8521_v58  ;;  %v8538_v53 = vmul.f32 %v8534_v6, %v8255_v51  ;;  %v8544_v58 = vld [vmem:[%s11963_s3 + $0x308] sm:$0xff]  ;;  %v8574_v19 = vmul.f32 %v13450_v18, %v8255_v51  ;;  %v8579_v61 = vld [vmem:[%s11963_s3 + $0x330] sm:$0xff]  ;;  %v12244_v18 = vrot.slane %v8261_v50, 2  ;;  %v2149_v50 = vrot.slane %v8353_v34, 2 }
 0x1b4   :  { %13445 = vst [vmem:[#allocation58_spill] sm:$0xff] %v8534_v6  ;;  %13446 = vst [vmem:[#allocation50_spill] sm:$0xff] %v8544_v58  ;;  %v8548_v48 = vmul.f32 %v8544_v58, %v8255_v51  ;;  %v8557_v6 = vld [vmem:[%s11963_s3 + $0x318] sm:$0xff]  ;;  %v8570_v58 = vmul.f32 %v8566_v29, %v8255_v51  ;;  %v2164_v34 = vrot.slane %v8419_v42, 2  ;;  %v2158_v42 = vsel %vm942_vm1, %v2156_v21, %v2157_v0 }
 0x1b5   :  { %13448 = vst [vmem:[#allocation64_spill] sm:$0xff] %v8557_v6  ;;  %v8561_v33 = vmul.f32 %v8557_v6, %v8255_v51  ;;  %13449 = vst [vmem:[#allocation71_spill] sm:$0xff] %v8566_v29  ;;  %v8583_v6 = vmul.f32 %v8579_v61, %v8255_v51  ;;  %v8592_v29 = vmul.f32 %v8588_v63, %v8255_v51  ;;  %v2136_v63 = vrot.slane %v8296_v25, 2 }
 0x1b6   :  { %13451 = vst [vmem:[#allocation73_spill] sm:$0xff] %v8579_v61  ;;  %v2132_v61 = vrot.slane %v8283_v24, 2  ;;  %v8605_v37 = vsel %vm942_vm1, %v12244_v18, %v2129_v13  ;;  %v2142_v51 = vrot.slane %v8327_v4, 2  ;;  %v2146_v24 = vrot.slane %v8340_v55, 2  ;;  %v13548_v18 = vld [vmem:[#allocation11_spill] sm:$0xff] }
 0x1b7   :  { %v2151_v13 = vrot.slane %v8362_v36, 2  ;;  %v2152_v25 = vrot.slane %v8371_v16, 2  ;;  %v2159_v4 = vrot.slane %v8397_v1, 2  ;;  %v2161_v55 = vrot.slane %v8406_v12, 2 }
 0x1b8   :  { %v2133_v3 = vsel %vm942_vm1, %v2131_v17, %v2132_v61  ;;  %v2135_v36 = vsel %vm942_vm1, %v2132_v61, %v2134_v28  ;;  %v2138_v16 = vsel %vm942_vm1, %v2136_v63, %v2137_v45  ;;  %v2143_v9 = vsel %vm942_vm1, %v2141_v43, %v2142_v51 }
 0x1b9   :  { %v2145_v56 = vsel %vm942_vm1, %v2142_v51, %v2144_v11  ;;  %v2148_v1 = vsel %vm942_vm1, %v2146_v24, %v2147_v15  ;;  %v2150_v17 = vsel %vm942_vm1, %v2147_v15, %v2149_v50  ;;  %v2153_v12 = vsel %vm942_vm1, %v2151_v13, %v2152_v25 }
 0x1ba   :  { %v2155_v10 = vsel %vm942_vm1, %v2152_v25, %v2154_v30  ;;  %v2160_v28 = vsel %vm942_vm1, %v2157_v0, %v2159_v4  ;;  %v2166_v63 = vrot.slane %v8428_v26, 2  ;;  %v2163_v49 = vsel %vm942_vm1, %v2161_v55, %v2162_v2 }
 0x1bb   :  { %v2165_v45 = vsel %vm942_vm1, %v2162_v2, %v2164_v34  ;;  %v2167_v61 = vrot.slane %v8437_v39, 2  ;;  %v2169_v51 = vrot.slane %v8441_v22, 2  ;;  %v2171_v50 = vrot.slane %v8450_v35, 2 }
 0x1bc   :  { %v2172_v43 = vrot.slane %v8459_v7, 2  ;;  %v2174_v11 = vrot.slane %v8463_v59, 2  ;;  %v2176_v24 = vrot.slane %v8472_v52, 2  ;;  %v2177_v15 = vrot.slane %v8481_v62, 2 }
 0x1bd   :  { %v2179_v26 = vrot.slane %v8485_v40, 2  ;;  %v2181_v13 = vrot.slane %v8494_v5, 2  ;;  %v2182_v25 = vrot.slane %v8503_v47, 2  ;;  %v2184_v39 = vrot.slane %v8507_v32, 2 }
 0x1be   :  { %v2186_v22 = vrot.slane %v8516_v27, 2  ;;  %v2187_v35 = vrot.slane %v8525_v31, 2  ;;  %v2189_v7 = vrot.slane %v8529_v14, 2  ;;  %v2191_v59 = vrot.slane %v8538_v53, 2 }
 0x1bf   :  { %v2192_v52 = vrot.slane %v8548_v48, 2  ;;  %v2194_v62 = vrot.slane %v8552_v46, 2  ;;  %v2196_v40 = vrot.slane %v8561_v33, 2  ;;  %v2197_v5 = vrot.slane %v8570_v58, 2 }
 0x1c0   :  { %v2199_v47 = vrot.slane %v8574_v19, 2  ;;  %v2201_v32 = vrot.slane %v8583_v6, 2  ;;  %v2202_v27 = vrot.slane %v8592_v29, 2  ;;  %v2168_v31 = vsel %vm942_vm1, %v2166_v63, %v2167_v61 }
 0x1c1   :  { %v2170_v14 = vsel %vm942_vm1, %v2167_v61, %v2169_v51  ;;  %v2173_v53 = vsel %vm942_vm1, %v2171_v50, %v2172_v43  ;;  %v2204_v48 = vrot.slane %v8597_v44, 2  ;;  %v2175_v46 = vsel %vm942_vm1, %v2172_v43, %v2174_v11  ;;  %v13454_v11 = vld [vmem:[#allocation89_spill] sm:$0xff] }
 0x1c2   :  { %v2178_v33 = vsel %vm942_vm1, %v2176_v24, %v2177_v15  ;;  %v2180_v58 = vsel %vm942_vm1, %v2177_v15, %v2179_v26  ;;  %v2183_v19 = vsel %vm942_vm1, %v2181_v13, %v2182_v25  ;;  %v2185_v6 = vsel %vm942_vm1, %v2182_v25, %v2184_v39 }
 0x1c3   :  { %v2188_v29 = vsel %vm942_vm1, %v2186_v22, %v2187_v35  ;;  %v2190_v30 = vsel %vm942_vm1, %v2187_v35, %v2189_v7  ;;  %v2193_v21 = vsel %vm942_vm1, %v2191_v59, %v2192_v52  ;;  %v2195_v0 = vsel %vm942_vm1, %v2192_v52, %v2194_v62  ;;  %v13470_v52 = vld [vmem:[#allocation158_spill] sm:$0xff] }
 0x1c4   :  { %v2198_v44 = vsel %vm942_vm1, %v2196_v40, %v2197_v5  ;;  %v2200_v4 = vsel %vm942_vm1, %v2197_v5, %v2199_v47  ;;  %v2203_v55 = vsel %vm942_vm1, %v2201_v32, %v2202_v27  ;;  %v2205_v2 = vsel %vm942_vm1, %v2202_v27, %v2204_v48  ;;  %v13471_v40 = vld [vmem:[#allocation126_spill] sm:$0xff]  ;;  %v13472_v47 = vld [vmem:[#allocation159_spill] sm:$0xff]  ;;  %v13477_v48 = vld [vmem:[#allocation161_spill] sm:$0xff] }
 0x1c5   :  { %v8681_v34 = vadd.f32 %v8605_v37, %v7620_v54  ;;  %v8684_v63 = vadd.f32 %v2133_v3, %v7623_v8  ;;  %v8687_v61 = vadd.f32 %v2135_v36, %v7626_v23  ;;  %v8690_v51 = vadd.f32 %v2138_v16, %v7629_v41  ;;  %v13455_v54 = vld [vmem:[#allocation41_spill] sm:$0xff]  ;;  %v13456_v8 = vld [vmem:[#allocation42_spill] sm:$0xff]  ;;  %v13458_v41 = vld [vmem:[#allocation48_spill] sm:$0xff] }
 0x1c6   :  { %v8693_v50 = vadd.f32 %v2140_v20, %v7632_v60  ;;  %v8696_v43 = vadd.f32 %v2143_v9, %v7635_v38  ;;  %v8699_v24 = vadd.f32 %v2145_v56, %v13454_v11  ;;  %v8702_v37 = vadd.f32 %v2148_v1, %v13455_v54  ;;  %v13457_v23 = vld [vmem:[#allocation90_spill] sm:$0xff]  ;;  %v13459_v60 = vld [vmem:[#allocation49_spill] sm:$0xff]  ;;  %v13473_v27 = vld [vmem:[#allocation127_spill] sm:$0xff] }
 0x1c7   :  { %v8705_v3 = vadd.f32 %v2150_v17, %v13456_v8  ;;  %v8708_v36 = vadd.f32 %v2153_v12, %v13457_v23  ;;  %v8711_v16 = vadd.f32 %v2155_v10, %v13458_v41  ;;  %v8714_v20 = vadd.f32 %v2158_v42, %v13459_v60  ;;  %v13460_v38 = vld [vmem:[#allocation153_spill] sm:$0xff]  ;;  %v13462_v1 = vld [vmem:[#allocation154_spill] sm:$0xff]  ;;  %v13464_v12 = vld [vmem:[#allocation155_spill] sm:$0xff] }
 0x1c8   :  { %v8717_v9 = vadd.f32 %v2160_v28, %v13460_v38  ;;  %v13461_v56 = vld [vmem:[#allocation117_spill] sm:$0xff]  ;;  %v8723_v26 = vadd.f32 %v2165_v45, %v13462_v1  ;;  %v13463_v17 = vld [vmem:[#allocation118_spill] sm:$0xff]  ;;  %v8729_v25 = vadd.f32 %v2170_v14, %v13464_v12  ;;  %v13465_v10 = vld [vmem:[#allocation119_spill] sm:$0xff]  ;;  %v8747_v62 = vadd.f32 %v2185_v6, %v13470_v52 }
 0x1c9   :  { %v8720_v15 = vadd.f32 %v2163_v49, %v13461_v56  ;;  %v8726_v13 = vadd.f32 %v2168_v31, %v13463_v17  ;;  %v8732_v39 = vadd.f32 %v2173_v53, %v13465_v10  ;;  %v13466_v42 = vld [vmem:[#allocation156_spill] sm:$0xff]  ;;  %v13468_v49 = vld [vmem:[#allocation157_spill] sm:$0xff]  ;;  %v8750_v5 = vadd.f32 %v2188_v29, %v13471_v40  ;;  %v13488_v8 = vld [vmem:[#allocation106_spill] sm:$0xff] }
 0x1ca   :  { %v8735_v22 = vadd.f32 %v2175_v46, %v13466_v42  ;;  %v13467_v28 = vld [vmem:[#allocation120_spill] sm:$0xff]  ;;  %v8741_v7 = vadd.f32 %v2180_v58, %v13468_v49  ;;  %v13469_v45 = vld [vmem:[#allocation125_spill] sm:$0xff]  ;;  %v8753_v32 = vadd.f32 %v2190_v30, %v13472_v47  ;;  %v8756_v31 = vadd.f32 %v2193_v21, %v13473_v27  ;;  %v13485_v30 = vld [vmem:[#allocation163_spill] sm:$0xff] }
 0x1cb   :  { %v8738_v35 = vadd.f32 %v2178_v33, %v13467_v28  ;;  %v8744_v59 = vadd.f32 %v2183_v19, %v13469_v45  ;;  %v13475_v14 = vld [vmem:[#allocation128_spill] sm:$0xff]  ;;  %v8762_v46 = vadd.f32 %v2198_v44, %v13477_v48  ;;  %v13481_v19 = vld [vmem:[#allocation162_spill] sm:$0xff]  ;;  %v13483_v29 = vld [vmem:[#allocation133_spill] sm:$0xff]  ;;  %v8775_v54 = vadd.f32 %v8127_v57, %v13485_v30 }
 0x1cc   :  { %13474 = vst [vmem:[#allocation51_spill] sm:$0xff] %v8756_v31  ;;  %v8759_v53 = vadd.f32 %v2195_v0, %v13475_v14  ;;  %v13479_v33 = vld [vmem:[#allocation132_spill] sm:$0xff]  ;;  %v8768_v6 = vadd.f32 %v2203_v55, %v13481_v19  ;;  %v8771_v11 = vadd.f32 %v2205_v2, %v13483_v29  ;;  %v13487_v21 = vld [vmem:[#allocation134_spill] sm:$0xff]  ;;  %v13491_v44 = vld [vmem:[#allocation137_spill] sm:$0xff] }
 0x1cd   :  { %13478 = vst [vmem:[#allocation60_spill] sm:$0xff] %v8762_v46  ;;  %v8765_v58 = vadd.f32 %v2200_v4, %v13479_v33  ;;  %13486 = vst [vmem:[#allocation74_spill] sm:$0xff] %v8775_v54  ;;  %v8779_v0 = vadd.f32 %v13488_v8, %v13487_v21  ;;  %v13490_v23 = vld [vmem:[#allocation164_spill] sm:$0xff]  ;;  %v13493_v4 = vld [vmem:[#allocation135_spill] sm:$0xff] }
 0x1ce   :  { %13476 = vst [vmem:[#allocation53_spill] sm:$0xff] %v8759_v53  ;;  %13482 = vst [vmem:[#allocation67_spill] sm:$0xff] %v8768_v6  ;;  %v8783_v41 = vadd.f32 %v13491_v44, %v13490_v23  ;;  %v13494_v60 = vld [vmem:[#allocation7_spill] sm:$0xff]  ;;  %v13496_v55 = vld [vmem:[#allocation165_spill] sm:$0xff] }
 0x1cf   :  { %13480 = vst [vmem:[#allocation62_spill] sm:$0xff] %v8765_v58  ;;  %13484 = vst [vmem:[#allocation69_spill] sm:$0xff] %v8771_v11  ;;  %v8787_v38 = vadd.f32 %v13494_v60, %v13493_v4  ;;  %v13497_v56 = vld [vmem:[#allocation138_spill] sm:$0xff]  ;;  %v13499_v1 = vld [vmem:[#allocation139_spill] sm:$0xff] }
 0x1d0   :  { %13489 = vst [vmem:[#allocation77_spill] sm:$0xff] %v8779_v0  ;;  %13492 = vst [vmem:[#allocation80_spill] sm:$0xff] %v8783_v41  ;;  %v8791_v2 = vadd.f32 %v13497_v56, %v13496_v55  ;;  %v13500_v17 = vld [vmem:[#allocation107_spill] sm:$0xff]  ;;  %v13502_v12 = vld [vmem:[#allocation166_spill] sm:$0xff] }
 0x1d1   :  { %13495 = vst [vmem:[#allocation82_spill] sm:$0xff] %v8787_v38  ;;  %v8795_v57 = vadd.f32 %v13500_v17, %v13499_v1  ;;  %v13503_v10 = vld [vmem:[#allocation93_spill] sm:$0xff]  ;;  %v13505_v28 = vld [vmem:[#allocation167_spill] sm:$0xff]  ;;  %v13506_v49 = vld [vmem:[#allocation108_spill] sm:$0xff] }
 0x1d2   :  { %13498 = vst [vmem:[#allocation110_spill] sm:$0xff] %v8791_v2  ;;  %v8799_v42 = vadd.f32 %v13503_v10, %v13502_v12  ;;  %v8803_v45 = vadd.f32 %v13506_v49, %v13505_v28  ;;  %v13508_v52 = vld [vmem:[#allocation141_spill] sm:$0xff]  ;;  %v13509_v40 = vld [vmem:[#allocation91_spill] sm:$0xff]  ;;  %v13511_v27 = vld [vmem:[#allocation168_spill] sm:$0xff] }
 0x1d3   :  { %13501 = vst [vmem:[#allocation43_spill] sm:$0xff] %v8795_v57  ;;  %v8807_v47 = vadd.f32 %v13509_v40, %v13508_v52  ;;  %v13512_v14 = vld [vmem:[#allocation8_spill] sm:$0xff]  ;;  %v13515_v19 = vld [vmem:[#allocation94_spill] sm:$0xff]  ;;  %v13518_v21 = vld [vmem:[#allocation109_spill] sm:$0xff] }
 0x1d4   :  { %13504 = vst [vmem:[#allocation76_spill] sm:$0xff] %v8799_v42  ;;  %13507 = vst [vmem:[#allocation112_spill] sm:$0xff] %v8803_v45  ;;  %v8811_v48 = vadd.f32 %v13512_v14, %v13511_v27  ;;  %v13514_v33 = vld [vmem:[#allocation160_spill] sm:$0xff]  ;;  %v13520_v23 = vld [vmem:[#allocation142_spill] sm:$0xff] }
 0x1d5   :  { %13510 = vst [vmem:[#allocation20_spill] sm:$0xff] %v8807_v47  ;;  %v8815_v29 = vadd.f32 %v13515_v19, %v13514_v33  ;;  %v13517_v30 = vld [vmem:[#allocation140_spill] sm:$0xff]  ;;  %v13521_v44 = vld [vmem:[#allocation95_spill] sm:$0xff]  ;;  %v13523_v60 = vld [vmem:[#allocation169_spill] sm:$0xff] }
 0x1d6   :  { %13513 = vst [vmem:[#allocation22_spill] sm:$0xff] %v8811_v48  ;;  %v8819_v8 = vadd.f32 %v13518_v21, %v13517_v30  ;;  %v8823_v4 = vadd.f32 %v13521_v44, %v13520_v23  ;;  %v13524_v55 = vld [vmem:[#allocation114_spill] sm:$0xff]  ;;  %v13526_v1 = vld [vmem:[#allocation145_spill] sm:$0xff]  ;;  %v13535_v14 = vld [vmem:[#allocation171_spill] sm:$0xff] }
 0x1d7   :  { %13516 = vst [vmem:[#allocation23_spill] sm:$0xff] %v8815_v29  ;;  %v8827_v56 = vadd.f32 %v13524_v55, %v13523_v60  ;;  %v13527_v17 = vld [vmem:[#allocation97_spill] sm:$0xff]  ;;  %v13529_v10 = vld [vmem:[#allocation170_spill] sm:$0xff]  ;;  %v13536_v33 = vld [vmem:[#allocation115_spill] sm:$0xff] }
 0x1d8   :  { %13519 = vst [vmem:[#allocation24_spill] sm:$0xff] %v8819_v8  ;;  %13522 = vst [vmem:[#allocation25_spill] sm:$0xff] %v8823_v4  ;;  %v8831_v12 = vadd.f32 %v13527_v17, %v13526_v1  ;;  %v13530_v28 = vld [vmem:[#allocation10_spill] sm:$0xff]  ;;  %v8843_v19 = vadd.f32 %v13536_v33, %v13535_v14  ;;  %v13538_v30 = vld [vmem:[#allocation147_spill] sm:$0xff] }
 0x1d9   :  { %13525 = vst [vmem:[#allocation29_spill] sm:$0xff] %v8827_v56  ;;  %v8835_v49 = vadd.f32 %v13530_v28, %v13529_v10  ;;  %v13532_v52 = vld [vmem:[#allocation146_spill] sm:$0xff]  ;;  %v13539_v21 = vld [vmem:[#allocation52_spill] sm:$0xff]  ;;  %v13547_v28 = vld [vmem:[#allocation85_spill] sm:$0xff] }
 0x1da   :  { %13528 = vst [vmem:[#allocation30_spill] sm:$0xff] %v8831_v12  ;;  %v13533_v40 = vld [vmem:[#allocation46_spill] sm:$0xff]  ;;  %13537 = vst [vmem:[#allocation36_spill] sm:$0xff] %v8843_v19  ;;  %v8847_v23 = vadd.f32 %v13539_v21, %v13538_v30  ;;  %v13541_v44 = vld [vmem:[#allocation172_spill] sm:$0xff] }
 0x1db   :  { %13531 = vst [vmem:[#allocation31_spill] sm:$0xff] %v8835_v49  ;;  %v8839_v27 = vadd.f32 %v13533_v40, %v13532_v52  ;;  %v13542_v60 = vld [vmem:[#allocation116_spill] sm:$0xff]  ;;  %v13545_v17 = vld [vmem:[#allocation54_spill] sm:$0xff]  ;;  %v8859_v52 = vadd.f32 %v13548_v18, %v13547_v28  ;;  %v13550_v40 = vld [vmem:[#allocation113_spill] sm:$0xff] }
 0x1dc   :  { %13540 = vst [vmem:[#allocation21_spill] sm:$0xff] %v8847_v23  ;;  %v8851_v55 = vadd.f32 %v13542_v60, %v13541_v44  ;;  %v13544_v1 = vld [vmem:[#allocation148_spill] sm:$0xff]  ;;  %v13553_v33 = vld [vmem:[#allocation121_spill] sm:$0xff]  ;;  %v13554_v19 = vld [vmem:[#allocation122_spill] sm:$0xff] }
 0x1dd   :  { %13534 = vst [vmem:[#allocation32_spill] sm:$0xff] %v8839_v27  ;;  %v8855_v10 = vadd.f32 %v13545_v17, %v13544_v1  ;;  %13549 = vst [vmem:[#allocation27_spill] sm:$0xff] %v8859_v52  ;;  %v13551_v27 = vld [vmem:[#allocation61_spill] sm:$0xff]  ;;  %v8867_v30 = vadd.f32 %v13554_v19, %v13553_v33  ;;  %v4132_v21 = vld [vmem:[%s11963_s3 + $0x18] sm:$0xff] }
 0x1de   :  { %13543 = vst [vmem:[#allocation78_spill] sm:$0xff] %v8851_v55  ;;  %v8863_v14 = vadd.f32 %v13551_v27, %v13550_v40  ;;  %v13556_v44 = vld [vmem:[#allocation16_spill] sm:$0xff]  ;;  %v4133_v18 = vld [vmem:[%s11963_s3 + $0x20] sm:$0xff]  ;;  %v13559_v27 = vld [vmem:[#allocation143_spill] sm:$0xff] }
 0x1df   :  { %13546 = vst [vmem:[#allocation26_spill] sm:$0xff] %v8855_v10  ;;  %13555 = vst [vmem:[#allocation28_spill] sm:$0xff] %v8867_v30  ;;  %v8873_v60 = vmul.f32 %v4132_v21, %v13556_v44  ;;  %v8879_v1 = vmul.f32 %v4133_v18, %v13556_v44  ;;  %v8883_v17 = vmul.f32 %v13559_v27, %v13556_v44  ;;  %v8888_v19 = vld [vmem:[%s11963_s3 + $0x30] sm:$0xff]  ;;  %v8897_v40 = vld [vmem:[%s11963_s3 + $0x38] sm:$0xff] }
 0x1e0   :  { %13552 = vst [vmem:[#allocation84_spill] sm:$0xff] %v8863_v14  ;;  %13561 = vst [vmem:[#allocation35_spill] sm:$0xff] %v8888_v19  ;;  %v8892_v28 = vmul.f32 %v8888_v19, %v13556_v44  ;;  %v8901_v33 = vmul.f32 %v8897_v40, %v13556_v44  ;;  %v13565_v21 = vld [vmem:[#allocation144_spill] sm:$0xff]  ;;  %v8910_v27 = vld [vmem:[%s11963_s3 + $0x48] sm:$0xff] }
 0x1e1   :  { %13557 = vst [vmem:[#allocation33_spill] sm:$0xff] %v8873_v60  ;;  %13558 = vst [vmem:[#allocation86_spill] sm:$0xff] %v8879_v1  ;;  %v8905_v18 = vmul.f32 %v13565_v21, %v13556_v44  ;;  %v8914_v19 = vmul.f32 %v8910_v27, %v13556_v44  ;;  %v8919_v30 = vld [vmem:[%s11963_s3 + $0x50] sm:$0xff]  ;;  %v13571_v21 = vld [vmem:[#allocation98_spill] sm:$0xff] }
 0x1e2   :  { %13560 = vst [vmem:[#allocation34_spill] sm:$0xff] %v8883_v17  ;;  %13562 = vst [vmem:[#allocation87_spill] sm:$0xff] %v8892_v28  ;;  %v8927_v14 = vmul.f32 %v13571_v21, %v13556_v44  ;;  %v8932_v52 = vld [vmem:[%s11963_s3 + $0x60] sm:$0xff]  ;;  %v8941_v10 = vld [vmem:[%s11963_s3 + $0x68] sm:$0xff] }
 0x1e3   :  { %13563 = vst [vmem:[#allocation37_spill] sm:$0xff] %v8897_v40  ;;  %13564 = vst [vmem:[#allocation88_spill] sm:$0xff] %v8901_v33  ;;  %v8923_v40 = vmul.f32 %v8919_v30, %v13556_v44  ;;  %v13577_v21 = vld [vmem:[#allocation149_spill] sm:$0xff]  ;;  %v8954_v23 = vld [vmem:[%s11963_s3 + $0x78] sm:$0xff] }
 0x1e4   :  { %13566 = vst [vmem:[#allocation39_spill] sm:$0xff] %v8905_v18  ;;  %13567 = vst [vmem:[#allocation40_spill] sm:$0xff] %v8910_v27  ;;  %v8936_v27 = vmul.f32 %v8932_v52, %v13556_v44  ;;  %v8949_v55 = vmul.f32 %v13577_v21, %v13556_v44  ;;  %v8963_v49 = vld [vmem:[%s11963_s3 + $0x80] sm:$0xff]  ;;  %v13583_v21 = vld [vmem:[#allocation99_spill] sm:$0xff] }
 0x1e5   :  { %13568 = vst [vmem:[#allocation38_spill] sm:$0xff] %v8914_v19  ;;  %13569 = vst [vmem:[#allocation89_spill] sm:$0xff] %v8919_v30  ;;  %v8945_v30 = vmul.f32 %v8941_v10, %v13556_v44  ;;  %v8971_v12 = vmul.f32 %v13583_v21, %v13556_v44  ;;  %v8976_v56 = vld [vmem:[%s11963_s3 + $0x90] sm:$0xff]  ;;  %v8985_v4 = vld [vmem:[%s11963_s3 + $0x98] sm:$0xff] }
 0x1e6   :  { %13570 = vst [vmem:[#allocation41_spill] sm:$0xff] %v8923_v40  ;;  %13572 = vst [vmem:[#allocation42_spill] sm:$0xff] %v8927_v14  ;;  %v13589_v21 = vld [vmem:[#allocation100_spill] sm:$0xff]  ;;  %v8998_v29 = vld [vmem:[%s11963_s3 + $0xa8] sm:$0xff] }
 0x1e7   :  { %13573 = vst [vmem:[#allocation90_spill] sm:$0xff] %v8932_v52  ;;  %13574 = vst [vmem:[#allocation48_spill] sm:$0xff] %v8936_v27  ;;  %v8958_v52 = vmul.f32 %v8954_v23, %v13556_v44  ;;  %v8993_v8 = vmul.f32 %v13589_v21, %v13556_v44  ;;  %v9007_v48 = vld [vmem:[%s11963_s3 + $0xb0] sm:$0xff]  ;;  %v13595_v21 = vld [vmem:[#allocation5_spill] sm:$0xff] }
 0x1e8   :  { %13575 = vst [vmem:[#allocation49_spill] sm:$0xff] %v8941_v10  ;;  %13576 = vst [vmem:[#allocation153_spill] sm:$0xff] %v8945_v30  ;;  %v8967_v10 = vmul.f32 %v8963_v49, %v13556_v44  ;;  %v9015_v47 = vmul.f32 %v13595_v21, %v13556_v44  ;;  %v9020_v45 = vld [vmem:[%s11963_s3 + $0xc0] sm:$0xff]  ;;  %v9029_v42 = vld [vmem:[%s11963_s3 + $0xc8] sm:$0xff] }
 0x1e9   :  { %13578 = vst [vmem:[#allocation117_spill] sm:$0xff] %v8949_v55  ;;  %13579 = vst [vmem:[#allocation154_spill] sm:$0xff] %v8954_v23  ;;  %v8980_v23 = vmul.f32 %v8976_v56, %v13556_v44  ;;  %v13601_v21 = vld [vmem:[#allocation101_spill] sm:$0xff]  ;;  %v9042_v2 = vld [vmem:[%s11963_s3 + $0xd8] sm:$0xff] }
 0x1ea   :  { %13580 = vst [vmem:[#allocation118_spill] sm:$0xff] %v8958_v52  ;;  %13581 = vst [vmem:[#allocation155_spill] sm:$0xff] %v8963_v49  ;;  %v8989_v49 = vmul.f32 %v8985_v4, %v13556_v44  ;;  %v9037_v57 = vmul.f32 %v13601_v21, %v13556_v44  ;;  %v9051_v38 = vld [vmem:[%s11963_s3 + $0xe0] sm:$0xff]  ;;  %v13607_v21 = vld [vmem:[#allocation102_spill] sm:$0xff] }
 0x1eb   :  { %13582 = vst [vmem:[#allocation119_spill] sm:$0xff] %v8967_v10  ;;  %13584 = vst [vmem:[#allocation156_spill] sm:$0xff] %v8971_v12  ;;  %v9059_v41 = vmul.f32 %v13607_v21, %v13556_v44  ;;  %v9064_v0 = vld [vmem:[%s11963_s3 + $0xf0] sm:$0xff]  ;;  %v9073_v54 = vld [vmem:[%s11963_s3 + $0xf8] sm:$0xff] }
 0x1ec   :  { %13585 = vst [vmem:[#allocation120_spill] sm:$0xff] %v8976_v56  ;;  %13586 = vst [vmem:[#allocation157_spill] sm:$0xff] %v8980_v23  ;;  %v9002_v56 = vmul.f32 %v8998_v29, %v13556_v44  ;;  %v13613_v21 = vld [vmem:[#allocation83_spill] sm:$0xff]  ;;  %v13651_v27 = vld [vmem:[#allocation96_spill] sm:$0xff] }
 0x1ed   :  { %13587 = vst [vmem:[#allocation125_spill] sm:$0xff] %v8985_v4  ;;  %13588 = vst [vmem:[#allocation158_spill] sm:$0xff] %v8989_v49  ;;  %v9011_v4 = vmul.f32 %v9007_v48, %v13556_v44  ;;  %v13652_v14 = vld [vmem:[#allocation44_spill] sm:$0xff]  ;;  %v13653_v40 = vld [vmem:[#allocation173_spill] sm:$0xff] }
 0x1ee   :  { %13590 = vst [vmem:[#allocation126_spill] sm:$0xff] %v8993_v8  ;;  %13591 = vst [vmem:[#allocation159_spill] sm:$0xff] %v8998_v29  ;;  %v9024_v29 = vmul.f32 %v9020_v45, %v13556_v44  ;;  %v13654_v19 = vld [vmem:[#allocation13_spill] sm:$0xff]  ;;  %v13655_v18 = vld [vmem:[#allocation130_spill] sm:$0xff] }
 0x1ef   :  { %13592 = vst [vmem:[#allocation127_spill] sm:$0xff] %v9002_v56  ;;  %13593 = vst [vmem:[#allocation128_spill] sm:$0xff] %v9007_v48  ;;  %v9033_v48 = vmul.f32 %v9029_v42, %v13556_v44  ;;  %v13640_v56 = vld [vmem:[#allocation19_spill] sm:$0xff]  ;;  %v13664_v58 = vld [vmem:[#allocation73_spill] sm:$0xff] }
 0x1f0   :  { %13594 = vst [vmem:[#allocation161_spill] sm:$0xff] %v9011_v4  ;;  %13596 = vst [vmem:[#allocation132_spill] sm:$0xff] %v9015_v47  ;;  %v13639_v47 = vld [vmem:[#allocation111_spill] sm:$0xff]  ;;  %v13665_v46 = vld [vmem:[#allocation45_spill] sm:$0xff] }
 0x1f1   :  { %13597 = vst [vmem:[#allocation162_spill] sm:$0xff] %v9020_v45  ;;  %13598 = vst [vmem:[#allocation133_spill] sm:$0xff] %v9024_v29  ;;  %v9046_v45 = vmul.f32 %v9042_v2, %v13556_v44  ;;  %v13656_v1 = vld [vmem:[#allocation131_spill] sm:$0xff] }
 0x1f2   :  { %13599 = vst [vmem:[#allocation163_spill] sm:$0xff] %v9029_v42  ;;  %13600 = vst [vmem:[#allocation134_spill] sm:$0xff] %v9033_v48  ;;  %v9055_v42 = vmul.f32 %v9051_v38, %v13556_v44  ;;  %v13637_v48 = vld [vmem:[#allocation151_spill] sm:$0xff] }
 0x1f3   :  { %13602 = vst [vmem:[#allocation106_spill] sm:$0xff] %v9037_v57  ;;  %13603 = vst [vmem:[#allocation164_spill] sm:$0xff] %v9042_v2  ;;  %v9068_v2 = vmul.f32 %v9064_v0, %v13556_v44 }
 0x1f4   :  { %13604 = vst [vmem:[#allocation137_spill] sm:$0xff] %v9046_v45  ;;  %13605 = vst [vmem:[#allocation135_spill] sm:$0xff] %v9051_v38  ;;  %v9077_v38 = vmul.f32 %v9073_v54, %v13556_v44  ;;  %v13636_v45 = vld [vmem:[#allocation55_spill] sm:$0xff] }
 0x1f5   :  { %13606 = vst [vmem:[#allocation7_spill] sm:$0xff] %v9055_v42  ;;  %13608 = vst [vmem:[#allocation165_spill] sm:$0xff] %v9059_v41  ;;  %v9081_v41 = vmul.f32 %v13613_v21, %v13556_v44  ;;  %v9086_v42 = vld [vmem:[%s11963_s3 + $0x108] sm:$0xff]  ;;  %v13619_v21 = vld [vmem:[#allocation103_spill] sm:$0xff] }
 0x1f6   :  { %13609 = vst [vmem:[#allocation138_spill] sm:$0xff] %v9064_v0  ;;  %13610 = vst [vmem:[#allocation139_spill] sm:$0xff] %v9068_v2  ;;  %v9090_v0 = vmul.f32 %v9086_v42, %v13556_v44  ;;  %v9095_v2 = vld [vmem:[%s11963_s3 + $0x110] sm:$0xff] }
 0x1f7   :  { %13611 = vst [vmem:[#allocation107_spill] sm:$0xff] %v9073_v54  ;;  %13612 = vst [vmem:[#allocation166_spill] sm:$0xff] %v9077_v38  ;;  %v9099_v54 = vmul.f32 %v9095_v2, %v13556_v44  ;;  %v9108_v38 = vld [vmem:[%s11963_s3 + $0x120] sm:$0xff] }
 0x1f8   :  { %13614 = vst [vmem:[#allocation93_spill] sm:$0xff] %v9081_v41  ;;  %13615 = vst [vmem:[#allocation167_spill] sm:$0xff] %v9086_v42  ;;  %v9103_v41 = vmul.f32 %v13619_v21, %v13556_v44  ;;  %v9112_v42 = vmul.f32 %v9108_v38, %v13556_v44  ;;  %v13625_v21 = vld [vmem:[#allocation104_spill] sm:$0xff] }
 0x1f9   :  { %13616 = vst [vmem:[#allocation108_spill] sm:$0xff] %v9090_v0  ;;  %13617 = vst [vmem:[#allocation141_spill] sm:$0xff] %v9095_v2  ;;  %v9117_v0 = vld [vmem:[%s11963_s3 + $0x128] sm:$0xff] }
 0x1fa   :  { %13618 = vst [vmem:[#allocation91_spill] sm:$0xff] %v9099_v54  ;;  %13620 = vst [vmem:[#allocation168_spill] sm:$0xff] %v9103_v41  ;;  %v9121_v2 = vmul.f32 %v9117_v0, %v13556_v44  ;;  %v9125_v41 = vmul.f32 %v13625_v21, %v13556_v44  ;;  %v9130_v54 = vld [vmem:[%s11963_s3 + $0x138] sm:$0xff]  ;;  %v13631_v21 = vld [vmem:[#allocation6_spill] sm:$0xff] }
 0x1fb   :  { %13621 = vst [vmem:[#allocation8_spill] sm:$0xff] %v9108_v38  ;;  %13622 = vst [vmem:[#allocation160_spill] sm:$0xff] %v9112_v42  ;;  %v9134_v38 = vmul.f32 %v9130_v54, %v13556_v44  ;;  %v9139_v42 = vld [vmem:[%s11963_s3 + $0x140] sm:$0xff] }
 0x1fc   :  { %13623 = vst [vmem:[#allocation94_spill] sm:$0xff] %v9117_v0  ;;  %13624 = vst [vmem:[#allocation140_spill] sm:$0xff] %v9121_v2  ;;  %v9143_v0 = vmul.f32 %v9139_v42, %v13556_v44  ;;  %v9152_v2 = vld [vmem:[%s11963_s3 + $0x150] sm:$0xff] }
 0x1fd   :  { %13626 = vst [vmem:[#allocation109_spill] sm:$0xff] %v9125_v41  ;;  %13627 = vst [vmem:[#allocation142_spill] sm:$0xff] %v9130_v54  ;;  %v9147_v41 = vmul.f32 %v13631_v21, %v13556_v44  ;;  %v9156_v54 = vmul.f32 %v9152_v2, %v13556_v44  ;;  %v13635_v21 = vld [vmem:[#allocation9_spill] sm:$0xff] }
 0x1fe   :  { %13628 = vst [vmem:[#allocation95_spill] sm:$0xff] %v9134_v38  ;;  %13629 = vst [vmem:[#allocation169_spill] sm:$0xff] %v9139_v42  ;;  %v9161_v38 = vld [vmem:[%s11960_s0 + $0x6] ss:$0 sm:$0xff] }
 0x1ff   :  { %13630 = vst [vmem:[#allocation114_spill] sm:$0xff] %v9143_v0  ;;  %13632 = vst [vmem:[#allocation145_spill] sm:$0xff] %v9147_v41  ;;  %v2372_v41 = vmul.f32 %v13635_v21, %v9161_v38  ;;  %v2373_v57 = vmul.f32 %v13636_v45, %v9161_v38  ;;  %v2374_v29 = vmul.f32 %v13637_v48, %v9161_v38  ;;  %v13641_v0 = vld [vmem:[#allocation152_spill] sm:$0xff]  ;;  %v13642_v21 = vld [vmem:[#allocation129_spill] sm:$0xff] }
 0x200   :  { %13633 = vst [vmem:[#allocation97_spill] sm:$0xff] %v9152_v2  ;;  %13634 = vst [vmem:[#allocation170_spill] sm:$0xff] %v9156_v54  ;;  %v13638_v2 = vld [vmem:[#allocation18_spill] sm:$0xff]  ;;  %v2376_v4 = vmul.f32 %v13639_v47, %v9161_v38  ;;  %v2377_v42 = vmul.f32 %v13640_v56, %v9161_v38  ;;  %v2378_v8 = vmul.f32 %v13641_v0, %v9161_v38  ;;  %v13643_v45 = vld [vmem:[#allocation15_spill] sm:$0xff] }
 0x201   :  { %v2375_v54 = vmul.f32 %v13638_v2, %v9161_v38  ;;  %v2379_v49 = vmul.f32 %v13642_v21, %v9161_v38  ;;  %v2380_v23 = vmul.f32 %v13643_v45, %v9161_v38  ;;  %v13644_v48 = vld [vmem:[#allocation56_spill] sm:$0xff]  ;;  %v13646_v47 = vld [vmem:[#allocation59_spill] sm:$0xff]  ;;  %v13647_v56 = vld [vmem:[#allocation65_spill] sm:$0xff]  ;;  %v2391_v60 = vmul.f32 %v13655_v18, %v9161_v38 }
 0x202   :  { %v2381_v12 = vmul.f32 %v13644_v48, %v9161_v38  ;;  %v13645_v2 = vld [vmem:[#allocation92_spill] sm:$0xff]  ;;  %v2383_v52 = vmul.f32 %v13646_v47, %v9161_v38  ;;  %v2384_v55 = vmul.f32 %v13647_v56, %v9161_v38  ;;  %v13648_v0 = vld [vmem:[#allocation66_spill] sm:$0xff]  ;;  %v2388_v47 = vmul.f32 %v13652_v14, %v9161_v38  ;;  %v9225_v18 = vld [vmem:[%s11963_s3 + $0x350] sm:$0xff] }
 0x203   :  { %v2382_v10 = vmul.f32 %v13645_v2, %v9161_v38  ;;  %v2385_v30 = vmul.f32 %v13648_v0, %v9161_v38  ;;  %v9196_v21 = vld [vmem:[%s11963_s3 + $0x348] sm:$0xff]  ;;  %v13650_v45 = vld [vmem:[#allocation72_spill] sm:$0xff]  ;;  %v2387_v2 = vmul.f32 %v13651_v27, %v9161_v38  ;;  %v2389_v56 = vmul.f32 %v13653_v40, %v9161_v38  ;;  %13662 = vst [vmem:[#allocation146_spill] sm:$0xff] %v9225_v18 }
 0x204   :  { %13649 = vst [vmem:[#allocation10_spill] sm:$0xff] %v9196_v21  ;;  %v2386_v48 = vmul.f32 %v13650_v45, %v9161_v38  ;;  %v2390_v0 = vmul.f32 %v13654_v19, %v9161_v38  ;;  %v2392_v33 = vmul.f32 %v13656_v1, %v9161_v38  ;;  %v13657_v45 = vld [vmem:[#allocation136_spill] sm:$0xff]  ;;  %v13658_v27 = vld [vmem:[#allocation150_spill] sm:$0xff]  ;;  %v13663_v1 = vld [vmem:[#allocation71_spill] sm:$0xff]  ;;  %v9238_v53 = vadd.f32 %v2372_v41, %v8681_v34 }
 0x205   :  { %v2393_v28 = vmul.f32 %v13657_v45, %v9161_v38  ;;  %v2394_v17 = vmul.f32 %v13658_v27, %v9161_v38  ;;  %v13659_v14 = vld [vmem:[#allocation58_spill] sm:$0xff]  ;;  %v13661_v19 = vld [vmem:[#allocation64_spill] sm:$0xff]  ;;  %v2398_v45 = vmul.f32 %v13663_v1, %v9161_v38  ;;  %v2399_v27 = vmul.f32 %v13664_v58, %v9161_v38 }
 0x206   :  { %v2395_v44 = vmul.f32 %v13659_v14, %v9161_v38  ;;  %v13660_v40 = vld [vmem:[#allocation50_spill] sm:$0xff]  ;;  %v2397_v6 = vmul.f32 %v13661_v19, %v9161_v38  ;;  %v2400_v14 = vmul.f32 %v13665_v46, %v9161_v38  ;;  %v2402_v19 = vmul.f32 %v9161_v38, %v9225_v18 }
 0x207   :  { %v2396_v11 = vmul.f32 %v13660_v40, %v9161_v38  ;;  %v2401_v40 = vmul.f32 %v9161_v38, %v9196_v21  ;;  %v9241_v31 = vadd.f32 %v2373_v57, %v8684_v63  ;;  %v9244_v1 = vadd.f32 %v2374_v29, %v8687_v61 }
 0x208   :  { %v9247_v58 = vadd.f32 %v2375_v54, %v8690_v51  ;;  %v9250_v46 = vadd.f32 %v2376_v4, %v8693_v50  ;;  %v9253_v21 = vadd.f32 %v2377_v42, %v8696_v43  ;;  %v9256_v18 = vadd.f32 %v2378_v8, %v8699_v24  ;;  %v13700_v8 = vld [vmem:[#allocation34_spill] sm:$0xff] }
 0x209   :  { %v9259_v34 = vadd.f32 %v2379_v49, %v8702_v37  ;;  %v9262_v63 = vadd.f32 %v2380_v23, %v8705_v3  ;;  %v9265_v61 = vadd.f32 %v2381_v12, %v8708_v36  ;;  %v9268_v51 = vadd.f32 %v2382_v10, %v8711_v16  ;;  %v13702_v49 = vld [vmem:[#allocation14_spill] sm:$0xff] }
 0x20a   :  { %v9271_v50 = vadd.f32 %v2383_v52, %v8714_v20  ;;  %v9274_v43 = vadd.f32 %v2384_v55, %v8717_v9  ;;  %v9277_v24 = vadd.f32 %v2385_v30, %v8720_v15  ;;  %v9280_v37 = vadd.f32 %v2386_v48, %v8723_v26  ;;  %v9346_v48 = vld [vmem:[%s11963_s3 + $0x168] sm:$0xff]  ;;  %v9369_v55 = vld [vmem:[%s11963_s3 + $0x180] sm:$0xff] }
 0x20b   :  { %13666 = vst [vmem:[#allocation46_spill] sm:$0xff] %v9259_v34  ;;  %13667 = vst [vmem:[#allocation171_spill] sm:$0xff] %v9262_v63  ;;  %v9283_v3 = vadd.f32 %v2387_v2, %v8726_v13  ;;  %v9286_v36 = vadd.f32 %v2388_v47, %v8729_v25  ;;  %v9289_v16 = vadd.f32 %v2389_v56, %v8732_v39  ;;  %v2049_v4 = vrot.slane %v13700_v8, 2  ;;  %v9356_v56 = vld [vmem:[%s11963_s3 + $0x170] sm:$0xff]  ;;  %v9378_v52 = vld [vmem:[%s11963_s3 + $0x188] sm:$0xff] }
 0x20c   :  { %13668 = vst [vmem:[#allocation115_spill] sm:$0xff] %v9265_v61  ;;  %13669 = vst [vmem:[#allocation147_spill] sm:$0xff] %v9268_v51  ;;  %v9292_v20 = vadd.f32 %v2390_v0, %v8735_v22  ;;  %v9295_v9 = vadd.f32 %v2391_v60, %v8738_v35  ;;  %v9298_v15 = vadd.f32 %v2392_v33, %v8741_v7  ;;  %v13684_v22 = vld [vmem:[#allocation51_spill] sm:$0xff]  ;;  %v13686_v35 = vld [vmem:[#allocation53_spill] sm:$0xff] }
 0x20d   :  { %13670 = vst [vmem:[#allocation52_spill] sm:$0xff] %v9271_v50  ;;  %13671 = vst [vmem:[#allocation172_spill] sm:$0xff] %v9274_v43  ;;  %v9301_v26 = vadd.f32 %v2393_v28, %v8744_v59  ;;  %v9304_v13 = vadd.f32 %v2394_v17, %v8747_v62  ;;  %v9307_v25 = vadd.f32 %v2395_v44, %v8750_v5  ;;  %v13688_v7 = vld [vmem:[#allocation60_spill] sm:$0xff]  ;;  %v13690_v59 = vld [vmem:[#allocation62_spill] sm:$0xff] }
 0x20e   :  { %13672 = vst [vmem:[#allocation116_spill] sm:$0xff] %v9277_v24  ;;  %13673 = vst [vmem:[#allocation148_spill] sm:$0xff] %v9280_v37  ;;  %v9310_v39 = vadd.f32 %v2396_v11, %v8753_v32  ;;  %v9313_v54 = vadd.f32 %v2397_v6, %v13684_v22  ;;  %v9316_v0 = vadd.f32 %v2398_v45, %v13686_v35  ;;  %v13692_v62 = vld [vmem:[#allocation67_spill] sm:$0xff]  ;;  %v13694_v5 = vld [vmem:[#allocation69_spill] sm:$0xff] }
 0x20f   :  { %13674 = vst [vmem:[#allocation54_spill] sm:$0xff] %v9283_v3  ;;  %13675 = vst [vmem:[#allocation85_spill] sm:$0xff] %v9286_v36  ;;  %v9319_v41 = vadd.f32 %v2399_v27, %v13688_v7  ;;  %v9322_v2 = vadd.f32 %v2400_v14, %v13690_v59  ;;  %v9325_v57 = vadd.f32 %v2401_v40, %v13692_v62  ;;  %v9333_v32 = vld [vmem:[%s11963_s3 + $0x158] sm:$0xff]  ;;  %v13698_v45 = vld [vmem:[#allocation105_spill] sm:$0xff] }
 0x210   :  { %13676 = vst [vmem:[#allocation11_spill] sm:$0xff] %v9289_v16  ;;  %13677 = vst [vmem:[#allocation113_spill] sm:$0xff] %v9292_v20  ;;  %v9328_v42 = vadd.f32 %v2402_v19, %v13694_v5  ;;  %v13697_v6 = vld [vmem:[#allocation16_spill] sm:$0xff]  ;;  %v13705_v30 = vld [vmem:[#allocation57_spill] sm:$0xff] }
 0x211   :  { %13678 = vst [vmem:[#allocation61_spill] sm:$0xff] %v9295_v9  ;;  %13679 = vst [vmem:[#allocation121_spill] sm:$0xff] %v9298_v15  ;;  %v9337_v11 = vmul.f32 %v9333_v32, %v13697_v6  ;;  %v9341_v47 = vmul.f32 %v13698_v45, %v13697_v6  ;;  %v9350_v29 = vmul.f32 %v9346_v48, %v13697_v6  ;;  %v4164_v60 = vld [vmem:[%s11963_s3 + $0x1c8] sm:$0xff]  ;;  %v13706_v19 = vld [vmem:[#allocation87_spill] sm:$0xff] }
 0x212   :  { %13680 = vst [vmem:[#allocation122_spill] sm:$0xff] %v9301_v26  ;;  %13681 = vst [vmem:[#allocation143_spill] sm:$0xff] %v9304_v13  ;;  %v9360_v12 = vmul.f32 %v9356_v56, %v13697_v6  ;;  %v9364_v23 = vmul.f32 %v13702_v49, %v13697_v6  ;;  %v9373_v10 = vmul.f32 %v9369_v55, %v13697_v6  ;;  %v2051_v28 = vrot.slane %v13706_v19, 2  ;;  %v13707_v40 = vld [vmem:[#allocation88_spill] sm:$0xff]  ;;  %v13708_v27 = vld [vmem:[#allocation86_spill] sm:$0xff] }
 0x213   :  { %13682 = vst [vmem:[#allocation144_spill] sm:$0xff] %v9307_v25  ;;  %13683 = vst [vmem:[#allocation98_spill] sm:$0xff] %v9310_v39  ;;  %v9382_v14 = vmul.f32 %v9378_v52, %v13697_v6  ;;  %v9386_v44 = vmul.f32 %v13697_v6, %v13705_v30  ;;  %v9392_v17 = vmul.f32 %v4164_v60, %v13697_v6  ;;  %v2052_v33 = vrot.slane %v13707_v40, 2  ;;  %v13710_v35 = vld [vmem:[#allocation33_spill] sm:$0xff]  ;;  %v13712_v62 = vld [vmem:[#allocation39_spill] sm:$0xff] }
 0x214   :  { %13685 = vst [vmem:[#allocation149_spill] sm:$0xff] %v9313_v54  ;;  %13687 = vst [vmem:[#allocation99_spill] sm:$0xff] %v9316_v0  ;;  %v13709_v22 = vrot.slane %v13708_v27, 2  ;;  %v13711_v7 = vrot.slane %v13710_v35, 2  ;;  %v2054_v5 = vrot.slane %v13712_v62, 2  ;;  %v13713_v45 = vld [vmem:[#allocation38_spill] sm:$0xff] }
 0x215   :  { %13689 = vst [vmem:[#allocation100_spill] sm:$0xff] %v9319_v41  ;;  %13691 = vst [vmem:[#allocation5_spill] sm:$0xff] %v9322_v2  ;;  %v2056_v8 = vrot.slane %v13713_v45, 2  ;;  %v13714_v49 = vld [vmem:[#allocation41_spill] sm:$0xff]  ;;  %v13716_v19 = vld [vmem:[#allocation42_spill] sm:$0xff] }
 0x216   :  { %13693 = vst [vmem:[#allocation101_spill] sm:$0xff] %v9325_v57  ;;  %13695 = vst [vmem:[#allocation102_spill] sm:$0xff] %v9328_v42  ;;  %v9401_v59 = vsel %vm942_vm1, %v13711_v7, %v13709_v22  ;;  %v2057_v30 = vrot.slane %v13714_v49, 2  ;;  %v13715_v6 = vmov %v13709_v22  ;;  %v2059_v40 = vrot.slane %v13716_v19, 2  ;;  %v13717_v42 = vld [vmem:[#allocation48_spill] sm:$0xff]  ;;  %v13718_v2 = vld [vmem:[#allocation153_spill] sm:$0xff] }
 0x217   :  { %13696 = vst [vmem:[#allocation83_spill] sm:$0xff] %v9333_v32  ;;  %13699 = vst [vmem:[#allocation103_spill] sm:$0xff] %v9346_v48  ;;  %v9409_v60 = vsel %vm942_vm1, %v13715_v6, %v2049_v4  ;;  %v2061_v57 = vrot.slane %v13717_v42, 2  ;;  %v2062_v35 = vrot.slane %v13718_v2, 2  ;;  %v13719_v41 = vld [vmem:[#allocation117_spill] sm:$0xff]  ;;  %v13720_v7 = vld [vmem:[#allocation118_spill] sm:$0xff] }
 0x218   :  { %13701 = vst [vmem:[#allocation104_spill] sm:$0xff] %v9356_v56  ;;  %13703 = vst [vmem:[#allocation6_spill] sm:$0xff] %v9369_v55  ;;  %v2064_v22 = vrot.slane %v13719_v41, 2  ;;  %v2066_v0 = vrot.slane %v13720_v7, 2  ;;  %v13721_v62 = vld [vmem:[#allocation119_spill] sm:$0xff]  ;;  %v13722_v45 = vld [vmem:[#allocation156_spill] sm:$0xff] }
 0x219   :  { %13704 = vst [vmem:[#allocation51_spill] sm:$0xff] %v9378_v52  ;;  %v2067_v54 = vrot.slane %v13721_v62, 2  ;;  %v2069_v39 = vrot.slane %v13722_v45, 2  ;;  %v13723_v49 = vld [vmem:[#allocation157_spill] sm:$0xff]  ;;  %v13724_v27 = vld [vmem:[#allocation158_spill] sm:$0xff]  ;;  %v13726_v26 = vld [vmem:[#allocation127_spill] sm:$0xff]  ;;  %v2053_v62 = vsel %vm942_vm1, %v2051_v28, %v2052_v33 }
 0x21a   :  { %v2071_v25 = vrot.slane %v13723_v49, 2  ;;  %v2072_v13 = vrot.slane %v13724_v27, 2  ;;  %v13725_v4 = vld [vmem:[#allocation126_spill] sm:$0xff]  ;;  %v2076_v19 = vrot.slane %v13726_v26, 2  ;;  %v13727_v15 = vld [vmem:[#allocation161_spill] sm:$0xff]  ;;  %v13728_v9 = vld [vmem:[#allocation132_spill] sm:$0xff]  ;;  %v2058_v26 = vsel %vm942_vm1, %v2056_v8, %v2057_v30 }
 0x21b   :  { %v2074_v6 = vrot.slane %v13725_v4, 2  ;;  %v2077_v42 = vrot.slane %v13727_v15, 2  ;;  %v2079_v2 = vrot.slane %v13728_v9, 2  ;;  %v13729_v20 = vld [vmem:[#allocation133_spill] sm:$0xff]  ;;  %v13730_v16 = vld [vmem:[#allocation134_spill] sm:$0xff]  ;;  %v13733_v37 = vld [vmem:[#allocation7_spill] sm:$0xff]  ;;  %v2055_v4 = vsel %vm942_vm1, %v2052_v33, %v2054_v5 }
 0x21c   :  { %v2081_v41 = vrot.slane %v13729_v20, 2  ;;  %v2082_v7 = vrot.slane %v13730_v16, 2  ;;  %v13731_v36 = vld [vmem:[#allocation106_spill] sm:$0xff]  ;;  %v13732_v3 = vld [vmem:[#allocation137_spill] sm:$0xff]  ;;  %v2087_v27 = vrot.slane %v13733_v37, 2  ;;  %v2060_v15 = vsel %vm942_vm1, %v2057_v30, %v2059_v40  ;;  %v13738_v24 = vld [vmem:[#allocation108_spill] sm:$0xff] }
 0x21d   :  { %v2084_v45 = vrot.slane %v13731_v36, 2  ;;  %v2086_v49 = vrot.slane %v13732_v3, 2  ;;  %v2063_v9 = vsel %vm942_vm1, %v2061_v57, %v2062_v35  ;;  %v2065_v20 = vsel %vm942_vm1, %v2062_v35, %v2064_v22  ;;  %v13734_v30 = vld [vmem:[#allocation165_spill] sm:$0xff]  ;;  %v13735_v35 = vld [vmem:[#allocation139_spill] sm:$0xff]  ;;  %v13736_v22 = vld [vmem:[#allocation166_spill] sm:$0xff] }
 0x21e   :  { %v2068_v16 = vsel %vm942_vm1, %v2066_v0, %v2067_v54  ;;  %v2070_v28 = vsel %vm942_vm1, %v2067_v54, %v2069_v39  ;;  %v2073_v36 = vsel %vm942_vm1, %v2071_v25, %v2072_v13  ;;  %v2075_v3 = vsel %vm942_vm1, %v2072_v13, %v2074_v6  ;;  %v13737_v54 = vld [vmem:[#allocation93_spill] sm:$0xff]  ;;  %v13739_v6 = vld [vmem:[#allocation91_spill] sm:$0xff]  ;;  %v13740_v43 = vld [vmem:[#allocation168_spill] sm:$0xff] }
 0x21f   :  { %v2078_v37 = vsel %vm942_vm1, %v2076_v19, %v2077_v42  ;;  %v2080_v33 = vsel %vm942_vm1, %v2077_v42, %v2079_v2  ;;  %v2083_v5 = vsel %vm942_vm1, %v2081_v41, %v2082_v7  ;;  %v2085_v8 = vsel %vm942_vm1, %v2082_v7, %v2084_v45  ;;  %v13741_v2 = vld [vmem:[#allocation160_spill] sm:$0xff]  ;;  %v13743_v45 = vld [vmem:[#allocation109_spill] sm:$0xff]  ;;  %v13744_v51 = vld [vmem:[#allocation95_spill] sm:$0xff] }
 0x220   :  { %v2088_v57 = vsel %vm942_vm1, %v2086_v49, %v2087_v27  ;;  %v2089_v40 = vrot.slane %v13734_v30, 2  ;;  %v2091_v0 = vrot.slane %v13735_v35, 2  ;;  %v2092_v39 = vrot.slane %v13736_v22, 2  ;;  %v13742_v50 = vld [vmem:[#allocation140_spill] sm:$0xff]  ;;  %v13745_v61 = vld [vmem:[#allocation114_spill] sm:$0xff]  ;;  %v13746_v63 = vld [vmem:[#allocation145_spill] sm:$0xff] }
 0x221   :  { %v2094_v25 = vrot.slane %v13737_v54, 2  ;;  %v2096_v13 = vrot.slane %v13738_v24, 2  ;;  %v2097_v19 = vrot.slane %v13739_v6, 2  ;;  %v2099_v42 = vrot.slane %v13740_v43, 2  ;;  %v13747_v34 = vld [vmem:[#allocation170_spill] sm:$0xff] }
 0x222   :  { %v2101_v41 = vrot.slane %v13741_v2, 2  ;;  %v2102_v7 = vrot.slane %v13742_v50, 2  ;;  %v2104_v49 = vrot.slane %v13743_v45, 2  ;;  %v2106_v30 = vrot.slane %v13744_v51, 2 }
 0x223   :  { %v2107_v35 = vrot.slane %v13745_v61, 2  ;;  %v2109_v22 = vrot.slane %v13746_v63, 2  ;;  %v2111_v54 = vrot.slane %v13747_v34, 2  ;;  %v2112_v24 = vrot.slane %v9337_v11, 2 }
 0x224   :  { %v2114_v6 = vrot.slane %v9341_v47, 2  ;;  %v2116_v43 = vrot.slane %v9350_v29, 2  ;;  %v2117_v2 = vrot.slane %v9360_v12, 2  ;;  %v2119_v50 = vrot.slane %v9364_v23, 2 }
 0x225   :  { %v2121_v45 = vrot.slane %v9373_v10, 2  ;;  %v2122_v51 = vrot.slane %v9382_v14, 2  ;;  %v2124_v61 = vrot.slane %v9386_v44, 2  ;;  %v2090_v63 = vsel %vm942_vm1, %v2087_v27, %v2089_v40 }
 0x226   :  { %v2093_v34 = vsel %vm942_vm1, %v2091_v0, %v2092_v39  ;;  %v2095_v11 = vsel %vm942_vm1, %v2092_v39, %v2094_v25  ;;  %v2126_v47 = vrot.slane %v9392_v17, 2  ;;  %v2098_v29 = vsel %vm942_vm1, %v2096_v13, %v2097_v19  ;;  %v13748_v13 = vld [vmem:[#allocation81_spill] sm:$0xff] }
 0x227   :  { %v2100_v12 = vsel %vm942_vm1, %v2097_v19, %v2099_v42  ;;  %v2103_v23 = vsel %vm942_vm1, %v2101_v41, %v2102_v7  ;;  %v2105_v10 = vsel %vm942_vm1, %v2102_v7, %v2104_v49  ;;  %v2108_v14 = vsel %vm942_vm1, %v2106_v30, %v2107_v35  ;;  %v13750_v41 = vld [vmem:[#allocation63_spill] sm:$0xff] }
 0x228   :  { %v2110_v44 = vsel %vm942_vm1, %v2107_v35, %v2109_v22  ;;  %v2113_v27 = vsel %vm942_vm1, %v2111_v54, %v2112_v24  ;;  %v2115_v40 = vsel %vm942_vm1, %v2112_v24, %v2114_v6  ;;  %v2118_v0 = vsel %vm942_vm1, %v2116_v43, %v2117_v2  ;;  %v13751_v49 = vld [vmem:[#allocation123_spill] sm:$0xff]  ;;  %v13752_v35 = vld [vmem:[#allocation68_spill] sm:$0xff]  ;;  %v13754_v6 = vld [vmem:[#allocation70_spill] sm:$0xff] }
 0x229   :  { %v2120_v17 = vsel %vm942_vm1, %v2117_v2, %v2119_v50  ;;  %v2123_v39 = vsel %vm942_vm1, %v2121_v45, %v2122_v51  ;;  %v2125_v25 = vsel %vm942_vm1, %v2122_v51, %v2124_v61  ;;  %v13749_v19 = vrot.slane %v13748_v13, 2  ;;  %v13753_v54 = vld [vmem:[#allocation12_spill] sm:$0xff]  ;;  %v13756_v45 = vld [vmem:[#allocation75_spill] sm:$0xff] }
 0x22a   :  { %v9487_v7 = vadd.f32 %v9401_v59, %v13750_v41  ;;  %v9491_v30 = vadd.f32 %v9409_v60, %v13751_v49  ;;  %v9494_v22 = vadd.f32 %v2053_v62, %v13752_v35  ;;  %v9497_v24 = vadd.f32 %v2055_v4, %v13753_v54  ;;  %v13755_v2 = vld [vmem:[#allocation124_spill] sm:$0xff]  ;;  %v13757_v59 = vld [vmem:[#allocation47_spill] sm:$0xff]  ;;  %v13759_v62 = vld [vmem:[#allocation74_spill] sm:$0xff] }
 0x22b   :  { %v2128_v42 = vsel %vm942_vm1, %v2126_v47, %v13749_v19  ;;  %v9500_v43 = vadd.f32 %v2058_v26, %v13754_v6  ;;  %v9503_v50 = vadd.f32 %v2060_v15, %v13755_v2  ;;  %v9506_v51 = vadd.f32 %v2063_v9, %v13756_v45  ;;  %v13758_v60 = vld [vmem:[#allocation79_spill] sm:$0xff]  ;;  %v13761_v4 = vld [vmem:[#allocation77_spill] sm:$0xff]  ;;  %v13763_v26 = vld [vmem:[#allocation80_spill] sm:$0xff] }
 0x22c   :  { %v9509_v61 = vadd.f32 %v2065_v20, %v13757_v59  ;;  %v9512_v47 = vadd.f32 %v2068_v16, %v13758_v60  ;;  %v9515_v13 = vadd.f32 %v2070_v28, %v13759_v62  ;;  %v9518_v19 = vadd.f32 %v2073_v36, %v13761_v4  ;;  %v13765_v15 = vld [vmem:[#allocation82_spill] sm:$0xff]  ;;  %v13769_v20 = vld [vmem:[#allocation43_spill] sm:$0xff]  ;;  %v13771_v16 = vld [vmem:[#allocation76_spill] sm:$0xff] }
 0x22d   :  { %v9521_v41 = vadd.f32 %v2075_v3, %v13763_v26  ;;  %v9524_v49 = vadd.f32 %v2078_v37, %v13765_v15  ;;  %v13767_v9 = vld [vmem:[#allocation110_spill] sm:$0xff]  ;;  %v9530_v54 = vadd.f32 %v2083_v5, %v13769_v20  ;;  %v9533_v6 = vadd.f32 %v2085_v8, %v13771_v16  ;;  %v13773_v28 = vld [vmem:[#allocation112_spill] sm:$0xff]  ;;  %v13779_v37 = vld [vmem:[#allocation23_spill] sm:$0xff] }
 0x22e   :  { %13760 = vst [vmem:[#allocation53_spill] sm:$0xff] %v9515_v13  ;;  %13762 = vst [vmem:[#allocation60_spill] sm:$0xff] %v9518_v19  ;;  %v9527_v35 = vadd.f32 %v2080_v33, %v13767_v9  ;;  %v9536_v2 = vadd.f32 %v2088_v57, %v13773_v28  ;;  %v13775_v36 = vld [vmem:[#allocation20_spill] sm:$0xff]  ;;  %v13777_v3 = vld [vmem:[#allocation22_spill] sm:$0xff]  ;;  %v9545_v60 = vadd.f32 %v2095_v11, %v13779_v37 }
 0x22f   :  { %13764 = vst [vmem:[#allocation62_spill] sm:$0xff] %v9521_v41  ;;  %13766 = vst [vmem:[#allocation67_spill] sm:$0xff] %v9524_v49  ;;  %v9539_v45 = vadd.f32 %v2090_v63, %v13775_v36  ;;  %v9542_v59 = vadd.f32 %v2093_v34, %v13777_v3  ;;  %v13781_v33 = vld [vmem:[#allocation24_spill] sm:$0xff]  ;;  %v13783_v5 = vld [vmem:[#allocation25_spill] sm:$0xff] }
 0x230   :  { %13768 = vst [vmem:[#allocation69_spill] sm:$0xff] %v9527_v35  ;;  %13770 = vst [vmem:[#allocation16_spill] sm:$0xff] %v9530_v54  ;;  %v9548_v62 = vadd.f32 %v2098_v29, %v13781_v33  ;;  %v9551_v4 = vadd.f32 %v2100_v12, %v13783_v5  ;;  %v13785_v8 = vld [vmem:[#allocation29_spill] sm:$0xff]  ;;  %v13787_v57 = vld [vmem:[#allocation30_spill] sm:$0xff] }
 0x231   :  { %13772 = vst [vmem:[#allocation105_spill] sm:$0xff] %v9533_v6  ;;  %13774 = vst [vmem:[#allocation34_spill] sm:$0xff] %v9536_v2  ;;  %v9554_v26 = vadd.f32 %v2103_v23, %v13785_v8  ;;  %v9557_v15 = vadd.f32 %v2105_v10, %v13787_v57  ;;  %v13789_v63 = vld [vmem:[#allocation31_spill] sm:$0xff]  ;;  %v13791_v34 = vld [vmem:[#allocation32_spill] sm:$0xff] }
 0x232   :  { %13776 = vst [vmem:[#allocation14_spill] sm:$0xff] %v9539_v45  ;;  %13778 = vst [vmem:[#allocation57_spill] sm:$0xff] %v9542_v59  ;;  %v9560_v9 = vadd.f32 %v2108_v14, %v13789_v63  ;;  %v9563_v20 = vadd.f32 %v2110_v44, %v13791_v34  ;;  %v13793_v11 = vld [vmem:[#allocation36_spill] sm:$0xff]  ;;  %v13795_v29 = vld [vmem:[#allocation21_spill] sm:$0xff] }
 0x233   :  { %13780 = vst [vmem:[#allocation87_spill] sm:$0xff] %v9545_v60  ;;  %13782 = vst [vmem:[#allocation88_spill] sm:$0xff] %v9548_v62  ;;  %v9566_v16 = vadd.f32 %v2113_v27, %v13793_v11  ;;  %v9569_v28 = vadd.f32 %v2115_v40, %v13795_v29  ;;  %v13797_v12 = vld [vmem:[#allocation78_spill] sm:$0xff]  ;;  %v13801_v10 = vld [vmem:[#allocation27_spill] sm:$0xff] }
 0x234   :  { %13784 = vst [vmem:[#allocation86_spill] sm:$0xff] %v9551_v4  ;;  %13786 = vst [vmem:[#allocation33_spill] sm:$0xff] %v9554_v26  ;;  %v9572_v36 = vadd.f32 %v2118_v0, %v13797_v12  ;;  %v13799_v23 = vld [vmem:[#allocation26_spill] sm:$0xff]  ;;  %v9578_v37 = vadd.f32 %v2123_v39, %v13801_v10  ;;  %v13803_v14 = vld [vmem:[#allocation84_spill] sm:$0xff] }
 0x235   :  { %13788 = vst [vmem:[#allocation39_spill] sm:$0xff] %v9557_v15  ;;  %13790 = vst [vmem:[#allocation38_spill] sm:$0xff] %v9560_v9  ;;  %v9575_v3 = vadd.f32 %v2120_v17, %v13799_v23  ;;  %v9581_v33 = vadd.f32 %v2125_v25, %v13803_v14  ;;  %v13805_v44 = vld [vmem:[#allocation28_spill] sm:$0xff]  ;;  %v13807_v27 = vld [vmem:[#allocation35_spill] sm:$0xff] }
 0x236   :  { %13792 = vst [vmem:[#allocation41_spill] sm:$0xff] %v9563_v20  ;;  %13794 = vst [vmem:[#allocation42_spill] sm:$0xff] %v9566_v16  ;;  %v9584_v5 = vadd.f32 %v2128_v42, %v13805_v44  ;;  %v2339_v8 = vmul.f32 %v13807_v27, %v9161_v38  ;;  %v13808_v40 = vld [vmem:[#allocation37_spill] sm:$0xff]  ;;  %v13809_v0 = vld [vmem:[#allocation40_spill] sm:$0xff] }
 0x237   :  { %13796 = vst [vmem:[#allocation48_spill] sm:$0xff] %v9569_v28  ;;  %13798 = vst [vmem:[#allocation153_spill] sm:$0xff] %v9572_v36  ;;  %v2340_v57 = vmul.f32 %v13808_v40, %v9161_v38  ;;  %v2341_v63 = vmul.f32 %v13809_v0, %v9161_v38  ;;  %v13810_v17 = vld [vmem:[#allocation89_spill] sm:$0xff]  ;;  %v13811_v39 = vld [vmem:[#allocation90_spill] sm:$0xff] }
 0x238   :  { %13800 = vst [vmem:[#allocation117_spill] sm:$0xff] %v9575_v3  ;;  %13802 = vst [vmem:[#allocation118_spill] sm:$0xff] %v9578_v37  ;;  %v2342_v34 = vmul.f32 %v13810_v17, %v9161_v38  ;;  %v2343_v11 = vmul.f32 %v13811_v39, %v9161_v38  ;;  %v13812_v25 = vld [vmem:[#allocation49_spill] sm:$0xff]  ;;  %v13813_v42 = vld [vmem:[#allocation154_spill] sm:$0xff] }
 0x239   :  { %13804 = vst [vmem:[#allocation119_spill] sm:$0xff] %v9581_v33  ;;  %13806 = vst [vmem:[#allocation156_spill] sm:$0xff] %v9584_v5  ;;  %v2344_v29 = vmul.f32 %v13812_v25, %v9161_v38  ;;  %v2345_v12 = vmul.f32 %v13813_v42, %v9161_v38  ;;  %v13814_v23 = vld [vmem:[#allocation155_spill] sm:$0xff]  ;;  %v13815_v14 = vld [vmem:[#allocation120_spill] sm:$0xff] }
 0x23a   :  { %v2346_v10 = vmul.f32 %v13814_v23, %v9161_v38  ;;  %v2347_v44 = vmul.f32 %v13815_v14, %v9161_v38  ;;  %v13816_v5 = vld [vmem:[#allocation125_spill] sm:$0xff]  ;;  %v13818_v17 = vld [vmem:[#allocation159_spill] sm:$0xff]  ;;  %v13820_v39 = vld [vmem:[#allocation128_spill] sm:$0xff] }
 0x23b   :  { %v9606_v33 = vmul.f32 %v13816_v5, %v9161_v38  ;;  %v9610_v0 = vmul.f32 %v13818_v17, %v9161_v38  ;;  %v9614_v25 = vmul.f32 %v13820_v39, %v9161_v38  ;;  %v13822_v42 = vld [vmem:[#allocation162_spill] sm:$0xff]  ;;  %v13824_v23 = vld [vmem:[#allocation163_spill] sm:$0xff]  ;;  %v13826_v14 = vld [vmem:[#allocation164_spill] sm:$0xff] }
 0x23c   :  { %v9618_v40 = vmul.f32 %v13822_v42, %v9161_v38  ;;  %v9622_v27 = vmul.f32 %v13824_v23, %v9161_v38  ;;  %v9626_v5 = vmul.f32 %v13826_v14, %v9161_v38  ;;  %v13828_v37 = vld [vmem:[#allocation135_spill] sm:$0xff]  ;;  %v13830_v3 = vld [vmem:[#allocation138_spill] sm:$0xff]  ;;  %v9643_v23 = vld [vmem:[%s11963_s3 + $0x198] sm:$0xff] }
 0x23d   :  { %13817 = vst [vmem:[#allocation157_spill] sm:$0xff] %v9606_v33  ;;  %13819 = vst [vmem:[#allocation158_spill] sm:$0xff] %v9610_v0  ;;  %v9630_v17 = vmul.f32 %v13828_v37, %v9161_v38  ;;  %v9634_v39 = vmul.f32 %v13830_v3, %v9161_v38  ;;  %v13832_v36 = vld [vmem:[#allocation107_spill] sm:$0xff]  ;;  %v13837_v37 = vld [vmem:[#allocation141_spill] sm:$0xff] }
 0x23e   :  { %13821 = vst [vmem:[#allocation126_spill] sm:$0xff] %v9614_v25  ;;  %13823 = vst [vmem:[#allocation127_spill] sm:$0xff] %v9618_v40  ;;  %v9638_v42 = vmul.f32 %v13832_v36, %v9161_v38  ;;  %v13835_v14 = vld [vmem:[#allocation167_spill] sm:$0xff]  ;;  %v9651_v16 = vmul.f32 %v13837_v37, %v9161_v38  ;;  %v13839_v3 = vld [vmem:[#allocation8_spill] sm:$0xff] }
 0x23f   :  { %13825 = vst [vmem:[#allocation161_spill] sm:$0xff] %v9622_v27  ;;  %13827 = vst [vmem:[#allocation132_spill] sm:$0xff] %v9626_v5  ;;  %v9647_v28 = vmul.f32 %v13835_v14, %v9161_v38  ;;  %v9655_v20 = vmul.f32 %v13839_v3, %v9161_v38  ;;  %v13841_v36 = vld [vmem:[#allocation94_spill] sm:$0xff]  ;;  %v13845_v4 = vld [vmem:[#allocation169_spill] sm:$0xff]  ;;  %v9675_v3 = vmul.f32 %v9333_v32, %v9161_v38 }
 0x240   :  { %13829 = vst [vmem:[#allocation133_spill] sm:$0xff] %v9630_v17  ;;  %13831 = vst [vmem:[#allocation134_spill] sm:$0xff] %v9634_v39  ;;  %v9659_v9 = vmul.f32 %v13841_v36, %v9161_v38  ;;  %v13843_v15 = vld [vmem:[#allocation142_spill] sm:$0xff]  ;;  %v9667_v14 = vmul.f32 %v13845_v4, %v9161_v38  ;;  %v13847_v62 = vld [vmem:[#allocation97_spill] sm:$0xff]  ;;  %v9688_v4 = vmul.f32 %v9356_v56, %v9161_v38 }
 0x241   :  { %13833 = vst [vmem:[#allocation106_spill] sm:$0xff] %v9638_v42  ;;  %13834 = vst [vmem:[#allocation137_spill] sm:$0xff] %v9643_v23  ;;  %v9663_v26 = vmul.f32 %v13843_v15, %v9161_v38  ;;  %v9671_v37 = vmul.f32 %v13847_v62, %v9161_v38  ;;  %v9680_v36 = vld [vmem:[%s11963_s3 + $0x1a0] sm:$0xff]  ;;  %v9684_v15 = vmul.f32 %v9346_v48, %v9161_v38  ;;  %v9958_v2 = vld [vmem:[%s11963_s3 + $0x310] sm:$0x3] }
 0x242   :  { %13836 = vst [vmem:[#allocation7_spill] sm:$0xff] %v9647_v28  ;;  %13838 = vst [vmem:[#allocation165_spill] sm:$0xff] %v9651_v16  ;;  %v9692_v62 = vmul.f32 %v9369_v55, %v9161_v38  ;;  %v9696_v32 = vmul.f32 %v9378_v52, %v9161_v38  ;;  %v9704_v48 = vmul.f32 %v9161_v38, %v9680_v36  ;;  %v13910_v5 = vld [vmem:[#allocation71_spill] sm:$0xff]  ;;  %v13915_v49 = vld [vmem:[#allocation10_spill] sm:$0xff] }
 0x243   :  { %13840 = vst [vmem:[#allocation139_spill] sm:$0xff] %v9655_v20  ;;  %13842 = vst [vmem:[#allocation166_spill] sm:$0xff] %v9659_v9  ;;  %v9714_v55 = vadd.f32 %v2340_v57, %v9491_v30  ;;  %v9717_v52 = vadd.f32 %v2341_v63, %v9494_v22  ;;  %v9735_v30 = vadd.f32 %v2347_v44, %v9512_v47  ;;  %v9740_v22 = vld [vmem:[%s11960_s0 + $0x7] ss:$0 sm:$0xff]  ;;  %v9766_v57 = vld [vmem:[%s11963_s3 + $0x208] sm:$0x3] }
 0x244   :  { %13844 = vst [vmem:[#allocation93_spill] sm:$0xff] %v9663_v26  ;;  %13846 = vst [vmem:[#allocation108_spill] sm:$0xff] %v9667_v14  ;;  %v9770_v63 = vmul.f32 %v9766_v57, %v9740_v22  ;;  %v9971_v54 = vmul.f32 %v13910_v5, %v9740_v22  ;;  %v9993_v5 = vld [vmem:[%s11963_s3 + $0x340] sm:$0x3]  ;;  %v13916_v25 = vld [vmem:[#allocation146_spill] sm:$0xff] }
 0x245   :  { %13848 = vst [vmem:[#allocation91_spill] sm:$0xff] %v9671_v37  ;;  %13849 = vst [vmem:[#allocation168_spill] sm:$0xff] %v9675_v3  ;;  %v9700_v3 = vmul.f32 %v9161_v38, %v9643_v23  ;;  %v9720_v23 = vadd.f32 %v2342_v34, %v9497_v24  ;;  %v13869_v24 = vld [vmem:[#allocation9_spill] sm:$0xff]  ;;  %v13875_v34 = vld [vmem:[#allocation18_spill] sm:$0xff]  ;;  %v9997_v40 = vmul.f32 %v9993_v5, %v9740_v22 }
 0x246   :  { %13850 = vst [vmem:[#allocation160_spill] sm:$0xff] %v9680_v36  ;;  %13851 = vst [vmem:[#allocation140_spill] sm:$0xff] %v9684_v15  ;;  %v13857_v15 = vld [vmem:[#allocation17_spill] sm:$0xff] }
 0x247   :  { %13852 = vst [vmem:[#allocation109_spill] sm:$0xff] %v9688_v4  ;;  %13853 = vst [vmem:[#allocation95_spill] sm:$0xff] %v9692_v62  ;;  %v9708_v56 = vmul.f32 %v13857_v15, %v9161_v38  ;;  %v9711_v4 = vadd.f32 %v2339_v8, %v9487_v7  ;;  %v9729_v38 = vadd.f32 %v2345_v12, %v9506_v51  ;;  %v13873_v15 = vld [vmem:[#allocation151_spill] sm:$0xff] }
 0x248   :  { %13854 = vst [vmem:[#allocation114_spill] sm:$0xff] %v9696_v32  ;;  %13855 = vst [vmem:[#allocation145_spill] sm:$0xff] %v9700_v3  ;;  %v9723_v3 = vadd.f32 %v2343_v11, %v9500_v43  ;;  %v9732_v7 = vadd.f32 %v2346_v10, %v9509_v61  ;;  %v9744_v43 = vmul.f32 %v13869_v24, %v9740_v22  ;;  %v13872_v61 = vld [vmem:[#allocation55_spill] sm:$0xff]  ;;  %v9783_v10 = vld [vmem:[%s11963_s3 + $0x220] sm:$0x3] }
 0x249   :  { %13856 = vst [vmem:[#allocation170_spill] sm:$0xff] %v9704_v48  ;;  %13858 = vst [vmem:[#allocation81_spill] sm:$0xff] %v9708_v56  ;;  %v9726_v48 = vadd.f32 %v2344_v29, %v9503_v50  ;;  %v9749_v50 = vld [vmem:[%s11963_s3 + $0x1f0] sm:$0x3]  ;;  %v9757_v47 = vmul.f32 %v13872_v61, %v9740_v22  ;;  %v9761_v8 = vmul.f32 %v13873_v15, %v9740_v22  ;;  %v13879_v15 = vld [vmem:[#allocation152_spill] sm:$0xff] }
 0x24a   :  { %13859 = vst [vmem:[#allocation63_spill] sm:$0xff] %v9711_v4  ;;  %13860 = vst [vmem:[#allocation123_spill] sm:$0xff] %v9714_v55  ;;  %v9753_v51 = vmul.f32 %v9749_v50, %v9740_v22  ;;  %v9774_v11 = vmul.f32 %v13875_v34, %v9740_v22  ;;  %v13876_v29 = vld [vmem:[#allocation111_spill] sm:$0xff]  ;;  %v9787_v44 = vmul.f32 %v9783_v10, %v9740_v22 }
 0x24b   :  { %13861 = vst [vmem:[#allocation68_spill] sm:$0xff] %v9717_v52  ;;  %13862 = vst [vmem:[#allocation12_spill] sm:$0xff] %v9720_v23  ;;  %v9778_v12 = vmul.f32 %v13876_v29, %v9740_v22  ;;  %v13878_v24 = vld [vmem:[#allocation19_spill] sm:$0xff]  ;;  %v9795_v34 = vmul.f32 %v13879_v15, %v9740_v22  ;;  %v9800_v29 = vld [vmem:[%s11963_s3 + $0x238] sm:$0x3]  ;;  %v2749_v0 = vrot.slane %v9757_v47, 1 }
 0x24c   :  { %13863 = vst [vmem:[#allocation70_spill] sm:$0xff] %v9723_v3  ;;  %13864 = vst [vmem:[#allocation124_spill] sm:$0xff] %v9726_v48  ;;  %v9791_v61 = vmul.f32 %v13878_v24, %v9740_v22  ;;  %v9804_v56 = vmul.f32 %v9800_v29, %v9740_v22  ;;  %v13882_v24 = vld [vmem:[#allocation15_spill] sm:$0xff]  ;;  %v2747_v6 = vrot.slane %v9753_v51, 1  ;;  %v2750_v19 = vrot.slane %v9761_v8, 1 }
 0x24d   :  { %13865 = vst [vmem:[#allocation75_spill] sm:$0xff] %v9729_v38  ;;  %13866 = vst [vmem:[#allocation47_spill] sm:$0xff] %v9732_v7  ;;  %v9812_v38 = vmul.f32 %v13882_v24, %v9740_v22  ;;  %v9817_v15 = vld [vmem:[%s11963_s3 + $0x250] sm:$0x3]  ;;  %v9834_v24 = vld [vmem:[%s11963_s3 + $0x268] sm:$0x3] }
 0x24e   :  { %13867 = vst [vmem:[#allocation79_spill] sm:$0xff] %v9735_v30  ;;  %13868 = vst [vmem:[#allocation74_spill] sm:$0xff] %v9740_v22  ;;  %v13881_v30 = vld [vmem:[#allocation129_spill] sm:$0xff]  ;;  %v9821_v48 = vmul.f32 %v9817_v15, %v9740_v22  ;;  %v2755_v33 = vrot.slane %v9778_v12, 1  ;;  %v2757_v13 = vrot.slane %v9787_v44, 1  ;;  %v2762_v47 = vrot.slane %v9804_v56, 1 }
 0x24f   :  { %13870 = vst [vmem:[#allocation77_spill] sm:$0xff] %v9744_v43  ;;  %13871 = vst [vmem:[#allocation80_spill] sm:$0xff] %v9749_v50  ;;  %v9808_v7 = vmul.f32 %v13881_v30, %v9740_v22  ;;  %v13885_v30 = vld [vmem:[#allocation92_spill] sm:$0xff]  ;;  %v9838_v50 = vmul.f32 %v9834_v24, %v9740_v22  ;;  %v2751_v56 = vsel %vm456_vm0, %v2749_v0, %v2750_v19 }
 0x250   :  { %13874 = vst [vmem:[#allocation82_spill] sm:$0xff] %v9766_v57  ;;  %13877 = vst [vmem:[#allocation110_spill] sm:$0xff] %v9783_v10  ;;  %v9829_v57 = vmul.f32 %v13885_v30, %v9740_v22  ;;  %v9851_v30 = vld [vmem:[%s11963_s3 + $0x280] sm:$0x3] }
 0x251   :  { %13880 = vst [vmem:[#allocation43_spill] sm:$0xff] %v9800_v29  ;;  %13883 = vst [vmem:[#allocation76_spill] sm:$0xff] %v9817_v15  ;;  %v13884_v29 = vld [vmem:[#allocation56_spill] sm:$0xff]  ;;  %v13887_v15 = vld [vmem:[#allocation59_spill] sm:$0xff]  ;;  %v9855_v52 = vmul.f32 %v9851_v30, %v9740_v22  ;;  %v2764_v8 = vrot.slane %v9808_v7, 1  ;;  %v2772_v12 = vrot.slane %v9838_v50, 1  ;;  %v2758_v50 = vsel %vm456_vm0, %v2755_v33, %v2757_v13 }
 0x252   :  { %v9825_v10 = vmul.f32 %v13884_v29, %v9740_v22  ;;  %13886 = vst [vmem:[#allocation112_spill] sm:$0xff] %v9834_v24  ;;  %v9842_v3 = vmul.f32 %v13887_v15, %v9740_v22  ;;  %v13888_v29 = vld [vmem:[#allocation65_spill] sm:$0xff]  ;;  %13889 = vst [vmem:[#allocation20_spill] sm:$0xff] %v9851_v30  ;;  %v13890_v24 = vld [vmem:[#allocation66_spill] sm:$0xff] }
 0x253   :  { %v9846_v23 = vmul.f32 %v13888_v29, %v9740_v22  ;;  %v9859_v55 = vmul.f32 %v13890_v24, %v9740_v22  ;;  %v13891_v15 = vld [vmem:[#allocation72_spill] sm:$0xff]  ;;  %13908 = vst [vmem:[#allocation31_spill] sm:$0xff] %v9958_v2  ;;  %13914 = vst [vmem:[#allocation36_spill] sm:$0xff] %v9993_v5  ;;  %v2752_v5 = vrot.slane %v9770_v63, 1  ;;  %v2765_v63 = vrot.slane %v9812_v38, 1 }
 0x254   :  { %v9863_v4 = vmul.f32 %v13891_v15, %v9740_v22  ;;  %v9868_v29 = vld [vmem:[%s11963_s3 + $0x298] sm:$0x3]  ;;  %v9885_v15 = vld [vmem:[%s11963_s3 + $0x2b0] sm:$0x3]  ;;  %v2774_v44 = vrot.slane %v9842_v3, 1 }
 0x255   :  { %13892 = vst [vmem:[#allocation22_spill] sm:$0xff] %v9868_v29  ;;  %v9872_v36 = vmul.f32 %v9868_v29, %v9740_v22  ;;  %v13893_v30 = vld [vmem:[#allocation96_spill] sm:$0xff]  ;;  %13895 = vst [vmem:[#allocation23_spill] sm:$0xff] %v9885_v15  ;;  %v9889_v37 = vmul.f32 %v9885_v15, %v9740_v22  ;;  %v13896_v29 = vld [vmem:[#allocation173_spill] sm:$0xff]  ;;  %v2779_v7 = vrot.slane %v9859_v55, 1 }
 0x256   :  { %v9876_v32 = vmul.f32 %v13893_v30, %v9740_v22  ;;  %v13894_v24 = vld [vmem:[#allocation44_spill] sm:$0xff]  ;;  %v9893_v14 = vmul.f32 %v13896_v29, %v9740_v22  ;;  %v13897_v30 = vld [vmem:[#allocation13_spill] sm:$0xff]  ;;  %v13899_v15 = vld [vmem:[#allocation130_spill] sm:$0xff]  ;;  %v2780_v38 = vrot.slane %v9863_v4, 1 }
 0x257   :  { %v9880_v62 = vmul.f32 %v13894_v24, %v9740_v22  ;;  %v9897_v26 = vmul.f32 %v13897_v30, %v9740_v22  ;;  %v9902_v24 = vld [vmem:[%s11963_s3 + $0x2c8] sm:$0x3]  ;;  %v9910_v20 = vmul.f32 %v13899_v15, %v9740_v22  ;;  %v13900_v29 = vld [vmem:[#allocation131_spill] sm:$0xff]  ;;  %v9919_v30 = vld [vmem:[%s11963_s3 + $0x2e0] sm:$0x3] }
 0x258   :  { %13898 = vst [vmem:[#allocation24_spill] sm:$0xff] %v9902_v24  ;;  %v9906_v9 = vmul.f32 %v9902_v24, %v9740_v22  ;;  %v9914_v16 = vmul.f32 %v13900_v29, %v9740_v22  ;;  %13901 = vst [vmem:[#allocation25_spill] sm:$0xff] %v9919_v30  ;;  %v9923_v60 = vmul.f32 %v9919_v30, %v9740_v22  ;;  %v13902_v24 = vld [vmem:[#allocation136_spill] sm:$0xff]  ;;  %v13903_v15 = vld [vmem:[#allocation150_spill] sm:$0xff] }
 0x259   :  { %v9927_v28 = vmul.f32 %v13902_v24, %v9740_v22  ;;  %v9931_v59 = vmul.f32 %v13903_v15, %v9740_v22  ;;  %v9936_v29 = vld [vmem:[%s11963_s3 + $0x2f8] sm:$0x3]  ;;  %v13905_v30 = vld [vmem:[#allocation58_spill] sm:$0xff]  ;;  %v2781_v13 = vsel %vm456_vm0, %v2779_v7, %v2780_v38 }
 0x25a   :  { %13904 = vst [vmem:[#allocation29_spill] sm:$0xff] %v9936_v29  ;;  %v9940_v42 = vmul.f32 %v9936_v29, %v9740_v22  ;;  %v9944_v45 = vmul.f32 %v13905_v30, %v9740_v22  ;;  %v9949_v24 = vld [vmem:[%s11963_s3 + $0x358] sm:$0x3]  ;;  %v13907_v15 = vld [vmem:[#allocation50_spill] sm:$0xff]  ;;  %v9962_v29 = vmul.f32 %v9958_v2, %v9740_v22  ;;  %v13912_v2 = vld [vmem:[#allocation73_spill] sm:$0xff] }
 0x25b   :  { %13906 = vst [vmem:[#allocation30_spill] sm:$0xff] %v9949_v24  ;;  %v9953_v39 = vmul.f32 %v13907_v15, %v9740_v22  ;;  %v13909_v30 = vld [vmem:[#allocation64_spill] sm:$0xff]  ;;  %v9976_v15 = vld [vmem:[%s11963_s3 + $0x328] sm:$0x3]  ;;  %v9984_v35 = vmul.f32 %v13912_v2, %v9740_v22  ;;  %v10005_v2 = vmul.f32 %v9740_v22, %v13916_v25  ;;  %v10010_v41 = vmul.f32 %v9740_v22, %v9949_v24 }
 0x25c   :  { %v9966_v17 = vmul.f32 %v13909_v30, %v9740_v22  ;;  %13911 = vst [vmem:[#allocation32_spill] sm:$0xff] %v9976_v15  ;;  %v9980_v27 = vmul.f32 %v9976_v15, %v9740_v22  ;;  %v13913_v30 = vld [vmem:[#allocation45_spill] sm:$0xff]  ;;  %v10001_v15 = vmul.f32 %v9740_v22, %v13915_v49  ;;  %v2754_v25 = vrot.slane %v9774_v11, 1 }
 0x25d   :  { %v9988_v51 = vmul.f32 %v13913_v30, %v9740_v22  ;;  %v12327_v30 = vrot.slane %v9744_v43, 1  ;;  %v2759_v24 = vrot.slane %v9791_v61, 1  ;;  %v2760_v22 = vrot.slane %v9795_v34, 1 }
 0x25e   :  { %v2767_v43 = vrot.slane %v9821_v48, 1  ;;  %v2770_v11 = vrot.slane %v9829_v57, 1  ;;  %v2775_v61 = vrot.slane %v9846_v23, 1  ;;  %v2777_v34 = vrot.slane %v9855_v52, 1 }
 0x25f   :  { %v10018_v49 = vsel %vm456_vm0, %v12327_v30, %v2747_v6  ;;  %v2769_v6 = vrot.slane %v9825_v10, 1  ;;  %v2782_v48 = vrot.slane %v9872_v36, 1  ;;  %v2753_v10 = vsel %vm456_vm0, %v2750_v19, %v2752_v5  ;;  %v14036_v30 = vld [vmem:[#allocation145_spill] sm:$0xff] }
 0x260   :  { %v2756_v57 = vsel %vm456_vm0, %v2754_v25, %v2755_v33  ;;  %v2761_v3 = vsel %vm456_vm0, %v2759_v24, %v2760_v22  ;;  %v2763_v23 = vsel %vm456_vm0, %v2760_v22, %v2762_v47  ;;  %v2766_v52 = vsel %vm456_vm0, %v2764_v8, %v2765_v63 }
 0x261   :  { %v2768_v0 = vsel %vm456_vm0, %v2765_v63, %v2767_v43  ;;  %v2771_v55 = vsel %vm456_vm0, %v2769_v6, %v2770_v11  ;;  %v2773_v4 = vsel %vm456_vm0, %v2770_v11, %v2772_v12  ;;  %v2776_v36 = vsel %vm456_vm0, %v2774_v44, %v2775_v61 }
 0x262   :  { %v2778_v19 = vsel %vm456_vm0, %v2775_v61, %v2777_v34  ;;  %v2784_v5 = vrot.slane %v9876_v32, 1  ;;  %v2783_v33 = vsel %vm456_vm0, %v2780_v38, %v2782_v48  ;;  %v2785_v22 = vrot.slane %v9880_v62, 1 }
 0x263   :  { %v2787_v24 = vrot.slane %v9889_v37, 1  ;;  %v2789_v43 = vrot.slane %v9893_v14, 1  ;;  %v2790_v25 = vrot.slane %v9897_v26, 1  ;;  %v2792_v47 = vrot.slane %v9906_v9, 1 }
 0x264   :  { %v2794_v8 = vrot.slane %v9910_v20, 1  ;;  %v2795_v63 = vrot.slane %v9914_v16, 1  ;;  %v2797_v32 = vrot.slane %v9923_v60, 1  ;;  %v2799_v6 = vrot.slane %v9927_v28, 1 }
 0x265   :  { %v2800_v11 = vrot.slane %v9931_v59, 1  ;;  %v2802_v62 = vrot.slane %v9940_v42, 1  ;;  %v2804_v37 = vrot.slane %v9944_v45, 1  ;;  %v2805_v14 = vrot.slane %v9953_v39, 1 }
 0x266   :  { %v2807_v26 = vrot.slane %v9962_v29, 1  ;;  %v2809_v9 = vrot.slane %v9966_v17, 1  ;;  %v2810_v20 = vrot.slane %v9971_v54, 1  ;;  %v2812_v16 = vrot.slane %v9980_v27, 1 }
 0x267   :  { %v2814_v60 = vrot.slane %v9984_v35, 1  ;;  %v2815_v28 = vrot.slane %v9988_v51, 1  ;;  %v2817_v59 = vrot.slane %v9997_v40, 1  ;;  %v2819_v42 = vrot.slane %v10001_v15, 1 }
 0x268   :  { %v2820_v45 = vrot.slane %v10005_v2, 1  ;;  %v2786_v39 = vsel %vm456_vm0, %v2784_v5, %v2785_v22  ;;  %v2788_v29 = vsel %vm456_vm0, %v2785_v22, %v2787_v24  ;;  %v2791_v17 = vsel %vm456_vm0, %v2789_v43, %v2790_v25 }
 0x269   :  { %v2822_v54 = vrot.slane %v10010_v41, 1  ;;  %v2793_v27 = vsel %vm456_vm0, %v2790_v25, %v2792_v47  ;;  %v2796_v35 = vsel %vm456_vm0, %v2794_v8, %v2795_v63  ;;  %v2798_v51 = vsel %vm456_vm0, %v2795_v63, %v2797_v32 }
 0x26a   :  { %v2801_v40 = vsel %vm456_vm0, %v2799_v6, %v2800_v11  ;;  %v2803_v15 = vsel %vm456_vm0, %v2800_v11, %v2802_v62  ;;  %v2806_v2 = vsel %vm456_vm0, %v2804_v37, %v2805_v14  ;;  %v2808_v12 = vsel %vm456_vm0, %v2805_v14, %v2807_v26  ;;  %v13954_v26 = vld [vmem:[#allocation143_spill] sm:$0xff] }
 0x26b   :  { %v2811_v44 = vsel %vm456_vm0, %v2809_v9, %v2810_v20  ;;  %v2813_v61 = vsel %vm456_vm0, %v2810_v20, %v2812_v16  ;;  %v2816_v41 = vsel %vm456_vm0, %v2814_v60, %v2815_v28  ;;  %v2818_v34 = vsel %vm456_vm0, %v2815_v28, %v2817_v59  ;;  %v13956_v20 = vld [vmem:[#allocation144_spill] sm:$0xff]  ;;  %v13958_v60 = vld [vmem:[#allocation98_spill] sm:$0xff]  ;;  %v13960_v59 = vld [vmem:[#allocation149_spill] sm:$0xff] }
 0x26c   :  { %v2821_v7 = vsel %vm456_vm0, %v2819_v42, %v2820_v45  ;;  %v2823_v38 = vsel %vm456_vm0, %v2820_v45, %v2822_v54  ;;  %v10094_v48 = vadd.f32 %v10018_v49, %v9238_v53  ;;  %v10097_v5 = vadd.f32 %v2751_v56, %v9241_v31  ;;  %v13924_v53 = vld [vmem:[#allocation46_spill] sm:$0xff]  ;;  %v13926_v31 = vld [vmem:[#allocation171_spill] sm:$0xff]  ;;  %v13966_v54 = vld [vmem:[#allocation5_spill] sm:$0xff] }
 0x26d   :  { %v10100_v22 = vadd.f32 %v2753_v10, %v9244_v1  ;;  %v10103_v24 = vadd.f32 %v2756_v57, %v9247_v58  ;;  %v10106_v43 = vadd.f32 %v2758_v50, %v9250_v46  ;;  %v10109_v25 = vadd.f32 %v2761_v3, %v9253_v21  ;;  %v13928_v1 = vld [vmem:[#allocation115_spill] sm:$0xff]  ;;  %v13932_v46 = vld [vmem:[#allocation52_spill] sm:$0xff] }
 0x26e   :  { %13917 = vst [vmem:[#allocation21_spill] sm:$0xff] %v10094_v48  ;;  %13918 = vst [vmem:[#allocation78_spill] sm:$0xff] %v10097_v5  ;;  %v10112_v47 = vadd.f32 %v2763_v23, %v9256_v18  ;;  %v10115_v49 = vadd.f32 %v2766_v52, %v13924_v53  ;;  %v10118_v56 = vadd.f32 %v2768_v0, %v13926_v31  ;;  %v13930_v58 = vld [vmem:[#allocation147_spill] sm:$0xff]  ;;  %v13934_v21 = vld [vmem:[#allocation172_spill] sm:$0xff] }
 0x26f   :  { %13919 = vst [vmem:[#allocation26_spill] sm:$0xff] %v10100_v22  ;;  %13920 = vst [vmem:[#allocation27_spill] sm:$0xff] %v10103_v24  ;;  %v10121_v10 = vadd.f32 %v2771_v55, %v13928_v1  ;;  %v10124_v57 = vadd.f32 %v2773_v4, %v13930_v58  ;;  %v10127_v50 = vadd.f32 %v2776_v36, %v13932_v46  ;;  %v13936_v18 = vld [vmem:[#allocation116_spill] sm:$0xff]  ;;  %v13940_v0 = vld [vmem:[#allocation54_spill] sm:$0xff] }
 0x270   :  { %13921 = vst [vmem:[#allocation84_spill] sm:$0xff] %v10106_v43  ;;  %13922 = vst [vmem:[#allocation28_spill] sm:$0xff] %v10109_v25  ;;  %v10130_v3 = vadd.f32 %v2778_v19, %v13934_v21  ;;  %v10133_v23 = vadd.f32 %v2781_v13, %v13936_v18  ;;  %v13938_v52 = vld [vmem:[#allocation148_spill] sm:$0xff]  ;;  %v10139_v63 = vadd.f32 %v2786_v39, %v13940_v0  ;;  %v13942_v55 = vld [vmem:[#allocation85_spill] sm:$0xff] }
 0x271   :  { %13923 = vst [vmem:[#allocation17_spill] sm:$0xff] %v10112_v47  ;;  %13925 = vst [vmem:[#allocation9_spill] sm:$0xff] %v10115_v49  ;;  %v10136_v8 = vadd.f32 %v2783_v33, %v13938_v52  ;;  %v10142_v32 = vadd.f32 %v2788_v29, %v13942_v55  ;;  %v13944_v4 = vld [vmem:[#allocation11_spill] sm:$0xff]  ;;  %v13946_v36 = vld [vmem:[#allocation113_spill] sm:$0xff]  ;;  %v10160_v9 = vadd.f32 %v2803_v15, %v13954_v26 }
 0x272   :  { %13927 = vst [vmem:[#allocation55_spill] sm:$0xff] %v10118_v56  ;;  %13929 = vst [vmem:[#allocation151_spill] sm:$0xff] %v10121_v10  ;;  %v10145_v6 = vadd.f32 %v2791_v17, %v13944_v4  ;;  %v10148_v11 = vadd.f32 %v2793_v27, %v13946_v36  ;;  %v13948_v19 = vld [vmem:[#allocation61_spill] sm:$0xff]  ;;  %v13952_v33 = vld [vmem:[#allocation122_spill] sm:$0xff]  ;;  %v10163_v16 = vadd.f32 %v2806_v2, %v13956_v20 }
 0x273   :  { %13931 = vst [vmem:[#allocation18_spill] sm:$0xff] %v10124_v57  ;;  %13933 = vst [vmem:[#allocation111_spill] sm:$0xff] %v10127_v50  ;;  %v10151_v62 = vadd.f32 %v2796_v35, %v13948_v19  ;;  %v13950_v13 = vld [vmem:[#allocation121_spill] sm:$0xff]  ;;  %v10157_v14 = vadd.f32 %v2801_v40, %v13952_v33  ;;  %v10166_v28 = vadd.f32 %v2808_v12, %v13958_v60  ;;  %v13962_v45 = vld [vmem:[#allocation99_spill] sm:$0xff] }
 0x274   :  { %13935 = vst [vmem:[#allocation19_spill] sm:$0xff] %v10130_v3  ;;  %13937 = vst [vmem:[#allocation152_spill] sm:$0xff] %v10133_v23  ;;  %v10154_v37 = vadd.f32 %v2798_v51, %v13950_v13  ;;  %v10169_v42 = vadd.f32 %v2811_v44, %v13960_v59  ;;  %v10172_v39 = vadd.f32 %v2813_v61, %v13962_v45  ;;  %v13964_v29 = vld [vmem:[#allocation100_spill] sm:$0xff]  ;;  %v13968_v35 = vld [vmem:[#allocation101_spill] sm:$0xff] }
 0x275   :  { %13939 = vst [vmem:[#allocation129_spill] sm:$0xff] %v10136_v8  ;;  %13941 = vst [vmem:[#allocation15_spill] sm:$0xff] %v10139_v63  ;;  %v10175_v17 = vadd.f32 %v2816_v41, %v13964_v29  ;;  %v10178_v27 = vadd.f32 %v2818_v34, %v13966_v54  ;;  %v10181_v51 = vadd.f32 %v2821_v7, %v13968_v35  ;;  %v13970_v40 = vld [vmem:[#allocation102_spill] sm:$0xff]  ;;  %v13972_v2 = vld [vmem:[#allocation53_spill] sm:$0xff] }
 0x276   :  { %13943 = vst [vmem:[#allocation56_spill] sm:$0xff] %v10142_v32  ;;  %13945 = vst [vmem:[#allocation92_spill] sm:$0xff] %v10145_v6  ;;  %v10184_v15 = vadd.f32 %v2823_v38, %v13970_v40  ;;  %v13973_v12 = vld [vmem:[#allocation157_spill] sm:$0xff]  ;;  %v13975_v44 = vld [vmem:[#allocation60_spill] sm:$0xff] }
 0x277   :  { %13947 = vst [vmem:[#allocation59_spill] sm:$0xff] %v10148_v11  ;;  %13949 = vst [vmem:[#allocation65_spill] sm:$0xff] %v10151_v62  ;;  %v10188_v53 = vadd.f32 %v13973_v12, %v13972_v2  ;;  %v13976_v31 = vld [vmem:[#allocation158_spill] sm:$0xff]  ;;  %v13981_v34 = vld [vmem:[#allocation67_spill] sm:$0xff] }
 0x278   :  { %13951 = vst [vmem:[#allocation66_spill] sm:$0xff] %v10154_v37  ;;  %13953 = vst [vmem:[#allocation72_spill] sm:$0xff] %v10157_v14  ;;  %v10192_v61 = vadd.f32 %v13976_v31, %v13975_v44  ;;  %v13978_v1 = vld [vmem:[#allocation62_spill] sm:$0xff]  ;;  %v13982_v46 = vld [vmem:[#allocation127_spill] sm:$0xff] }
 0x279   :  { %13955 = vst [vmem:[#allocation96_spill] sm:$0xff] %v10160_v9  ;;  %13957 = vst [vmem:[#allocation44_spill] sm:$0xff] %v10163_v16  ;;  %v13979_v41 = vld [vmem:[#allocation126_spill] sm:$0xff]  ;;  %v10200_v21 = vadd.f32 %v13982_v46, %v13981_v34  ;;  %v13984_v7 = vld [vmem:[#allocation69_spill] sm:$0xff] }
 0x27a   :  { %13959 = vst [vmem:[#allocation173_spill] sm:$0xff] %v10166_v28  ;;  %13961 = vst [vmem:[#allocation13_spill] sm:$0xff] %v10169_v42  ;;  %v10196_v58 = vadd.f32 %v13979_v41, %v13978_v1  ;;  %v13985_v18 = vld [vmem:[#allocation161_spill] sm:$0xff]  ;;  %v13987_v52 = vld [vmem:[#allocation16_spill] sm:$0xff] }
 0x27b   :  { %13963 = vst [vmem:[#allocation130_spill] sm:$0xff] %v10172_v39  ;;  %13965 = vst [vmem:[#allocation131_spill] sm:$0xff] %v10175_v17  ;;  %v10204_v38 = vadd.f32 %v13985_v18, %v13984_v7  ;;  %v13988_v0 = vld [vmem:[#allocation132_spill] sm:$0xff]  ;;  %v13990_v4 = vld [vmem:[#allocation105_spill] sm:$0xff] }
 0x27c   :  { %13967 = vst [vmem:[#allocation136_spill] sm:$0xff] %v10178_v27  ;;  %13969 = vst [vmem:[#allocation150_spill] sm:$0xff] %v10181_v51  ;;  %v10208_v55 = vadd.f32 %v13988_v0, %v13987_v52  ;;  %v13991_v36 = vld [vmem:[#allocation133_spill] sm:$0xff]  ;;  %v13993_v13 = vld [vmem:[#allocation34_spill] sm:$0xff] }
 0x27d   :  { %13971 = vst [vmem:[#allocation58_spill] sm:$0xff] %v10184_v15  ;;  %13974 = vst [vmem:[#allocation50_spill] sm:$0xff] %v10188_v53  ;;  %v10212_v19 = vadd.f32 %v13991_v36, %v13990_v4  ;;  %v13994_v33 = vld [vmem:[#allocation134_spill] sm:$0xff]  ;;  %v13999_v45 = vld [vmem:[#allocation57_spill] sm:$0xff] }
 0x27e   :  { %13977 = vst [vmem:[#allocation64_spill] sm:$0xff] %v10192_v61  ;;  %13980 = vst [vmem:[#allocation71_spill] sm:$0xff] %v10196_v58  ;;  %v10216_v26 = vadd.f32 %v13994_v33, %v13993_v13  ;;  %v13996_v20 = vld [vmem:[#allocation14_spill] sm:$0xff]  ;;  %v14000_v29 = vld [vmem:[#allocation7_spill] sm:$0xff] }
 0x27f   :  { %13983 = vst [vmem:[#allocation73_spill] sm:$0xff] %v10200_v21  ;;  %13986 = vst [vmem:[#allocation45_spill] sm:$0xff] %v10204_v38  ;;  %v13997_v60 = vld [vmem:[#allocation106_spill] sm:$0xff]  ;;  %v10224_v54 = vadd.f32 %v14000_v29, %v13999_v45  ;;  %v14002_v35 = vld [vmem:[#allocation87_spill] sm:$0xff] }
 0x280   :  { %13989 = vst [vmem:[#allocation10_spill] sm:$0xff] %v10208_v55  ;;  %13992 = vst [vmem:[#allocation146_spill] sm:$0xff] %v10212_v19  ;;  %v10220_v59 = vadd.f32 %v13997_v60, %v13996_v20  ;;  %v14003_v40 = vld [vmem:[#allocation165_spill] sm:$0xff]  ;;  %v14005_v12 = vld [vmem:[#allocation88_spill] sm:$0xff] }
 0x281   :  { %13995 = vst [vmem:[#allocation46_spill] sm:$0xff] %v10216_v26  ;;  %14001 = vst [vmem:[#allocation115_spill] sm:$0xff] %v10224_v54  ;;  %v10228_v2 = vadd.f32 %v14003_v40, %v14002_v35  ;;  %v14006_v44 = vld [vmem:[#allocation139_spill] sm:$0xff]  ;;  %v14008_v1 = vld [vmem:[#allocation86_spill] sm:$0xff] }
 0x282   :  { %13998 = vst [vmem:[#allocation171_spill] sm:$0xff] %v10220_v59  ;;  %v10232_v31 = vadd.f32 %v14006_v44, %v14005_v12  ;;  %v14009_v41 = vld [vmem:[#allocation166_spill] sm:$0xff]  ;;  %v14011_v46 = vld [vmem:[#allocation33_spill] sm:$0xff]  ;;  %v14014_v52 = vld [vmem:[#allocation39_spill] sm:$0xff] }
 0x283   :  { %14004 = vst [vmem:[#allocation147_spill] sm:$0xff] %v10228_v2  ;;  %v10236_v34 = vadd.f32 %v14009_v41, %v14008_v1  ;;  %v14012_v7 = vld [vmem:[#allocation93_spill] sm:$0xff]  ;;  %v14015_v0 = vld [vmem:[#allocation108_spill] sm:$0xff]  ;;  %v14017_v36 = vld [vmem:[#allocation38_spill] sm:$0xff] }
 0x284   :  { %14007 = vst [vmem:[#allocation52_spill] sm:$0xff] %v10232_v31  ;;  %v10240_v18 = vadd.f32 %v14012_v7, %v14011_v46  ;;  %v10244_v4 = vadd.f32 %v14015_v0, %v14014_v52  ;;  %v14018_v13 = vld [vmem:[#allocation91_spill] sm:$0xff]  ;;  %v14020_v20 = vld [vmem:[#allocation41_spill] sm:$0xff]  ;;  %v14021_v60 = vld [vmem:[#allocation168_spill] sm:$0xff] }
 0x285   :  { %14010 = vst [vmem:[#allocation172_spill] sm:$0xff] %v10236_v34  ;;  %v10248_v33 = vadd.f32 %v14018_v13, %v14017_v36  ;;  %v10252_v45 = vadd.f32 %v14021_v60, %v14020_v20  ;;  %v14023_v29 = vld [vmem:[#allocation42_spill] sm:$0xff]  ;;  %v14024_v35 = vld [vmem:[#allocation140_spill] sm:$0xff]  ;;  %v14027_v44 = vld [vmem:[#allocation109_spill] sm:$0xff] }
 0x286   :  { %14013 = vst [vmem:[#allocation116_spill] sm:$0xff] %v10240_v18  ;;  %14016 = vst [vmem:[#allocation148_spill] sm:$0xff] %v10244_v4  ;;  %v10256_v40 = vadd.f32 %v14024_v35, %v14023_v29  ;;  %v14026_v12 = vld [vmem:[#allocation48_spill] sm:$0xff]  ;;  %v14029_v41 = vld [vmem:[#allocation153_spill] sm:$0xff] }
 0x287   :  { %14019 = vst [vmem:[#allocation54_spill] sm:$0xff] %v10248_v33  ;;  %14022 = vst [vmem:[#allocation85_spill] sm:$0xff] %v10252_v45  ;;  %v10260_v1 = vadd.f32 %v14027_v44, %v14026_v12  ;;  %v14030_v46 = vld [vmem:[#allocation95_spill] sm:$0xff]  ;;  %v14032_v52 = vld [vmem:[#allocation117_spill] sm:$0xff] }
 0x288   :  { %14025 = vst [vmem:[#allocation11_spill] sm:$0xff] %v10256_v40  ;;  %v10264_v7 = vadd.f32 %v14030_v46, %v14029_v41  ;;  %v14033_v0 = vld [vmem:[#allocation114_spill] sm:$0xff]  ;;  %v14039_v45 = vld [vmem:[#allocation35_spill] sm:$0xff]  ;;  %v14040_v35 = vld [vmem:[#allocation37_spill] sm:$0xff] }
 0x289   :  { %14028 = vst [vmem:[#allocation113_spill] sm:$0xff] %v10260_v1  ;;  %v10268_v36 = vadd.f32 %v14033_v0, %v14032_v52  ;;  %v14035_v13 = vld [vmem:[#allocation118_spill] sm:$0xff]  ;;  %v10285_v44 = vld [vmem:[%s11963_s3 + $0x40] sm:$0x3]  ;;  %v10302_v0 = vld [vmem:[%s11963_s3 + $0x58] sm:$0x3] }
 0x28a   :  { %14031 = vst [vmem:[#allocation61_spill] sm:$0xff] %v10264_v7  ;;  %v10272_v20 = vadd.f32 %v14036_v30, %v14035_v13  ;;  %v14038_v60 = vld [vmem:[#allocation74_spill] sm:$0xff]  ;;  %v14041_v30 = vld [vmem:[#allocation40_spill] sm:$0xff]  ;;  %v14050_v54 = vld [vmem:[#allocation159_spill] sm:$0xff] }
 0x28b   :  { %14034 = vst [vmem:[#allocation121_spill] sm:$0xff] %v10268_v36  ;;  %v10276_v29 = vmul.f32 %v14039_v45, %v14038_v60  ;;  %v10280_v12 = vmul.f32 %v14040_v35, %v14038_v60  ;;  %v10289_v41 = vmul.f32 %v10285_v44, %v14038_v60  ;;  %v10293_v46 = vmul.f32 %v14041_v30, %v14038_v60  ;;  %v14042_v45 = vld [vmem:[#allocation89_spill] sm:$0xff]  ;;  %v14043_v35 = vld [vmem:[#allocation90_spill] sm:$0xff]  ;;  %v14047_v18 = vld [vmem:[#allocation120_spill] sm:$0xff] }
 0x28c   :  { %14037 = vst [vmem:[#allocation122_spill] sm:$0xff] %v10272_v20  ;;  %v10297_v52 = vmul.f32 %v14042_v45, %v14038_v60  ;;  %v10306_v13 = vmul.f32 %v10302_v0, %v14038_v60  ;;  %v10310_v20 = vmul.f32 %v14043_v35, %v14038_v60  ;;  %v14044_v30 = vld [vmem:[#allocation49_spill] sm:$0xff]  ;;  %v10319_v45 = vld [vmem:[%s11963_s3 + $0x70] sm:$0x3]  ;;  %v14045_v1 = vld [vmem:[#allocation154_spill] sm:$0xff]  ;;  %v10344_v34 = vmul.f32 %v14047_v18, %v14038_v60 }
 0x28d   :  { %v10314_v36 = vmul.f32 %v14044_v30, %v14038_v60  ;;  %v10323_v7 = vmul.f32 %v10319_v45, %v14038_v60  ;;  %v10327_v40 = vmul.f32 %v14045_v1, %v14038_v60  ;;  %v14046_v35 = vld [vmem:[#allocation155_spill] sm:$0xff]  ;;  %v10336_v30 = vld [vmem:[%s11963_s3 + $0x88] sm:$0x3]  ;;  %v14048_v1 = vld [vmem:[#allocation125_spill] sm:$0xff]  ;;  %v10361_v59 = vmul.f32 %v14050_v54, %v14038_v60 }
 0x28e   :  { %v10331_v33 = vmul.f32 %v14046_v35, %v14038_v60  ;;  %v10340_v4 = vmul.f32 %v10336_v30, %v14038_v60  ;;  %v10348_v31 = vmul.f32 %v14048_v1, %v14038_v60  ;;  %v10353_v35 = vld [vmem:[%s11963_s3 + $0xa0] sm:$0x3]  ;;  %v14051_v18 = vld [vmem:[#allocation128_spill] sm:$0xff]  ;;  %v14053_v55 = vld [vmem:[#allocation162_spill] sm:$0xff]  ;;  %v2665_v63 = vrot.slane %v10280_v12, 1 }
 0x28f   :  { %14049 = vst [vmem:[#allocation143_spill] sm:$0xff] %v10353_v35  ;;  %v10357_v2 = vmul.f32 %v10353_v35, %v14038_v60  ;;  %v10365_v26 = vmul.f32 %v14051_v18, %v14038_v60  ;;  %v10370_v1 = vld [vmem:[%s11963_s3 + $0xb8] sm:$0x3]  ;;  %v10378_v38 = vmul.f32 %v14053_v55, %v14038_v60  ;;  %v14054_v54 = vld [vmem:[#allocation163_spill] sm:$0xff] }
 0x290   :  { %14052 = vst [vmem:[#allocation144_spill] sm:$0xff] %v10370_v1  ;;  %v10374_v19 = vmul.f32 %v10370_v1, %v14038_v60  ;;  %v10382_v21 = vmul.f32 %v14054_v54, %v14038_v60  ;;  %v10387_v18 = vld [vmem:[%s11963_s3 + $0xd0] sm:$0x3]  ;;  %v14056_v61 = vld [vmem:[#allocation164_spill] sm:$0xff]  ;;  %v10404_v54 = vld [vmem:[%s11963_s3 + $0xe8] sm:$0x3] }
 0x291   :  { %14055 = vst [vmem:[#allocation98_spill] sm:$0xff] %v10387_v18  ;;  %v10391_v58 = vmul.f32 %v10387_v18, %v14038_v60  ;;  %v10395_v53 = vmul.f32 %v14056_v61, %v14038_v60  ;;  %v14057_v55 = vld [vmem:[#allocation135_spill] sm:$0xff]  ;;  %14058 = vst [vmem:[#allocation149_spill] sm:$0xff] %v10404_v54  ;;  %v10408_v35 = vmul.f32 %v10404_v54, %v14038_v60  ;;  %v14059_v18 = vld [vmem:[#allocation138_spill] sm:$0xff] }
 0x292   :  { %v10399_v1 = vmul.f32 %v14057_v55, %v14038_v60  ;;  %v10412_v15 = vmul.f32 %v14059_v18, %v14038_v60  ;;  %v14060_v61 = vld [vmem:[#allocation107_spill] sm:$0xff]  ;;  %v10421_v55 = vld [vmem:[%s11963_s3 + $0x100] sm:$0x3]  ;;  %v10520_v8 = vld [vmem:[%s11963_s3 + $0x178] sm:$0x3] }
 0x293   :  { %v10416_v51 = vmul.f32 %v14060_v61, %v14038_v60  ;;  %14061 = vst [vmem:[#allocation99_spill] sm:$0xff] %v10421_v55  ;;  %v10425_v27 = vmul.f32 %v10421_v55, %v14038_v60  ;;  %v14062_v54 = vld [vmem:[#allocation167_spill] sm:$0xff]  ;;  %v14063_v18 = vld [vmem:[#allocation141_spill] sm:$0xff]  ;;  %v10438_v61 = vld [vmem:[%s11963_s3 + $0x118] sm:$0x3]  ;;  %v10524_v12 = vmul.f32 %v10520_v8, %v14038_v60 }
 0x294   :  { %v10429_v17 = vmul.f32 %v14062_v54, %v14038_v60  ;;  %v10433_v39 = vmul.f32 %v14063_v18, %v14038_v60  ;;  %14064 = vst [vmem:[#allocation100_spill] sm:$0xff] %v10438_v61  ;;  %v10442_v42 = vmul.f32 %v10438_v61, %v14038_v60  ;;  %v14065_v55 = vld [vmem:[#allocation8_spill] sm:$0xff]  ;;  %v14067_v54 = vld [vmem:[#allocation94_spill] sm:$0xff]  ;;  %v10455_v18 = vld [vmem:[%s11963_s3 + $0x130] sm:$0x3] }
 0x295   :  { %v10446_v28 = vmul.f32 %v14065_v55, %v14038_v60  ;;  %v10450_v16 = vmul.f32 %v14067_v54, %v14038_v60  ;;  %14069 = vst [vmem:[#allocation102_spill] sm:$0xff] %v10455_v18  ;;  %v10459_v9 = vmul.f32 %v10455_v18, %v14038_v60  ;;  %v14071_v61 = vld [vmem:[#allocation142_spill] sm:$0xff]  ;;  %v14073_v55 = vld [vmem:[#allocation169_spill] sm:$0xff]  ;;  %14088 = vst [vmem:[#allocation105_spill] sm:$0xff] %v10520_v8 }
 0x296   :  { %v10463_v14 = vmul.f32 %v14071_v61, %v14038_v60  ;;  %v10467_v37 = vmul.f32 %v14073_v55, %v14038_v60  ;;  %v10472_v54 = vld [vmem:[%s11963_s3 + $0x148] sm:$0x3]  ;;  %v14077_v18 = vld [vmem:[#allocation97_spill] sm:$0xff]  ;;  %v14079_v61 = vld [vmem:[#allocation83_spill] sm:$0xff]  ;;  %14089 = vst [vmem:[#allocation133_spill] sm:$0xff] %v10524_v12 }
 0x297   :  { %14066 = vst [vmem:[#allocation5_spill] sm:$0xff] %v10446_v28  ;;  %14068 = vst [vmem:[#allocation101_spill] sm:$0xff] %v10450_v16  ;;  %v10476_v62 = vmul.f32 %v10472_v54, %v14038_v60  ;;  %v10480_v11 = vmul.f32 %v14077_v18, %v14038_v60  ;;  %v10484_v6 = vmul.f32 %v14079_v61, %v14038_v60  ;;  %v10489_v55 = vld [vmem:[%s11963_s3 + $0x160] sm:$0x3]  ;;  %v14085_v18 = vld [vmem:[#allocation104_spill] sm:$0xff]  ;;  %v2664_v61 = vrot.slane %v10276_v29, 1 }
 0x298   :  { %14070 = vst [vmem:[#allocation53_spill] sm:$0xff] %v10459_v9  ;;  %14072 = vst [vmem:[#allocation157_spill] sm:$0xff] %v10463_v14  ;;  %v10493_v32 = vmul.f32 %v10489_v55, %v14038_v60  ;;  %v2677_v29 = vrot.slane %v10323_v7, 1  ;;  %v10537_v7 = vld [vmem:[%s11963_s3 + $0x190] sm:$0x3]  ;;  %v14098_v12 = vld [vmem:[#allocation160_spill] sm:$0xff] }
 0x299   :  { %14074 = vst [vmem:[#allocation60_spill] sm:$0xff] %v10467_v37  ;;  %14075 = vst [vmem:[#allocation158_spill] sm:$0xff] %v10472_v54  ;;  %v14083_v54 = vld [vmem:[#allocation103_spill] sm:$0xff]  ;;  %v14145_v24 = vld [vmem:[#allocation32_spill] sm:$0xff] }
 0x29a   :  { %14076 = vst [vmem:[#allocation62_spill] sm:$0xff] %v10476_v62  ;;  %14078 = vst [vmem:[#allocation126_spill] sm:$0xff] %v10480_v11  ;;  %v10497_v62 = vmul.f32 %v14083_v54, %v14038_v60  ;;  %v10501_v11 = vmul.f32 %v14085_v18, %v14038_v60  ;;  %v2670_v54 = vrot.slane %v10297_v52, 1  ;;  %v2674_v18 = vrot.slane %v10310_v20, 1  ;;  %v14092_v52 = vld [vmem:[#allocation51_spill] sm:$0xff] }
 0x29b   :  { %14080 = vst [vmem:[#allocation67_spill] sm:$0xff] %v10484_v6  ;;  %14081 = vst [vmem:[#allocation127_spill] sm:$0xff] %v10489_v55  ;;  %v10507_v6 = vld [vmem:[%s11963_s3 + $0x1a8] sm:$0x3]  ;;  %v2667_v55 = vrot.slane %v10289_v41, 1  ;;  %v10532_v20 = vmul.f32 %v14092_v52, %v14038_v60 }
 0x29c   :  { %14082 = vst [vmem:[#allocation69_spill] sm:$0xff] %v10493_v32  ;;  %14084 = vst [vmem:[#allocation161_spill] sm:$0xff] %v10497_v62  ;;  %v2669_v32 = vrot.slane %v10293_v46, 1  ;;  %v2672_v62 = vrot.slane %v10306_v13, 1  ;;  %v14090_v41 = vld [vmem:[#allocation6_spill] sm:$0xff]  ;;  %v14096_v13 = vld [vmem:[#allocation137_spill] sm:$0xff]  ;;  %v10553_v52 = vmul.f32 %v14038_v60, %v10507_v6 }
 0x29d   :  { %14086 = vst [vmem:[#allocation16_spill] sm:$0xff] %v10501_v11  ;;  %14087 = vst [vmem:[#allocation132_spill] sm:$0xff] %v10507_v6  ;;  %v2675_v11 = vrot.slane %v10314_v36, 1  ;;  %v10528_v46 = vmul.f32 %v14090_v41, %v14038_v60  ;;  %v10541_v36 = vmul.f32 %v10537_v7, %v14038_v60  ;;  %v10545_v8 = vmul.f32 %v14038_v60, %v14096_v13 }
 0x29e   :  { %14093 = vst [vmem:[#allocation134_spill] sm:$0xff] %v10532_v20  ;;  %14094 = vst [vmem:[#allocation14_spill] sm:$0xff] %v10537_v7  ;;  %v10549_v41 = vmul.f32 %v14038_v60, %v14098_v12  ;;  %v10558_v20 = vld [vmem:[%s11963_s3 + $0x1e0] sm:$0xff]  ;;  %v2666_v13 = vsel %vm456_vm0, %v2664_v61, %v2665_v63  ;;  %v2671_v12 = vsel %vm456_vm0, %v2669_v32, %v2670_v54  ;;  %v2685_v61 = vrot.slane %v10348_v31, 1 }
 0x29f   :  { %14091 = vst [vmem:[#allocation34_spill] sm:$0xff] %v10528_v46  ;;  %14095 = vst [vmem:[#allocation106_spill] sm:$0xff] %v10541_v36  ;;  %v10562_v7 = vmul.f32 %v10558_v20, %v14038_v60  ;;  %v2673_v6 = vsel %vm456_vm0, %v2670_v54, %v2672_v62  ;;  %v10571_v36 = vsel %vm456_vm0, %v2675_v11, %v2677_v29  ;;  %v2680_v46 = vrot.slane %v10331_v33, 1 }
 0x2a0   :  { %14097 = vst [vmem:[#allocation57_spill] sm:$0xff] %v10545_v8  ;;  %14099 = vst [vmem:[#allocation7_spill] sm:$0xff] %v10549_v41  ;;  %v2668_v8 = vsel %vm456_vm0, %v2665_v63, %v2667_v55  ;;  %v2679_v41 = vrot.slane %v10327_v40, 1  ;;  %v2682_v60 = vrot.slane %v10340_v4, 1  ;;  %v2687_v63 = vrot.slane %v10357_v2, 1 }
 0x2a1   :  { %14100 = vst [vmem:[#allocation87_spill] sm:$0xff] %v10553_v52  ;;  %14101 = vst [vmem:[#allocation165_spill] sm:$0xff] %v10558_v20  ;;  %v2676_v52 = vsel %vm456_vm0, %v2674_v18, %v2675_v11  ;;  %v2684_v20 = vrot.slane %v10344_v34, 1  ;;  %v2689_v32 = vrot.slane %v10361_v59, 1  ;;  %v2690_v40 = vrot.slane %v10365_v26, 1 }
 0x2a2   :  { %14102 = vst [vmem:[#allocation88_spill] sm:$0xff] %v10562_v7  ;;  %14103 = vst [vmem:[#allocation139_spill] sm:$0xff] %v10571_v36  ;;  %v2692_v62 = vrot.slane %v10374_v19, 1  ;;  %v2694_v55 = vrot.slane %v10378_v38, 1  ;;  %v2695_v11 = vrot.slane %v10382_v21, 1  ;;  %v2697_v33 = vrot.slane %v10391_v58, 1 }
 0x2a3   :  { %v2699_v4 = vrot.slane %v10395_v53, 1  ;;  %v2700_v34 = vrot.slane %v10399_v1, 1  ;;  %v2702_v31 = vrot.slane %v10408_v35, 1  ;;  %v2704_v2 = vrot.slane %v10412_v15, 1 }
 0x2a4   :  { %v2705_v59 = vrot.slane %v10416_v51, 1  ;;  %v2707_v26 = vrot.slane %v10425_v27, 1  ;;  %v10591_v19 = vsel %vm456_vm0, %v2679_v41, %v2680_v46  ;;  %v10594_v38 = vsel %vm456_vm0, %v2680_v46, %v2682_v60  ;;  %v10633_v46 = vld [vmem:[%s11960_s0 + $0x8] ss:$0 sm:$0xff] }
 0x2a5   :  { %14104 = vst [vmem:[#allocation86_spill] sm:$0xff] %v10591_v19  ;;  %14105 = vst [vmem:[#allocation166_spill] sm:$0xff] %v10594_v38  ;;  %v2709_v58 = vrot.slane %v10429_v17, 1  ;;  %v2710_v53 = vrot.slane %v10433_v39, 1  ;;  %v10599_v21 = vsel %vm456_vm0, %v2684_v20, %v2685_v61  ;;  %v10602_v35 = vsel %vm456_vm0, %v2685_v61, %v2687_v63  ;;  %v14132_v61 = vld [vmem:[#allocation80_spill] sm:$0xff] }
 0x2a6   :  { %14106 = vst [vmem:[#allocation33_spill] sm:$0xff] %v10599_v21  ;;  %14107 = vst [vmem:[#allocation93_spill] sm:$0xff] %v10602_v35  ;;  %v10605_v51 = vsel %vm456_vm0, %v2689_v32, %v2690_v40  ;;  %v2712_v27 = vrot.slane %v10442_v42, 1  ;;  %v10609_v15 = vsel %vm456_vm0, %v2690_v40, %v2692_v62  ;;  %v10612_v1 = vsel %vm456_vm0, %v2694_v55, %v2695_v11  ;;  %v14118_v40 = vld [vmem:[#allocation63_spill] sm:$0xff] }
 0x2a7   :  { %14108 = vst [vmem:[#allocation39_spill] sm:$0xff] %v10605_v51  ;;  %14109 = vst [vmem:[#allocation108_spill] sm:$0xff] %v10609_v15  ;;  %v10615_v17 = vsel %vm456_vm0, %v2695_v11, %v2697_v33  ;;  %v10618_v39 = vsel %vm456_vm0, %v2699_v4, %v2700_v34  ;;  %v10621_v54 = vsel %vm456_vm0, %v2700_v34, %v2702_v31  ;;  %v14120_v55 = vld [vmem:[#allocation123_spill] sm:$0xff]  ;;  %v14122_v33 = vld [vmem:[#allocation68_spill] sm:$0xff] }
 0x2a8   :  { %14110 = vst [vmem:[#allocation38_spill] sm:$0xff] %v10612_v1  ;;  %14111 = vst [vmem:[#allocation91_spill] sm:$0xff] %v10615_v17  ;;  %v10624_v18 = vsel %vm456_vm0, %v2704_v2, %v2705_v59  ;;  %v10627_v42 = vsel %vm456_vm0, %v2705_v59, %v2707_v26  ;;  %v10636_v20 = vsel %vm456_vm0, %v2709_v58, %v2710_v53  ;;  %v14124_v34 = vld [vmem:[#allocation12_spill] sm:$0xff]  ;;  %v14126_v2 = vld [vmem:[#allocation70_spill] sm:$0xff] }
 0x2a9   :  { %14112 = vst [vmem:[#allocation41_spill] sm:$0xff] %v10618_v39  ;;  %14113 = vst [vmem:[#allocation168_spill] sm:$0xff] %v10621_v54  ;;  %v10642_v63 = vsel %vm456_vm0, %v2710_v53, %v2712_v27  ;;  %v10646_v62 = vadd.f32 %v2666_v13, %v14118_v40  ;;  %v10649_v11 = vadd.f32 %v2668_v8, %v14120_v55  ;;  %v4196_v26 = vld [vmem:[%s11963_s3 + $0x30] sm:$0xff]  ;;  %v4197_v8 = vld [vmem:[%s11963_s3 + $0x38] sm:$0xff] }
 0x2aa   :  { %14114 = vst [vmem:[#allocation42_spill] sm:$0xff] %v10624_v18  ;;  %14115 = vst [vmem:[#allocation140_spill] sm:$0xff] %v10627_v42  ;;  %v10652_v4 = vadd.f32 %v2671_v12, %v14122_v33  ;;  %v10655_v31 = vadd.f32 %v2673_v6, %v14124_v34  ;;  %v10658_v59 = vadd.f32 %v2676_v52, %v14126_v2  ;;  %v4198_v52 = vld [vmem:[%s11963_s3 + $0x48] sm:$0xff]  ;;  %v4199_v53 = vld [vmem:[%s11963_s3 + $0x50] sm:$0xff] }
 0x2ab   :  { %14116 = vst [vmem:[#allocation48_spill] sm:$0xff] %v10636_v20  ;;  %14117 = vst [vmem:[#allocation109_spill] sm:$0xff] %v10642_v63  ;;  %v10664_v58 = vmul.f32 %v4196_v26, %v10633_v46  ;;  %v10670_v13 = vmul.f32 %v4197_v8, %v10633_v46  ;;  %v10674_v6 = vmul.f32 %v10285_v44, %v10633_v46  ;;  %v4200_v44 = vld [vmem:[%s11963_s3 + $0x60] sm:$0xff]  ;;  %v4201_v33 = vld [vmem:[%s11963_s3 + $0x68] sm:$0xff] }
 0x2ac   :  { %14119 = vst [vmem:[#allocation153_spill] sm:$0xff] %v10646_v62  ;;  %14121 = vst [vmem:[#allocation95_spill] sm:$0xff] %v10649_v11  ;;  %v10680_v12 = vmul.f32 %v4198_v52, %v10633_v46  ;;  %v10686_v27 = vmul.f32 %v4199_v53, %v10633_v46  ;;  %v10690_v40 = vmul.f32 %v10302_v0, %v10633_v46  ;;  %v4202_v0 = vld [vmem:[%s11963_s3 + $0x78] sm:$0xff]  ;;  %v4203_v8 = vld [vmem:[%s11963_s3 + $0x80] sm:$0xff] }
 0x2ad   :  { %14123 = vst [vmem:[#allocation117_spill] sm:$0xff] %v10652_v4  ;;  %14125 = vst [vmem:[#allocation114_spill] sm:$0xff] %v10655_v31  ;;  %v10696_v55 = vmul.f32 %v4200_v44, %v10633_v46  ;;  %v10702_v34 = vmul.f32 %v4201_v33, %v10633_v46  ;;  %v10706_v2 = vmul.f32 %v10319_v45, %v10633_v46  ;;  %v4204_v45 = vld [vmem:[%s11963_s3 + $0x90] sm:$0xff]  ;;  %v4205_v33 = vld [vmem:[%s11963_s3 + $0x98] sm:$0xff]  ;;  %v3150_v43 = vrot.slane %v10670_v13, 2 }
 0x2ae   :  { %14127 = vst [vmem:[#allocation118_spill] sm:$0xff] %v10658_v59  ;;  %v10712_v26 = vmul.f32 %v4202_v0, %v10633_v46  ;;  %v10718_v52 = vmul.f32 %v4203_v8, %v10633_v46  ;;  %v10722_v53 = vmul.f32 %v10336_v30, %v10633_v46  ;;  %v10728_v44 = vmul.f32 %v4204_v45, %v10633_v46  ;;  %v4206_v8 = vld [vmem:[%s11963_s3 + $0x1e8] sm:$0xff]  ;;  %v4207_v45 = vld [vmem:[%s11963_s3 + $0x1f8] sm:$0xff] }
 0x2af   :  { %v10734_v0 = vmul.f32 %v4205_v33, %v10633_v46  ;;  %v10740_v30 = vmul.f32 %v4206_v8, %v10633_v46  ;;  %v10744_v32 = vmul.f32 %v14132_v61, %v10633_v46  ;;  %v10750_v60 = vmul.f32 %v4207_v45, %v10633_v46  ;;  %v4208_v33 = vld [vmem:[%s11963_s3 + $0x200] sm:$0xff]  ;;  %v14133_v8 = vld [vmem:[#allocation82_spill] sm:$0xff]  ;;  %v4209_v61 = vld [vmem:[%s11963_s3 + $0x210] sm:$0xff] }
 0x2b0   :  { %14128 = vst [vmem:[#allocation145_spill] sm:$0xff] %v10722_v53  ;;  %14129 = vst [vmem:[#allocation74_spill] sm:$0xff] %v10728_v44  ;;  %v10756_v29 = vmul.f32 %v4208_v33, %v10633_v46  ;;  %v10760_v41 = vmul.f32 %v14133_v8, %v10633_v46  ;;  %v10766_v7 = vmul.f32 %v4209_v61, %v10633_v46  ;;  %v4210_v45 = vld [vmem:[%s11963_s3 + $0x218] sm:$0xff]  ;;  %v14134_v33 = vld [vmem:[#allocation110_spill] sm:$0xff]  ;;  %v3155_v5 = vrot.slane %v10686_v27, 2 }
 0x2b1   :  { %14130 = vst [vmem:[#allocation35_spill] sm:$0xff] %v10734_v0  ;;  %14131 = vst [vmem:[#allocation37_spill] sm:$0xff] %v10740_v30  ;;  %v10772_v63 = vmul.f32 %v4210_v45, %v10633_v46  ;;  %v10776_v20 = vmul.f32 %v14134_v33, %v10633_v46  ;;  %v4211_v8 = vld [vmem:[%s11963_s3 + $0x228] sm:$0xff]  ;;  %v4212_v61 = vld [vmem:[%s11963_s3 + $0x230] sm:$0xff]  ;;  %v10955_v22 = vmul.f32 %v14145_v24, %v10633_v46  ;;  %v3157_v48 = vrot.slane %v10690_v40, 2 }
 0x2b2   :  { %v10782_v42 = vmul.f32 %v4211_v8, %v10633_v46  ;;  %v10788_v18 = vmul.f32 %v4212_v61, %v10633_v46  ;;  %v14135_v45 = vld [vmem:[#allocation43_spill] sm:$0xff]  ;;  %v4213_v33 = vld [vmem:[%s11963_s3 + $0x240] sm:$0xff]  ;;  %v4214_v8 = vld [vmem:[%s11963_s3 + $0x248] sm:$0xff] }
 0x2b3   :  { %v10792_v54 = vmul.f32 %v14135_v45, %v10633_v46  ;;  %v10798_v39 = vmul.f32 %v4213_v33, %v10633_v46  ;;  %v10804_v17 = vmul.f32 %v4214_v8, %v10633_v46  ;;  %v14136_v61 = vld [vmem:[#allocation76_spill] sm:$0xff]  ;;  %v4216_v33 = vld [vmem:[%s11963_s3 + $0x260] sm:$0xff] }
 0x2b4   :  { %v10808_v1 = vmul.f32 %v14136_v61, %v10633_v46  ;;  %v4215_v45 = vld [vmem:[%s11963_s3 + $0x258] sm:$0xff]  ;;  %v10820_v51 = vmul.f32 %v4216_v33, %v10633_v46  ;;  %v4217_v61 = vld [vmem:[%s11963_s3 + $0x270] sm:$0xff] }
 0x2b5   :  { %v10814_v15 = vmul.f32 %v4215_v45, %v10633_v46  ;;  %v14137_v8 = vld [vmem:[#allocation112_spill] sm:$0xff]  ;;  %v10830_v37 = vmul.f32 %v4217_v61, %v10633_v46  ;;  %v4220_v61 = vld [vmem:[%s11963_s3 + $0x290] sm:$0xff] }
 0x2b6   :  { %v10824_v14 = vmul.f32 %v14137_v8, %v10633_v46  ;;  %v4218_v45 = vld [vmem:[%s11963_s3 + $0x278] sm:$0xff]  ;;  %v4219_v8 = vld [vmem:[%s11963_s3 + $0x288] sm:$0xff]  ;;  %v10852_v9 = vmul.f32 %v4220_v61, %v10633_v46  ;;  %v14140_v61 = vld [vmem:[#allocation23_spill] sm:$0xff] }
 0x2b7   :  { %v10836_v35 = vmul.f32 %v4218_v45, %v10633_v46  ;;  %v14138_v33 = vld [vmem:[#allocation20_spill] sm:$0xff]  ;;  %v10846_v38 = vmul.f32 %v4219_v8, %v10633_v46  ;;  %v14139_v45 = vld [vmem:[#allocation22_spill] sm:$0xff]  ;;  %v10872_v19 = vmul.f32 %v14140_v61, %v10633_v46  ;;  %v4225_v61 = vld [vmem:[%s11963_s3 + $0x2d0] sm:$0xff] }
 0x2b8   :  { %v10840_v21 = vmul.f32 %v14138_v33, %v10633_v46  ;;  %v10856_v0 = vmul.f32 %v14139_v45, %v10633_v46  ;;  %v4221_v33 = vld [vmem:[%s11963_s3 + $0x2a0] sm:$0xff]  ;;  %v4222_v8 = vld [vmem:[%s11963_s3 + $0x2a8] sm:$0xff]  ;;  %v4223_v45 = vld [vmem:[%s11963_s3 + $0x2b8] sm:$0xff]  ;;  %v10894_v31 = vmul.f32 %v4225_v61, %v10633_v46 }
 0x2b9   :  { %v10862_v44 = vmul.f32 %v4221_v33, %v10633_v46  ;;  %v10868_v59 = vmul.f32 %v4222_v8, %v10633_v46  ;;  %v10878_v53 = vmul.f32 %v4223_v45, %v10633_v46  ;;  %v4224_v33 = vld [vmem:[%s11963_s3 + $0x2c0] sm:$0xff]  ;;  %v14141_v8 = vld [vmem:[#allocation24_spill] sm:$0xff]  ;;  %v4228_v61 = vld [vmem:[%s11963_s3 + $0x2f0] sm:$0xff] }
 0x2ba   :  { %v10884_v28 = vmul.f32 %v4224_v33, %v10633_v46  ;;  %v10888_v16 = vmul.f32 %v14141_v8, %v10633_v46  ;;  %v4226_v45 = vld [vmem:[%s11963_s3 + $0x2d8] sm:$0xff]  ;;  %v14142_v33 = vld [vmem:[#allocation25_spill] sm:$0xff]  ;;  %v4227_v8 = vld [vmem:[%s11963_s3 + $0x2e8] sm:$0xff]  ;;  %v10916_v50 = vmul.f32 %v4228_v61, %v10633_v46 }
 0x2bb   :  { %v10900_v36 = vmul.f32 %v4226_v45, %v10633_v46  ;;  %v10904_v23 = vmul.f32 %v14142_v33, %v10633_v46  ;;  %v10910_v3 = vmul.f32 %v4227_v8, %v10633_v46  ;;  %v14143_v45 = vld [vmem:[#allocation29_spill] sm:$0xff]  ;;  %v4230_v8 = vld [vmem:[%s11963_s3 + $0x308] sm:$0xff]  ;;  %v14144_v61 = vld [vmem:[#allocation31_spill] sm:$0xff] }
 0x2bc   :  { %v10920_v57 = vmul.f32 %v14143_v45, %v10633_v46  ;;  %v4229_v33 = vld [vmem:[%s11963_s3 + $0x300] sm:$0xff]  ;;  %v10932_v56 = vmul.f32 %v4230_v8, %v10633_v46  ;;  %v10936_v49 = vmul.f32 %v14144_v61, %v10633_v46  ;;  %v4231_v45 = vld [vmem:[%s11963_s3 + $0x318] sm:$0xff]  ;;  %v3149_v8 = vrot.slane %v10664_v58, 2 }
 0x2bd   :  { %v10926_v10 = vmul.f32 %v4229_v33, %v10633_v46  ;;  %v10942_v47 = vmul.f32 %v4231_v45, %v10633_v46  ;;  %v4232_v33 = vld [vmem:[%s11963_s3 + $0x320] sm:$0xff]  ;;  %v3152_v61 = vrot.slane %v10674_v6, 2  ;;  %v3154_v45 = vrot.slane %v10680_v12, 2  ;;  %v4234_v13 = vld [vmem:[%s11963_s3 + $0x338] sm:$0xff]  ;;  %v14150_v12 = vld [vmem:[#allocation30_spill] sm:$0xff] }
 0x2be   :  { %v10948_v25 = vmul.f32 %v4232_v33, %v10633_v46  ;;  %v4233_v33 = vld [vmem:[%s11963_s3 + $0x330] sm:$0xff]  ;;  %v10970_v24 = vmul.f32 %v4234_v13, %v10633_v46  ;;  %v3159_v6 = vrot.slane %v10696_v55, 2  ;;  %v14146_v27 = vld [vmem:[#allocation36_spill] sm:$0xff]  ;;  %v3232_v55 = vrot.slane %v10744_v32, 2 }
 0x2bf   :  { %v10964_v58 = vmul.f32 %v4233_v33, %v10633_v46  ;;  %v10976_v40 = vmul.f32 %v14146_v27, %v10633_v46  ;;  %v4235_v33 = vld [vmem:[%s11963_s3 + $0x348] sm:$0xff]  ;;  %v4236_v13 = vld [vmem:[%s11963_s3 + $0x350] sm:$0xff]  ;;  %v10993_v27 = vmul.f32 %v10633_v46, %v14150_v12  ;;  %v10996_v62 = vsel %vm942_vm1, %v3149_v8, %v3150_v43 }
 0x2c0   :  { %v10982_v4 = vmul.f32 %v4235_v33, %v10633_v46  ;;  %v10988_v11 = vmul.f32 %v4236_v13, %v10633_v46  ;;  %v11006_v13 = vsel %vm942_vm1, %v3155_v5, %v3157_v48  ;;  %v14151_v12 = vrot.slane %v10702_v34, 2 }
 0x2c1   :  { %14147 = vst [vmem:[#allocation40_spill] sm:$0xff] %v10976_v40  ;;  %v10999_v40 = vsel %vm942_vm1, %v3150_v43, %v3152_v61  ;;  %v3234_v61 = vrot.slane %v10750_v60, 2  ;;  %v3235_v33 = vrot.slane %v10756_v29, 2  ;;  %v3240_v32 = vrot.slane %v10772_v63, 2 }
 0x2c2   :  { %14148 = vst [vmem:[#allocation89_spill] sm:$0xff] %v10982_v4  ;;  %14149 = vst [vmem:[#allocation90_spill] sm:$0xff] %v10988_v11  ;;  %v11003_v4 = vsel %vm942_vm1, %v3154_v45, %v3155_v5  ;;  %v12357_v11 = vrot.slane %v10740_v30, 2  ;;  %v11013_v8 = vsel %vm942_vm1, %v3159_v6, %v14151_v12  ;;  %v3237_v5 = vrot.slane %v10760_v41, 2 }
 0x2c3   :  { %v3239_v45 = vrot.slane %v10766_v7, 2  ;;  %v3242_v6 = vrot.slane %v10776_v20, 2  ;;  %v3244_v12 = vrot.slane %v10782_v42, 2  ;;  %v3245_v43 = vrot.slane %v10788_v18, 2 }
 0x2c4   :  { %v11021_v48 = vsel %vm942_vm1, %v12357_v11, %v3232_v55  ;;  %v3247_v60 = vrot.slane %v10792_v54, 2  ;;  %v3249_v29 = vrot.slane %v10798_v39, 2  ;;  %v3250_v30 = vrot.slane %v10804_v17, 2  ;;  %v14230_v11 = vld [vmem:[#allocation166_spill] sm:$0xff] }
 0x2c5   :  { %v3252_v55 = vrot.slane %v10808_v1, 2  ;;  %v3254_v41 = vrot.slane %v10814_v15, 2  ;;  %v3255_v7 = vrot.slane %v10820_v51, 2  ;;  %v3257_v63 = vrot.slane %v10824_v14, 2 }
 0x2c6   :  { %v3259_v20 = vrot.slane %v10830_v37, 2  ;;  %v3260_v42 = vrot.slane %v10836_v35, 2  ;;  %v3262_v18 = vrot.slane %v10840_v21, 2  ;;  %v3264_v54 = vrot.slane %v10846_v38, 2 }
 0x2c7   :  { %v3265_v39 = vrot.slane %v10852_v9, 2  ;;  %v3267_v17 = vrot.slane %v10856_v0, 2  ;;  %v3236_v1 = vsel %vm942_vm1, %v3234_v61, %v3235_v33  ;;  %v3238_v15 = vsel %vm942_vm1, %v3235_v33, %v3237_v5 }
 0x2c8   :  { %v3269_v51 = vrot.slane %v10862_v44, 2  ;;  %v3270_v14 = vrot.slane %v10868_v59, 2  ;;  %v3241_v37 = vsel %vm942_vm1, %v3239_v45, %v3240_v32  ;;  %v3243_v35 = vsel %vm942_vm1, %v3240_v32, %v3242_v6 }
 0x2c9   :  { %v3246_v21 = vsel %vm942_vm1, %v3244_v12, %v3245_v43  ;;  %v3248_v38 = vsel %vm942_vm1, %v3245_v43, %v3247_v60  ;;  %v3251_v9 = vsel %vm942_vm1, %v3249_v29, %v3250_v30  ;;  %v3253_v0 = vsel %vm942_vm1, %v3250_v30, %v3252_v55 }
 0x2ca   :  { %v3256_v61 = vsel %vm942_vm1, %v3254_v41, %v3255_v7  ;;  %v3258_v33 = vsel %vm942_vm1, %v3255_v7, %v3257_v63  ;;  %v3261_v44 = vsel %vm942_vm1, %v3259_v20, %v3260_v42  ;;  %v3263_v59 = vsel %vm942_vm1, %v3260_v42, %v3262_v18  ;;  %v14152_v20 = vld [vmem:[#allocation40_spill] sm:$0xff]  ;;  %v14153_v42 = vld [vmem:[#allocation89_spill] sm:$0xff]  ;;  %v14154_v18 = vld [vmem:[#allocation90_spill] sm:$0xff] }
 0x2cb   :  { %v3266_v5 = vsel %vm942_vm1, %v3264_v54, %v3265_v39  ;;  %v3268_v32 = vsel %vm942_vm1, %v3265_v39, %v3267_v17  ;;  %v3271_v45 = vsel %vm942_vm1, %v3269_v51, %v3270_v14  ;;  %v3272_v43 = vrot.slane %v10872_v19, 2 }
 0x2cc   :  { %v3274_v6 = vrot.slane %v10878_v53, 2  ;;  %v3275_v30 = vrot.slane %v10884_v28, 2  ;;  %v3277_v12 = vrot.slane %v10888_v16, 2  ;;  %v3279_v60 = vrot.slane %v10894_v31, 2 }
 0x2cd   :  { %v3280_v29 = vrot.slane %v10900_v36, 2  ;;  %v3282_v55 = vrot.slane %v10904_v23, 2  ;;  %v3284_v41 = vrot.slane %v10910_v3, 2  ;;  %v3285_v7 = vrot.slane %v10916_v50, 2 }
 0x2ce   :  { %v3287_v63 = vrot.slane %v10920_v57, 2  ;;  %v3289_v19 = vrot.slane %v10926_v10, 2  ;;  %v3290_v53 = vrot.slane %v10932_v56, 2  ;;  %v3292_v28 = vrot.slane %v10936_v49, 2 }
 0x2cf   :  { %v3294_v16 = vrot.slane %v10942_v47, 2  ;;  %v3295_v31 = vrot.slane %v10948_v25, 2  ;;  %v3297_v36 = vrot.slane %v10955_v22, 2  ;;  %v3299_v23 = vrot.slane %v10964_v58, 2 }
 0x2d0   :  { %v3300_v3 = vrot.slane %v10970_v24, 2  ;;  %v3302_v50 = vrot.slane %v14152_v20, 2  ;;  %v3273_v57 = vsel %vm942_vm1, %v3270_v14, %v3272_v43  ;;  %v3304_v10 = vrot.slane %v14153_v42, 2 }
 0x2d1   :  { %v3305_v56 = vrot.slane %v14154_v18, 2  ;;  %v3307_v49 = vrot.slane %v10993_v27, 2  ;;  %v3276_v47 = vsel %vm942_vm1, %v3274_v6, %v3275_v30  ;;  %v3278_v25 = vsel %vm942_vm1, %v3275_v30, %v3277_v12  ;;  %v14155_v12 = vld [vmem:[#allocation153_spill] sm:$0xff] }
 0x2d2   :  { %v3281_v22 = vsel %vm942_vm1, %v3279_v60, %v3280_v29  ;;  %v3283_v58 = vsel %vm942_vm1, %v3280_v29, %v3282_v55  ;;  %v3286_v24 = vsel %vm942_vm1, %v3284_v41, %v3285_v7  ;;  %v3288_v54 = vsel %vm942_vm1, %v3285_v7, %v3287_v63  ;;  %v14157_v29 = vld [vmem:[#allocation95_spill] sm:$0xff]  ;;  %v14159_v41 = vld [vmem:[#allocation117_spill] sm:$0xff] }
 0x2d3   :  { %v3291_v39 = vsel %vm942_vm1, %v3289_v19, %v3290_v53  ;;  %v3293_v17 = vsel %vm942_vm1, %v3290_v53, %v3292_v28  ;;  %v3296_v51 = vsel %vm942_vm1, %v3294_v16, %v3295_v31  ;;  %v3298_v27 = vsel %vm942_vm1, %v3295_v31, %v3297_v36  ;;  %v14161_v63 = vld [vmem:[#allocation21_spill] sm:$0xff]  ;;  %v14162_v53 = vld [vmem:[#allocation78_spill] sm:$0xff] }
 0x2d4   :  { %v3301_v14 = vsel %vm942_vm1, %v3299_v23, %v3300_v3  ;;  %v3303_v43 = vsel %vm942_vm1, %v3300_v3, %v3302_v50  ;;  %v3306_v6 = vsel %vm942_vm1, %v3304_v10, %v3305_v56  ;;  %v3308_v30 = vsel %vm942_vm1, %v3305_v56, %v3307_v49  ;;  %v14163_v16 = vld [vmem:[#allocation26_spill] sm:$0xff]  ;;  %v14165_v23 = vld [vmem:[#allocation84_spill] sm:$0xff] }
 0x2d5   :  { %v11098_v60 = vadd.f32 %v10996_v62, %v14155_v12  ;;  %v11102_v55 = vadd.f32 %v10999_v40, %v14157_v29  ;;  %v11106_v7 = vadd.f32 %v11003_v4, %v14159_v41  ;;  %v11110_v19 = vadd.f32 %v11021_v48, %v14161_v63  ;;  %v14164_v62 = vld [vmem:[#allocation27_spill] sm:$0xff]  ;;  %v14166_v3 = vld [vmem:[#allocation28_spill] sm:$0xff]  ;;  %v14167_v4 = vld [vmem:[#allocation17_spill] sm:$0xff] }
 0x2d6   :  { %v11113_v28 = vadd.f32 %v3236_v1, %v14162_v53  ;;  %v11116_v31 = vadd.f32 %v3238_v15, %v14163_v16  ;;  %v11119_v36 = vadd.f32 %v3241_v37, %v14164_v62  ;;  %v11122_v40 = vadd.f32 %v3243_v35, %v14165_v23  ;;  %v14168_v48 = vld [vmem:[#allocation9_spill] sm:$0xff]  ;;  %v14169_v1 = vld [vmem:[#allocation55_spill] sm:$0xff]  ;;  %v14171_v37 = vld [vmem:[#allocation18_spill] sm:$0xff] }
 0x2d7   :  { %14156 = vst [vmem:[#allocation49_spill] sm:$0xff] %v11098_v60  ;;  %14158 = vst [vmem:[#allocation154_spill] sm:$0xff] %v11102_v55  ;;  %v11125_v20 = vadd.f32 %v3246_v21, %v14166_v3  ;;  %v11128_v50 = vadd.f32 %v3248_v38, %v14167_v4  ;;  %v11131_v42 = vadd.f32 %v3251_v9, %v14168_v48  ;;  %v14170_v15 = vld [vmem:[#allocation151_spill] sm:$0xff]  ;;  %v14174_v38 = vld [vmem:[#allocation152_spill] sm:$0xff] }
 0x2d8   :  { %14160 = vst [vmem:[#allocation155_spill] sm:$0xff] %v11106_v7  ;;  %v11134_v10 = vadd.f32 %v3253_v0, %v14169_v1  ;;  %v11137_v18 = vadd.f32 %v3256_v61, %v14170_v15  ;;  %v11140_v56 = vadd.f32 %v3258_v33, %v14171_v37  ;;  %v14172_v35 = vld [vmem:[#allocation111_spill] sm:$0xff]  ;;  %v11149_v29 = vadd.f32 %v3266_v5, %v14174_v38  ;;  %v14175_v9 = vld [vmem:[#allocation129_spill] sm:$0xff]  ;;  %v14177_v61 = vld [vmem:[#allocation56_spill] sm:$0xff] }
 0x2d9   :  { %v11143_v49 = vadd.f32 %v3261_v44, %v14172_v35  ;;  %v14173_v21 = vld [vmem:[#allocation19_spill] sm:$0xff]  ;;  %v11152_v41 = vadd.f32 %v3268_v32, %v14175_v9  ;;  %v11158_v53 = vadd.f32 %v3273_v57, %v14177_v61  ;;  %v14178_v33 = vld [vmem:[#allocation92_spill] sm:$0xff]  ;;  %v14183_v5 = vld [vmem:[#allocation66_spill] sm:$0xff] }
 0x2da   :  { %v11146_v12 = vadd.f32 %v3263_v59, %v14173_v21  ;;  %v14176_v0 = vld [vmem:[#allocation15_spill] sm:$0xff]  ;;  %v11161_v16 = vadd.f32 %v3276_v47, %v14178_v33  ;;  %v14181_v59 = vld [vmem:[#allocation65_spill] sm:$0xff]  ;;  %v11170_v3 = vadd.f32 %v3283_v58, %v14183_v5  ;;  %v14185_v32 = vld [vmem:[#allocation72_spill] sm:$0xff] }
 0x2db   :  { %v11155_v63 = vadd.f32 %v3271_v45, %v14176_v0  ;;  %v14179_v44 = vld [vmem:[#allocation59_spill] sm:$0xff]  ;;  %v11167_v23 = vadd.f32 %v3281_v22, %v14181_v59  ;;  %v11173_v4 = vadd.f32 %v3286_v24, %v14185_v32  ;;  %v14187_v45 = vld [vmem:[#allocation96_spill] sm:$0xff]  ;;  %v14191_v47 = vld [vmem:[#allocation173_spill] sm:$0xff] }
 0x2dc   :  { %v11164_v62 = vadd.f32 %v3278_v25, %v14179_v44  ;;  %14184 = vst [vmem:[#allocation159_spill] sm:$0xff] %v11170_v3  ;;  %v11176_v48 = vadd.f32 %v3288_v54, %v14187_v45  ;;  %v14189_v57 = vld [vmem:[#allocation44_spill] sm:$0xff]  ;;  %v11182_v15 = vadd.f32 %v3293_v17, %v14191_v47  ;;  %v14193_v25 = vld [vmem:[#allocation13_spill] sm:$0xff]  ;;  %v14195_v22 = vld [vmem:[#allocation130_spill] sm:$0xff]  ;;  %v14215_v47 = vrot.slane %v10706_v2, 2 }
 0x2dd   :  { %14182 = vst [vmem:[#allocation125_spill] sm:$0xff] %v11167_v23  ;;  %14186 = vst [vmem:[#allocation128_spill] sm:$0xff] %v11173_v4  ;;  %v11179_v1 = vadd.f32 %v3291_v39, %v14189_v57  ;;  %v11185_v37 = vadd.f32 %v3296_v51, %v14193_v25  ;;  %v11188_v35 = vadd.f32 %v3298_v27, %v14195_v22  ;;  %v14197_v58 = vld [vmem:[#allocation131_spill] sm:$0xff]  ;;  %v14199_v24 = vld [vmem:[#allocation136_spill] sm:$0xff]  ;;  %v14216_v25 = vrot.slane %v10702_v34, 2 }
 0x2de   :  { %14180 = vst [vmem:[#allocation120_spill] sm:$0xff] %v11164_v62  ;;  %14188 = vst [vmem:[#allocation162_spill] sm:$0xff] %v11176_v48  ;;  %v11191_v21 = vadd.f32 %v3301_v14, %v14197_v58  ;;  %v11194_v38 = vadd.f32 %v3303_v43, %v14199_v24  ;;  %v14201_v54 = vld [vmem:[#allocation150_spill] sm:$0xff]  ;;  %v14206_v33 = vld [vmem:[#allocation124_spill] sm:$0xff]  ;;  %v3437_v14 = vadd.f32 %v11102_v55, %v11098_v60 }
 0x2df   :  { %14190 = vst [vmem:[#allocation163_spill] sm:$0xff] %v11179_v1  ;;  %14192 = vst [vmem:[#allocation164_spill] sm:$0xff] %v11182_v15  ;;  %v11197_v9 = vadd.f32 %v3306_v6, %v14201_v54  ;;  %v14203_v39 = vld [vmem:[#allocation58_spill] sm:$0xff]  ;;  %v14207_v51 = vld [vmem:[#allocation139_spill] sm:$0xff] }
 0x2e0   :  { %14194 = vst [vmem:[#allocation135_spill] sm:$0xff] %v11185_v37  ;;  %14196 = vst [vmem:[#allocation138_spill] sm:$0xff] %v11188_v35  ;;  %v11200_v0 = vadd.f32 %v3308_v30, %v14203_v39  ;;  %v14205_v17 = vld [vmem:[#allocation62_spill] sm:$0xff]  ;;  %v2893_v44 = vadd.f32 %v14207_v51, %v14206_v33  ;;  %v14210_v43 = vld [vmem:[#allocation101_spill] sm:$0xff]  ;;  %v3438_v2 = vadd.f32 %v3437_v14, %v11106_v7 }
 0x2e1   :  { %14198 = vst [vmem:[#allocation107_spill] sm:$0xff] %v11191_v21  ;;  %14200 = vst [vmem:[#allocation167_spill] sm:$0xff] %v11194_v38  ;;  %v2722_v61 = vrot.slane %v14205_v17, 1  ;;  %v14208_v59 = vld [vmem:[#allocation114_spill] sm:$0xff]  ;;  %v14211_v5 = vrot.slane %v14210_v43, 1  ;;  %v14212_v32 = vld [vmem:[#allocation5_spill] sm:$0xff] }
 0x2e2   :  { %14202 = vst [vmem:[#allocation141_spill] sm:$0xff] %v11197_v9  ;;  %14204 = vst [vmem:[#allocation8_spill] sm:$0xff] %v11200_v0  ;;  %v11207_v27 = vadd.f32 %v11006_v13, %v14208_v59  ;;  %v14213_v6 = vrot.slane %v14212_v32, 1  ;;  %v14214_v30 = vld [vmem:[#allocation143_spill] sm:$0xff]  ;;  %v3163_v13 = vsel %vm942_vm1, %v14216_v25, %v14215_v47  ;;  %v14217_v22 = vld [vmem:[#allocation145_spill] sm:$0xff]  ;;  %v14222_v32 = vrot.slane %v10718_v52, 2 }
 0x2e3   :  { %v2971_v57 = vmul.f32 %v14214_v30, %v10633_v46  ;;  %v3167_v58 = vrot.slane %v14217_v22, 2  ;;  %v14218_v24 = vld [vmem:[#allocation75_spill] sm:$0xff]  ;;  %v14219_v54 = vld [vmem:[#allocation86_spill] sm:$0xff]  ;;  %v14228_v14 = vrot.slane %v14210_v43, 1  ;;  %v11257_v7 = vadd.f32 %v3163_v13, %v2893_v44 }
 0x2e4   :  { %14209 = vst [vmem:[#allocation94_spill] sm:$0xff] %v11207_v27  ;;  %v11216_v45 = vsel %vm456_vm0, %v14213_v6, %v14211_v5  ;;  %v2894_v39 = vadd.f32 %v14219_v54, %v14218_v24  ;;  %v4237_v17 = vld [vmem:[%s11963_s3 + $0xa8] sm:$0xff]  ;;  %v4238_v34 = vld [vmem:[%s11963_s3 + $0xb0] sm:$0xff]  ;;  %v14223_v6 = vrot.slane %v10712_v26, 2  ;;  %v3439_v26 = vadd.f32 %v3438_v2, %v11207_v27 }
 0x2e5   :  { %v2972_v33 = vmul.f32 %v4237_v17, %v10633_v46  ;;  %v14220_v51 = vld [vmem:[#allocation118_spill] sm:$0xff]  ;;  %v2973_v5 = vmul.f32 %v4238_v34, %v10633_v46  ;;  %v14225_v22 = vld [vmem:[#allocation35_spill] sm:$0xff]  ;;  %14231 = vst [vmem:[#allocation169_spill] sm:$0xff] %v11257_v7  ;;  %v3172_v43 = vrot.slane %v2971_v57, 2 }
 0x2e6   :  { %v11234_v59 = vadd.f32 %v11013_v8, %v14220_v51  ;;  %v3166_v30 = vsel %vm942_vm1, %v14223_v6, %v14222_v32  ;;  %v14224_v47 = vld [vmem:[#allocation74_spill] sm:$0xff]  ;;  %v3170_v24 = vrot.slane %v14225_v22, 2  ;;  %v14226_v8 = vld [vmem:[#allocation53_spill] sm:$0xff]  ;;  %v14229_v51 = vld [vmem:[#allocation47_spill] sm:$0xff]  ;;  %v14234_v22 = vrot.slane %v10718_v52, 2 }
 0x2e7   :  { %v3169_v25 = vrot.slane %v14224_v47, 2  ;;  %v14227_v54 = vrot.slane %v14226_v8, 1  ;;  %v2895_v34 = vadd.f32 %v14230_v11, %v14229_v51  ;;  %v14232_v55 = vld [vmem:[#allocation126_spill] sm:$0xff]  ;;  %v14233_v6 = vld [vmem:[#allocation144_spill] sm:$0xff]  ;;  %v14235_v60 = vld [vmem:[#allocation79_spill] sm:$0xff]  ;;  %v11272_v13 = vadd.f32 %v3166_v30, %v2894_v39 }
 0x2e8   :  { %14221 = vst [vmem:[#allocation142_spill] sm:$0xff] %v11234_v59  ;;  %v2724_v32 = vrot.slane %v14232_v55, 1  ;;  %v2974_v47 = vmul.f32 %v14233_v6, %v10633_v46  ;;  %v3168_v8 = vsel %vm942_vm1, %v14234_v22, %v3167_v58  ;;  %v4239_v11 = vld [vmem:[%s11963_s3 + $0xc0] sm:$0xff]  ;;  %v3440_v55 = vadd.f32 %v3439_v26, %v11234_v59  ;;  %v4240_v52 = vld [vmem:[%s11963_s3 + $0xc8] sm:$0xff]  ;;  %v14238_v51 = vld [vmem:[#allocation67_spill] sm:$0xff] }
 0x2e9   :  { %v11253_v17 = vsel %vm456_vm0, %v14228_v14, %v14227_v54  ;;  %v14236_v54 = vld [vmem:[#allocation33_spill] sm:$0xff]  ;;  %v2975_v44 = vmul.f32 %v4239_v11, %v10633_v46  ;;  %14237 = vst [vmem:[#allocation97_spill] sm:$0xff] %v11272_v13  ;;  %v2976_v58 = vmul.f32 %v4240_v52, %v10633_v46  ;;  %v3171_v57 = vsel %vm942_vm1, %v3169_v25, %v3170_v24  ;;  %v14239_v22 = vld [vmem:[#allocation50_spill] sm:$0xff]  ;;  %v14242_v30 = vld [vmem:[#allocation60_spill] sm:$0xff] }
 0x2ea   :  { %v2896_v14 = vadd.f32 %v14236_v54, %v14235_v60  ;;  %v3174_v2 = vrot.slane %v2972_v33, 2  ;;  %v3175_v60 = vrot.slane %v2973_v5, 2  ;;  %v14240_v54 = vld [vmem:[#allocation93_spill] sm:$0xff]  ;;  %v11283_v11 = vadd.f32 %v3168_v8, %v2895_v34  ;;  %v14246_v25 = vld [vmem:[#allocation98_spill] sm:$0xff]  ;;  %v14247_v6 = vld [vmem:[#allocation64_spill] sm:$0xff] }
 0x2eb   :  { %v2897_v27 = vadd.f32 %v14240_v54, %v14239_v22  ;;  %v3441_v39 = vadd.f32 %v3440_v55, %v11257_v7  ;;  %v14243_v26 = vrot.slane %v14242_v30, 1  ;;  %v14244_v59 = vld [vmem:[#allocation157_spill] sm:$0xff]  ;;  %v2977_v33 = vmul.f32 %v14246_v25, %v10633_v46  ;;  %v14248_v38 = vld [vmem:[#allocation39_spill] sm:$0xff]  ;;  %v4241_v34 = vld [vmem:[%s11963_s3 + $0xd8] sm:$0xff] }
 0x2ec   :  { %14241 = vst [vmem:[#allocation83_spill] sm:$0xff] %v11283_v11  ;;  %v14245_v0 = vrot.slane %v14244_v59, 1  ;;  %v3173_v5 = vsel %vm942_vm1, %v3170_v24, %v3172_v43  ;;  %v3177_v52 = vrot.slane %v2974_v47, 2  ;;  %v2898_v22 = vadd.f32 %v14248_v38, %v14247_v6  ;;  %v4242_v59 = vld [vmem:[%s11963_s3 + $0xe0] sm:$0xff]  ;;  %v14257_v30 = vld [vmem:[#allocation38_spill] sm:$0xff] }
 0x2ed   :  { %v2978_v8 = vmul.f32 %v4241_v34, %v10633_v46  ;;  %v11302_v55 = vadd.f32 %v3171_v57, %v2896_v14  ;;  %v2979_v24 = vmul.f32 %v4242_v59, %v10633_v46  ;;  %v3176_v47 = vsel %vm942_vm1, %v3174_v2, %v3175_v60  ;;  %v14252_v14 = vld [vmem:[#allocation108_spill] sm:$0xff]  ;;  %v14254_v34 = vld [vmem:[#allocation69_spill] sm:$0xff] }
 0x2ee   :  { %v11291_v9 = vsel %vm456_vm0, %v14245_v0, %v14243_v26  ;;  %v3442_v0 = vadd.f32 %v3441_v39, %v11272_v13  ;;  %v3179_v43 = vrot.slane %v2975_v44, 2  ;;  %v3180_v38 = vrot.slane %v2976_v58, 2  ;;  %v14255_v59 = vld [vmem:[#allocation149_spill] sm:$0xff] }
 0x2ef   :  { %14249 = vst [vmem:[#allocation103_spill] sm:$0xff] %v11302_v55  ;;  %v14250_v6 = vmov %v14243_v26  ;;  %v14251_v26 = vld [vmem:[#allocation71_spill] sm:$0xff]  ;;  %v11317_v25 = vadd.f32 %v3173_v5, %v2897_v27  ;;  %v2727_v13 = vrot.slane %v14254_v34, 1  ;;  %v2980_v7 = vmul.f32 %v14255_v59, %v10633_v46  ;;  %v14256_v2 = vld [vmem:[#allocation73_spill] sm:$0xff] }
 0x2f0   :  { %v11313_v54 = vsel %vm456_vm0, %v14250_v6, %v2722_v61  ;;  %v2899_v57 = vadd.f32 %v14252_v14, %v14251_v26  ;;  %v3443_v39 = vadd.f32 %v3442_v0, %v11283_v11  ;;  %v3178_v44 = vsel %vm942_vm1, %v3175_v60, %v3177_v52  ;;  %v4243_v61 = vld [vmem:[%s11963_s3 + $0xf0] sm:$0xff]  ;;  %v4244_v6 = vld [vmem:[%s11963_s3 + $0xf8] sm:$0xff]  ;;  %v14259_v14 = vld [vmem:[#allocation161_spill] sm:$0xff] }
 0x2f1   :  { %14253 = vst [vmem:[#allocation104_spill] sm:$0xff] %v11317_v25  ;;  %v3182_v58 = vrot.slane %v2977_v33, 2  ;;  %v2900_v21 = vadd.f32 %v14257_v30, %v14256_v2  ;;  %v2981_v27 = vmul.f32 %v4243_v61, %v10633_v46  ;;  %v11330_v5 = vadd.f32 %v3176_v47, %v2898_v22  ;;  %v14260_v59 = vld [vmem:[#allocation45_spill] sm:$0xff]  ;;  %v14261_v2 = vld [vmem:[#allocation91_spill] sm:$0xff] }
 0x2f2   :  { %v3444_v0 = vadd.f32 %v3443_v39, %v11302_v55  ;;  %v2982_v60 = vmul.f32 %v4244_v6, %v10633_v46  ;;  %v3181_v33 = vsel %vm942_vm1, %v3179_v43, %v3180_v38  ;;  %v3184_v52 = vrot.slane %v2978_v8, 2  ;;  %v14264_v6 = vld [vmem:[#allocation99_spill] sm:$0xff]  ;;  %v14265_v43 = vld [vmem:[#allocation10_spill] sm:$0xff]  ;;  %v14266_v34 = vld [vmem:[#allocation41_spill] sm:$0xff] }
 0x2f3   :  { %14258 = vst [vmem:[#allocation6_spill] sm:$0xff] %v11330_v5  ;;  %v3185_v26 = vrot.slane %v2979_v24, 2  ;;  %v2901_v30 = vadd.f32 %v14261_v2, %v14260_v59  ;;  %v11341_v61 = vadd.f32 %v3178_v44, %v2899_v57  ;;  %v14263_v47 = vrot.slane %v14238_v51, 1  ;;  %v4245_v57 = vld [vmem:[%s11963_s3 + $0x108] sm:$0xff]  ;;  %v4246_v59 = vld [vmem:[%s11963_s3 + $0x110] sm:$0xff]  ;;  %v14268_v2 = vld [vmem:[#allocation16_spill] sm:$0xff] }
 0x2f4   :  { %v3445_v22 = vadd.f32 %v3444_v0, %v11317_v25  ;;  %v2983_v55 = vmul.f32 %v14264_v6, %v10633_v46  ;;  %v3183_v8 = vsel %vm942_vm1, %v3180_v38, %v3182_v58  ;;  %v3187_v24 = vrot.slane %v2980_v7, 2  ;;  %v14269_v6 = vld [vmem:[#allocation146_spill] sm:$0xff] }
 0x2f5   :  { %14262 = vst [vmem:[#allocation51_spill] sm:$0xff] %v11341_v61  ;;  %v11347_v39 = vsel %vm456_vm0, %v2724_v32, %v14263_v47  ;;  %v2902_v11 = vadd.f32 %v14266_v34, %v14265_v43  ;;  %v2984_v44 = vmul.f32 %v4245_v57, %v10633_v46  ;;  %v11358_v0 = vadd.f32 %v3181_v33, %v2900_v21  ;;  %v14270_v43 = vld [vmem:[#allocation168_spill] sm:$0xff]  ;;  %v14272_v33 = vld [vmem:[#allocation133_spill] sm:$0xff] }
 0x2f6   :  { %v3446_v32 = vadd.f32 %v3445_v22, %v11330_v5  ;;  %v2985_v38 = vmul.f32 %v4246_v59, %v10633_v46  ;;  %v3186_v7 = vsel %vm942_vm1, %v3184_v52, %v3185_v26  ;;  %v3189_v58 = vrot.slane %v2981_v27, 2  ;;  %v14273_v5 = vld [vmem:[#allocation100_spill] sm:$0xff]  ;;  %v14274_v52 = vld [vmem:[#allocation46_spill] sm:$0xff]  ;;  %v4247_v47 = vld [vmem:[%s11963_s3 + $0x120] sm:$0xff] }
 0x2f7   :  { %14267 = vst [vmem:[#allocation137_spill] sm:$0xff] %v11358_v0  ;;  %v3190_v34 = vrot.slane %v2982_v60, 2  ;;  %v2903_v25 = vadd.f32 %v14270_v43, %v14269_v6  ;;  %v11369_v57 = vadd.f32 %v3183_v8, %v2901_v30  ;;  %v2986_v35 = vmul.f32 %v14273_v5, %v10633_v46  ;;  %v14275_v27 = vld [vmem:[#allocation42_spill] sm:$0xff]  ;;  %v14279_v22 = vld [vmem:[#allocation140_spill] sm:$0xff] }
 0x2f8   :  { %v3447_v21 = vadd.f32 %v3446_v32, %v11341_v61  ;;  %v3188_v59 = vsel %vm942_vm1, %v3185_v26, %v3187_v24  ;;  %v3192_v37 = vrot.slane %v2983_v55, 2  ;;  %v2904_v60 = vadd.f32 %v14275_v27, %v14274_v52  ;;  %v4248_v5 = vld [vmem:[%s11963_s3 + $0x128] sm:$0xff]  ;;  %v14278_v27 = vld [vmem:[#allocation171_spill] sm:$0xff]  ;;  %v14283_v52 = vld [vmem:[#allocation48_spill] sm:$0xff] }
 0x2f9   :  { %14271 = vst [vmem:[#allocation160_spill] sm:$0xff] %v11369_v57  ;;  %v2987_v30 = vmul.f32 %v4247_v47, %v10633_v46  ;;  %v11382_v8 = vadd.f32 %v3186_v7, %v2902_v11  ;;  %v2988_v26 = vmul.f32 %v4248_v5, %v10633_v46  ;;  %v3191_v55 = vsel %vm942_vm1, %v3189_v58, %v3190_v34  ;;  %v14277_v43 = vld [vmem:[#allocation34_spill] sm:$0xff]  ;;  %v14282_v58 = vld [vmem:[#allocation115_spill] sm:$0xff] }
 0x2fa   :  { %v3448_v32 = vadd.f32 %v3447_v21, %v11358_v0  ;;  %v3194_v24 = vrot.slane %v2984_v44, 2  ;;  %v3195_v6 = vrot.slane %v2985_v38, 2  ;;  %v2905_v61 = vadd.f32 %v14279_v22, %v14278_v27  ;;  %v14281_v5 = vld [vmem:[#allocation102_spill] sm:$0xff] }
 0x2fb   :  { %14276 = vst [vmem:[#allocation63_spill] sm:$0xff] %v11382_v8  ;;  %v11393_v47 = vadd.f32 %v3188_v59, %v2903_v25  ;;  %v14280_v7 = vrot.slane %v14238_v51, 1  ;;  %v2989_v0 = vmul.f32 %v14281_v5, %v10633_v46  ;;  %v3193_v44 = vsel %vm942_vm1, %v3190_v34, %v3192_v37  ;;  %v4249_v25 = vld [vmem:[%s11963_s3 + $0x138] sm:$0xff]  ;;  %v4250_v51 = vld [vmem:[%s11963_s3 + $0x140] sm:$0xff] }
 0x2fc   :  { %v3449_v11 = vadd.f32 %v3448_v32, %v11369_v57  ;;  %v3197_v38 = vrot.slane %v2986_v35, 2  ;;  %v2906_v15 = vadd.f32 %v14283_v52, %v14282_v58  ;;  %v2990_v22 = vmul.f32 %v4249_v25, %v10633_v46  ;;  %v14285_v52 = vld [vmem:[#allocation134_spill] sm:$0xff]  ;;  %v14287_v5 = vld [vmem:[#allocation109_spill] sm:$0xff] }
 0x2fd   :  { %v11399_v21 = vsel %vm456_vm0, %v14280_v7, %v2727_v13  ;;  %v11410_v59 = vadd.f32 %v3191_v55, %v2904_v60  ;;  %v2991_v37 = vmul.f32 %v4250_v51, %v10633_v46  ;;  %v3196_v35 = vsel %vm942_vm1, %v3194_v24, %v3195_v6  ;;  %v14286_v7 = vld [vmem:[#allocation147_spill] sm:$0xff]  ;;  %v14288_v55 = vld [vmem:[#allocation106_spill] sm:$0xff]  ;;  %v14290_v24 = vld [vmem:[#allocation52_spill] sm:$0xff] }
 0x2fe   :  { %v3450_v13 = vadd.f32 %v3449_v11, %v11382_v8  ;;  %v3199_v34 = vrot.slane %v2987_v30, 2  ;;  %v3200_v32 = vrot.slane %v2988_v26, 2  ;;  %v2907_v58 = vadd.f32 %v14287_v5, %v14286_v7  ;;  %v14289_v8 = vld [vmem:[#allocation158_spill] sm:$0xff]  ;;  %v4251_v26 = vld [vmem:[%s11963_s3 + $0x150] sm:$0xff]  ;;  %v14292_v7 = vld [vmem:[#allocation57_spill] sm:$0xff] }
 0x2ff   :  { %14284 = vst [vmem:[#allocation123_spill] sm:$0xff] %v11410_v59  ;;  %v11421_v25 = vadd.f32 %v3193_v44, %v2905_v61  ;;  %v2992_v57 = vmul.f32 %v14289_v8, %v10633_v46  ;;  %v3198_v51 = vsel %vm942_vm1, %v3195_v6, %v3197_v38  ;;  %v3202_v1 = vrot.slane %v2989_v0, 2  ;;  %v4252_v8 = vld [vmem:[%s11963_s3 + $0x158] sm:$0xff] }
 0x300   :  { %v3451_v60 = vadd.f32 %v3450_v13, %v11393_v47  ;;  %v2908_v30 = vadd.f32 %v11216_v45, %v14290_v24  ;;  %v2993_v61 = vmul.f32 %v4251_v26, %v10633_v46  ;;  %v11434_v44 = vadd.f32 %v3196_v35, %v2906_v15  ;;  %v14293_v24 = vld [vmem:[#allocation172_spill] sm:$0xff] }
 0x301   :  { %v2994_v6 = vmul.f32 %v4252_v8, %v10633_v46  ;;  %v3201_v0 = vsel %vm942_vm1, %v3199_v34, %v3200_v32  ;;  %v3204_v38 = vrot.slane %v2990_v22, 2  ;;  %v3205_v45 = vrot.slane %v2991_v37, 2  ;;  %v14297_v8 = vld [vmem:[#allocation127_spill] sm:$0xff]  ;;  %v14298_v5 = vld [vmem:[#allocation116_spill] sm:$0xff] }
 0x302   :  { %14291 = vst [vmem:[#allocation68_spill] sm:$0xff] %v11434_v44  ;;  %v3452_v13 = vadd.f32 %v3451_v60, %v11410_v59  ;;  %v2909_v11 = vadd.f32 %v11253_v17, %v14293_v24  ;;  %v11445_v26 = vadd.f32 %v3198_v51, %v2907_v58  ;;  %v14295_v35 = vrot.slane %v14268_v2, 1  ;;  %v4253_v17 = vld [vmem:[%s11963_s3 + $0x168] sm:$0xff] }
 0x303   :  { %v14296_v60 = vrot.slane %v14259_v14, 1  ;;  %v2995_v34 = vmul.f32 %v14297_v8, %v10633_v46  ;;  %v3203_v22 = vsel %vm942_vm1, %v3200_v32, %v3202_v1  ;;  %v3207_v37 = vrot.slane %v2992_v57, 2  ;;  %v14303_v8 = vld [vmem:[#allocation7_spill] sm:$0xff] }
 0x304   :  { %14294 = vst [vmem:[#allocation12_spill] sm:$0xff] %v11445_v26  ;;  %v3453_v15 = vadd.f32 %v3452_v13, %v11421_v25  ;;  %v2910_v59 = vadd.f32 %v11291_v9, %v14298_v5  ;;  %v2996_v58 = vmul.f32 %v4253_v17, %v10633_v46  ;;  %v11462_v51 = vadd.f32 %v3201_v0, %v2908_v30  ;;  %v4254_v13 = vld [vmem:[%s11963_s3 + $0x170] sm:$0xff]  ;;  %v14302_v30 = vld [vmem:[#allocation148_spill] sm:$0xff] }
 0x305   :  { %v2731_v27 = vsel %vm456_vm0, %v14296_v60, %v14295_v35  ;;  %v2997_v1 = vmul.f32 %v4254_v13, %v10633_v46  ;;  %v3206_v57 = vsel %vm942_vm1, %v3204_v38, %v3205_v45  ;;  %v3209_v32 = vrot.slane %v2993_v61, 2  ;;  %v14304_v13 = vld [vmem:[#allocation105_spill] sm:$0xff] }
 0x306   :  { %14299 = vst [vmem:[#allocation70_spill] sm:$0xff] %v11462_v51  ;;  %v3454_v14 = vadd.f32 %v3453_v15, %v11434_v44  ;;  %v3210_v9 = vrot.slane %v2994_v6, 2  ;;  %v14300_v5 = vrot.slane %v14272_v33, 1  ;;  %v14301_v24 = vmov %v14295_v35  ;;  %v14305_v33 = vld [vmem:[#allocation54_spill] sm:$0xff] }
 0x307   :  { %v2911_v0 = vadd.f32 %v11313_v54, %v14302_v30  ;;  %v11477_v15 = vadd.f32 %v3203_v22, %v2909_v11  ;;  %v2740_v17 = vrot.slane %v14303_v8, 1  ;;  %v2998_v38 = vmul.f32 %v14304_v13, %v10633_v46  ;;  %v14308_v8 = vld [vmem:[#allocation85_spill] sm:$0xff] }
 0x308   :  { %v2733_v35 = vsel %vm456_vm0, %v14301_v24, %v14300_v5  ;;  %v3455_v60 = vadd.f32 %v3454_v14, %v11445_v26  ;;  %v3208_v61 = vsel %vm942_vm1, %v3205_v45, %v3207_v37  ;;  %v3212_v6 = vrot.slane %v2995_v34, 2  ;;  %v4255_v5 = vld [vmem:[%s11963_s3 + $0x180] sm:$0xff]  ;;  %v4256_v14 = vld [vmem:[%s11963_s3 + $0x188] sm:$0xff]  ;;  %v14307_v24 = vld [vmem:[#allocation87_spill] sm:$0xff] }
 0x309   :  { %v2912_v2 = vadd.f32 %v11347_v39, %v14305_v33  ;;  %v2999_v54 = vmul.f32 %v4255_v5, %v10633_v46  ;;  %v11490_v11 = vadd.f32 %v3206_v57, %v2910_v59  ;;  %v3000_v45 = vmul.f32 %v4256_v14, %v10633_v46  ;;  %v14312_v14 = vld [vmem:[#allocation14_spill] sm:$0xff] }
 0x30a   :  { %v3456_v22 = vadd.f32 %v3455_v60, %v11462_v51  ;;  %v3211_v34 = vsel %vm942_vm1, %v3209_v32, %v3210_v9  ;;  %v3214_v37 = vrot.slane %v2996_v58, 2  ;;  %v3215_v39 = vrot.slane %v2997_v1, 2 }
 0x30b   :  { %14306 = vst [vmem:[#allocation80_spill] sm:$0xff] %v11490_v11  ;;  %v2742_v30 = vrot.slane %v14307_v24, 1  ;;  %v2913_v13 = vadd.f32 %v11399_v21, %v14308_v8  ;;  %v11501_v33 = vadd.f32 %v3208_v61, %v2911_v0  ;;  %v14310_v57 = vrot.slane %v14285_v52, 1  ;;  %v14313_v24 = vld [vmem:[#allocation11_spill] sm:$0xff]  ;;  %v4257_v21 = vld [vmem:[%s11963_s3 + $0x198] sm:$0xff] }
 0x30c   :  { %v3457_v59 = vadd.f32 %v3456_v22, %v11477_v15  ;;  %v14311_v60 = vrot.slane %v14277_v43, 1  ;;  %v3001_v32 = vmul.f32 %v14312_v14, %v10633_v46  ;;  %v3213_v58 = vsel %vm942_vm1, %v3210_v9, %v3212_v6  ;;  %v4258_v22 = vld [vmem:[%s11963_s3 + $0x1a0] sm:$0xff] }
 0x30d   :  { %14309 = vst [vmem:[#allocation82_spill] sm:$0xff] %v11501_v33  ;;  %v3217_v1 = vrot.slane %v2998_v38, 2  ;;  %v2914_v51 = vadd.f32 %v2731_v27, %v14313_v24  ;;  %v3002_v0 = vmul.f32 %v4257_v21, %v10633_v46  ;;  %v11517_v61 = vadd.f32 %v3211_v34, %v2912_v2  ;;  %v14315_v2 = vld [vmem:[#allocation113_spill] sm:$0xff]  ;;  %v14316_v24 = vld [vmem:[#allocation88_spill] sm:$0xff] }
 0x30e   :  { %v2736_v5 = vsel %vm456_vm0, %v14311_v60, %v14310_v57  ;;  %v3458_v43 = vadd.f32 %v3457_v59, %v11490_v11  ;;  %v3003_v8 = vmul.f32 %v4258_v22, %v10633_v46  ;;  %v3216_v9 = vsel %vm942_vm1, %v3214_v37, %v3215_v39  ;;  %v14317_v11 = vld [vmem:[#allocation132_spill] sm:$0xff]  ;;  %v14319_v37 = vld [vmem:[#allocation61_spill] sm:$0xff] }
 0x30f   :  { %v3219_v38 = vrot.slane %v2999_v54, 2  ;;  %v3220_v27 = vrot.slane %v3000_v45, 2  ;;  %v14314_v6 = vrot.slane %v14288_v55, 1  ;;  %v2915_v34 = vadd.f32 %v2733_v35, %v14315_v2 }
 0x310   :  { %v11531_v14 = vadd.f32 %v3213_v58, %v2913_v13  ;;  %v3459_v59 = vadd.f32 %v3458_v43, %v11501_v33  ;;  %v2744_v21 = vrot.slane %v14316_v24, 1  ;;  %v3004_v22 = vmul.f32 %v10633_v46, %v14317_v11  ;;  %v14320_v13 = vld [vmem:[#allocation165_spill] sm:$0xff]  ;;  %v14321_v24 = vld [vmem:[#allocation119_spill] sm:$0xff] }
 0x311   :  { %v2738_v60 = vsel %vm456_vm0, %v14310_v57, %v14314_v6  ;;  %v3218_v54 = vsel %vm942_vm1, %v3215_v39, %v3217_v1  ;;  %v3222_v45 = vrot.slane %v3001_v32, 2  ;;  %v14318_v55 = vrot.slane %v14292_v7, 1  ;;  %v14322_v39 = vld [vmem:[#allocation170_spill] sm:$0xff]  ;;  %v14323_v1 = vld [vmem:[#allocation121_spill] sm:$0xff] }
 0x312   :  { %v2916_v6 = vadd.f32 %v2736_v5, %v14319_v37  ;;  %v11542_v57 = vadd.f32 %v3216_v9, %v2914_v51  ;;  %v3460_v35 = vadd.f32 %v3459_v59, %v11517_v61  ;;  %v3005_v58 = vmul.f32 %v14320_v13, %v10633_v46  ;;  %v14325_v46 = vld [vmem:[#allocation81_spill] sm:$0xff] }
 0x313   :  { %v2741_v52 = vsel %vm456_vm0, %v14318_v55, %v2740_v17  ;;  %v3221_v43 = vsel %vm942_vm1, %v3219_v38, %v3220_v27  ;;  %v3224_v2 = vrot.slane %v3002_v0, 2  ;;  %v3225_v11 = vrot.slane %v3003_v8, 2  ;;  %v14324_v55 = vld [vmem:[#allocation156_spill] sm:$0xff]  ;;  %v14326_v38 = vld [vmem:[#allocation122_spill] sm:$0xff] }
 0x314   :  { %v2434_v32 = vadd.f32 %v14322_v39, %v14321_v24  ;;  %v2917_v7 = vadd.f32 %v2738_v60, %v14323_v1  ;;  %v11551_v33 = vadd.f32 %v3218_v54, %v2915_v34  ;;  %v3461_v5 = vadd.f32 %v3460_v35, %v11531_v14  ;;  %v14327_v24 = vld [vmem:[#allocation77_spill] sm:$0xff] }
 0x315   :  { %v2743_v51 = vsel %vm456_vm0, %v2740_v17, %v2742_v30  ;;  %v3223_v9 = vsel %vm942_vm1, %v3220_v27, %v3222_v45  ;;  %v3227_v59 = vrot.slane %v3004_v22, 2  ;;  %v2435_v37 = vadd.f32 %v14325_v46, %v14324_v55 }
 0x316   :  { %v2918_v0 = vadd.f32 %v2741_v52, %v14326_v38  ;;  %v11559_v8 = vadd.f32 %v3221_v43, %v2916_v6  ;;  %v3462_v13 = vadd.f32 %v3461_v5, %v11542_v57  ;;  %v14328_v60 = vrot.slane %v14327_v24, 1  ;;  %v14329_v43 = vld [vmem:[#allocation37_spill] sm:$0xff] }
 0x317   :  { %v3226_v54 = vsel %vm942_vm1, %v3224_v2, %v3225_v11  ;;  %v3229_v35 = vrot.slane %v3005_v58, 2  ;;  %v2919_v17 = vadd.f32 %v2743_v51, %v2434_v32  ;;  %v11566_v30 = vadd.f32 %v3223_v9, %v2917_v7 }
 0x318   :  { %v2746_v34 = vsel %vm456_vm0, %v2744_v21, %v14328_v60  ;;  %v3463_v27 = vadd.f32 %v3462_v13, %v11551_v33  ;;  %v3228_v22 = vsel %vm942_vm1, %v3225_v11, %v3227_v59  ;;  %v11570_v52 = vadd.f32 %v3226_v54, %v2918_v0 }
 0x319   :  { %v2920_v45 = vadd.f32 %v2746_v34, %v2435_v37  ;;  %v14330_v39 = vrot.slane %v14329_v43, 2  ;;  %v11576_v21 = vadd.f32 %v3228_v22, %v2919_v17 }
 0x31a   :  { %v3464_v6 = vadd.f32 %v3463_v27, %v11559_v8 }
 0x31b   :  { %v3231_v1 = vsel %vm942_vm1, %v3229_v35, %v14330_v39 }
 0x31c   :  { %v3465_v58 = vadd.f32 %v3464_v6, %v11566_v30  ;;  %v11579_v2 = vadd.f32 %v3231_v1, %v2920_v45 }
 0x31e   :  { %v3466_v32 = vadd.f32 %v3465_v58, %v11570_v52  ;;  %v14331_v58 = vld [vmem:[#allocation163_spill] sm:$0xff] }
 0x320   :  { %v3467_v7 = vadd.f32 %v3466_v32, %v11576_v21 }
 0x322   :  { %v3468_v11 = vadd.f32 %v3467_v7, %v11579_v2  ;;  %v14332_v7 = vld [vmem:[#allocation164_spill] sm:$0xff] }
 0x324   :  { %v3469_v5 = vadd.f32 %v3468_v11, %v11110_v19 }
 0x326   :  { %v3470_v51 = vadd.f32 %v3469_v5, %v11113_v28  ;;  %v14333_v5 = vld [vmem:[#allocation135_spill] sm:$0xff] }
 0x328   :  { %v3471_v9 = vadd.f32 %v3470_v51, %v11116_v31 }
 0x32a   :  { %v3472_v59 = vadd.f32 %v3471_v9, %v11119_v36  ;;  %v14334_v9 = vld [vmem:[#allocation138_spill] sm:$0xff] }
 0x32c   :  { %v3473_v55 = vadd.f32 %v3472_v59, %v11122_v40 }
 0x32e   :  { %v3474_v46 = vadd.f32 %v3473_v55, %v11125_v20  ;;  %v14335_v55 = vld [vmem:[#allocation107_spill] sm:$0xff] }
 0x330   :  { %v3475_v37 = vadd.f32 %v3474_v46, %v11128_v50 }
 0x332   :  { %v3476_v38 = vadd.f32 %v3475_v37, %v11131_v42  ;;  %v14336_v37 = vld [vmem:[#allocation167_spill] sm:$0xff] }
 0x334   :  { %v3477_v0 = vadd.f32 %v3476_v38, %v11134_v10 }
 0x336   :  { %v3478_v13 = vadd.f32 %v3477_v0, %v11137_v18  ;;  %v14337_v0 = vld [vmem:[#allocation141_spill] sm:$0xff] }
 0x338   :  { %v3479_v24 = vadd.f32 %v3478_v13, %v11140_v56 }
 0x33a   :  { %v3480_v60 = vadd.f32 %v3479_v24, %v11143_v49  ;;  %v14338_v24 = vld [vmem:[#allocation8_spill] sm:$0xff] }
 0x33c   :  { %v3481_v34 = vadd.f32 %v3480_v60, %v11146_v12 }
 0x33e   :  { %v3482_v54 = vadd.f32 %v3481_v34, %v11149_v29 }
 0x340   :  { %v3483_v35 = vadd.f32 %v3482_v54, %v11152_v41 }
 0x342   :  { %v3484_v17 = vadd.f32 %v3483_v35, %v11155_v63 }
 0x344   :  { %v3485_v27 = vadd.f32 %v3484_v17, %v11158_v53 }
 0x346   :  { %v3486_v22 = vadd.f32 %v3485_v27, %v11161_v16 }
 0x348   :  { %v3487_v45 = vadd.f32 %v3486_v22, %v11164_v62 }
 0x34a   :  { %v3488_v6 = vadd.f32 %v3487_v45, %v11167_v23 }
 0x34c   :  { %v3489_v43 = vadd.f32 %v3488_v6, %v11170_v3  ;;  %v14339_v6 = vld [vmem:[#allocation49_spill] sm:$0xff] }
 0x34e   :  { %v3490_v39 = vadd.f32 %v3489_v43, %v11173_v4 }
 0x350   :  { %v3491_v1 = vadd.f32 %v3490_v39, %v11176_v48  ;;  %v14340_v39 = vld [vmem:[#allocation154_spill] sm:$0xff] }
 0x352   :  { %v3492_v32 = vadd.f32 %v3491_v1, %v14331_v58 }
 0x354   :  { %v3493_v11 = vadd.f32 %v3492_v32, %v14332_v7  ;;  %v14341_v32 = vld [vmem:[#allocation155_spill] sm:$0xff] }
 0x356   :  { %v3494_v51 = vadd.f32 %v3493_v11, %v14333_v5 }
 0x358   :  { %v3495_v59 = vadd.f32 %v3494_v51, %v14334_v9  ;;  %v14342_v51 = vld [vmem:[#allocation94_spill] sm:$0xff] }
 0x35a   :  { %v3496_v46 = vadd.f32 %v3495_v59, %v14335_v55  ;;  %v14348_v55 = vld [vmem:[#allocation104_spill] sm:$0xff] }
 0x35c   :  { %v3497_v38 = vadd.f32 %v3496_v46, %v14336_v37 }
 0x35e   :  { %v3498_v13 = vadd.f32 %v3497_v38, %v14337_v0 }
 0x360   :  { %v3499_v60 = vadd.f32 %v3498_v13, %v14338_v24  ;;  %v14343_v13 = vld [vmem:[#allocation142_spill] sm:$0xff] }
 0x362   :  { %v3500_v34 = vrot.slane %v3499_v60, 4 }
 0x364   :  { %v3501_v54 = vadd.f32 %v3500_v34, %v3499_v60 }
 0x366   :  { %v3502_v35 = vrot.slane %v3501_v54, 2 }
 0x368   :  { %v3503_v17 = vadd.f32 %v3502_v35, %v3501_v54  ;;  %v14344_v54 = vld [vmem:[#allocation169_spill] sm:$0xff] }
 0x36a   :  { %v3504_v27 = vrot.slane %v3503_v17, 1 }
 0x36c   :  { %v3505_v22 = vadd.f32 %v3504_v27, %v3503_v17 }
 0x36e   :  { %v11615_v45 = vmul.f32 0.001953125, %v3505_v22  ;;  %v14345_v22 = vld [vmem:[#allocation97_spill] sm:$0xff] }
 0x370   :  { %v3508_v43 = vsub.f32 %v14339_v6, %v11615_v45  ;;  %v3509_v1 = vsub.f32 %v14340_v39, %v11615_v45  ;;  %v3510_v11 = vsub.f32 %v14341_v32, %v11615_v45  ;;  %v3511_v59 = vsub.f32 %v14342_v51, %v11615_v45  ;;  %v14346_v32 = vld [vmem:[#allocation83_spill] sm:$0xff] }
 0x371   :  { %v3512_v60 = vsub.f32 %v14343_v13, %v11615_v45  ;;  %v3513_v35 = vsub.f32 %v14344_v54, %v11615_v45  ;;  %v3514_v39 = vsub.f32 %v14345_v22, %v11615_v45  ;;  %v3515_v0 = vsub.f32 %v14346_v32, %v11615_v45 }
 0x372   :  { %v3572_v46 = vmul.f32 %v3508_v43, %v3508_v43  ;;  %v3573_v38 = vmul.f32 %v3509_v1, %v3509_v1  ;;  %v3574_v34 = vmul.f32 %v3510_v11, %v3510_v11  ;;  %v3575_v17 = vmul.f32 %v3511_v59, %v3511_v59  ;;  %v14347_v1 = vld [vmem:[#allocation103_spill] sm:$0xff] }
 0x373   :  { %v3576_v6 = vmul.f32 %v3512_v60, %v3512_v60  ;;  %v3577_v51 = vmul.f32 %v3513_v35, %v3513_v35  ;;  %v3516_v37 = vsub.f32 %v14347_v1, %v11615_v45  ;;  %v3578_v13 = vmul.f32 %v3514_v39, %v3514_v39 }
 0x374   :  { %v3636_v27 = vadd.f32 %v3573_v38, %v3572_v46  ;;  %v3517_v54 = vsub.f32 %v14348_v55, %v11615_v45  ;;  %v3579_v59 = vmul.f32 %v3515_v0, %v3515_v0  ;;  %v14349_v38 = vld [vmem:[#allocation6_spill] sm:$0xff] }
 0x375   :  { %v3518_v22 = vsub.f32 %v14349_v38, %v11615_v45  ;;  %v3580_v60 = vmul.f32 %v3516_v37, %v3516_v37 }
 0x376   :  { %v3637_v24 = vadd.f32 %v3636_v27, %v3574_v34  ;;  %v14350_v27 = vld [vmem:[#allocation51_spill] sm:$0xff]  ;;  %v3581_v35 = vmul.f32 %v3517_v54, %v3517_v54 }
 0x377   :  { %v3519_v32 = vsub.f32 %v14350_v27, %v11615_v45  ;;  %v3582_v39 = vmul.f32 %v3518_v22, %v3518_v22 }
 0x378   :  { %v3638_v43 = vadd.f32 %v3637_v24, %v3575_v17  ;;  %v14351_v17 = vld [vmem:[#allocation137_spill] sm:$0xff] }
 0x379   :  { %v3520_v1 = vsub.f32 %v14351_v17, %v11615_v45  ;;  %v3583_v0 = vmul.f32 %v3519_v32, %v3519_v32 }
 0x37a   :  { %v3639_v11 = vadd.f32 %v3638_v43, %v3576_v6  ;;  %v14352_v43 = vld [vmem:[#allocation160_spill] sm:$0xff] }
 0x37b   :  { %v3521_v55 = vsub.f32 %v14352_v43, %v11615_v45  ;;  %v3584_v37 = vmul.f32 %v3520_v1, %v3520_v1 }
 0x37c   :  { %v3640_v46 = vadd.f32 %v3639_v11, %v3577_v51  ;;  %v14353_v11 = vld [vmem:[#allocation63_spill] sm:$0xff] }
 0x37d   :  { %v3522_v38 = vsub.f32 %v14353_v11, %v11615_v45  ;;  %v3585_v54 = vmul.f32 %v3521_v55, %v3521_v55 }
 0x37e   :  { %v3641_v34 = vadd.f32 %v3640_v46, %v3578_v13  ;;  %v3523_v46 = vsub.f32 %v11393_v47, %v11615_v45 }
 0x37f   :  { %v3586_v22 = vmul.f32 %v3522_v38, %v3522_v38 }
 0x380   :  { %v3642_v24 = vadd.f32 %v3641_v34, %v3579_v59  ;;  %v14354_v34 = vld [vmem:[#allocation123_spill] sm:$0xff]  ;;  %v3587_v32 = vmul.f32 %v3523_v46, %v3523_v46 }
 0x381   :  { %v3524_v17 = vsub.f32 %v14354_v34, %v11615_v45 }
 0x382   :  { %v3643_v6 = vadd.f32 %v3642_v24, %v3580_v60  ;;  %v3525_v24 = vsub.f32 %v11421_v25, %v11615_v45 }
 0x383   :  { %v3588_v1 = vmul.f32 %v3524_v17, %v3524_v17 }
 0x384   :  { %v3644_v51 = vadd.f32 %v3643_v6, %v3581_v35  ;;  %v3526_v6 = vsub.f32 %v11434_v44, %v11615_v45  ;;  %v3589_v55 = vmul.f32 %v3525_v24, %v3525_v24 }
 0x386   :  { %v3645_v13 = vadd.f32 %v3644_v51, %v3582_v39  ;;  %v3527_v51 = vsub.f32 %v11445_v26, %v11615_v45  ;;  %v3590_v38 = vmul.f32 %v3526_v6, %v3526_v6 }
 0x388   :  { %v3646_v59 = vadd.f32 %v3645_v13, %v3583_v0  ;;  %v14355_v13 = vld [vmem:[#allocation70_spill] sm:$0xff]  ;;  %v3591_v46 = vmul.f32 %v3527_v51, %v3527_v51 }
 0x389   :  { %v3528_v34 = vsub.f32 %v14355_v13, %v11615_v45 }
 0x38a   :  { %v3647_v60 = vadd.f32 %v3646_v59, %v3584_v37  ;;  %v3529_v59 = vsub.f32 %v11477_v15, %v11615_v45 }
 0x38b   :  { %v3592_v17 = vmul.f32 %v3528_v34, %v3528_v34 }
 0x38c   :  { %v3648_v35 = vadd.f32 %v3647_v60, %v3585_v54  ;;  %v14356_v60 = vld [vmem:[#allocation80_spill] sm:$0xff]  ;;  %v3593_v24 = vmul.f32 %v3529_v59, %v3529_v59 }
 0x38d   :  { %v3530_v44 = vsub.f32 %v14356_v60, %v11615_v45 }
 0x38e   :  { %v3649_v39 = vadd.f32 %v3648_v35, %v3586_v22  ;;  %v14357_v35 = vld [vmem:[#allocation82_spill] sm:$0xff] }
 0x38f   :  { %v3531_v26 = vsub.f32 %v14357_v35, %v11615_v45  ;;  %v3594_v6 = vmul.f32 %v3530_v44, %v3530_v44 }
 0x390   :  { %v3650_v0 = vadd.f32 %v3649_v39, %v3587_v32  ;;  %v3532_v39 = vsub.f32 %v11517_v61, %v11615_v45 }
 0x391   :  { %v3595_v51 = vmul.f32 %v3531_v26, %v3531_v26 }
 0x392   :  { %v3651_v37 = vadd.f32 %v3650_v0, %v3588_v1  ;;  %v3533_v0 = vsub.f32 %v11531_v14, %v11615_v45  ;;  %v3596_v34 = vmul.f32 %v3532_v39, %v3532_v39 }
 0x394   :  { %v3652_v54 = vadd.f32 %v3651_v37, %v3589_v55  ;;  %v3534_v37 = vsub.f32 %v11542_v57, %v11615_v45  ;;  %v3597_v59 = vmul.f32 %v3533_v0, %v3533_v0 }
 0x396   :  { %v3653_v22 = vadd.f32 %v3652_v54, %v3590_v38  ;;  %v3535_v54 = vsub.f32 %v11551_v33, %v11615_v45  ;;  %v3598_v44 = vmul.f32 %v3534_v37, %v3534_v37 }
 0x398   :  { %v3654_v32 = vadd.f32 %v3653_v22, %v3591_v46  ;;  %v3536_v22 = vsub.f32 %v11559_v8, %v11615_v45  ;;  %v3599_v26 = vmul.f32 %v3535_v54, %v3535_v54 }
 0x39a   :  { %v3655_v1 = vadd.f32 %v3654_v32, %v3592_v17  ;;  %v3537_v32 = vsub.f32 %v11566_v30, %v11615_v45  ;;  %v3600_v39 = vmul.f32 %v3536_v22, %v3536_v22 }
 0x39c   :  { %v3656_v55 = vadd.f32 %v3655_v1, %v3593_v24  ;;  %v3538_v1 = vsub.f32 %v11570_v52, %v11615_v45  ;;  %v3601_v0 = vmul.f32 %v3537_v32, %v3537_v32 }
 0x39e   :  { %v3657_v38 = vadd.f32 %v3656_v55, %v3594_v6  ;;  %v3539_v55 = vsub.f32 %v11576_v21, %v11615_v45  ;;  %v3602_v37 = vmul.f32 %v3538_v1, %v3538_v1 }
 0x3a0   :  { %v3658_v46 = vadd.f32 %v3657_v38, %v3595_v51  ;;  %v3540_v38 = vsub.f32 %v11579_v2, %v11615_v45  ;;  %v3603_v54 = vmul.f32 %v3539_v55, %v3539_v55 }
 0x3a2   :  { %v3659_v17 = vadd.f32 %v3658_v46, %v3596_v34  ;;  %v3541_v46 = vsub.f32 %v11110_v19, %v11615_v45  ;;  %v3604_v22 = vmul.f32 %v3540_v38, %v3540_v38 }
 0x3a4   :  { %v3660_v24 = vadd.f32 %v3659_v17, %v3597_v59  ;;  %v3542_v17 = vsub.f32 %v11113_v28, %v11615_v45  ;;  %v3605_v32 = vmul.f32 %v3541_v46, %v3541_v46 }
 0x3a6   :  { %v3661_v6 = vadd.f32 %v3660_v24, %v3598_v44  ;;  %v3543_v24 = vsub.f32 %v11116_v31, %v11615_v45  ;;  %v3606_v1 = vmul.f32 %v3542_v17, %v3542_v17 }
 0x3a8   :  { %v3662_v51 = vadd.f32 %v3661_v6, %v3599_v26  ;;  %v3544_v6 = vsub.f32 %v11119_v36, %v11615_v45  ;;  %v3607_v55 = vmul.f32 %v3543_v24, %v3543_v24 }
 0x3aa   :  { %v3663_v34 = vadd.f32 %v3662_v51, %v3600_v39  ;;  %v3545_v51 = vsub.f32 %v11122_v40, %v11615_v45  ;;  %v3608_v38 = vmul.f32 %v3544_v6, %v3544_v6 }
 0x3ac   :  { %v3664_v59 = vadd.f32 %v3663_v34, %v3601_v0  ;;  %v3546_v34 = vsub.f32 %v11125_v20, %v11615_v45  ;;  %v3609_v46 = vmul.f32 %v3545_v51, %v3545_v51 }
 0x3ae   :  { %v3665_v44 = vadd.f32 %v3664_v59, %v3602_v37  ;;  %v3547_v59 = vsub.f32 %v11128_v50, %v11615_v45  ;;  %v3610_v17 = vmul.f32 %v3546_v34, %v3546_v34 }
 0x3b0   :  { %v3666_v26 = vadd.f32 %v3665_v44, %v3603_v54  ;;  %v3548_v44 = vsub.f32 %v11131_v42, %v11615_v45  ;;  %v3611_v24 = vmul.f32 %v3547_v59, %v3547_v59 }
 0x3b2   :  { %v3667_v39 = vadd.f32 %v3666_v26, %v3604_v22  ;;  %v3549_v26 = vsub.f32 %v11134_v10, %v11615_v45  ;;  %v3612_v6 = vmul.f32 %v3548_v44, %v3548_v44 }
 0x3b4   :  { %v3668_v0 = vadd.f32 %v3667_v39, %v3605_v32  ;;  %v3550_v39 = vsub.f32 %v11137_v18, %v11615_v45  ;;  %v3613_v51 = vmul.f32 %v3549_v26, %v3549_v26 }
 0x3b6   :  { %v3669_v37 = vadd.f32 %v3668_v0, %v3606_v1  ;;  %v3551_v0 = vsub.f32 %v11140_v56, %v11615_v45  ;;  %v3614_v34 = vmul.f32 %v3550_v39, %v3550_v39 }
 0x3b8   :  { %v3670_v54 = vadd.f32 %v3669_v37, %v3607_v55  ;;  %v3552_v37 = vsub.f32 %v11143_v49, %v11615_v45  ;;  %v3615_v59 = vmul.f32 %v3551_v0, %v3551_v0 }
 0x3ba   :  { %v3671_v22 = vadd.f32 %v3670_v54, %v3608_v38  ;;  %v3553_v54 = vsub.f32 %v11146_v12, %v11615_v45  ;;  %v3616_v44 = vmul.f32 %v3552_v37, %v3552_v37 }
 0x3bc   :  { %v3672_v32 = vadd.f32 %v3671_v22, %v3609_v46  ;;  %v3554_v22 = vsub.f32 %v11149_v29, %v11615_v45  ;;  %v3617_v26 = vmul.f32 %v3553_v54, %v3553_v54 }
 0x3be   :  { %v3673_v1 = vadd.f32 %v3672_v32, %v3610_v17  ;;  %v3555_v32 = vsub.f32 %v11152_v41, %v11615_v45  ;;  %v3618_v39 = vmul.f32 %v3554_v22, %v3554_v22 }
 0x3c0   :  { %v3674_v55 = vadd.f32 %v3673_v1, %v3611_v24  ;;  %v3556_v1 = vsub.f32 %v11155_v63, %v11615_v45  ;;  %v3619_v0 = vmul.f32 %v3555_v32, %v3555_v32 }
 0x3c2   :  { %v3675_v38 = vadd.f32 %v3674_v55, %v3612_v6  ;;  %v3557_v55 = vsub.f32 %v11158_v53, %v11615_v45  ;;  %v3620_v37 = vmul.f32 %v3556_v1, %v3556_v1 }
 0x3c4   :  { %v3676_v46 = vadd.f32 %v3675_v38, %v3613_v51  ;;  %v3558_v38 = vsub.f32 %v11161_v16, %v11615_v45  ;;  %v3621_v54 = vmul.f32 %v3557_v55, %v3557_v55 }
 0x3c6   :  { %v3677_v17 = vadd.f32 %v3676_v46, %v3614_v34  ;;  %v3559_v46 = vsub.f32 %v11164_v62, %v11615_v45  ;;  %v3622_v22 = vmul.f32 %v3558_v38, %v3558_v38 }
 0x3c8   :  { %v3678_v24 = vadd.f32 %v3677_v17, %v3615_v59  ;;  %v3560_v17 = vsub.f32 %v11167_v23, %v11615_v45  ;;  %v3623_v32 = vmul.f32 %v3559_v46, %v3559_v46 }
 0x3ca   :  { %v3679_v6 = vadd.f32 %v3678_v24, %v3616_v44  ;;  %v3561_v24 = vsub.f32 %v11170_v3, %v11615_v45  ;;  %v3624_v1 = vmul.f32 %v3560_v17, %v3560_v17 }
 0x3cc   :  { %v3680_v51 = vadd.f32 %v3679_v6, %v3617_v26  ;;  %v3562_v6 = vsub.f32 %v11173_v4, %v11615_v45  ;;  %v3625_v55 = vmul.f32 %v3561_v24, %v3561_v24 }
 0x3ce   :  { %v3681_v34 = vadd.f32 %v3680_v51, %v3618_v39  ;;  %v3563_v51 = vsub.f32 %v11176_v48, %v11615_v45  ;;  %v3626_v38 = vmul.f32 %v3562_v6, %v3562_v6 }
 0x3d0   :  { %v3682_v59 = vadd.f32 %v3681_v34, %v3619_v0  ;;  %v3564_v34 = vsub.f32 %v14331_v58, %v11615_v45  ;;  %v3627_v46 = vmul.f32 %v3563_v51, %v3563_v51 }
 0x3d2   :  { %v3683_v44 = vadd.f32 %v3682_v59, %v3620_v37  ;;  %v3565_v59 = vsub.f32 %v14332_v7, %v11615_v45  ;;  %v3628_v17 = vmul.f32 %v3564_v34, %v3564_v34 }
 0x3d4   :  { %v3684_v26 = vadd.f32 %v3683_v44, %v3621_v54  ;;  %v3566_v44 = vsub.f32 %v14333_v5, %v11615_v45  ;;  %v3629_v24 = vmul.f32 %v3565_v59, %v3565_v59 }
 0x3d6   :  { %v3685_v39 = vadd.f32 %v3684_v26, %v3622_v22  ;;  %v3567_v26 = vsub.f32 %v14334_v9, %v11615_v45  ;;  %v3630_v6 = vmul.f32 %v3566_v44, %v3566_v44 }
 0x3d8   :  { %v3686_v0 = vadd.f32 %v3685_v39, %v3623_v32  ;;  %v14358_v39 = vld [vmem:[#allocation107_spill] sm:$0xff]  ;;  %v3631_v51 = vmul.f32 %v3567_v26, %v3567_v26 }
 0x3d9   :  { %v3568_v58 = vsub.f32 %v14358_v39, %v11615_v45 }
 0x3da   :  { %v3687_v37 = vadd.f32 %v3686_v0, %v3624_v1  ;;  %v14359_v0 = vld [vmem:[#allocation167_spill] sm:$0xff] }
 0x3db   :  { %v3569_v7 = vsub.f32 %v14359_v0, %v11615_v45  ;;  %v3632_v34 = vmul.f32 %v3568_v58, %v3568_v58 }
 0x3dc   :  { %v3688_v54 = vadd.f32 %v3687_v37, %v3625_v55  ;;  %v14360_v37 = vld [vmem:[#allocation141_spill] sm:$0xff] }
 0x3dd   :  { %v3570_v5 = vsub.f32 %v14360_v37, %v11615_v45  ;;  %v3633_v59 = vmul.f32 %v3569_v7, %v3569_v7  ;;  %v3708_v7 = vld [vmem:[%s11961_s1] sm:$0x1]  ;;  %s4283_s1 = smov [#allocation2]  }
 0x3de   :  { %v3689_v22 = vadd.f32 %v3688_v54, %v3626_v38  ;;  %v14361_v54 = vld [vmem:[#allocation8_spill] sm:$0xff] }
 0x3df   :  { %v3571_v9 = vsub.f32 %v14361_v54, %v11615_v45 }
 0x3e0   :  { %v3690_v32 = vadd.f32 %v3689_v22, %v3627_v46  ;;  %v3634_v22 = vmul.f32 %v3570_v5, %v3570_v5 }
 0x3e1   :  { %v3635_v39 = vmul.f32 %v3571_v9, %v3571_v9 }
 0x3e2   :  { %v3691_v1 = vadd.f32 %v3690_v32, %v3628_v17 }
 0x3e4   :  { %v3692_v55 = vadd.f32 %v3691_v1, %v3629_v24 }
 0x3e6   :  { %v3693_v38 = vadd.f32 %v3692_v55, %v3630_v6  ;;  %v3713_v6 = vlaneseq }
 0x3e8   :  { %v3694_v46 = vadd.f32 %v3693_v38, %v3631_v51  ;;  %v3714_v55 = vshrl.u32 %v3713_v6, 7  ;;  %v14362_v51 = vld [vmem:[#allocation49_spill] sm:$0xff]  ;;  %v14369_v6 = vld [vmem:[#allocation83_spill] sm:$0xff] }
 0x3ea   :  { %v3695_v48 = vadd.f32 %v3694_v46, %v3632_v34  ;;  %v3715_v5 = vsub.s32 0, %v3714_v55  ;;  %v14363_v34 = vld [vmem:[#allocation154_spill] sm:$0xff] }
 0x3ec   :  { %v3696_v44 = vadd.f32 %v3695_v48, %v3633_v59  ;;  %v14364_v59 = vld [vmem:[#allocation155_spill] sm:$0xff] }
 0x3ee   :  { %v3697_v17 = vadd.f32 %v3696_v44, %v3634_v22  ;;  %v14365_v22 = vld [vmem:[#allocation94_spill] sm:$0xff] }
 0x3f0   :  { %v3698_v32 = vadd.f32 %v3697_v17, %v3635_v39  ;;  %v14366_v17 = vld [vmem:[#allocation142_spill] sm:$0xff] }
 0x3f2   :  { %v3699_v4 = vrot.slane %v3698_v32, 4 }
 0x3f4   :  { %v3700_v0 = vadd.f32 %v3699_v4, %v3698_v32  ;;  %v3710_v4 = vld [vmem:[%s11962_s2] sm:$0x1]  ;;  %s3984_s2 = sshll.u32 %s4283_s1, 4  ;;  %s3985_s2 = int_to_ptr.vmem [resolvable:$true] %s3984_s2 }
 0x3f5   :  { %s4259_s19 = scalar_lea.vmem %s3985_s2, 8192  ;;  %p4264_p1 = scmp.lt.s32.totalorder %s3985_s2, %s3985_s2 }
 0x3f6   :  { %v3701_v26 = vrot.slane %v3700_v0, 2  ;;  %p4260_p0 = scmp.ne.s32.totalorder %s3985_s2, %s4259_s19  ;;  %p4265_p2 = scmp.lt.s32.totalorder %s4259_s19, %s4259_s19 }
 0x3f8   :  { %v3702_v24 = vadd.f32 %v3701_v26, %v3700_v0  ;;  %v14367_v26 = vld [vmem:[#allocation169_spill] sm:$0xff]  ;;  %p4266_p3 = por %p4265_p2, %p4264_p1 }
 0x3fa   :  { %v3703_v1 = vrot.slane %v3702_v24, 1  ;;  %p4267_p4 = pnand %p4266_p3, %p4260_p0 }
 0x3fc   :  { %v3704_v3 = vadd.f32 %v3703_v1, %v3702_v24  ;;  %v14368_v24 = vld [vmem:[#allocation97_spill] sm:$0xff] }
 0x3fe   :  { %v3705_v37 = vmul.f32 0.001953125, %v3704_v3 }
 0x400   :  { %v3706_v58 = vadd.f32 1e-05, %v3705_v37 }
 0x402   :  { %4007 = vrsqrt.f32 %v3706_v58 }
 0x40c   :  { %v4008_v9 = vpop.eup %4007 }
 0x40d   :  { %v3709_v48 = vmul.f32 %v4008_v9, %v3708_v7  ;;  %v14370_v7 = vld [vmem:[#allocation103_spill] sm:$0xff] }
 0x40f   :  { %v3711_v39 = vmul.f32 %v3709_v48, %v11615_v45  ;;  %v11752_v0 = vrot.slane %v3709_v48, %v3715_v5  ;;  %v14371_v48 = vld [vmem:[#allocation104_spill] sm:$0xff] }
 0x411   :  { %v3712_v3 = vsub.f32 %v3710_v4, %v3711_v39  ;;  %v3717_v37 = vmul.f32 %v11752_v0, %v14362_v51  ;;  %v3718_v38 = vmul.f32 %v11752_v0, %v14363_v34  ;;  %v3719_v46 = vmul.f32 %v11752_v0, %v14364_v59  ;;  %v14372_v39 = vld [vmem:[#allocation6_spill] sm:$0xff]  ;;  %v14373_v59 = vld [vmem:[#allocation137_spill] sm:$0xff] }
 0x412   :  { %v3720_v44 = vmul.f32 %v11752_v0, %v14365_v22  ;;  %v3721_v32 = vmul.f32 %v11752_v0, %v14366_v17  ;;  %v3722_v45 = vmul.f32 %v11752_v0, %v14367_v26  ;;  %v3723_v1 = vmul.f32 %v11752_v0, %v14368_v24 }
 0x413   :  { %v11768_v58 = vrot.slane %v3712_v3, %v3715_v5  ;;  %v3724_v55 = vmul.f32 %v11752_v0, %v14369_v6  ;;  %v3725_v9 = vmul.f32 %v11752_v0, %v14370_v7  ;;  %v3726_v4 = vmul.f32 %v11752_v0, %v14371_v48 }
 0x414   :  { %v3727_v51 = vmul.f32 %v11752_v0, %v14372_v39  ;;  %v3728_v34 = vmul.f32 %v11752_v0, %v14350_v27  ;;  %v3729_v22 = vmul.f32 %v11752_v0, %v14373_v59  ;;  %v3730_v5 = vmul.f32 %v11752_v0, %v14352_v43 }
 0x415   :  { %v3787_v3 = vadd.f32 %v11768_v58, %v3717_v37  ;;  %v3788_v17 = vadd.f32 %v11768_v58, %v3718_v38  ;;  %v3789_v26 = vadd.f32 %v11768_v58, %v3719_v46  ;;  %v3790_v24 = vadd.f32 %v11768_v58, %v3720_v44 }
 0x416   :  { %v3791_v6 = vadd.f32 %v11768_v58, %v3721_v32  ;;  %v3792_v7 = vadd.f32 %v11768_v58, %v3722_v45  ;;  %v3793_v27 = vadd.f32 %v11768_v58, %v3723_v1  ;;  %v3794_v48 = vadd.f32 %v11768_v58, %v3724_v55 }
 0x417   :  { %v3851_v39 = vmax.f32 %v3787_v3, 0.0  ;;  %v3852_v59 = vmax.f32 %v3788_v17, 0.0  ;;  %v3853_v54 = vmax.f32 %v3789_v26, 0.0  ;;  %v3854_v43 = vmax.f32 %v3790_v24, 0.0 }
 0x418   :  { %v3855_v23 = vmax.f32 %v3791_v6, 0.0  ;;  %v3856_v37 = vmax.f32 %v3792_v7, 0.0  ;;  %v3857_v62 = vmax.f32 %v3793_v27, 0.0  ;;  %v3858_v38 = vmax.f32 %v3794_v48, 0.0  ;;  %v14376_v6 = vld [vmem:[#allocation12_spill] sm:$0xff] }
 0x419   :  { %3915 = vst [vmem:[#allocation2] sm:$0xff] %v3851_v39  ;;  %3916 = vst [vmem:[#allocation2 + $0x8] sm:$0xff] %v3852_v59  ;;  %v3795_v46 = vadd.f32 %v11768_v58, %v3725_v9  ;;  %v3796_v44 = vadd.f32 %v11768_v58, %v3726_v4  ;;  %v3797_v32 = vadd.f32 %v11768_v58, %v3727_v51 }
 0x41a   :  { %3917 = vst [vmem:[#allocation2 + $0x10] sm:$0xff] %v3853_v54  ;;  %3918 = vst [vmem:[#allocation2 + $0x18] sm:$0xff] %v3854_v43  ;;  %v3798_v45 = vadd.f32 %v11768_v58, %v3728_v34  ;;  %v3799_v1 = vadd.f32 %v11768_v58, %v3729_v22  ;;  %v3800_v55 = vadd.f32 %v11768_v58, %v3730_v5  ;;  %v14374_v22 = vld [vmem:[#allocation123_spill] sm:$0xff]  ;;  %v14375_v5 = vld [vmem:[#allocation68_spill] sm:$0xff] }
 0x41b   :  { %3919 = vst [vmem:[#allocation2 + $0x20] sm:$0xff] %v3855_v23  ;;  %3920 = vst [vmem:[#allocation2 + $0x28] sm:$0xff] %v3856_v37  ;;  %v3731_v54 = vmul.f32 %v11752_v0, %v14353_v11  ;;  %v3732_v9 = vmul.f32 %v11752_v0, %v11393_v47  ;;  %v3859_v3 = vmax.f32 %v3795_v46, 0.0  ;;  %v3860_v4 = vmax.f32 %v3796_v44, 0.0 }
 0x41c   :  { %3921 = vst [vmem:[#allocation2 + $0x30] sm:$0xff] %v3857_v62  ;;  %3922 = vst [vmem:[#allocation2 + $0x38] sm:$0xff] %v3858_v38  ;;  %v3861_v17 = vmax.f32 %v3797_v32, 0.0  ;;  %v3862_v51 = vmax.f32 %v3798_v45, 0.0  ;;  %v3863_v26 = vmax.f32 %v3799_v1, 0.0  ;;  %v3864_v34 = vmax.f32 %v3800_v55, 0.0 }
 0x41d   :  { %v3801_v23 = vadd.f32 %v11768_v58, %v3731_v54  ;;  %v3802_v62 = vadd.f32 %v11768_v58, %v3732_v9  ;;  %3923 = vst [vmem:[#allocation2 + $0x40] sm:$0xff] %v3859_v3  ;;  %3924 = vst [vmem:[#allocation2 + $0x48] sm:$0xff] %v3860_v4  ;;  %v3733_v11 = vmul.f32 %v11752_v0, %v14374_v22 }
 0x41e   :  { %3925 = vst [vmem:[#allocation2 + $0x50] sm:$0xff] %v3861_v17  ;;  %3926 = vst [vmem:[#allocation2 + $0x58] sm:$0xff] %v3862_v51  ;;  %v3734_v47 = vmul.f32 %v11752_v0, %v11421_v25  ;;  %v3735_v24 = vmul.f32 %v11752_v0, %v14375_v5  ;;  %v3736_v7 = vmul.f32 %v11752_v0, %v14376_v6 }
 0x41f   :  { %3927 = vst [vmem:[#allocation2 + $0x60] sm:$0xff] %v3863_v26  ;;  %3928 = vst [vmem:[#allocation2 + $0x68] sm:$0xff] %v3864_v34  ;;  %v3865_v27 = vmax.f32 %v3801_v23, 0.0  ;;  %v3866_v48 = vmax.f32 %v3802_v62, 0.0  ;;  %v3737_v39 = vmul.f32 %v11752_v0, %v14355_v13  ;;  %v3738_v59 = vmul.f32 %v11752_v0, %v11477_v15 }
 0x420   :  { %v3803_v43 = vadd.f32 %v11768_v58, %v3733_v11  ;;  %v3804_v25 = vadd.f32 %v11768_v58, %v3734_v47  ;;  %v3805_v37 = vadd.f32 %v11768_v58, %v3735_v24  ;;  %v3806_v38 = vadd.f32 %v11768_v58, %v3736_v7 }
 0x421   :  { %3929 = vst [vmem:[#allocation2 + $0x70] sm:$0xff] %v3865_v27  ;;  %3930 = vst [vmem:[#allocation2 + $0x78] sm:$0xff] %v3866_v48  ;;  %v3807_v46 = vadd.f32 %v11768_v58, %v3737_v39  ;;  %v3808_v44 = vadd.f32 %v11768_v58, %v3738_v59  ;;  %v3739_v13 = vmul.f32 %v11752_v0, %v14356_v60 }
 0x422   :  { %v3740_v15 = vmul.f32 %v11752_v0, %v14357_v35  ;;  %v3867_v32 = vmax.f32 %v3803_v43, 0.0  ;;  %v3868_v45 = vmax.f32 %v3804_v25, 0.0  ;;  %v3869_v1 = vmax.f32 %v3805_v37, 0.0 }
 0x423   :  { %v3870_v55 = vmax.f32 %v3806_v38, 0.0  ;;  %v3871_v54 = vmax.f32 %v3807_v46, 0.0  ;;  %v3872_v9 = vmax.f32 %v3808_v44, 0.0  ;;  %v3809_v3 = vadd.f32 %v11768_v58, %v3739_v13 }
 0x424   :  { %v3810_v4 = vadd.f32 %v11768_v58, %v3740_v15  ;;  %3931 = vst [vmem:[#allocation2 + $0x80] sm:$0xff] %v3867_v32  ;;  %3932 = vst [vmem:[#allocation2 + $0x88] sm:$0xff] %v3868_v45  ;;  %v3741_v60 = vmul.f32 %v11752_v0, %v11517_v61  ;;  %v3742_v35 = vmul.f32 %v11752_v0, %v11531_v14 }
 0x425   :  { %3933 = vst [vmem:[#allocation2 + $0x90] sm:$0xff] %v3869_v1  ;;  %3934 = vst [vmem:[#allocation2 + $0x98] sm:$0xff] %v3870_v55  ;;  %v3743_v17 = vmul.f32 %v11752_v0, %v11542_v57  ;;  %v3744_v51 = vmul.f32 %v11752_v0, %v11551_v33  ;;  %v3873_v26 = vmax.f32 %v3809_v3, 0.0  ;;  %v3745_v23 = vmul.f32 %v11752_v0, %v11559_v8 }
 0x426   :  { %3935 = vst [vmem:[#allocation2 + $0xa0] sm:$0xff] %v3871_v54  ;;  %3936 = vst [vmem:[#allocation2 + $0xa8] sm:$0xff] %v3872_v9  ;;  %v3874_v34 = vmax.f32 %v3810_v4, 0.0  ;;  %v3746_v62 = vmul.f32 %v11752_v0, %v11566_v30  ;;  %v3811_v61 = vadd.f32 %v11768_v58, %v3741_v60  ;;  %v3812_v14 = vadd.f32 %v11768_v58, %v3742_v35 }
 0x427   :  { %v3813_v22 = vadd.f32 %v11768_v58, %v3743_v17  ;;  %v3814_v57 = vadd.f32 %v11768_v58, %v3744_v51  ;;  %3937 = vst [vmem:[#allocation2 + $0xb0] sm:$0xff] %v3873_v26  ;;  %v3815_v33 = vadd.f32 %v11768_v58, %v3745_v23  ;;  %v3747_v8 = vmul.f32 %v11752_v0, %v11570_v52 }
 0x428   :  { %3938 = vst [vmem:[#allocation2 + $0xb8] sm:$0xff] %v3874_v34  ;;  %v3816_v11 = vadd.f32 %v11768_v58, %v3746_v62  ;;  %v3748_v30 = vmul.f32 %v11752_v0, %v11576_v21  ;;  %v3875_v47 = vmax.f32 %v3811_v61, 0.0  ;;  %v3876_v5 = vmax.f32 %v3812_v14, 0.0 }
 0x429   :  { %v3877_v24 = vmax.f32 %v3813_v22, 0.0  ;;  %v3878_v6 = vmax.f32 %v3814_v57, 0.0  ;;  %v3879_v7 = vmax.f32 %v3815_v33, 0.0  ;;  %v3817_v48 = vadd.f32 %v11768_v58, %v3747_v8 }
 0x42a   :  { %v3880_v27 = vmax.f32 %v3816_v11, 0.0  ;;  %v3818_v39 = vadd.f32 %v11768_v58, %v3748_v30  ;;  %3939 = vst [vmem:[#allocation2 + $0xc0] sm:$0xff] %v3875_v47  ;;  %3940 = vst [vmem:[#allocation2 + $0xc8] sm:$0xff] %v3876_v5  ;;  %v3749_v52 = vmul.f32 %v11752_v0, %v11579_v2  ;;  %v3750_v21 = vmul.f32 %v11752_v0, %v11110_v19  ;;  %v14377_v47 = vld [vmem:[#allocation120_spill] sm:$0xff] }
 0x42b   :  { %3941 = vst [vmem:[#allocation2 + $0xd0] sm:$0xff] %v3877_v24  ;;  %3942 = vst [vmem:[#allocation2 + $0xd8] sm:$0xff] %v3878_v6  ;;  %v3751_v59 = vmul.f32 %v11752_v0, %v11113_v28  ;;  %v3752_v43 = vmul.f32 %v11752_v0, %v11116_v31  ;;  %v3881_v25 = vmax.f32 %v3817_v48, 0.0  ;;  %v3753_v38 = vmul.f32 %v11752_v0, %v11119_v36  ;;  %v14379_v48 = vld [vmem:[#allocation159_spill] sm:$0xff] }
 0x42c   :  { %3943 = vst [vmem:[#allocation2 + $0xe0] sm:$0xff] %v3879_v7  ;;  %3944 = vst [vmem:[#allocation2 + $0xe8] sm:$0xff] %v3880_v27  ;;  %v3882_v37 = vmax.f32 %v3818_v39, 0.0  ;;  %v3754_v46 = vmul.f32 %v11752_v0, %v11122_v40  ;;  %v3819_v2 = vadd.f32 %v11768_v58, %v3749_v52  ;;  %v3820_v19 = vadd.f32 %v11768_v58, %v3750_v21  ;;  %v14378_v7 = vld [vmem:[#allocation125_spill] sm:$0xff] }
 0x42d   :  { %v3821_v44 = vadd.f32 %v11768_v58, %v3751_v59  ;;  %v3822_v28 = vadd.f32 %v11768_v58, %v3752_v43  ;;  %3945 = vst [vmem:[#allocation2 + $0xf0] sm:$0xff] %v3881_v25  ;;  %v3823_v31 = vadd.f32 %v11768_v58, %v3753_v38  ;;  %v3755_v36 = vmul.f32 %v11752_v0, %v11125_v20  ;;  %v14380_v43 = vld [vmem:[#allocation128_spill] sm:$0xff] }
 0x42e   :  { %3946 = vst [vmem:[#allocation2 + $0xf8] sm:$0xff] %v3882_v37  ;;  %v3824_v13 = vadd.f32 %v11768_v58, %v3754_v46  ;;  %v3756_v40 = vmul.f32 %v11752_v0, %v11128_v50  ;;  %v3883_v15 = vmax.f32 %v3819_v2, 0.0  ;;  %v3884_v32 = vmax.f32 %v3820_v19, 0.0  ;;  %v14381_v37 = vld [vmem:[#allocation162_spill] sm:$0xff] }
 0x42f   :  { %v3885_v45 = vmax.f32 %v3821_v44, 0.0  ;;  %v3886_v1 = vmax.f32 %v3822_v28, 0.0  ;;  %v3887_v55 = vmax.f32 %v3823_v31, 0.0  ;;  %v3825_v9 = vadd.f32 %v11768_v58, %v3755_v36 }
 0x430   :  { %v3888_v54 = vmax.f32 %v3824_v13, 0.0  ;;  %v3826_v3 = vadd.f32 %v11768_v58, %v3756_v40  ;;  %3947 = vst [vmem:[#allocation2 + $0x100] sm:$0xff] %v3883_v15  ;;  %3948 = vst [vmem:[#allocation2 + $0x108] sm:$0xff] %v3884_v32  ;;  %v3757_v20 = vmul.f32 %v11752_v0, %v11131_v42  ;;  %v3758_v50 = vmul.f32 %v11752_v0, %v11134_v10  ;;  %v14382_v40 = vld [vmem:[#allocation163_spill] sm:$0xff]  ;;  %v14383_v32 = vld [vmem:[#allocation164_spill] sm:$0xff] }
 0x431   :  { %3949 = vst [vmem:[#allocation2 + $0x110] sm:$0xff] %v3885_v45  ;;  %3950 = vst [vmem:[#allocation2 + $0x118] sm:$0xff] %v3886_v1  ;;  %v3759_v4 = vmul.f32 %v11752_v0, %v11137_v18  ;;  %v3760_v60 = vmul.f32 %v11752_v0, %v11140_v56  ;;  %v3889_v35 = vmax.f32 %v3825_v9, 0.0  ;;  %v3761_v51 = vmul.f32 %v11752_v0, %v11143_v49  ;;  %v14384_v1 = vld [vmem:[#allocation135_spill] sm:$0xff] }
 0x432   :  { %3951 = vst [vmem:[#allocation2 + $0x120] sm:$0xff] %v3887_v55  ;;  %3952 = vst [vmem:[#allocation2 + $0x128] sm:$0xff] %v3888_v54  ;;  %v3890_v17 = vmax.f32 %v3826_v3, 0.0  ;;  %v3762_v26 = vmul.f32 %v11752_v0, %v11146_v12  ;;  %v3827_v42 = vadd.f32 %v11768_v58, %v3757_v20  ;;  %v3828_v10 = vadd.f32 %v11768_v58, %v3758_v50  ;;  %v14385_v54 = vld [vmem:[#allocation138_spill] sm:$0xff]  ;;  %v14386_v50 = vld [vmem:[#allocation107_spill] sm:$0xff] }
 0x433   :  { %v3829_v34 = vadd.f32 %v11768_v58, %v3759_v4  ;;  %v3830_v18 = vadd.f32 %v11768_v58, %v3760_v60  ;;  %3953 = vst [vmem:[#allocation2 + $0x130] sm:$0xff] %v3889_v35  ;;  %v3831_v56 = vadd.f32 %v11768_v58, %v3761_v51  ;;  %v3763_v49 = vmul.f32 %v11752_v0, %v11149_v29  ;;  %v14387_v60 = vld [vmem:[#allocation167_spill] sm:$0xff] }
 0x434   :  { %3954 = vst [vmem:[#allocation2 + $0x138] sm:$0xff] %v3890_v17  ;;  %v3832_v23 = vadd.f32 %v11768_v58, %v3762_v26  ;;  %v3764_v12 = vmul.f32 %v11752_v0, %v11152_v41  ;;  %v3891_v62 = vmax.f32 %v3827_v42, 0.0  ;;  %v3892_v61 = vmax.f32 %v3828_v10, 0.0 }
 0x435   :  { %v3893_v14 = vmax.f32 %v3829_v34, 0.0  ;;  %v3894_v22 = vmax.f32 %v3830_v18, 0.0  ;;  %v3895_v57 = vmax.f32 %v3831_v56, 0.0  ;;  %v3833_v11 = vadd.f32 %v11768_v58, %v3763_v49  ;;  %v14388_v18 = vld [vmem:[#allocation141_spill] sm:$0xff] }
 0x436   :  { %v3896_v33 = vmax.f32 %v3832_v23, 0.0  ;;  %v3834_v8 = vadd.f32 %v11768_v58, %v3764_v12  ;;  %3955 = vst [vmem:[#allocation2 + $0x140] sm:$0xff] %v3891_v62  ;;  %3956 = vst [vmem:[#allocation2 + $0x148] sm:$0xff] %v3892_v61  ;;  %v3765_v29 = vmul.f32 %v11752_v0, %v11155_v63  ;;  %v3766_v41 = vmul.f32 %v11752_v0, %v11158_v53  ;;  %v14389_v23 = vld [vmem:[#allocation8_spill] sm:$0xff] }
 0x437   :  { %3957 = vst [vmem:[#allocation2 + $0x150] sm:$0xff] %v3893_v14  ;;  %3958 = vst [vmem:[#allocation2 + $0x158] sm:$0xff] %v3894_v22  ;;  %v3767_v30 = vmul.f32 %v11752_v0, %v11161_v16  ;;  %v3768_v5 = vmul.f32 %v11752_v0, %v14377_v47  ;;  %v3897_v24 = vmax.f32 %v3833_v11, 0.0  ;;  %v3769_v27 = vmul.f32 %v11752_v0, %v14378_v7 }
 0x438   :  { %3959 = vst [vmem:[#allocation2 + $0x160] sm:$0xff] %v3895_v57  ;;  %3960 = vst [vmem:[#allocation2 + $0x168] sm:$0xff] %v3896_v33  ;;  %v3898_v6 = vmax.f32 %v3834_v8, 0.0  ;;  %v3770_v39 = vmul.f32 %v11752_v0, %v14379_v48  ;;  %v3835_v63 = vadd.f32 %v11768_v58, %v3765_v29  ;;  %v3836_v53 = vadd.f32 %v11768_v58, %v3766_v41 }
 0x439   :  { %v3837_v52 = vadd.f32 %v11768_v58, %v3767_v30  ;;  %v3838_v16 = vadd.f32 %v11768_v58, %v3768_v5  ;;  %3961 = vst [vmem:[#allocation2 + $0x170] sm:$0xff] %v3897_v24  ;;  %v3839_v21 = vadd.f32 %v11768_v58, %v3769_v27  ;;  %v3771_v25 = vmul.f32 %v11752_v0, %v14380_v43 }
 0x43a   :  { %3962 = vst [vmem:[#allocation2 + $0x178] sm:$0xff] %v3898_v6  ;;  %v3840_v59 = vadd.f32 %v11768_v58, %v3770_v39  ;;  %v3772_v38 = vmul.f32 %v11752_v0, %v14381_v37  ;;  %v3899_v46 = vmax.f32 %v3835_v63, 0.0  ;;  %v3900_v2 = vmax.f32 %v3836_v53, 0.0 }
 0x43b   :  { %v3901_v19 = vmax.f32 %v3837_v52, 0.0  ;;  %v3902_v44 = vmax.f32 %v3838_v16, 0.0  ;;  %v3903_v28 = vmax.f32 %v3839_v21, 0.0  ;;  %v3841_v13 = vadd.f32 %v11768_v58, %v3771_v25 }
 0x43c   :  { %v3904_v31 = vmax.f32 %v3840_v59, 0.0  ;;  %v3842_v36 = vadd.f32 %v11768_v58, %v3772_v38  ;;  %3963 = vst [vmem:[#allocation2 + $0x180] sm:$0xff] %v3899_v46  ;;  %3964 = vst [vmem:[#allocation2 + $0x188] sm:$0xff] %v3900_v2  ;;  %v3773_v15 = vmul.f32 %v11752_v0, %v14382_v40  ;;  %v3774_v45 = vmul.f32 %v11752_v0, %v14383_v32 }
 0x43d   :  { %3965 = vst [vmem:[#allocation2 + $0x190] sm:$0xff] %v3901_v19  ;;  %3966 = vst [vmem:[#allocation2 + $0x198] sm:$0xff] %v3902_v44  ;;  %v3775_v55 = vmul.f32 %v11752_v0, %v14384_v1  ;;  %v3776_v9 = vmul.f32 %v11752_v0, %v14385_v54  ;;  %v3905_v3 = vmax.f32 %v3841_v13, 0.0  ;;  %v3777_v4 = vmul.f32 %v11752_v0, %v14386_v50 }
 0x43e   :  { %3967 = vst [vmem:[#allocation2 + $0x1a0] sm:$0xff] %v3903_v28  ;;  %3968 = vst [vmem:[#allocation2 + $0x1a8] sm:$0xff] %v3904_v31  ;;  %v3906_v20 = vmax.f32 %v3842_v36, 0.0  ;;  %v3778_v35 = vmul.f32 %v11752_v0, %v14387_v60  ;;  %v3843_v17 = vadd.f32 %v11768_v58, %v3773_v15  ;;  %v3844_v51 = vadd.f32 %v11768_v58, %v3774_v45 }
 0x43f   :  { %v3845_v26 = vadd.f32 %v11768_v58, %v3775_v55  ;;  %v3846_v42 = vadd.f32 %v11768_v58, %v3776_v9  ;;  %3969 = vst [vmem:[#allocation2 + $0x1b0] sm:$0xff] %v3905_v3  ;;  %v3847_v10 = vadd.f32 %v11768_v58, %v3777_v4  ;;  %v3779_v56 = vmul.f32 %v11752_v0, %v14388_v18 }
 0x440   :  { %3970 = vst [vmem:[#allocation2 + $0x1b8] sm:$0xff] %v3906_v20  ;;  %v3848_v34 = vadd.f32 %v11768_v58, %v3778_v35  ;;  %v3780_v49 = vmul.f32 %v11752_v0, %v14389_v23  ;;  %v3907_v12 = vmax.f32 %v3843_v17, 0.0  ;;  %v3908_v62 = vmax.f32 %v3844_v51, 0.0 }
 0x441   :  { %v3909_v61 = vmax.f32 %v3845_v26, 0.0  ;;  %v3910_v14 = vmax.f32 %v3846_v42, 0.0  ;;  %v3911_v22 = vmax.f32 %v3847_v10, 0.0  ;;  %v3849_v33 = vadd.f32 %v11768_v58, %v3779_v56 }
 0x442   :  { %v3912_v57 = vmax.f32 %v3848_v34, 0.0  ;;  %v3850_v11 = vadd.f32 %v11768_v58, %v3780_v49  ;;  %3971 = vst [vmem:[#allocation2 + $0x1c0] sm:$0xff] %v3907_v12  ;;  %3972 = vst [vmem:[#allocation2 + $0x1c8] sm:$0xff] %v3908_v62 }
 0x443   :  { %3973 = vst [vmem:[#allocation2 + $0x1d0] sm:$0xff] %v3909_v61  ;;  %3974 = vst [vmem:[#allocation2 + $0x1d8] sm:$0xff] %v3910_v14  ;;  %v3913_v0 = vmax.f32 %v3849_v33, 0.0 }
 0x444   :  { %3975 = vst [vmem:[#allocation2 + $0x1e0] sm:$0xff] %v3911_v22  ;;  %3976 = vst [vmem:[#allocation2 + $0x1e8] sm:$0xff] %v3912_v57  ;;  %v3914_v8 = vmax.f32 %v3850_v11, 0.0 }
 0x445   :  { %3977 = vst [vmem:[#allocation2 + $0x1f0] sm:$0xff] %v3913_v0 }
 0x446   :  { %3978 = vst [vmem:[#allocation2 + $0x1f8] sm:$0xff] %v3914_v8 }
 0x447   :  { %4270 = shalt.err (!%p4267_p4)
}
 0x448   :  { %s4271_s22 = scalar_lea.hbm %s11964_s4, 8192 }
 0x449   :  { %p4272_p5 = scmp.ne.s32.totalorder %s11964_s4, %s4271_s22  ;;  %p4275_p6 = scmp.lt.u32.totalorder %s4271_s22, %s11964_s4 }
 0x44b   :  { %p4277_p7 = pnand %p4275_p6, %p4272_p5 }
 0x44d   :  { %4280 = shalt.err (!%p4277_p7)
}
 0x44e   :  { %s4284_s26 = smov 128   ;;  %s4285_s27 = smov 8  }
 0x44f   :  { %3990 = dma.vmem_to_hbm [thread:$0]  %s3985_s2, 8192, %s11964_s4, [#allocation3], %s4284_s26, %s4284_s26, %s4285_s27  }
 0x450   :  { %4281 = dma.done.wait [#allocation3], 8192  }
 0x451   :  { %4282 = vsyncadd [#allocation3], 4294959104 }
 0x452   :  { %3994 = vsyncpa [#allocation3], 1 }

</bundles_post_ra>
